<compile_context>
chip_gen: v7x
topology: tpu7x:2x2x1
jax: 0.10.0
libtpu: 0.0.40
codegen_flags: <defaults>
</compile_context>

<pallas_src>
import jax
import jax.numpy as jnp
from jax.experimental import pallas as pl
from jax.experimental.pallas import tpu as pltpu


# ----------------------------------------------------------------------------
# Conv (5x5, padding=2) + bias + ReLU as a single deep-K matmul per row block.
# ----------------------------------------------------------------------------
def _conv_relu_kernel(x_ref, w_ref, b_ref, o_ref):
    y = jnp.dot(x_ref[...], w_ref[...], preferred_element_type=jnp.float32)
    o_ref[...] = jnp.maximum(y + b_ref[...], 0.0)


def conv2d_same_relu(x_nhwc, w, b, *, tm=256):
    """5x5 'same' conv + bias + ReLU. x: (B,H,W,Cin) f32, w: (KH,KW,Cin,Cout)."""
    B, H, W, Cin = x_nhwc.shape
    KH, KW, _, Cout = w.shape
    ph, pw = KH // 2, KW // 2

    xb = x_nhwc.astype(jnp.bfloat16)
    xp = jnp.pad(xb, ((0, 0), (ph, ph), (pw, pw), (0, 0)))

    # Glue: fold all KH*KW taps into one deep contraction dim K = KH*KW*Cin.
    cols = [xp[:, kh:kh + H, kw:kw + W, :]
            for kh in range(KH) for kw in range(KW)]
    K = KH * KW * Cin
    BHW = B * H * W
    x_taps = jnp.concatenate(cols, axis=-1).reshape(BHW, K)

    nb = pl.cdiv(BHW, tm)
    pad_rows = nb * tm - BHW
    if pad_rows:
        x_taps = jnp.pad(x_taps, ((0, pad_rows), (0, 0)))

    wb = w.reshape(K, Cout).astype(jnp.bfloat16)   # same (kh,kw,cin) ordering
    b2 = b.reshape(1, Cout)

    out = pl.pallas_call(
        _conv_relu_kernel,
        out_shape=jax.ShapeDtypeStruct((nb * tm, Cout), jnp.float32),
        grid=(nb,),
        in_specs=[
            pl.BlockSpec((tm, K), lambda i: (i, 0)),
            pl.BlockSpec((K, Cout), lambda i: (0, 0)),
            pl.BlockSpec((1, Cout), lambda i: (0, 0)),
        ],
        out_specs=pl.BlockSpec((tm, Cout), lambda i: (i, 0)),
        compiler_params=pltpu.CompilerParams(
            dimension_semantics=("parallel",)),
    )(x_taps, wb, b2)
    return out[:BHW].reshape(B, H, W, Cout)


# ----------------------------------------------------------------------------
# 2x2 max-pool (stride 2) — small, proven strided-ds kernel.
# ----------------------------------------------------------------------------
def _maxpool2_kernel(x_ref, o_ref):
    B, Ho, Wo, C = o_ref.shape
    a = x_ref[:, pl.ds(0, Ho, stride=2), pl.ds(0, Wo, stride=2), :]
    b = x_ref[:, pl.ds(0, Ho, stride=2), pl.ds(1, Wo, stride=2), :]
    c = x_ref[:, pl.ds(1, Ho, stride=2), pl.ds(0, Wo, stride=2), :]
    d = x_ref[:, pl.ds(1, Ho, stride=2), pl.ds(1, Wo, stride=2), :]
    o_ref[...] = jnp.maximum(jnp.maximum(a, b), jnp.maximum(c, d))


def maxpool2(x_nhwc):
    B, H, W, C = x_nhwc.shape
    Ho, Wo = H // 2, W // 2
    return pl.pallas_call(
        _maxpool2_kernel,
        out_shape=jax.ShapeDtypeStruct((B, Ho, Wo, C), x_nhwc.dtype),
        grid=(1,),
        in_specs=[pl.BlockSpec((B, H, W, C), lambda i: (0, 0, 0, 0))],
        out_specs=pl.BlockSpec((B, Ho, Wo, C), lambda i: (0, 0, 0, 0)),
    )(x_nhwc)


# ----------------------------------------------------------------------------
# Fused fc (3136->1024, ReLU) + final_fc (1024->10), N-tiled over fc columns.
# ----------------------------------------------------------------------------
def _fc_fused_kernel(x_ref, w1_ref, b1_ref, w2_ref, b2_ref, o_ref, acc_ref):
    j = pl.program_id(0)

    @pl.when(j == 0)
    def _():
        acc_ref[...] = jnp.zeros_like(acc_ref)

    h = jnp.dot(x_ref[...], w1_ref[...], preferred_element_type=jnp.float32)
    h = jnp.maximum(h + b1_ref[...], 0.0)
    acc_ref[...] += jnp.dot(h.astype(jnp.bfloat16), w2_ref[...],
                            preferred_element_type=jnp.float32)

    @pl.when(j == pl.num_programs(0) - 1)
    def _():
        o_ref[...] = acc_ref[...] + b2_ref[...]


def fc_fused(x, w1, b1, w2, b2, *, nt=256):
    """x:(B,3136), w1:(3136,1024), b1:(1024,), w2:(1024,10), b2:(10,)."""
    B, K1 = x.shape
    Hm = w1.shape[1]
    N = w2.shape[1]
    NP = 128  # pad logits to a lane-dense width; slice back afterwards

    xb = x.astype(jnp.bfloat16)
    w1b = w1.astype(jnp.bfloat16)
    w2p = jnp.pad(w2, ((0, 0), (0, NP - N))).astype(jnp.bfloat16)
    b1r = b1.reshape(1, Hm)
    b2p = jnp.pad(b2, (0, NP - N)).reshape(1, NP)

    out = pl.pallas_call(
        _fc_fused_kernel,
        out_shape=jax.ShapeDtypeStruct((B, NP), jnp.float32),
        grid=(Hm // nt,),
        in_specs=[
            pl.BlockSpec((B, K1), lambda j: (0, 0)),
            pl.BlockSpec((K1, nt), lambda j: (0, j)),
            pl.BlockSpec((1, nt), lambda j: (0, j)),
            pl.BlockSpec((nt, NP), lambda j: (j, 0)),
            pl.BlockSpec((1, NP), lambda j: (0, 0)),
        ],
        out_specs=pl.BlockSpec((B, NP), lambda j: (0, 0)),
        scratch_shapes=[pltpu.VMEM((B, NP), jnp.float32)],
        compiler_params=pltpu.CompilerParams(
            dimension_semantics=("arbitrary",)),
    )(xb, w1b, b1r, w2p, b2p)
    return out[:, :N]


# ----------------------------------------------------------------------------
# Parameters & forward
# ----------------------------------------------------------------------------
def init_params(key):
    ks = jax.random.split(key, 8)

    def u(k, shape, fan_in):
        bound = 1.0 / (fan_in ** 0.5)
        return jax.random.uniform(k, shape, jnp.float32, -bound, bound)

    return {
        "conv1_w": u(ks[0], (5, 5, 1, 32), 5 * 5 * 1),
        "conv1_b": u(ks[1], (32,), 5 * 5 * 1),
        "conv2_w": u(ks[2], (5, 5, 32, 64), 5 * 5 * 32),
        "conv2_b": u(ks[3], (64,), 5 * 5 * 32),
        "fc_w": u(ks[4], (3136, 1024), 3136),
        "fc_b": u(ks[5], (1024,), 3136),
        "final_w": u(ks[6], (1024, 10), 1024),
        "final_b": u(ks[7], (10,), 1024),
    }


@jax.jit
def forward(params, x_nchw):
    x = jnp.transpose(x_nchw, (0, 2, 3, 1))                        # NCHW->NHWC
    h = conv2d_same_relu(x, params["conv1_w"], params["conv1_b"])  # (B,28,28,32)
    h = maxpool2(h)                                                # (B,14,14,32)
    h = conv2d_same_relu(h, params["conv2_w"], params["conv2_b"])  # (B,14,14,64)
    h = maxpool2(h)                                                # (B,7,7,64)
    # Match PyTorch's NCHW .view() flatten order: (B, C, H, W) -> (B, C*H*W)
    h = jnp.transpose(h, (0, 3, 1, 2)).reshape(h.shape[0], -1)     # (B, 3136)
    return fc_fused(h, params["fc_w"], params["fc_b"],
                    params["final_w"], params["final_b"])          # (B, 10)


if __name__ == "__main__":
    key = jax.random.PRNGKey(0)
    pkey, xkey = jax.random.split(key)
    params = init_params(pkey)
    # MNIST-shaped input: the fc layer (3136 = 64*7*7) forces 1x28x28 images.
    x = jax.random.uniform(xkey, (2, 1, 28, 28), dtype=jnp.float32)
    out = forward(params, x)
    out = jax.block_until_ready(out)
    assert out.shape == (2, 10) and out.dtype == jnp.float32
    print("KERNEL_OK")
</pallas_src>

<mosaic_0001>
module attributes {stable_mosaic.version = 11 : i64} {
  func.func @_conv_relu_kernel(%arg0: i32, %arg1: memref<256x25xbf16, #tpu.memory_space<vmem>>, %arg2: memref<25x32xbf16, #tpu.memory_space<vmem>>, %arg3: memref<1x32xf32, #tpu.memory_space<vmem>>, %arg4: memref<256x32xf32, #tpu.memory_space<vmem>>) attributes {dimension_semantics = [#tpu.dimension_semantics<parallel>], iteration_bounds = array<i64: 7>, scalar_prefetch = 0 : i64, scratch_operands = 0 : i64, tpu.core_type = #tpu.core_type<tc>, window_params = [{transform_indices = @transform_0, window_bounds = array<i64: 256, 25>}, {pipeline_mode = #tpu.pipeline_mode<synchronous>, transform_indices = @transform_1, window_bounds = array<i64: 25, 32>}, {pipeline_mode = #tpu.pipeline_mode<synchronous>, transform_indices = @transform_2, window_bounds = array<i64: 1, 32>}, {transform_indices = @transform_3, window_bounds = array<i64: 256, 32>}]} {
    %c0 = arith.constant 0 : index
    %c0_0 = arith.constant 0 : index
    %0 = vector.load %arg1[%c0, %c0_0] : memref<256x25xbf16, #tpu.memory_space<vmem>>, vector<256x25xbf16>
    %c0_1 = arith.constant 0 : index
    %c0_2 = arith.constant 0 : index
    %1 = vector.load %arg2[%c0_1, %c0_2] : memref<25x32xbf16, #tpu.memory_space<vmem>>, vector<25x32xbf16>
    %cst = arith.constant dense<0.000000e+00> : vector<256x32xf32>
    %2 = tpu.matmul %0, %1, %cst {dimension_numbers = #tpu.dot_dimension_numbers<[1], [0], [0], [1], [0, 0, 1, 1], [], []>} : vector<256x25xbf16>, vector<25x32xbf16>, vector<256x32xf32> -> vector<256x32xf32>
    %c0_3 = arith.constant 0 : index
    %c0_4 = arith.constant 0 : index
    %3 = vector.load %arg3[%c0_3, %c0_4] : memref<1x32xf32, #tpu.memory_space<vmem>>, vector<1x32xf32>
    %4 = vector.broadcast %3 : vector<1x32xf32> to vector<256x32xf32>
    %5 = arith.addf %2, %4 : vector<256x32xf32>
    %cst_5 = arith.constant 0.000000e+00 : f32
    %6 = vector.broadcast %cst_5 : f32 to vector<256x32xf32>
    %7 = arith.maximumf %5, %6 : vector<256x32xf32>
    %c0_6 = arith.constant 0 : index
    %c0_7 = arith.constant 0 : index
    %8 = vector.load %arg4[%c0_6, %c0_7] : memref<256x32xf32, #tpu.memory_space<vmem>>, vector<256x32xf32>
    tpu.vector_store %arg4[%c0_6, %c0_7], %7 {strides = array<i32>} : memref<256x32xf32, #tpu.memory_space<vmem>>, vector<256x32xf32>,
    return
  }
  func.func @transform_0(%arg0: i32) -> (i32, i32) {
    %c0_i32 = arith.constant 0 : i32
    %c0_i32_0 = arith.constant 0 : i32
    return %arg0, %c0_i32 : i32, i32
  }
  func.func @transform_1(%arg0: i32) -> (i32, i32) {
    %c0_i32 = arith.constant 0 : i32
    %c0_i32_0 = arith.constant 0 : i32
    %c0_i32_1 = arith.constant 0 : i32
    return %c0_i32, %c0_i32_0 : i32, i32
  }
  func.func @transform_2(%arg0: i32) -> (i32, i32) {
    %c0_i32 = arith.constant 0 : i32
    %c0_i32_0 = arith.constant 0 : i32
    %c0_i32_1 = arith.constant 0 : i32
    return %c0_i32, %c0_i32_0 : i32, i32
  }
  func.func @transform_3(%arg0: i32) -> (i32, i32) {
    %c0_i32 = arith.constant 0 : i32
    %c0_i32_0 = arith.constant 0 : i32
    return %arg0, %c0_i32 : i32, i32
  }
}

module attributes {stable_mosaic.version = 11 : i64} {
  func.func @_maxpool2_kernel(%arg0: i32, %arg1: memref<2x28x28x32xf32, #tpu.memory_space<vmem>>, %arg2: memref<2x14x14x32xf32, #tpu.memory_space<vmem>>) attributes {dimension_semantics = [#tpu.dimension_semantics<arbitrary>], iteration_bounds = array<i64: 1>, scalar_prefetch = 0 : i64, scratch_operands = 0 : i64, tpu.core_type = #tpu.core_type<tc>, window_params = [{pipeline_mode = #tpu.pipeline_mode<synchronous>, transform_indices = @transform_0, window_bounds = array<i64: 2, 28, 28, 32>}, {pipeline_mode = #tpu.pipeline_mode<synchronous>, transform_indices = @transform_1, window_bounds = array<i64: 2, 14, 14, 32>}]} {
    %c0 = arith.constant 0 : index
    %c0_0 = arith.constant 0 : index
    %c0_1 = arith.constant 0 : index
    %c0_2 = arith.constant 0 : index
    %0 = tpu.strided_load %arg1[%c0, %c0_0, %c0_1, %c0_2] {strides = array<i32: 1, 2, 2, 1>} : memref<2x28x28x32xf32, #tpu.memory_space<vmem>>, vector<2x14x14x32xf32>
    %c0_3 = arith.constant 0 : index
    %c0_4 = arith.constant 0 : index
    %c1 = arith.constant 1 : index
    %c0_5 = arith.constant 0 : index
    %1 = tpu.strided_load %arg1[%c0_3, %c0_4, %c1, %c0_5] {strides = array<i32: 1, 2, 2, 1>} : memref<2x28x28x32xf32, #tpu.memory_space<vmem>>, vector<2x14x14x32xf32>
    %c0_6 = arith.constant 0 : index
    %c1_7 = arith.constant 1 : index
    %c0_8 = arith.constant 0 : index
    %c0_9 = arith.constant 0 : index
    %2 = tpu.strided_load %arg1[%c0_6, %c1_7, %c0_8, %c0_9] {strides = array<i32: 1, 2, 2, 1>} : memref<2x28x28x32xf32, #tpu.memory_space<vmem>>, vector<2x14x14x32xf32>
    %c0_10 = arith.constant 0 : index
    %c1_11 = arith.constant 1 : index
    %c1_12 = arith.constant 1 : index
    %c0_13 = arith.constant 0 : index
    %3 = tpu.strided_load %arg1[%c0_10, %c1_11, %c1_12, %c0_13] {strides = array<i32: 1, 2, 2, 1>} : memref<2x28x28x32xf32, #tpu.memory_space<vmem>>, vector<2x14x14x32xf32>
    %4 = arith.maximumf %0, %1 : vector<2x14x14x32xf32>
    %5 = arith.maximumf %2, %3 : vector<2x14x14x32xf32>
    %6 = arith.maximumf %4, %5 : vector<2x14x14x32xf32>
    %c0_14 = arith.constant 0 : index
    %c0_15 = arith.constant 0 : index
    %c0_16 = arith.constant 0 : index
    %c0_17 = arith.constant 0 : index
    %7 = vector.load %arg2[%c0_14, %c0_15, %c0_16, %c0_17] : memref<2x14x14x32xf32, #tpu.memory_space<vmem>>, vector<2x14x14x32xf32>
    tpu.vector_store %arg2[%c0_14, %c0_15, %c0_16, %c0_17], %6 {strides = array<i32>} : memref<2x14x14x32xf32, #tpu.memory_space<vmem>>, vector<2x14x14x32xf32>,
    return
  }
  func.func @transform_0(%arg0: i32) -> (i32, i32, i32, i32) {
    %c0_i32 = arith.constant 0 : i32
    %c0_i32_0 = arith.constant 0 : i32
    %c0_i32_1 = arith.constant 0 : i32
    %c0_i32_2 = arith.constant 0 : i32
    %c0_i32_3 = arith.constant 0 : i32
    return %c0_i32, %c0_i32_0, %c0_i32_1, %c0_i32_2 : i32, i32, i32, i32
  }
  func.func @transform_1(%arg0: i32) -> (i32, i32, i32, i32) {
    %c0_i32 = arith.constant 0 : i32
    %c0_i32_0 = arith.constant 0 : i32
    %c0_i32_1 = arith.constant 0 : i32
    %c0_i32_2 = arith.constant 0 : i32
    %c0_i32_3 = arith.constant 0 : i32
    return %c0_i32, %c0_i32_0, %c0_i32_1, %c0_i32_2 : i32, i32, i32, i32
  }
}

module attributes {stable_mosaic.version = 11 : i64} {
  func.func @_conv_relu_kernel(%arg0: i32, %arg1: memref<256x800xbf16, #tpu.memory_space<vmem>>, %arg2: memref<800x64xbf16, #tpu.memory_space<vmem>>, %arg3: memref<1x64xf32, #tpu.memory_space<vmem>>, %arg4: memref<256x64xf32, #tpu.memory_space<vmem>>) attributes {dimension_semantics = [#tpu.dimension_semantics<parallel>], iteration_bounds = array<i64: 2>, scalar_prefetch = 0 : i64, scratch_operands = 0 : i64, tpu.core_type = #tpu.core_type<tc>, window_params = [{transform_indices = @transform_0, window_bounds = array<i64: 256, 800>}, {pipeline_mode = #tpu.pipeline_mode<synchronous>, transform_indices = @transform_1, window_bounds = array<i64: 800, 64>}, {pipeline_mode = #tpu.pipeline_mode<synchronous>, transform_indices = @transform_2, window_bounds = array<i64: 1, 64>}, {transform_indices = @transform_3, window_bounds = array<i64: 256, 64>}]} {
    %c0 = arith.constant 0 : index
    %c0_0 = arith.constant 0 : index
    %0 = vector.load %arg1[%c0, %c0_0] : memref<256x800xbf16, #tpu.memory_space<vmem>>, vector<256x800xbf16>
    %c0_1 = arith.constant 0 : index
    %c0_2 = arith.constant 0 : index
    %1 = vector.load %arg2[%c0_1, %c0_2] : memref<800x64xbf16, #tpu.memory_space<vmem>>, vector<800x64xbf16>
    %cst = arith.constant dense<0.000000e+00> : vector<256x64xf32>
    %2 = tpu.matmul %0, %1, %cst {dimension_numbers = #tpu.dot_dimension_numbers<[1], [0], [0], [1], [0, 0, 1, 1], [], []>} : vector<256x800xbf16>, vector<800x64xbf16>, vector<256x64xf32> -> vector<256x64xf32>
    %c0_3 = arith.constant 0 : index
    %c0_4 = arith.constant 0 : index
    %3 = vector.load %arg3[%c0_3, %c0_4] : memref<1x64xf32, #tpu.memory_space<vmem>>, vector<1x64xf32>
    %4 = vector.broadcast %3 : vector<1x64xf32> to vector<256x64xf32>
    %5 = arith.addf %2, %4 : vector<256x64xf32>
    %cst_5 = arith.constant 0.000000e+00 : f32
    %6 = vector.broadcast %cst_5 : f32 to vector<256x64xf32>
    %7 = arith.maximumf %5, %6 : vector<256x64xf32>
    %c0_6 = arith.constant 0 : index
    %c0_7 = arith.constant 0 : index
    %8 = vector.load %arg4[%c0_6, %c0_7] : memref<256x64xf32, #tpu.memory_space<vmem>>, vector<256x64xf32>
    tpu.vector_store %arg4[%c0_6, %c0_7], %7 {strides = array<i32>} : memref<256x64xf32, #tpu.memory_space<vmem>>, vector<256x64xf32>,
    return
  }
  func.func @transform_0(%arg0: i32) -> (i32, i32) {
    %c0_i32 = arith.constant 0 : i32
    %c0_i32_0 = arith.constant 0 : i32
    return %arg0, %c0_i32 : i32, i32
  }
  func.func @transform_1(%arg0: i32) -> (i32, i32) {
    %c0_i32 = arith.constant 0 : i32
    %c0_i32_0 = arith.constant 0 : i32
    %c0_i32_1 = arith.constant 0 : i32
    return %c0_i32, %c0_i32_0 : i32, i32
  }
  func.func @transform_2(%arg0: i32) -> (i32, i32) {
    %c0_i32 = arith.constant 0 : i32
    %c0_i32_0 = arith.constant 0 : i32
    %c0_i32_1 = arith.constant 0 : i32
    return %c0_i32, %c0_i32_0 : i32, i32
  }
  func.func @transform_3(%arg0: i32) -> (i32, i32) {
    %c0_i32 = arith.constant 0 : i32
    %c0_i32_0 = arith.constant 0 : i32
    return %arg0, %c0_i32 : i32, i32
  }
}

module attributes {stable_mosaic.version = 11 : i64} {
  func.func @_maxpool2_kernel(%arg0: i32, %arg1: memref<2x14x14x64xf32, #tpu.memory_space<vmem>>, %arg2: memref<2x7x7x64xf32, #tpu.memory_space<vmem>>) attributes {dimension_semantics = [#tpu.dimension_semantics<arbitrary>], iteration_bounds = array<i64: 1>, scalar_prefetch = 0 : i64, scratch_operands = 0 : i64, tpu.core_type = #tpu.core_type<tc>, window_params = [{pipeline_mode = #tpu.pipeline_mode<synchronous>, transform_indices = @transform_0, window_bounds = array<i64: 2, 14, 14, 64>}, {pipeline_mode = #tpu.pipeline_mode<synchronous>, transform_indices = @transform_1, window_bounds = array<i64: 2, 7, 7, 64>}]} {
    %c0 = arith.constant 0 : index
    %c0_0 = arith.constant 0 : index
    %c0_1 = arith.constant 0 : index
    %c0_2 = arith.constant 0 : index
    %0 = tpu.strided_load %arg1[%c0, %c0_0, %c0_1, %c0_2] {strides = array<i32: 1, 2, 2, 1>} : memref<2x14x14x64xf32, #tpu.memory_space<vmem>>, vector<2x7x7x64xf32>
    %c0_3 = arith.constant 0 : index
    %c0_4 = arith.constant 0 : index
    %c1 = arith.constant 1 : index
    %c0_5 = arith.constant 0 : index
    %1 = tpu.strided_load %arg1[%c0_3, %c0_4, %c1, %c0_5] {strides = array<i32: 1, 2, 2, 1>} : memref<2x14x14x64xf32, #tpu.memory_space<vmem>>, vector<2x7x7x64xf32>
    %c0_6 = arith.constant 0 : index
    %c1_7 = arith.constant 1 : index
    %c0_8 = arith.constant 0 : index
    %c0_9 = arith.constant 0 : index
    %2 = tpu.strided_load %arg1[%c0_6, %c1_7, %c0_8, %c0_9] {strides = array<i32: 1, 2, 2, 1>} : memref<2x14x14x64xf32, #tpu.memory_space<vmem>>, vector<2x7x7x64xf32>
    %c0_10 = arith.constant 0 : index
    %c1_11 = arith.constant 1 : index
    %c1_12 = arith.constant 1 : index
    %c0_13 = arith.constant 0 : index
    %3 = tpu.strided_load %arg1[%c0_10, %c1_11, %c1_12, %c0_13] {strides = array<i32: 1, 2, 2, 1>} : memref<2x14x14x64xf32, #tpu.memory_space<vmem>>, vector<2x7x7x64xf32>
    %4 = arith.maximumf %0, %1 : vector<2x7x7x64xf32>
    %5 = arith.maximumf %2, %3 : vector<2x7x7x64xf32>
    %6 = arith.maximumf %4, %5 : vector<2x7x7x64xf32>
    %c0_14 = arith.constant 0 : index
    %c0_15 = arith.constant 0 : index
    %c0_16 = arith.constant 0 : index
    %c0_17 = arith.constant 0 : index
    %7 = vector.load %arg2[%c0_14, %c0_15, %c0_16, %c0_17] : memref<2x7x7x64xf32, #tpu.memory_space<vmem>>, vector<2x7x7x64xf32>
    tpu.vector_store %arg2[%c0_14, %c0_15, %c0_16, %c0_17], %6 {strides = array<i32>} : memref<2x7x7x64xf32, #tpu.memory_space<vmem>>, vector<2x7x7x64xf32>,
    return
  }
  func.func @transform_0(%arg0: i32) -> (i32, i32, i32, i32) {
    %c0_i32 = arith.constant 0 : i32
    %c0_i32_0 = arith.constant 0 : i32
    %c0_i32_1 = arith.constant 0 : i32
    %c0_i32_2 = arith.constant 0 : i32
    %c0_i32_3 = arith.constant 0 : i32
    return %c0_i32, %c0_i32_0, %c0_i32_1, %c0_i32_2 : i32, i32, i32, i32
  }
  func.func @transform_1(%arg0: i32) -> (i32, i32, i32, i32) {
    %c0_i32 = arith.constant 0 : i32
    %c0_i32_0 = arith.constant 0 : i32
    %c0_i32_1 = arith.constant 0 : i32
    %c0_i32_2 = arith.constant 0 : i32
    %c0_i32_3 = arith.constant 0 : i32
    return %c0_i32, %c0_i32_0, %c0_i32_1, %c0_i32_2 : i32, i32, i32, i32
  }
}

module attributes {stable_mosaic.version = 11 : i64} {
  func.func @_fc_fused_kernel(%arg0: i32, %arg1: memref<2x3136xbf16, #tpu.memory_space<vmem>>, %arg2: memref<3136x256xbf16, #tpu.memory_space<vmem>>, %arg3: memref<1x256xf32, #tpu.memory_space<vmem>>, %arg4: memref<256x128xbf16, #tpu.memory_space<vmem>>, %arg5: memref<1x128xf32, #tpu.memory_space<vmem>>, %arg6: memref<2x128xf32, #tpu.memory_space<vmem>>, %arg7: memref<2x128xf32, #tpu.memory_space<vmem>>) attributes {dimension_semantics = [#tpu.dimension_semantics<arbitrary>], iteration_bounds = array<i64: 4>, scalar_prefetch = 0 : i64, scratch_operands = 1 : i64, tpu.core_type = #tpu.core_type<tc>, window_params = [{pipeline_mode = #tpu.pipeline_mode<synchronous>, transform_indices = @transform_0, window_bounds = array<i64: 2, 3136>}, {transform_indices = @transform_1, window_bounds = array<i64: 3136, 256>}, {transform_indices = @transform_2, window_bounds = array<i64: 1, 256>}, {transform_indices = @transform_3, window_bounds = array<i64: 256, 128>}, {pipeline_mode = #tpu.pipeline_mode<synchronous>, transform_indices = @transform_4, window_bounds = array<i64: 1, 128>}, {pipeline_mode = #tpu.pipeline_mode<synchronous>, transform_indices = @transform_5, window_bounds = array<i64: 2, 128>}]} {
    %c0_i32 = arith.constant 0 : i32
    %0 = arith.cmpi eq, %arg0, %c0_i32 : i32
    %1 = arith.extui %0 : i1 to i32
    %c0_i32_0 = arith.constant 0 : i32
    %2 = arith.cmpi ne, %1, %c0_i32_0 : i32
    scf.if %2 {
      %cst_15 = arith.constant 0.000000e+00 : f32
      %20 = vector.broadcast %cst_15 : f32 to vector<2x128xf32>
      %c0_16 = arith.constant 0 : index
      %c0_17 = arith.constant 0 : index
      %21 = vector.load %arg7[%c0_16, %c0_17] : memref<2x128xf32, #tpu.memory_space<vmem>>, vector<2x128xf32>
      tpu.vector_store %arg7[%c0_16, %c0_17], %20 {strides = array<i32>} : memref<2x128xf32, #tpu.memory_space<vmem>>, vector<2x128xf32>,
    } else {
    }
    %c0 = arith.constant 0 : index
    %c0_1 = arith.constant 0 : index
    %3 = vector.load %arg1[%c0, %c0_1] : memref<2x3136xbf16, #tpu.memory_space<vmem>>, vector<2x3136xbf16>
    %c0_2 = arith.constant 0 : index
    %c0_3 = arith.constant 0 : index
    %4 = vector.load %arg2[%c0_2, %c0_3] : memref<3136x256xbf16, #tpu.memory_space<vmem>>, vector<3136x256xbf16>
    %cst = arith.constant dense<0.000000e+00> : vector<2x256xf32>
    %5 = tpu.matmul %3, %4, %cst {dimension_numbers = #tpu.dot_dimension_numbers<[1], [0], [0], [1], [0, 0, 1, 1], [], []>} : vector<2x3136xbf16>, vector<3136x256xbf16>, vector<2x256xf32> -> vector<2x256xf32>
    %c0_4 = arith.constant 0 : index
    %c0_5 = arith.constant 0 : index
    %6 = vector.load %arg3[%c0_4, %c0_5] : memref<1x256xf32, #tpu.memory_space<vmem>>, vector<1x256xf32>
    %7 = vector.broadcast %6 : vector<1x256xf32> to vector<2x256xf32>
    %8 = arith.addf %5, %7 : vector<2x256xf32>
    %cst_6 = arith.constant 0.000000e+00 : f32
    %9 = vector.broadcast %cst_6 : f32 to vector<2x256xf32>
    %10 = arith.maximumf %8, %9 : vector<2x256xf32>
    %c0_7 = arith.constant 0 : index
    %c0_8 = arith.constant 0 : index
    %11 = vector.load %arg7[%c0_7, %c0_8] : memref<2x128xf32, #tpu.memory_space<vmem>>, vector<2x128xf32>
    %12 = arith.truncf %10 : vector<2x256xf32> to vector<2x256xbf16>
    %c0_9 = arith.constant 0 : index
    %c0_10 = arith.constant 0 : index
    %13 = vector.load %arg4[%c0_9, %c0_10] : memref<256x128xbf16, #tpu.memory_space<vmem>>, vector<256x128xbf16>
    %cst_11 = arith.constant dense<0.000000e+00> : vector<2x128xf32>
    %14 = tpu.matmul %12, %13, %cst_11 {dimension_numbers = #tpu.dot_dimension_numbers<[1], [0], [0], [1], [0, 0, 1, 1], [], []>} : vector<2x256xbf16>, vector<256x128xbf16>, vector<2x128xf32> -> vector<2x128xf32>
    %15 = arith.addf %11, %14 : vector<2x128xf32>
    %c0_12 = arith.constant 0 : index
    %c0_13 = arith.constant 0 : index
    %16 = vector.load %arg7[%c0_12, %c0_13] : memref<2x128xf32, #tpu.memory_space<vmem>>, vector<2x128xf32>
    tpu.vector_store %arg7[%c0_12, %c0_13], %15 {strides = array<i32>} : memref<2x128xf32, #tpu.memory_space<vmem>>, vector<2x128xf32>,
    %c3_i32 = arith.constant 3 : i32
    %17 = arith.cmpi eq, %arg0, %c3_i32 : i32
    %18 = arith.extui %17 : i1 to i32
    %c0_i32_14 = arith.constant 0 : i32
    %19 = arith.cmpi ne, %18, %c0_i32_14 : i32
    scf.if %19 {
      %c0_15 = arith.constant 0 : index
      %c0_16 = arith.constant 0 : index
      %20 = vector.load %arg7[%c0_15, %c0_16] : memref<2x128xf32, #tpu.memory_space<vmem>>, vector<2x128xf32>
      %c0_17 = arith.constant 0 : index
      %c0_18 = arith.constant 0 : index
      %21 = vector.load %arg5[%c0_17, %c0_18] : memref<1x128xf32, #tpu.memory_space<vmem>>, vector<1x128xf32>
      %22 = vector.broadcast %21 : vector<1x128xf32> to vector<2x128xf32>
      %23 = arith.addf %20, %22 : vector<2x128xf32>
      %c0_19 = arith.constant 0 : index
      %c0_20 = arith.constant 0 : index
      %24 = vector.load %arg6[%c0_19, %c0_20] : memref<2x128xf32, #tpu.memory_space<vmem>>, vector<2x128xf32>
      tpu.vector_store %arg6[%c0_19, %c0_20], %23 {strides = array<i32>} : memref<2x128xf32, #tpu.memory_space<vmem>>, vector<2x128xf32>,
    } else {
    }
    return
  }
  func.func @transform_0(%arg0: i32) -> (i32, i32) {
    %c0_i32 = arith.constant 0 : i32
    %c0_i32_0 = arith.constant 0 : i32
    %c0_i32_1 = arith.constant 0 : i32
    return %c0_i32, %c0_i32_0 : i32, i32
  }
  func.func @transform_1(%arg0: i32) -> (i32, i32) {
    %c0_i32 = arith.constant 0 : i32
    %c0_i32_0 = arith.constant 0 : i32
    return %c0_i32, %arg0 : i32, i32
  }
  func.func @transform_2(%arg0: i32) -> (i32, i32) {
    %c0_i32 = arith.constant 0 : i32
    %c0_i32_0 = arith.constant 0 : i32
    return %c0_i32, %arg0 : i32, i32
  }
  func.func @transform_3(%arg0: i32) -> (i32, i32) {
    %c0_i32 = arith.constant 0 : i32
    %c0_i32_0 = arith.constant 0 : i32
    return %arg0, %c0_i32 : i32, i32
  }
  func.func @transform_4(%arg0: i32) -> (i32, i32) {
    %c0_i32 = arith.constant 0 : i32
    %c0_i32_0 = arith.constant 0 : i32
    %c0_i32_1 = arith.constant 0 : i32
    return %c0_i32, %c0_i32_0 : i32, i32
  }
  func.func @transform_5(%arg0: i32) -> (i32, i32) {
    %c0_i32 = arith.constant 0 : i32
    %c0_i32_0 = arith.constant 0 : i32
    %c0_i32_1 = arith.constant 0 : i32
    return %c0_i32, %c0_i32_0 : i32, i32
  }
}

</mosaic_0001>

<bundles_post_ra>
// kernel: forward.5
= control target key start
LH: loop header
LB: loop body
LE: loop exit
PB: predicated region body
PF: predicated region fallthrough
CT: control target
= control target key end

     0   :  { %8 = vsyncpa [#allocation3], 0  ;;  %s878_s12 = smov 0   ;;  %s1081_s0 = inlined_call_operand.vmem [shape: bf16[1792,25], index: 0, kind: input, shape index: {}]   ;;  %s1082_s1 = inlined_call_operand.vmem [shape: bf16[25,32], index: 1, kind: input, shape index: {}]   ;;  %s1083_s2 = inlined_call_operand.hbm [shape: f32[1,32], index: 2, kind: input, shape index: {}]   ;;  %s1084_s3 = inlined_call_operand.vmem [shape: f32[1792,32], index: 3, kind: output, shape index: {}]  }
   0x1 LB: > { %s672_s13 = sadd.s32 4294967295, %s854_s12   ;;  %p674_p0 = scmp.ge.s32.totalorder %s854_s12, 1  ;;  %s854_s12 = sphi %s878_s12, %s14_s12  }
   0x2   : > { %p113_p1 = scmp.lt.s32.totalorder %s854_s12, 8  ;;  %p892_p3 = scmp.eq.s32.totalorder %s672_s13, 0 }
   0x3   : > { %s856_s16 = smov [#allocation2]   ;;  %s816_s21 = scalar_lea.hbm %s1083_s2, 16 }
   0x4   : > { %p886_p2 = pnand %p674_p0, %p113_p1  ;;  %s129_s17 = sshll.u32 %s856_s16, 4  ;;  %s130_s17 = int_to_ptr.vmem [resolvable:$true] %s129_s17 }
   0x5   : > { %s1089_s15 = scalar_select %p892_p3, 1, 0 }
   0x6   : > { %s1088_s14 = scalar_select %p886_p2, 1, 0 }
   0x7   : > { %p782_p4 = pneg %p886_p2  ;;  %p817_p6 = scmp.ne.s32.totalorder %s1083_s2, %s816_s21 }
   0x8   : > { %p823_p10 = scmp.lt.u32.totalorder %s816_s21, %s1083_s2 }
   0x9   : > { %p900_p5 = pnand %p892_p3, %p782_p4 }
   0xb   : > { %p818_p7 = pneg %p900_p5 }
   0xd   : > { %p819_p8 = pnand %p818_p7, %p817_p6 }
   0xf   : > { %p820_p9 = pneg %p819_p8 }
  0x11   : > { %p825_p11 = pnand %p823_p10, %p820_p9 }
  0x13   : > { %828 = shalt.err (!%p825_p11)
}
  0x14   : > { %s829_s26 = scalar_lea.vmem %s130_s17, 16  ;;  %s836_s27 = scalar_lea.vmem %s130_s17, 32 }
  0x15   : > { %p830_p12 = scmp.ne.s32.totalorder %s130_s17, %s829_s26  ;;  %p837_p1 = scmp.lt.s32.totalorder %s130_s17, %s130_s17 }
  0x16   : > { %p838_p4 = scmp.lt.s32.totalorder %s836_s27, %s829_s26 }
  0x17   : > { %p832_p13 = pnand %p830_p12, %p818_p7 }
  0x18   : > { %p839_p3 = por %p838_p4, %p837_p1 }
  0x19   : > { %p833_p0 = pneg %p832_p13 }
  0x1b   : > { %p840_p2 = pnand %p839_p3, %p833_p0 }
  0x1d   : > { %843 = shalt.err (!%p840_p2)
}
  0x1e   : > { %785 = dma.hbm_to_vmem [thread:$0]  (!%p900_p5), %s1083_s2, 16, %s130_s17, [#allocation3]  }
  0x1f   : > { %p1091_p6 = scmp.ne.s32.totalorder %s1088_s14, 0 }
  0x20   : > { %p1092_p8 = scmp.ne.s32.totalorder (!%p1091_p6), %s1089_s15, 0 }
  0x21   : > { %151 = sbr.rel (%p1091_p6) target bundleno = 296 (0x128), region = 32 }
  0x28   : > { %849 = dma.done.wait (%p1092_p8), [#allocation3], 16  }
  0x29   : > { %851 = vsyncadd (%p1092_p8), [#allocation3], 4294967280  ;;  %s679_s30 = sshll.u32 %s672_s13, 5  ;;  %vm371_vm0 = vcmask 1043456   ;;  %vm372_vm1 = vcmask 1044480   ;;  %v857_v0 = vmov 65535  }
  0x2a   : > { %p176_p2 = scmp.lt.s32.totalorder %s679_s30, 223  ;;  %v373_v1 = vsel %vm371_vm0, 4294967295, %v857_v0  ;;  %vm322_vm2 = vcmask 203776   ;;  %v798_v2 = vld [vmem:[%s1082_s1] sm:$0xff]   ;;  %v799_v4 = vld [vmem:[%s1082_s1 + $0x8] sm:$0x1f]  }
  0x2b   : > { %v374_v3 = vsel %vm372_vm1, %v373_v1, 0  ;;  %738 = vmatprep.subr.bf16.mxu0 %v798_v2  ;;  %774 = vmatprep.subr.bf16.mxu1 %v798_v2  ;;  %v974_v22 = vld [vmem:[#allocation2] ss:$0 sm:$0xff]  ;;  %vm571_vm3 = vcmask 261120  }
  0x2c   : > { %s1094_s30 = smov (!%p176_p2, %s679_s30), 223  ;;  %739 = vmatpush3.bf16.msra.mxu0 %v798_v2  ;;  %776 = vmatpush3.bf16.msra.mxu1 %v798_v2  ;;  %v376_v6 = vand.u32 %v799_v4, %v374_v3 }
  0x2d   : > { %s680_s4 = sshll.u32 %s1094_s30, 2  ;;  %s682_s13 = sshll.u32 %s1094_s30, 3 }
  0x2e   : > { %s934_s7 = scalar_lea.vmem %s1081_s0, %s680_s4  ;;  %740 = vmatprep.subr.bf16.mxu0 %v376_v6  ;;  %775 = vmatprep.subr.bf16.mxu1 %v376_v6  ;;  %s982_s16 = scalar_lea.vmem %s1084_s3, %s682_s13 }
  0x2f   : > { %v800_v5 = vld [vmem:[%s934_s7] sm:$0xff]   ;;  %v802_v8 = vld [vmem:[%s934_s7 + $0x8] sm:$0xff]   ;;  %v804_v10 = vld [vmem:[%s934_s7 + $0x10] sm:$0xff]  }
  0x30   : > { %v801_v7 = vld [vmem:[%s934_s7 + $0x40] sm:$0xff]   ;;  %742 = vmatprep.mubr.msk.bf16.mxu0 %vm322_vm2, %v800_v5  ;;  %v803_v9 = vld [vmem:[%s934_s7 + $0x48] sm:$0xff]   ;;  %741 = vmatpush3.bf16.msra.mxu0 %v376_v6  ;;  %v805_v11 = vld [vmem:[%s934_s7 + $0x50] sm:$0xff]  }
  0x31   : > { %758 = vmatprep.mubr.msk.bf16.mxu1 %vm322_vm2, %v801_v7  ;;  %777 = vmatpush3.bf16.msra.mxu1 %v376_v6  ;;  %v806_v12 = vld [vmem:[%s934_s7 + $0x18] sm:$0xff]   ;;  %v808_v14 = vld [vmem:[%s934_s7 + $0x20] sm:$0xff]   ;;  %v810_v16 = vld [vmem:[%s934_s7 + $0x28] sm:$0xff]  }
  0x32   : > { %v807_v13 = vld [vmem:[%s934_s7 + $0x58] sm:$0xff]   ;;  %v809_v15 = vld [vmem:[%s934_s7 + $0x60] sm:$0xff]   ;;  %v811_v17 = vld [vmem:[%s934_s7 + $0x68] sm:$0xff]  }
  0x33   : > { %743 = vmatmul.mubr.msk.bf16.vlgmr.msra.gmra.mrb[0].mxu0 %vm322_vm2, %v802_v8  ;;  %v812_v18 = vld [vmem:[%s934_s7 + $0x30] sm:$0xff]   ;;  %v814_v20 = vld [vmem:[%s934_s7 + $0x38] sm:$0xff]  }
  0x34   : > { %759 = vmatmul.mubr.msk.bf16.vlgmr.msra.gmra.mrb[0].mxu1 %vm322_vm2, %v803_v9  ;;  %746 = vmatprep.mubr.msk.bf16.mxu0 %vm322_vm2, %v804_v10  ;;  %v813_v19 = vld [vmem:[%s934_s7 + $0x70] sm:$0xff]   ;;  %v815_v21 = vld [vmem:[%s934_s7 + $0x78] sm:$0xff]  }
  0x35   : > { %762 = vmatprep.mubr.msk.bf16.mxu1 %vm322_vm2, %v805_v11 }
  0x3b   : > { %747 = vmatmul.mubr.msk.bf16.gmra.mrb[4].mxu0 %vm322_vm2, %v806_v12 }
  0x3c   : > { %763 = vmatmul.mubr.msk.bf16.gmra.mrb[4].mxu1 %vm322_vm2, %v807_v13  ;;  %750 = vmatprep.mubr.msk.bf16.mxu0 %vm322_vm2, %v808_v14 }
  0x3d   : > { %766 = vmatprep.mubr.msk.bf16.mxu1 %vm322_vm2, %v809_v15 }
  0x43   : > { %751 = vmatmul.mubr.msk.bf16.gmra.mrb[8].mxu0 %vm322_vm2, %v810_v16 }
  0x44   : > { %767 = vmatmul.mubr.msk.bf16.gmra.mrb[8].mxu1 %vm322_vm2, %v811_v17  ;;  %754 = vmatprep.mubr.msk.bf16.mxu0 %vm322_vm2, %v812_v18 }
  0x45   : > { %770 = vmatprep.mubr.msk.bf16.mxu1 %vm322_vm2, %v813_v19 }
  0x4b   : > { %755 = vmatmul.mubr.msk.bf16.gmra.mrb[12].mxu0 %vm322_vm2, %v814_v20 }
  0x4c   : > { %771 = vmatmul.mubr.msk.bf16.gmra.mrb[12].mxu1 %vm322_vm2, %v815_v21 }
 0x106   : > { %v744_v23 = vpop.f32.mrb[0].mxu0 }
 0x107   : > { %v760_v24 = vpop.f32.mrb[0].mxu1  ;;  %v421_v25 = vadd.f32 %v744_v23, %v974_v22  ;;  %v412_v27 = vpop.f32.mrb[1].mxu0 }
 0x108   : > { %v485_v26 = vadd.f32 %v760_v24, %v974_v22  ;;  %v476_v28 = vpop.f32.mrb[1].mxu1  ;;  %v413_v29 = vadd.f32 %v974_v22, %v412_v27  ;;  %v745_v31 = vpop.f32.mrb[2].mxu0 }
 0x109   : > { %v477_v30 = vadd.f32 %v974_v22, %v476_v28  ;;  %v761_v32 = vpop.f32.mrb[2].mxu1  ;;  %v541_v33 = vmax.f32 %v421_v25, 0.0  ;;  %v424_v35 = vadd.f32 %v745_v31, %v974_v22  ;;  %v415_v37 = vpop.f32.mrb[3].mxu0 }
 0x10a   : > { %v557_v34 = vmax.f32 %v485_v26, 0.0  ;;  %v488_v36 = vadd.f32 %v761_v32, %v974_v22  ;;  %v479_v38 = vpop.f32.mrb[3].mxu1  ;;  %v539_v39 = vmax.f32 %v413_v29, 0.0  ;;  %v416_v41 = vadd.f32 %v974_v22, %v415_v37 }
 0x10b   : > { %v555_v40 = vmax.f32 %v477_v30, 0.0  ;;  %v480_v42 = vadd.f32 %v974_v22, %v479_v38  ;;  %574 = vst.msk [vmem:[%s982_s16 + $0x10] sm:$0xff] %vm571_vm3, %v541_v33  ;;  %v542_v43 = vmax.f32 %v424_v35, 0.0 }
 0x10c   : > { %590 = vst.msk [vmem:[%s982_s16 + $0x90] sm:$0xff] %vm571_vm3, %v557_v34  ;;  %v558_v44 = vmax.f32 %v488_v36, 0.0  ;;  %572 = vst.msk [vmem:[%s982_s16] sm:$0xff] %vm571_vm3, %v539_v39  ;;  %v540_v45 = vmax.f32 %v416_v41, 0.0 }
 0x10d   : > { %588 = vst.msk [vmem:[%s982_s16 + $0x80] sm:$0xff] %vm571_vm3, %v555_v40  ;;  %v556_v46 = vmax.f32 %v480_v42, 0.0  ;;  %575 = vst.msk [vmem:[%s982_s16 + $0x18] sm:$0xff] %vm571_vm3, %v542_v43 }
 0x10e   : > { %591 = vst.msk [vmem:[%s982_s16 + $0x98] sm:$0xff] %vm571_vm3, %v558_v44  ;;  %573 = vst.msk [vmem:[%s982_s16 + $0x8] sm:$0xff] %vm571_vm3, %v540_v45  ;;  %v748_v47 = vpop.f32.mrb[4].mxu0 }
 0x10f   : > { %589 = vst.msk [vmem:[%s982_s16 + $0x88] sm:$0xff] %vm571_vm3, %v556_v46  ;;  %v764_v48 = vpop.f32.mrb[4].mxu1  ;;  %v437_v49 = vadd.f32 %v748_v47, %v974_v22  ;;  %v428_v51 = vpop.f32.mrb[5].mxu0 }
 0x110   : > { %v501_v50 = vadd.f32 %v764_v48, %v974_v22  ;;  %v492_v52 = vpop.f32.mrb[5].mxu1  ;;  %v429_v53 = vadd.f32 %v974_v22, %v428_v51  ;;  %v749_v55 = vpop.f32.mrb[6].mxu0 }
 0x111   : > { %v493_v54 = vadd.f32 %v974_v22, %v492_v52  ;;  %v765_v56 = vpop.f32.mrb[6].mxu1  ;;  %v545_v57 = vmax.f32 %v437_v49, 0.0  ;;  %v440_v59 = vadd.f32 %v749_v55, %v974_v22  ;;  %v431_v61 = vpop.f32.mrb[7].mxu0 }
 0x112   : > { %v561_v58 = vmax.f32 %v501_v50, 0.0  ;;  %v504_v60 = vadd.f32 %v765_v56, %v974_v22  ;;  %v495_v62 = vpop.f32.mrb[7].mxu1  ;;  %v543_v63 = vmax.f32 %v429_v53, 0.0  ;;  %v432_v1 = vadd.f32 %v974_v22, %v431_v61 }
 0x113   : > { %v559_v0 = vmax.f32 %v493_v54, 0.0  ;;  %v496_v2 = vadd.f32 %v974_v22, %v495_v62  ;;  %578 = vst.msk [vmem:[%s982_s16 + $0x30] sm:$0xff] %vm571_vm3, %v545_v57  ;;  %v546_v3 = vmax.f32 %v440_v59, 0.0 }
 0x114   : > { %594 = vst.msk [vmem:[%s982_s16 + $0xb0] sm:$0xff] %vm571_vm3, %v561_v58  ;;  %v562_v4 = vmax.f32 %v504_v60, 0.0  ;;  %576 = vst.msk [vmem:[%s982_s16 + $0x20] sm:$0xff] %vm571_vm3, %v543_v63  ;;  %v544_v5 = vmax.f32 %v432_v1, 0.0 }
 0x115   : > { %592 = vst.msk [vmem:[%s982_s16 + $0xa0] sm:$0xff] %vm571_vm3, %v559_v0  ;;  %v560_v6 = vmax.f32 %v496_v2, 0.0  ;;  %579 = vst.msk [vmem:[%s982_s16 + $0x38] sm:$0xff] %vm571_vm3, %v546_v3 }
 0x116   : > { %595 = vst.msk [vmem:[%s982_s16 + $0xb8] sm:$0xff] %vm571_vm3, %v562_v4  ;;  %577 = vst.msk [vmem:[%s982_s16 + $0x28] sm:$0xff] %vm571_vm3, %v544_v5  ;;  %v752_v7 = vpop.f32.mrb[8].mxu0 }
 0x117   : > { %593 = vst.msk [vmem:[%s982_s16 + $0xa8] sm:$0xff] %vm571_vm3, %v560_v6  ;;  %v768_v8 = vpop.f32.mrb[8].mxu1  ;;  %v453_v9 = vadd.f32 %v752_v7, %v974_v22  ;;  %v444_v11 = vpop.f32.mrb[9].mxu0 }
 0x118   : > { %v517_v10 = vadd.f32 %v768_v8, %v974_v22  ;;  %v508_v12 = vpop.f32.mrb[9].mxu1  ;;  %v445_v13 = vadd.f32 %v974_v22, %v444_v11  ;;  %v753_v15 = vpop.f32.mrb[10].mxu0 }
 0x119   : > { %v509_v14 = vadd.f32 %v974_v22, %v508_v12  ;;  %v769_v16 = vpop.f32.mrb[10].mxu1  ;;  %v549_v17 = vmax.f32 %v453_v9, 0.0  ;;  %v456_v19 = vadd.f32 %v753_v15, %v974_v22  ;;  %v447_v21 = vpop.f32.mrb[11].mxu0 }
 0x11a   : > { %v565_v18 = vmax.f32 %v517_v10, 0.0  ;;  %v520_v20 = vadd.f32 %v769_v16, %v974_v22  ;;  %v511_v23 = vpop.f32.mrb[11].mxu1  ;;  %v547_v24 = vmax.f32 %v445_v13, 0.0  ;;  %v448_v26 = vadd.f32 %v974_v22, %v447_v21 }
 0x11b   : > { %v563_v25 = vmax.f32 %v509_v14, 0.0  ;;  %v512_v27 = vadd.f32 %v974_v22, %v511_v23  ;;  %582 = vst.msk [vmem:[%s982_s16 + $0x50] sm:$0xff] %vm571_vm3, %v549_v17  ;;  %v550_v28 = vmax.f32 %v456_v19, 0.0 }
 0x11c   : > { %598 = vst.msk [vmem:[%s982_s16 + $0xd0] sm:$0xff] %vm571_vm3, %v565_v18  ;;  %v566_v29 = vmax.f32 %v520_v20, 0.0  ;;  %580 = vst.msk [vmem:[%s982_s16 + $0x40] sm:$0xff] %vm571_vm3, %v547_v24  ;;  %v548_v30 = vmax.f32 %v448_v26, 0.0 }
 0x11d   : > { %596 = vst.msk [vmem:[%s982_s16 + $0xc0] sm:$0xff] %vm571_vm3, %v563_v25  ;;  %v564_v31 = vmax.f32 %v512_v27, 0.0  ;;  %583 = vst.msk [vmem:[%s982_s16 + $0x58] sm:$0xff] %vm571_vm3, %v550_v28 }
 0x11e   : > { %599 = vst.msk [vmem:[%s982_s16 + $0xd8] sm:$0xff] %vm571_vm3, %v566_v29  ;;  %581 = vst.msk [vmem:[%s982_s16 + $0x48] sm:$0xff] %vm571_vm3, %v548_v30  ;;  %v756_v32 = vpop.f32.mrb[12].mxu0 }
 0x11f   : > { %597 = vst.msk [vmem:[%s982_s16 + $0xc8] sm:$0xff] %vm571_vm3, %v564_v31  ;;  %v772_v33 = vpop.f32.mrb[12].mxu1  ;;  %v469_v34 = vadd.f32 %v756_v32, %v974_v22  ;;  %v460_v36 = vpop.f32.mrb[13].mxu0 }
 0x120   : > { %v533_v35 = vadd.f32 %v772_v33, %v974_v22  ;;  %v524_v37 = vpop.f32.mrb[13].mxu1  ;;  %v461_v38 = vadd.f32 %v974_v22, %v460_v36  ;;  %v757_v40 = vpop.f32.mrb[14].mxu0 }
 0x121   : > { %v525_v39 = vadd.f32 %v974_v22, %v524_v37  ;;  %v773_v41 = vpop.f32.mrb[14].mxu1  ;;  %v553_v42 = vmax.f32 %v469_v34, 0.0  ;;  %v472_v44 = vadd.f32 %v757_v40, %v974_v22  ;;  %v463_v46 = vpop.f32.mrb[15].mxu0 }
 0x122   : > { %v569_v43 = vmax.f32 %v533_v35, 0.0  ;;  %v536_v45 = vadd.f32 %v773_v41, %v974_v22  ;;  %v527_v47 = vpop.f32.mrb[15].mxu1  ;;  %v551_v48 = vmax.f32 %v461_v38, 0.0  ;;  %v464_v50 = vadd.f32 %v974_v22, %v463_v46 }
 0x123   : > { %v567_v49 = vmax.f32 %v525_v39, 0.0  ;;  %v528_v51 = vadd.f32 %v974_v22, %v527_v47  ;;  %586 = vst.msk [vmem:[%s982_s16 + $0x70] sm:$0xff] %vm571_vm3, %v553_v42  ;;  %v554_v52 = vmax.f32 %v472_v44, 0.0 }
 0x124   : > { %602 = vst.msk [vmem:[%s982_s16 + $0xf0] sm:$0xff] %vm571_vm3, %v569_v43  ;;  %v570_v53 = vmax.f32 %v536_v45, 0.0  ;;  %584 = vst.msk [vmem:[%s982_s16 + $0x60] sm:$0xff] %vm571_vm3, %v551_v48  ;;  %v552_v54 = vmax.f32 %v464_v50, 0.0 }
 0x125   : > { %600 = vst.msk [vmem:[%s982_s16 + $0xe0] sm:$0xff] %vm571_vm3, %v567_v49  ;;  %v568_v55 = vmax.f32 %v528_v51, 0.0  ;;  %587 = vst.msk [vmem:[%s982_s16 + $0x78] sm:$0xff] %vm571_vm3, %v554_v52 }
 0x126   : > { %603 = vst.msk [vmem:[%s982_s16 + $0xf8] sm:$0xff] %vm571_vm3, %v570_v53  ;;  %585 = vst.msk [vmem:[%s982_s16 + $0x68] sm:$0xff] %vm571_vm3, %v552_v54 }
 0x127   : > { %601 = vst.msk [vmem:[%s982_s16 + $0xe8] sm:$0xff] %vm571_vm3, %v568_v55 }
 0x128 PF: > { %s14_s12 = sadd.s32 1, %s854_s12  }
 0x129   : > { %p11_p3 = scmp.ge.s32.totalorder %s14_s12, 9  }
 0x12b   :  { %13 = sbr.rel (!%p11_p3) target bundleno = 1 (0x1), region = 67 }
 0x132   :  { %626 = vsyncpa [#allocation3], 1 }
 0x133   :  { %628 = vsyncpa [#allocation3 + $0x1], 1 }

// kernel: forward.6
= control target key start
LH: loop header
LB: loop body
LE: loop exit
PB: predicated region body
PF: predicated region fallthrough
CT: control target
= control target key end

     0   :  { %vm623_vm0 = vcmask 261120   ;;  %vm625_vm1 = vcmask 259072   ;;  %s1925_s0 = inlined_call_operand.vmem [shape: f32[2,28,28,32], index: 0, kind: input, shape index: {}]   ;;  %s1926_s1 = inlined_call_operand.vmem [shape: f32[2,14,14,32], index: 1, kind: output, shape index: {}]  }
   0x1   :  { %v8_v0 = vld [vmem:[%s1925_s0] ss:$2 sm:$0xff]  ;;  %v851_v1 = vld [vmem:[%s1925_s0 + $0x1] ss:$2 sm:$0xff] }
   0x2   :  { %v907_v2 = vld [vmem:[%s1925_s0 + $0x20] ss:$2 sm:$0xff]  ;;  %v963_v3 = vld [vmem:[%s1925_s0 + $0x21] ss:$2 sm:$0xff]  ;;  %v455_v4 = vmax.f32 %v8_v0, %v851_v1 }
   0x3   :  { %v796_v5 = vld [vmem:[%s1925_s0 + $0x10] ss:$2 sm:$0x3f]  ;;  %v511_v6 = vmax.f32 %v907_v2, %v963_v3  ;;  %v852_v7 = vld [vmem:[%s1925_s0 + $0x11] ss:$2 sm:$0x3f] }
   0x4   :  { %v908_v8 = vld [vmem:[%s1925_s0 + $0x30] ss:$2 sm:$0x3f]  ;;  %v964_v9 = vld [vmem:[%s1925_s0 + $0x31] ss:$2 sm:$0x3f]  ;;  %v456_v10 = vmax.f32 %v796_v5, %v852_v7 }
   0x5   :  { %v797_v11 = vld [vmem:[%s1925_s0 + $0x40] ss:$2 sm:$0xff]  ;;  %v567_v12 = vmax.f32 %v455_v4, %v511_v6  ;;  %v512_v13 = vmax.f32 %v908_v8, %v964_v9  ;;  %v853_v14 = vld [vmem:[%s1925_s0 + $0x41] ss:$2 sm:$0xff] }
   0x6   :  { %v909_v15 = vld [vmem:[%s1925_s0 + $0x60] ss:$2 sm:$0xff]  ;;  %v965_v16 = vld [vmem:[%s1925_s0 + $0x61] ss:$2 sm:$0xff]  ;;  %v457_v17 = vmax.f32 %v797_v11, %v853_v14 }
   0x7   :  { %v513_v18 = vmax.f32 %v909_v15, %v965_v16  ;;  %v798_v19 = vld [vmem:[%s1925_s0 + $0x50] ss:$2 sm:$0x3f]  ;;  %v854_v20 = vld [vmem:[%s1925_s0 + $0x51] ss:$2 sm:$0x3f]  ;;  %v568_v21 = vmax.f32 %v456_v10, %v512_v13 }
   0x8   :  { %624 = vst.msk [vmem:[%s1926_s1] sm:$0xff] %vm623_vm0, %v567_v12  ;;  %v910_v22 = vld [vmem:[%s1925_s0 + $0x70] ss:$2 sm:$0x3f]  ;;  %v458_v24 = vmax.f32 %v798_v19, %v854_v20  ;;  %v799_v27 = vld [vmem:[%s1925_s0 + $0x80] ss:$2 sm:$0xff] }
   0x9   :  { %v966_v23 = vld [vmem:[%s1925_s0 + $0x71] ss:$2 sm:$0x3f]  ;;  %v569_v25 = vmax.f32 %v457_v17, %v513_v18  ;;  %v855_v28 = vld [vmem:[%s1925_s0 + $0x81] ss:$2 sm:$0xff] }
   0xa   :  { %v514_v26 = vmax.f32 %v910_v22, %v966_v23  ;;  %v911_v29 = vld [vmem:[%s1925_s0 + $0xa0] ss:$2 sm:$0xff]  ;;  %626 = vst.msk [vmem:[%s1926_s1 + $0x8] sm:$0x3f] %vm625_vm1, %v568_v21  ;;  %v967_v30 = vld [vmem:[%s1925_s0 + $0xa1] ss:$2 sm:$0xff]  ;;  %v459_v31 = vmax.f32 %v799_v27, %v855_v28 }
   0xb   :  { %v800_v32 = vld [vmem:[%s1925_s0 + $0x90] ss:$2 sm:$0x3f]  ;;  %627 = vst.msk [vmem:[%s1926_s1 + $0x10] sm:$0xff] %vm623_vm0, %v569_v25  ;;  %v515_v34 = vmax.f32 %v911_v29, %v967_v30  ;;  %v801_v39 = vld [vmem:[%s1925_s0 + $0xc0] ss:$2 sm:$0xff] }
   0xc   :  { %v570_v33 = vmax.f32 %v458_v24, %v514_v26  ;;  %v856_v35 = vld [vmem:[%s1925_s0 + $0x91] ss:$2 sm:$0x3f]  ;;  %v912_v36 = vld [vmem:[%s1925_s0 + $0xb0] ss:$2 sm:$0x3f] }
   0xd   :  { %v968_v37 = vld [vmem:[%s1925_s0 + $0xb1] ss:$2 sm:$0x3f]  ;;  %v460_v38 = vmax.f32 %v800_v32, %v856_v35  ;;  %v571_v40 = vmax.f32 %v459_v31, %v515_v34  ;;  %v857_v42 = vld [vmem:[%s1925_s0 + $0xc1] ss:$2 sm:$0xff] }
   0xe   :  { %628 = vst.msk [vmem:[%s1926_s1 + $0x18] sm:$0x3f] %vm625_vm1, %v570_v33  ;;  %v516_v41 = vmax.f32 %v912_v36, %v968_v37  ;;  %v913_v43 = vld [vmem:[%s1925_s0 + $0xe0] ss:$2 sm:$0xff]  ;;  %v969_v44 = vld [vmem:[%s1925_s0 + $0xe1] ss:$2 sm:$0xff]  ;;  %v461_v45 = vmax.f32 %v801_v39, %v857_v42 }
   0xf   :  { %v517_v46 = vmax.f32 %v913_v43, %v969_v44  ;;  %v802_v47 = vld [vmem:[%s1925_s0 + $0xd0] ss:$2 sm:$0x3f]  ;;  %v858_v48 = vld [vmem:[%s1925_s0 + $0xd1] ss:$2 sm:$0x3f] }
  0x10   :  { %629 = vst.msk [vmem:[%s1926_s1 + $0x20] sm:$0xff] %vm623_vm0, %v571_v40  ;;  %v572_v49 = vmax.f32 %v460_v38, %v516_v41  ;;  %v914_v50 = vld [vmem:[%s1925_s0 + $0xf0] ss:$2 sm:$0x3f]  ;;  %v462_v52 = vmax.f32 %v802_v47, %v858_v48  ;;  %v803_v55 = vld [vmem:[%s1925_s0 + $0x100] ss:$2 sm:$0xff] }
  0x11   :  { %v970_v51 = vld [vmem:[%s1925_s0 + $0xf1] ss:$2 sm:$0x3f]  ;;  %v573_v53 = vmax.f32 %v461_v45, %v517_v46  ;;  %v859_v56 = vld [vmem:[%s1925_s0 + $0x101] ss:$2 sm:$0xff] }
  0x12   :  { %v518_v54 = vmax.f32 %v914_v50, %v970_v51  ;;  %v915_v57 = vld [vmem:[%s1925_s0 + $0x120] ss:$2 sm:$0xff]  ;;  %630 = vst.msk [vmem:[%s1926_s1 + $0x28] sm:$0x3f] %vm625_vm1, %v572_v49  ;;  %v971_v58 = vld [vmem:[%s1925_s0 + $0x121] ss:$2 sm:$0xff]  ;;  %v463_v59 = vmax.f32 %v803_v55, %v859_v56 }
  0x13   :  { %v804_v60 = vld [vmem:[%s1925_s0 + $0x110] ss:$2 sm:$0x3f]  ;;  %631 = vst.msk [vmem:[%s1926_s1 + $0x30] sm:$0xff] %vm623_vm0, %v573_v53  ;;  %v519_v62 = vmax.f32 %v915_v57, %v971_v58  ;;  %v805_v3 = vld [vmem:[%s1925_s0 + $0x140] ss:$2 sm:$0xff] }
  0x14   :  { %v574_v61 = vmax.f32 %v462_v52, %v518_v54  ;;  %v860_v63 = vld [vmem:[%s1925_s0 + $0x111] ss:$2 sm:$0x3f]  ;;  %v916_v0 = vld [vmem:[%s1925_s0 + $0x130] ss:$2 sm:$0x3f] }
  0x15   :  { %v972_v1 = vld [vmem:[%s1925_s0 + $0x131] ss:$2 sm:$0x3f]  ;;  %v464_v2 = vmax.f32 %v804_v60, %v860_v63  ;;  %v575_v4 = vmax.f32 %v463_v59, %v519_v62  ;;  %v861_v6 = vld [vmem:[%s1925_s0 + $0x141] ss:$2 sm:$0xff] }
  0x16   :  { %632 = vst.msk [vmem:[%s1926_s1 + $0x38] sm:$0x3f] %vm625_vm1, %v574_v61  ;;  %v520_v5 = vmax.f32 %v916_v0, %v972_v1  ;;  %v917_v7 = vld [vmem:[%s1925_s0 + $0x160] ss:$2 sm:$0xff]  ;;  %v973_v8 = vld [vmem:[%s1925_s0 + $0x161] ss:$2 sm:$0xff]  ;;  %v465_v9 = vmax.f32 %v805_v3, %v861_v6 }
  0x17   :  { %v521_v10 = vmax.f32 %v917_v7, %v973_v8  ;;  %v806_v11 = vld [vmem:[%s1925_s0 + $0x150] ss:$2 sm:$0x3f]  ;;  %v862_v12 = vld [vmem:[%s1925_s0 + $0x151] ss:$2 sm:$0x3f] }
  0x18   :  { %633 = vst.msk [vmem:[%s1926_s1 + $0x40] sm:$0xff] %vm623_vm0, %v575_v4  ;;  %v576_v13 = vmax.f32 %v464_v2, %v520_v5  ;;  %v918_v14 = vld [vmem:[%s1925_s0 + $0x170] ss:$2 sm:$0x3f]  ;;  %v466_v16 = vmax.f32 %v806_v11, %v862_v12  ;;  %v807_v19 = vld [vmem:[%s1925_s0 + $0x180] ss:$2 sm:$0xff] }
  0x19   :  { %v974_v15 = vld [vmem:[%s1925_s0 + $0x171] ss:$2 sm:$0x3f]  ;;  %v577_v17 = vmax.f32 %v465_v9, %v521_v10  ;;  %v863_v20 = vld [vmem:[%s1925_s0 + $0x181] ss:$2 sm:$0xff] }
  0x1a   :  { %v522_v18 = vmax.f32 %v918_v14, %v974_v15  ;;  %v919_v21 = vld [vmem:[%s1925_s0 + $0x1a0] ss:$2 sm:$0xff]  ;;  %634 = vst.msk [vmem:[%s1926_s1 + $0x48] sm:$0x3f] %vm625_vm1, %v576_v13  ;;  %v975_v22 = vld [vmem:[%s1925_s0 + $0x1a1] ss:$2 sm:$0xff]  ;;  %v467_v23 = vmax.f32 %v807_v19, %v863_v20 }
  0x1b   :  { %v808_v24 = vld [vmem:[%s1925_s0 + $0x190] ss:$2 sm:$0x3f]  ;;  %635 = vst.msk [vmem:[%s1926_s1 + $0x50] sm:$0xff] %vm623_vm0, %v577_v17  ;;  %v523_v26 = vmax.f32 %v919_v21, %v975_v22  ;;  %v809_v31 = vld [vmem:[%s1925_s0 + $0x1c0] ss:$2 sm:$0xff] }
  0x1c   :  { %v578_v25 = vmax.f32 %v466_v16, %v522_v18  ;;  %v864_v27 = vld [vmem:[%s1925_s0 + $0x191] ss:$2 sm:$0x3f]  ;;  %v920_v28 = vld [vmem:[%s1925_s0 + $0x1b0] ss:$2 sm:$0x3f] }
  0x1d   :  { %v976_v29 = vld [vmem:[%s1925_s0 + $0x1b1] ss:$2 sm:$0x3f]  ;;  %v468_v30 = vmax.f32 %v808_v24, %v864_v27  ;;  %v579_v32 = vmax.f32 %v467_v23, %v523_v26  ;;  %v865_v34 = vld [vmem:[%s1925_s0 + $0x1c1] ss:$2 sm:$0xff] }
  0x1e   :  { %636 = vst.msk [vmem:[%s1926_s1 + $0x58] sm:$0x3f] %vm625_vm1, %v578_v25  ;;  %v524_v33 = vmax.f32 %v920_v28, %v976_v29  ;;  %v921_v35 = vld [vmem:[%s1925_s0 + $0x1e0] ss:$2 sm:$0xff]  ;;  %v977_v36 = vld [vmem:[%s1925_s0 + $0x1e1] ss:$2 sm:$0xff]  ;;  %v469_v37 = vmax.f32 %v809_v31, %v865_v34 }
  0x1f   :  { %v525_v38 = vmax.f32 %v921_v35, %v977_v36  ;;  %v810_v39 = vld [vmem:[%s1925_s0 + $0x1d0] ss:$2 sm:$0x3f]  ;;  %v866_v40 = vld [vmem:[%s1925_s0 + $0x1d1] ss:$2 sm:$0x3f] }
  0x20   :  { %637 = vst.msk [vmem:[%s1926_s1 + $0x60] sm:$0xff] %vm623_vm0, %v579_v32  ;;  %v580_v41 = vmax.f32 %v468_v30, %v524_v33  ;;  %v922_v42 = vld [vmem:[%s1925_s0 + $0x1f0] ss:$2 sm:$0x3f]  ;;  %v470_v44 = vmax.f32 %v810_v39, %v866_v40  ;;  %v811_v47 = vld [vmem:[%s1925_s0 + $0x200] ss:$2 sm:$0xff] }
  0x21   :  { %v978_v43 = vld [vmem:[%s1925_s0 + $0x1f1] ss:$2 sm:$0x3f]  ;;  %v581_v45 = vmax.f32 %v469_v37, %v525_v38  ;;  %v867_v48 = vld [vmem:[%s1925_s0 + $0x201] ss:$2 sm:$0xff] }
  0x22   :  { %v526_v46 = vmax.f32 %v922_v42, %v978_v43  ;;  %v923_v49 = vld [vmem:[%s1925_s0 + $0x220] ss:$2 sm:$0xff]  ;;  %638 = vst.msk [vmem:[%s1926_s1 + $0x68] sm:$0x3f] %vm625_vm1, %v580_v41  ;;  %v979_v50 = vld [vmem:[%s1925_s0 + $0x221] ss:$2 sm:$0xff]  ;;  %v471_v51 = vmax.f32 %v811_v47, %v867_v48 }
  0x23   :  { %v812_v52 = vld [vmem:[%s1925_s0 + $0x210] ss:$2 sm:$0x3f]  ;;  %639 = vst.msk [vmem:[%s1926_s1 + $0x70] sm:$0xff] %vm623_vm0, %v581_v45  ;;  %v527_v54 = vmax.f32 %v923_v49, %v979_v50  ;;  %v813_v59 = vld [vmem:[%s1925_s0 + $0x240] ss:$2 sm:$0xff] }
  0x24   :  { %v582_v53 = vmax.f32 %v470_v44, %v526_v46  ;;  %v868_v55 = vld [vmem:[%s1925_s0 + $0x211] ss:$2 sm:$0x3f]  ;;  %v924_v56 = vld [vmem:[%s1925_s0 + $0x230] ss:$2 sm:$0x3f] }
  0x25   :  { %v980_v57 = vld [vmem:[%s1925_s0 + $0x231] ss:$2 sm:$0x3f]  ;;  %v472_v58 = vmax.f32 %v812_v52, %v868_v55  ;;  %v583_v60 = vmax.f32 %v471_v51, %v527_v54  ;;  %v869_v62 = vld [vmem:[%s1925_s0 + $0x241] ss:$2 sm:$0xff] }
  0x26   :  { %640 = vst.msk [vmem:[%s1926_s1 + $0x78] sm:$0x3f] %vm625_vm1, %v582_v53  ;;  %v528_v61 = vmax.f32 %v924_v56, %v980_v57  ;;  %v925_v63 = vld [vmem:[%s1925_s0 + $0x260] ss:$2 sm:$0xff]  ;;  %v981_v0 = vld [vmem:[%s1925_s0 + $0x261] ss:$2 sm:$0xff]  ;;  %v473_v1 = vmax.f32 %v813_v59, %v869_v62 }
  0x27   :  { %v529_v2 = vmax.f32 %v925_v63, %v981_v0  ;;  %v814_v3 = vld [vmem:[%s1925_s0 + $0x250] ss:$2 sm:$0x3f]  ;;  %v870_v4 = vld [vmem:[%s1925_s0 + $0x251] ss:$2 sm:$0x3f] }
  0x28   :  { %641 = vst.msk [vmem:[%s1926_s1 + $0x80] sm:$0xff] %vm623_vm0, %v583_v60  ;;  %v584_v5 = vmax.f32 %v472_v58, %v528_v61  ;;  %v926_v6 = vld [vmem:[%s1925_s0 + $0x270] ss:$2 sm:$0x3f]  ;;  %v474_v8 = vmax.f32 %v814_v3, %v870_v4  ;;  %v815_v11 = vld [vmem:[%s1925_s0 + $0x280] ss:$2 sm:$0xff] }
  0x29   :  { %v982_v7 = vld [vmem:[%s1925_s0 + $0x271] ss:$2 sm:$0x3f]  ;;  %v585_v9 = vmax.f32 %v473_v1, %v529_v2  ;;  %v871_v12 = vld [vmem:[%s1925_s0 + $0x281] ss:$2 sm:$0xff] }
  0x2a   :  { %v530_v10 = vmax.f32 %v926_v6, %v982_v7  ;;  %v927_v13 = vld [vmem:[%s1925_s0 + $0x2a0] ss:$2 sm:$0xff]  ;;  %642 = vst.msk [vmem:[%s1926_s1 + $0x88] sm:$0x3f] %vm625_vm1, %v584_v5  ;;  %v983_v14 = vld [vmem:[%s1925_s0 + $0x2a1] ss:$2 sm:$0xff]  ;;  %v475_v15 = vmax.f32 %v815_v11, %v871_v12 }
  0x2b   :  { %v816_v16 = vld [vmem:[%s1925_s0 + $0x290] ss:$2 sm:$0x3f]  ;;  %643 = vst.msk [vmem:[%s1926_s1 + $0x90] sm:$0xff] %vm623_vm0, %v585_v9  ;;  %v531_v18 = vmax.f32 %v927_v13, %v983_v14  ;;  %v817_v23 = vld [vmem:[%s1925_s0 + $0x2c0] ss:$2 sm:$0xff] }
  0x2c   :  { %v586_v17 = vmax.f32 %v474_v8, %v530_v10  ;;  %v872_v19 = vld [vmem:[%s1925_s0 + $0x291] ss:$2 sm:$0x3f]  ;;  %v928_v20 = vld [vmem:[%s1925_s0 + $0x2b0] ss:$2 sm:$0x3f] }
  0x2d   :  { %v984_v21 = vld [vmem:[%s1925_s0 + $0x2b1] ss:$2 sm:$0x3f]  ;;  %v476_v22 = vmax.f32 %v816_v16, %v872_v19  ;;  %v587_v24 = vmax.f32 %v475_v15, %v531_v18  ;;  %v873_v26 = vld [vmem:[%s1925_s0 + $0x2c1] ss:$2 sm:$0xff] }
  0x2e   :  { %644 = vst.msk [vmem:[%s1926_s1 + $0x98] sm:$0x3f] %vm625_vm1, %v586_v17  ;;  %v532_v25 = vmax.f32 %v928_v20, %v984_v21  ;;  %v929_v27 = vld [vmem:[%s1925_s0 + $0x2e0] ss:$2 sm:$0xff]  ;;  %v985_v28 = vld [vmem:[%s1925_s0 + $0x2e1] ss:$2 sm:$0xff]  ;;  %v477_v29 = vmax.f32 %v817_v23, %v873_v26 }
  0x2f   :  { %v533_v30 = vmax.f32 %v929_v27, %v985_v28  ;;  %v818_v31 = vld [vmem:[%s1925_s0 + $0x2d0] ss:$2 sm:$0x3f]  ;;  %v874_v32 = vld [vmem:[%s1925_s0 + $0x2d1] ss:$2 sm:$0x3f] }
  0x30   :  { %645 = vst.msk [vmem:[%s1926_s1 + $0xa0] sm:$0xff] %vm623_vm0, %v587_v24  ;;  %v588_v33 = vmax.f32 %v476_v22, %v532_v25  ;;  %v930_v34 = vld [vmem:[%s1925_s0 + $0x2f0] ss:$2 sm:$0x3f]  ;;  %v478_v36 = vmax.f32 %v818_v31, %v874_v32  ;;  %v819_v39 = vld [vmem:[%s1925_s0 + $0x300] ss:$2 sm:$0xff] }
  0x31   :  { %v986_v35 = vld [vmem:[%s1925_s0 + $0x2f1] ss:$2 sm:$0x3f]  ;;  %v589_v37 = vmax.f32 %v477_v29, %v533_v30  ;;  %v875_v40 = vld [vmem:[%s1925_s0 + $0x301] ss:$2 sm:$0xff] }
  0x32   :  { %v534_v38 = vmax.f32 %v930_v34, %v986_v35  ;;  %v931_v41 = vld [vmem:[%s1925_s0 + $0x320] ss:$2 sm:$0xff]  ;;  %646 = vst.msk [vmem:[%s1926_s1 + $0xa8] sm:$0x3f] %vm625_vm1, %v588_v33  ;;  %v987_v42 = vld [vmem:[%s1925_s0 + $0x321] ss:$2 sm:$0xff]  ;;  %v479_v43 = vmax.f32 %v819_v39, %v875_v40 }
  0x33   :  { %v820_v44 = vld [vmem:[%s1925_s0 + $0x310] ss:$2 sm:$0x3f]  ;;  %647 = vst.msk [vmem:[%s1926_s1 + $0xb0] sm:$0xff] %vm623_vm0, %v589_v37  ;;  %v535_v46 = vmax.f32 %v931_v41, %v987_v42  ;;  %v821_v51 = vld [vmem:[%s1925_s0 + $0x340] ss:$2 sm:$0xff] }
  0x34   :  { %v590_v45 = vmax.f32 %v478_v36, %v534_v38  ;;  %v876_v47 = vld [vmem:[%s1925_s0 + $0x311] ss:$2 sm:$0x3f]  ;;  %v932_v48 = vld [vmem:[%s1925_s0 + $0x330] ss:$2 sm:$0x3f] }
  0x35   :  { %v988_v49 = vld [vmem:[%s1925_s0 + $0x331] ss:$2 sm:$0x3f]  ;;  %v480_v50 = vmax.f32 %v820_v44, %v876_v47  ;;  %v591_v52 = vmax.f32 %v479_v43, %v535_v46  ;;  %v877_v54 = vld [vmem:[%s1925_s0 + $0x341] ss:$2 sm:$0xff] }
  0x36   :  { %648 = vst.msk [vmem:[%s1926_s1 + $0xb8] sm:$0x3f] %vm625_vm1, %v590_v45  ;;  %v536_v53 = vmax.f32 %v932_v48, %v988_v49  ;;  %v933_v55 = vld [vmem:[%s1925_s0 + $0x360] ss:$2 sm:$0xff]  ;;  %v989_v56 = vld [vmem:[%s1925_s0 + $0x361] ss:$2 sm:$0xff]  ;;  %v481_v57 = vmax.f32 %v821_v51, %v877_v54 }
  0x37   :  { %v537_v58 = vmax.f32 %v933_v55, %v989_v56  ;;  %v822_v59 = vld [vmem:[%s1925_s0 + $0x350] ss:$2 sm:$0x3f]  ;;  %v878_v60 = vld [vmem:[%s1925_s0 + $0x351] ss:$2 sm:$0x3f] }
  0x38   :  { %649 = vst.msk [vmem:[%s1926_s1 + $0xc0] sm:$0xff] %vm623_vm0, %v591_v52  ;;  %v592_v61 = vmax.f32 %v480_v50, %v536_v53  ;;  %v934_v62 = vld [vmem:[%s1925_s0 + $0x370] ss:$2 sm:$0x3f]  ;;  %v482_v0 = vmax.f32 %v822_v59, %v878_v60  ;;  %v823_v3 = vld [vmem:[%s1925_s0 + $0x380] ss:$2 sm:$0xff] }
  0x39   :  { %v990_v63 = vld [vmem:[%s1925_s0 + $0x371] ss:$2 sm:$0x3f]  ;;  %v593_v1 = vmax.f32 %v481_v57, %v537_v58  ;;  %v879_v4 = vld [vmem:[%s1925_s0 + $0x381] ss:$2 sm:$0xff] }
  0x3a   :  { %v538_v2 = vmax.f32 %v934_v62, %v990_v63  ;;  %v935_v5 = vld [vmem:[%s1925_s0 + $0x3a0] ss:$2 sm:$0xff]  ;;  %650 = vst.msk [vmem:[%s1926_s1 + $0xc8] sm:$0x3f] %vm625_vm1, %v592_v61  ;;  %v991_v6 = vld [vmem:[%s1925_s0 + $0x3a1] ss:$2 sm:$0xff]  ;;  %v483_v7 = vmax.f32 %v823_v3, %v879_v4 }
  0x3b   :  { %v824_v8 = vld [vmem:[%s1925_s0 + $0x390] ss:$2 sm:$0x3f]  ;;  %651 = vst.msk [vmem:[%s1926_s1 + $0xd0] sm:$0xff] %vm623_vm0, %v593_v1  ;;  %v539_v10 = vmax.f32 %v935_v5, %v991_v6  ;;  %v825_v15 = vld [vmem:[%s1925_s0 + $0x3c0] ss:$2 sm:$0xff] }
  0x3c   :  { %v594_v9 = vmax.f32 %v482_v0, %v538_v2  ;;  %v880_v11 = vld [vmem:[%s1925_s0 + $0x391] ss:$2 sm:$0x3f]  ;;  %v936_v12 = vld [vmem:[%s1925_s0 + $0x3b0] ss:$2 sm:$0x3f] }
  0x3d   :  { %v992_v13 = vld [vmem:[%s1925_s0 + $0x3b1] ss:$2 sm:$0x3f]  ;;  %v484_v14 = vmax.f32 %v824_v8, %v880_v11  ;;  %v595_v16 = vmax.f32 %v483_v7, %v539_v10  ;;  %v881_v18 = vld [vmem:[%s1925_s0 + $0x3c1] ss:$2 sm:$0xff] }
  0x3e   :  { %652 = vst.msk [vmem:[%s1926_s1 + $0xd8] sm:$0x3f] %vm625_vm1, %v594_v9  ;;  %v540_v17 = vmax.f32 %v936_v12, %v992_v13  ;;  %v937_v19 = vld [vmem:[%s1925_s0 + $0x3e0] ss:$2 sm:$0xff]  ;;  %v993_v20 = vld [vmem:[%s1925_s0 + $0x3e1] ss:$2 sm:$0xff]  ;;  %v485_v21 = vmax.f32 %v825_v15, %v881_v18 }
  0x3f   :  { %v541_v22 = vmax.f32 %v937_v19, %v993_v20  ;;  %v826_v23 = vld [vmem:[%s1925_s0 + $0x3d0] ss:$2 sm:$0x3f]  ;;  %v882_v24 = vld [vmem:[%s1925_s0 + $0x3d1] ss:$2 sm:$0x3f] }
  0x40   :  { %653 = vst.msk [vmem:[%s1926_s1 + $0xe0] sm:$0xff] %vm623_vm0, %v595_v16  ;;  %v596_v25 = vmax.f32 %v484_v14, %v540_v17  ;;  %v938_v26 = vld [vmem:[%s1925_s0 + $0x3f0] ss:$2 sm:$0x3f]  ;;  %v486_v28 = vmax.f32 %v826_v23, %v882_v24  ;;  %v827_v31 = vld [vmem:[%s1925_s0 + $0x400] ss:$2 sm:$0xff] }
  0x41   :  { %v994_v27 = vld [vmem:[%s1925_s0 + $0x3f1] ss:$2 sm:$0x3f]  ;;  %v597_v29 = vmax.f32 %v485_v21, %v541_v22  ;;  %v883_v32 = vld [vmem:[%s1925_s0 + $0x401] ss:$2 sm:$0xff] }
  0x42   :  { %v542_v30 = vmax.f32 %v938_v26, %v994_v27  ;;  %v939_v33 = vld [vmem:[%s1925_s0 + $0x420] ss:$2 sm:$0xff]  ;;  %654 = vst.msk [vmem:[%s1926_s1 + $0xe8] sm:$0x3f] %vm625_vm1, %v596_v25  ;;  %v995_v34 = vld [vmem:[%s1925_s0 + $0x421] ss:$2 sm:$0xff]  ;;  %v487_v35 = vmax.f32 %v827_v31, %v883_v32 }
  0x43   :  { %v828_v36 = vld [vmem:[%s1925_s0 + $0x410] ss:$2 sm:$0x3f]  ;;  %655 = vst.msk [vmem:[%s1926_s1 + $0xf0] sm:$0xff] %vm623_vm0, %v597_v29  ;;  %v543_v38 = vmax.f32 %v939_v33, %v995_v34  ;;  %v829_v43 = vld [vmem:[%s1925_s0 + $0x440] ss:$2 sm:$0xff] }
  0x44   :  { %v598_v37 = vmax.f32 %v486_v28, %v542_v30  ;;  %v884_v39 = vld [vmem:[%s1925_s0 + $0x411] ss:$2 sm:$0x3f]  ;;  %v940_v40 = vld [vmem:[%s1925_s0 + $0x430] ss:$2 sm:$0x3f] }
  0x45   :  { %v996_v41 = vld [vmem:[%s1925_s0 + $0x431] ss:$2 sm:$0x3f]  ;;  %v488_v42 = vmax.f32 %v828_v36, %v884_v39  ;;  %v599_v44 = vmax.f32 %v487_v35, %v543_v38  ;;  %v885_v46 = vld [vmem:[%s1925_s0 + $0x441] ss:$2 sm:$0xff] }
  0x46   :  { %656 = vst.msk [vmem:[%s1926_s1 + $0xf8] sm:$0x3f] %vm625_vm1, %v598_v37  ;;  %v544_v45 = vmax.f32 %v940_v40, %v996_v41  ;;  %v941_v47 = vld [vmem:[%s1925_s0 + $0x460] ss:$2 sm:$0xff]  ;;  %v997_v48 = vld [vmem:[%s1925_s0 + $0x461] ss:$2 sm:$0xff]  ;;  %v489_v49 = vmax.f32 %v829_v43, %v885_v46 }
  0x47   :  { %v545_v50 = vmax.f32 %v941_v47, %v997_v48  ;;  %v830_v51 = vld [vmem:[%s1925_s0 + $0x450] ss:$2 sm:$0x3f]  ;;  %v886_v52 = vld [vmem:[%s1925_s0 + $0x451] ss:$2 sm:$0x3f] }
  0x48   :  { %657 = vst.msk [vmem:[%s1926_s1 + $0x100] sm:$0xff] %vm623_vm0, %v599_v44  ;;  %v600_v53 = vmax.f32 %v488_v42, %v544_v45  ;;  %v942_v54 = vld [vmem:[%s1925_s0 + $0x470] ss:$2 sm:$0x3f]  ;;  %v490_v56 = vmax.f32 %v830_v51, %v886_v52  ;;  %v831_v59 = vld [vmem:[%s1925_s0 + $0x480] ss:$2 sm:$0xff] }
  0x49   :  { %v998_v55 = vld [vmem:[%s1925_s0 + $0x471] ss:$2 sm:$0x3f]  ;;  %v601_v57 = vmax.f32 %v489_v49, %v545_v50  ;;  %v887_v60 = vld [vmem:[%s1925_s0 + $0x481] ss:$2 sm:$0xff] }
  0x4a   :  { %v546_v58 = vmax.f32 %v942_v54, %v998_v55  ;;  %v943_v61 = vld [vmem:[%s1925_s0 + $0x4a0] ss:$2 sm:$0xff]  ;;  %658 = vst.msk [vmem:[%s1926_s1 + $0x108] sm:$0x3f] %vm625_vm1, %v600_v53  ;;  %v999_v62 = vld [vmem:[%s1925_s0 + $0x4a1] ss:$2 sm:$0xff]  ;;  %v491_v63 = vmax.f32 %v831_v59, %v887_v60 }
  0x4b   :  { %v832_v0 = vld [vmem:[%s1925_s0 + $0x490] ss:$2 sm:$0x3f]  ;;  %659 = vst.msk [vmem:[%s1926_s1 + $0x110] sm:$0xff] %vm623_vm0, %v601_v57  ;;  %v547_v2 = vmax.f32 %v943_v61, %v999_v62  ;;  %v833_v7 = vld [vmem:[%s1925_s0 + $0x4c0] ss:$2 sm:$0xff] }
  0x4c   :  { %v602_v1 = vmax.f32 %v490_v56, %v546_v58  ;;  %v888_v3 = vld [vmem:[%s1925_s0 + $0x491] ss:$2 sm:$0x3f]  ;;  %v944_v4 = vld [vmem:[%s1925_s0 + $0x4b0] ss:$2 sm:$0x3f] }
  0x4d   :  { %v1000_v5 = vld [vmem:[%s1925_s0 + $0x4b1] ss:$2 sm:$0x3f]  ;;  %v492_v6 = vmax.f32 %v832_v0, %v888_v3  ;;  %v603_v8 = vmax.f32 %v491_v63, %v547_v2  ;;  %v889_v10 = vld [vmem:[%s1925_s0 + $0x4c1] ss:$2 sm:$0xff] }
  0x4e   :  { %660 = vst.msk [vmem:[%s1926_s1 + $0x118] sm:$0x3f] %vm625_vm1, %v602_v1  ;;  %v548_v9 = vmax.f32 %v944_v4, %v1000_v5  ;;  %v945_v11 = vld [vmem:[%s1925_s0 + $0x4e0] ss:$2 sm:$0xff]  ;;  %v1001_v12 = vld [vmem:[%s1925_s0 + $0x4e1] ss:$2 sm:$0xff]  ;;  %v493_v13 = vmax.f32 %v833_v7, %v889_v10 }
  0x4f   :  { %v549_v14 = vmax.f32 %v945_v11, %v1001_v12  ;;  %v834_v15 = vld [vmem:[%s1925_s0 + $0x4d0] ss:$2 sm:$0x3f]  ;;  %v890_v16 = vld [vmem:[%s1925_s0 + $0x4d1] ss:$2 sm:$0x3f] }
  0x50   :  { %661 = vst.msk [vmem:[%s1926_s1 + $0x120] sm:$0xff] %vm623_vm0, %v603_v8  ;;  %v604_v17 = vmax.f32 %v492_v6, %v548_v9  ;;  %v946_v18 = vld [vmem:[%s1925_s0 + $0x4f0] ss:$2 sm:$0x3f]  ;;  %v494_v20 = vmax.f32 %v834_v15, %v890_v16  ;;  %v835_v23 = vld [vmem:[%s1925_s0 + $0x500] ss:$2 sm:$0xff] }
  0x51   :  { %v1002_v19 = vld [vmem:[%s1925_s0 + $0x4f1] ss:$2 sm:$0x3f]  ;;  %v605_v21 = vmax.f32 %v493_v13, %v549_v14  ;;  %v891_v24 = vld [vmem:[%s1925_s0 + $0x501] ss:$2 sm:$0xff] }
  0x52   :  { %v550_v22 = vmax.f32 %v946_v18, %v1002_v19  ;;  %v947_v25 = vld [vmem:[%s1925_s0 + $0x520] ss:$2 sm:$0xff]  ;;  %662 = vst.msk [vmem:[%s1926_s1 + $0x128] sm:$0x3f] %vm625_vm1, %v604_v17  ;;  %v1003_v26 = vld [vmem:[%s1925_s0 + $0x521] ss:$2 sm:$0xff]  ;;  %v495_v27 = vmax.f32 %v835_v23, %v891_v24 }
  0x53   :  { %v836_v28 = vld [vmem:[%s1925_s0 + $0x510] ss:$2 sm:$0x3f]  ;;  %663 = vst.msk [vmem:[%s1926_s1 + $0x130] sm:$0xff] %vm623_vm0, %v605_v21  ;;  %v551_v30 = vmax.f32 %v947_v25, %v1003_v26  ;;  %v837_v35 = vld [vmem:[%s1925_s0 + $0x540] ss:$2 sm:$0xff] }
  0x54   :  { %v606_v29 = vmax.f32 %v494_v20, %v550_v22  ;;  %v892_v31 = vld [vmem:[%s1925_s0 + $0x511] ss:$2 sm:$0x3f]  ;;  %v948_v32 = vld [vmem:[%s1925_s0 + $0x530] ss:$2 sm:$0x3f] }
  0x55   :  { %v1004_v33 = vld [vmem:[%s1925_s0 + $0x531] ss:$2 sm:$0x3f]  ;;  %v496_v34 = vmax.f32 %v836_v28, %v892_v31  ;;  %v607_v36 = vmax.f32 %v495_v27, %v551_v30  ;;  %v893_v38 = vld [vmem:[%s1925_s0 + $0x541] ss:$2 sm:$0xff] }
  0x56   :  { %664 = vst.msk [vmem:[%s1926_s1 + $0x138] sm:$0x3f] %vm625_vm1, %v606_v29  ;;  %v552_v37 = vmax.f32 %v948_v32, %v1004_v33  ;;  %v949_v39 = vld [vmem:[%s1925_s0 + $0x560] ss:$2 sm:$0xff]  ;;  %v1005_v40 = vld [vmem:[%s1925_s0 + $0x561] ss:$2 sm:$0xff]  ;;  %v497_v41 = vmax.f32 %v837_v35, %v893_v38 }
  0x57   :  { %v553_v42 = vmax.f32 %v949_v39, %v1005_v40  ;;  %v838_v43 = vld [vmem:[%s1925_s0 + $0x550] ss:$2 sm:$0x3f]  ;;  %v894_v44 = vld [vmem:[%s1925_s0 + $0x551] ss:$2 sm:$0x3f] }
  0x58   :  { %665 = vst.msk [vmem:[%s1926_s1 + $0x140] sm:$0xff] %vm623_vm0, %v607_v36  ;;  %v608_v45 = vmax.f32 %v496_v34, %v552_v37  ;;  %v950_v46 = vld [vmem:[%s1925_s0 + $0x570] ss:$2 sm:$0x3f]  ;;  %v498_v48 = vmax.f32 %v838_v43, %v894_v44  ;;  %v839_v51 = vld [vmem:[%s1925_s0 + $0x580] ss:$2 sm:$0xff] }
  0x59   :  { %v1006_v47 = vld [vmem:[%s1925_s0 + $0x571] ss:$2 sm:$0x3f]  ;;  %v609_v49 = vmax.f32 %v497_v41, %v553_v42  ;;  %v895_v52 = vld [vmem:[%s1925_s0 + $0x581] ss:$2 sm:$0xff] }
  0x5a   :  { %v554_v50 = vmax.f32 %v950_v46, %v1006_v47  ;;  %v951_v53 = vld [vmem:[%s1925_s0 + $0x5a0] ss:$2 sm:$0xff]  ;;  %666 = vst.msk [vmem:[%s1926_s1 + $0x148] sm:$0x3f] %vm625_vm1, %v608_v45  ;;  %v1007_v54 = vld [vmem:[%s1925_s0 + $0x5a1] ss:$2 sm:$0xff]  ;;  %v499_v55 = vmax.f32 %v839_v51, %v895_v52 }
  0x5b   :  { %v840_v56 = vld [vmem:[%s1925_s0 + $0x590] ss:$2 sm:$0x3f]  ;;  %667 = vst.msk [vmem:[%s1926_s1 + $0x150] sm:$0xff] %vm623_vm0, %v609_v49  ;;  %v555_v58 = vmax.f32 %v951_v53, %v1007_v54  ;;  %v841_v63 = vld [vmem:[%s1925_s0 + $0x5c0] ss:$2 sm:$0xff] }
  0x5c   :  { %v610_v57 = vmax.f32 %v498_v48, %v554_v50  ;;  %v896_v59 = vld [vmem:[%s1925_s0 + $0x591] ss:$2 sm:$0x3f]  ;;  %v952_v60 = vld [vmem:[%s1925_s0 + $0x5b0] ss:$2 sm:$0x3f] }
  0x5d   :  { %v1008_v61 = vld [vmem:[%s1925_s0 + $0x5b1] ss:$2 sm:$0x3f]  ;;  %v500_v62 = vmax.f32 %v840_v56, %v896_v59  ;;  %v611_v0 = vmax.f32 %v499_v55, %v555_v58  ;;  %v897_v2 = vld [vmem:[%s1925_s0 + $0x5c1] ss:$2 sm:$0xff] }
  0x5e   :  { %668 = vst.msk [vmem:[%s1926_s1 + $0x158] sm:$0x3f] %vm625_vm1, %v610_v57  ;;  %v556_v1 = vmax.f32 %v952_v60, %v1008_v61  ;;  %v953_v3 = vld [vmem:[%s1925_s0 + $0x5e0] ss:$2 sm:$0xff]  ;;  %v1009_v4 = vld [vmem:[%s1925_s0 + $0x5e1] ss:$2 sm:$0xff]  ;;  %v501_v5 = vmax.f32 %v841_v63, %v897_v2 }
  0x5f   :  { %v557_v6 = vmax.f32 %v953_v3, %v1009_v4  ;;  %v842_v7 = vld [vmem:[%s1925_s0 + $0x5d0] ss:$2 sm:$0x3f]  ;;  %v898_v8 = vld [vmem:[%s1925_s0 + $0x5d1] ss:$2 sm:$0x3f] }
  0x60   :  { %669 = vst.msk [vmem:[%s1926_s1 + $0x160] sm:$0xff] %vm623_vm0, %v611_v0  ;;  %v612_v9 = vmax.f32 %v500_v62, %v556_v1  ;;  %v954_v10 = vld [vmem:[%s1925_s0 + $0x5f0] ss:$2 sm:$0x3f]  ;;  %v502_v12 = vmax.f32 %v842_v7, %v898_v8  ;;  %v843_v15 = vld [vmem:[%s1925_s0 + $0x600] ss:$2 sm:$0xff] }
  0x61   :  { %v1010_v11 = vld [vmem:[%s1925_s0 + $0x5f1] ss:$2 sm:$0x3f]  ;;  %v613_v13 = vmax.f32 %v501_v5, %v557_v6  ;;  %v899_v16 = vld [vmem:[%s1925_s0 + $0x601] ss:$2 sm:$0xff] }
  0x62   :  { %v558_v14 = vmax.f32 %v954_v10, %v1010_v11  ;;  %v955_v17 = vld [vmem:[%s1925_s0 + $0x620] ss:$2 sm:$0xff]  ;;  %670 = vst.msk [vmem:[%s1926_s1 + $0x168] sm:$0x3f] %vm625_vm1, %v612_v9  ;;  %v1011_v18 = vld [vmem:[%s1925_s0 + $0x621] ss:$2 sm:$0xff]  ;;  %v503_v19 = vmax.f32 %v843_v15, %v899_v16 }
  0x63   :  { %v844_v20 = vld [vmem:[%s1925_s0 + $0x610] ss:$2 sm:$0x3f]  ;;  %671 = vst.msk [vmem:[%s1926_s1 + $0x170] sm:$0xff] %vm623_vm0, %v613_v13  ;;  %v559_v22 = vmax.f32 %v955_v17, %v1011_v18  ;;  %v845_v27 = vld [vmem:[%s1925_s0 + $0x640] ss:$2 sm:$0xff] }
  0x64   :  { %v614_v21 = vmax.f32 %v502_v12, %v558_v14  ;;  %v900_v23 = vld [vmem:[%s1925_s0 + $0x611] ss:$2 sm:$0x3f]  ;;  %v956_v24 = vld [vmem:[%s1925_s0 + $0x630] ss:$2 sm:$0x3f] }
  0x65   :  { %v1012_v25 = vld [vmem:[%s1925_s0 + $0x631] ss:$2 sm:$0x3f]  ;;  %v504_v26 = vmax.f32 %v844_v20, %v900_v23  ;;  %v615_v28 = vmax.f32 %v503_v19, %v559_v22  ;;  %v901_v30 = vld [vmem:[%s1925_s0 + $0x641] ss:$2 sm:$0xff] }
  0x66   :  { %672 = vst.msk [vmem:[%s1926_s1 + $0x178] sm:$0x3f] %vm625_vm1, %v614_v21  ;;  %v560_v29 = vmax.f32 %v956_v24, %v1012_v25  ;;  %v957_v31 = vld [vmem:[%s1925_s0 + $0x660] ss:$2 sm:$0xff]  ;;  %v1013_v32 = vld [vmem:[%s1925_s0 + $0x661] ss:$2 sm:$0xff]  ;;  %v505_v33 = vmax.f32 %v845_v27, %v901_v30 }
  0x67   :  { %v561_v34 = vmax.f32 %v957_v31, %v1013_v32  ;;  %v846_v35 = vld [vmem:[%s1925_s0 + $0x650] ss:$2 sm:$0x3f]  ;;  %v902_v36 = vld [vmem:[%s1925_s0 + $0x651] ss:$2 sm:$0x3f] }
  0x68   :  { %673 = vst.msk [vmem:[%s1926_s1 + $0x180] sm:$0xff] %vm623_vm0, %v615_v28  ;;  %v616_v37 = vmax.f32 %v504_v26, %v560_v29  ;;  %v958_v38 = vld [vmem:[%s1925_s0 + $0x670] ss:$2 sm:$0x3f]  ;;  %v506_v40 = vmax.f32 %v846_v35, %v902_v36  ;;  %v847_v43 = vld [vmem:[%s1925_s0 + $0x680] ss:$2 sm:$0xff] }
  0x69   :  { %v1014_v39 = vld [vmem:[%s1925_s0 + $0x671] ss:$2 sm:$0x3f]  ;;  %v617_v41 = vmax.f32 %v505_v33, %v561_v34  ;;  %v903_v44 = vld [vmem:[%s1925_s0 + $0x681] ss:$2 sm:$0xff] }
  0x6a   :  { %v562_v42 = vmax.f32 %v958_v38, %v1014_v39  ;;  %v959_v45 = vld [vmem:[%s1925_s0 + $0x6a0] ss:$2 sm:$0xff]  ;;  %674 = vst.msk [vmem:[%s1926_s1 + $0x188] sm:$0x3f] %vm625_vm1, %v616_v37  ;;  %v1015_v46 = vld [vmem:[%s1925_s0 + $0x6a1] ss:$2 sm:$0xff]  ;;  %v507_v47 = vmax.f32 %v847_v43, %v903_v44 }
  0x6b   :  { %v848_v48 = vld [vmem:[%s1925_s0 + $0x690] ss:$2 sm:$0x3f]  ;;  %675 = vst.msk [vmem:[%s1926_s1 + $0x190] sm:$0xff] %vm623_vm0, %v617_v41  ;;  %v563_v50 = vmax.f32 %v959_v45, %v1015_v46  ;;  %v849_v55 = vld [vmem:[%s1925_s0 + $0x6c0] ss:$2 sm:$0xff] }
  0x6c   :  { %v618_v49 = vmax.f32 %v506_v40, %v562_v42  ;;  %v904_v51 = vld [vmem:[%s1925_s0 + $0x691] ss:$2 sm:$0x3f]  ;;  %v960_v52 = vld [vmem:[%s1925_s0 + $0x6b0] ss:$2 sm:$0x3f] }
  0x6d   :  { %v1016_v53 = vld [vmem:[%s1925_s0 + $0x6b1] ss:$2 sm:$0x3f]  ;;  %v508_v54 = vmax.f32 %v848_v48, %v904_v51  ;;  %v619_v56 = vmax.f32 %v507_v47, %v563_v50  ;;  %v905_v58 = vld [vmem:[%s1925_s0 + $0x6c1] ss:$2 sm:$0xff] }
  0x6e   :  { %676 = vst.msk [vmem:[%s1926_s1 + $0x198] sm:$0x3f] %vm625_vm1, %v618_v49  ;;  %v564_v57 = vmax.f32 %v960_v52, %v1016_v53  ;;  %v961_v59 = vld [vmem:[%s1925_s0 + $0x6e0] ss:$2 sm:$0xff]  ;;  %v1017_v60 = vld [vmem:[%s1925_s0 + $0x6e1] ss:$2 sm:$0xff]  ;;  %v509_v61 = vmax.f32 %v849_v55, %v905_v58 }
  0x6f   :  { %v565_v62 = vmax.f32 %v961_v59, %v1017_v60  ;;  %v850_v63 = vld [vmem:[%s1925_s0 + $0x6d0] ss:$2 sm:$0x3f]  ;;  %v906_v0 = vld [vmem:[%s1925_s0 + $0x6d1] ss:$2 sm:$0x3f] }
  0x70   :  { %677 = vst.msk [vmem:[%s1926_s1 + $0x1a0] sm:$0xff] %vm623_vm0, %v619_v56  ;;  %v620_v1 = vmax.f32 %v508_v54, %v564_v57  ;;  %v962_v2 = vld [vmem:[%s1925_s0 + $0x6f0] ss:$2 sm:$0x3f]  ;;  %v510_v4 = vmax.f32 %v850_v63, %v906_v0 }
  0x71   :  { %v1018_v3 = vld [vmem:[%s1925_s0 + $0x6f1] ss:$2 sm:$0x3f]  ;;  %v621_v5 = vmax.f32 %v509_v61, %v565_v62 }
  0x72   :  { %v566_v6 = vmax.f32 %v962_v2, %v1018_v3  ;;  %678 = vst.msk [vmem:[%s1926_s1 + $0x1a8] sm:$0x3f] %vm625_vm1, %v620_v1 }
  0x73   :  { %679 = vst.msk [vmem:[%s1926_s1 + $0x1b0] sm:$0xff] %vm623_vm0, %v621_v5 }
  0x74   :  { %v622_v7 = vmax.f32 %v510_v4, %v566_v6 }
  0x76   :  { %680 = vst.msk [vmem:[%s1926_s1 + $0x1b8] sm:$0x3f] %vm625_vm1, %v622_v7 }

// kernel: forward.7
= control target key start
LH: loop header
LB: loop body
LE: loop exit
PB: predicated region body
PF: predicated region fallthrough
CT: control target
= control target key end

     0   :  { %s2930_s12 = smov 0   ;;  %s3541_s0 = inlined_call_operand.vmem [shape: bf16[512,800], index: 0, kind: input, shape index: {}]   ;;  %s3542_s1 = inlined_call_operand.vmem [shape: bf16[800,64], index: 1, kind: input, shape index: {}]   ;;  %s3543_s2 = inlined_call_operand.vmem [shape: f32[1,64], index: 2, kind: input, shape index: {}]   ;;  %s3544_s3 = inlined_call_operand.vmem [shape: f32[512,64], index: 3, kind: output, shape index: {}]  }
   0x1 LB: > { %s2087_s13 = sadd.s32 4294967295, %s2908_s12   ;;  %p2091_p0 = scmp.ge.s32.totalorder %s2908_s12, 1  ;;  %s2908_s12 = sphi %s2930_s12, %s13_s12  }
   0x2   : > { %p139_p1 = scmp.lt.s32.totalorder %s2908_s12, 3 }
   0x4   : > { %p140_p2 = pnand %p2091_p0, %p139_p1 }
   0x5   : > { %v2692_v0 = vld [vmem:[%s3542_s1 + $0x40] sm:$0xff] (!%p140_p2)   ;;  %s2092_s16 = sshll.u32 (!%p140_p2), %s2087_s13, 5  ;;  %v2694_v2 = vld [vmem:[%s3542_s1 + $0x48] sm:$0xff] (!%p140_p2)   ;;  %v2696_v4 = vld [vmem:[%s3542_s1 + $0x50] sm:$0xff] (!%p140_p2)   ;;  %vm1273_vm0 = vcmask (!%p140_p2), 261120   ;;  %vm1998_vm1 = vcmask (!%p140_p2), 523264  }
   0x6   : > { %143 = sbr.rel (%p140_p2) target bundleno = 478 (0x1de), region = 32  ;;  %v2693_v1 = vld [vmem:[%s3542_s1] sm:$0xff] (!%p140_p2)   ;;  %2277 = vmatprep.subr.bf16.mxu0 (!%p140_p2), %v2692_v0  ;;  %2667 = vmatprep.subr.bf16.mxu1 (!%p140_p2), %v2692_v0  ;;  %p165_p3 = scmp.lt.s32.totalorder (!%p140_p2), %s2092_s16, 63  ;;  %v2695_v3 = vld [vmem:[%s3542_s1 + $0x8] sm:$0xff] (!%p140_p2)   ;;  %v2697_v5 = vld [vmem:[%s3542_s1 + $0x10] sm:$0xff] (!%p140_p2)  }
   0x7   : > { %2278 = vmatpush3.bf16.msra.mxu0 (!%p140_p2), %v2693_v1  ;;  %2675 = vmatpush3.bf16.msra.mxu1 (!%p140_p2), %v2693_v1  ;;  %v2698_v6 = vld [vmem:[%s3542_s1 + $0x58] sm:$0xff] (!%p140_p2)   ;;  %v2700_v8 = vld [vmem:[%s3542_s1 + $0x60] sm:$0xff] (!%p140_p2)   ;;  %v2702_v10 = vld [vmem:[%s3542_s1 + $0x68] sm:$0xff] (!%p140_p2)  }
   0x8   : > { %2279 = vmatprep.subr.bf16.mxu0 (!%p140_p2), %v2694_v2  ;;  %2668 = vmatprep.subr.bf16.mxu1 (!%p140_p2), %v2694_v2  ;;  %v2699_v7 = vld [vmem:[%s3542_s1 + $0x18] sm:$0xff] (!%p140_p2)   ;;  %v2701_v9 = vld [vmem:[%s3542_s1 + $0x20] sm:$0xff] (!%p140_p2)   ;;  %v2703_v13 = vld [vmem:[%s3542_s1 + $0x28] sm:$0xff] (!%p140_p2)  }
   0x9   : > { %v2704_v14 = vld [vmem:[%s3542_s1 + $0x70] sm:$0xff] (!%p140_p2)   ;;  %v2706_v16 = vld [vmem:[%s3542_s1 + $0x78] sm:$0xff] (!%p140_p2)   ;;  %v2714_v18 = vld [vmem:[%s3542_s1 + $0xc0] sm:$0xff] (!%p140_p2)  }
   0xa   : > { %v2705_v15 = vld [vmem:[%s3542_s1 + $0x30] sm:$0xff] (!%p140_p2)   ;;  %v2707_v17 = vld [vmem:[%s3542_s1 + $0x38] sm:$0xff] (!%p140_p2)   ;;  %v2715_v21 = vld [vmem:[%s3542_s1 + $0x140] sm:$0xff] (!%p140_p2)  }
   0xb   : > { %2280 = vmatpush3.bf16.msra.mxu0 (!%p140_p2), %v2695_v3  ;;  %2676 = vmatpush3.bf16.msra.mxu1 (!%p140_p2), %v2695_v3  ;;  %v2716_v22 = vld [vmem:[%s3542_s1 + $0x80] sm:$0xff] (!%p140_p2)   ;;  %v2718_v24 = vld [vmem:[%s3542_s1 + $0xc8] sm:$0xff] (!%p140_p2)   ;;  %v2726_v32 = vld [vmem:[%s3542_s1 + $0xd0] sm:$0xff] (!%p140_p2)  }
   0xc   : > { %2281 = vmatprep.subr.bf16.mxu0 (!%p140_p2), %v2696_v4  ;;  %2669 = vmatprep.subr.bf16.mxu1 (!%p140_p2), %v2696_v4  ;;  %v2717_v23 = vld [vmem:[%s3542_s1 + $0x100] sm:$0xff] (!%p140_p2)   ;;  %v2729_v27 = vld [vmem:[%s3542_s1 + $0x148] sm:$0xff] (!%p140_p2)   ;;  %v2727_v33 = vld [vmem:[%s3542_s1 + $0x90] sm:$0xff] (!%p140_p2)  }
   0xd   : > { %s3546_s16 = smov (!%p165_p3, %s2092_s16), 63  ;;  %v2719_v28 = vld [vmem:[%s3542_s1 + $0x88] sm:$0xff]   ;;  %v2728_v34 = vld [vmem:[%s3542_s1 + $0xd8] sm:$0xff]   ;;  %v2738_v38 = vld [vmem:[%s3542_s1 + $0xe0] sm:$0xff]  }
   0xe   : > { %s2683_s29 = smul.u32 28, %s3546_s16  ;;  %v2731_v29 = vld [vmem:[%s3542_s1 + $0x108] sm:$0xff]   ;;  %v2730_v37 = vld [vmem:[%s3542_s1 + $0x98] sm:$0xff]   ;;  %v2749_v41 = vld [vmem:[%s3542_s1 + $0x150] sm:$0xff]   ;;  %s2095_s23 = sshll.u32 %s3546_s16, 3 }
   0xf   : > { %2282 = vmatpush3.bf16.msra.mxu0 %v2697_v5  ;;  %2677 = vmatpush3.bf16.msra.mxu1 %v2697_v5  ;;  %v2739_v42 = vld [vmem:[%s3542_s1 + $0xa0] sm:$0xff]   ;;  %v2740_v43 = vld [vmem:[%s3542_s1 + $0xe8] sm:$0xff]   ;;  %v2751_v44 = vld [vmem:[%s3542_s1 + $0x110] sm:$0xff]   ;;  %s3432_s26 = scalar_lea.vmem %s3544_s3, %s2095_s23 }
  0x10   : > { %2283 = vmatprep.subr.bf16.mxu0 %v2698_v6  ;;  %2670 = vmatprep.subr.bf16.mxu1 %v2698_v6  ;;  %s2971_s9 = scalar_lea.vmem %s3541_s0, %s2683_s29  ;;  %v2741_v47 = vld [vmem:[%s3542_s1 + $0xa8] sm:$0xff]   ;;  %v2748_v48 = vld [vmem:[%s3542_s1 + $0xf0] sm:$0xff]   ;;  %v2760_v51 = vld [vmem:[%s3542_s1 + $0x158] sm:$0xff]  }
  0x11   : > { %v2710_v11 = vld [vmem:[%s2971_s9 + $0x4] ss:$28 sps:$4 sm:$0xff]   ;;  %v2720_v25 = vld [vmem:[%s2971_s9 + $0x3c] ss:$28 sps:$4 sm:$0xff]   ;;  %v2732_v35 = vld [vmem:[%s2971_s9 + $0x74] ss:$28 sps:$4 sm:$0xff]  }
  0x12   : > { %v2713_v12 = vld [vmem:[%s2971_s9 + $0x2a4] ss:$28 sps:$4 sm:$0xff]   ;;  %1354 = vmatprep.mubr.bf16.mxu0 %v2710_v11  ;;  %v2722_v26 = vld [vmem:[%s2971_s9 + $0x2dc] ss:$28 sps:$4 sm:$0xff]   ;;  %v2734_v36 = vld [vmem:[%s2971_s9 + $0x314] ss:$28 sps:$4 sm:$0xff]  }
  0x13   : > { %2284 = vmatpush3.bf16.msra.mxu0 %v2699_v7  ;;  %2678 = vmatpush3.bf16.msra.mxu1 %v2699_v7  ;;  %v2708_v19 = vld [vmem:[%s2971_s9] ss:$28 sps:$4 sm:$0xff]   ;;  %v2724_v30 = vld [vmem:[%s2971_s9 + $0x38] ss:$28 sps:$4 sm:$0xff]   ;;  %v2736_v39 = vld [vmem:[%s2971_s9 + $0x70] ss:$28 sps:$4 sm:$0xff]  }
  0x14   : > { %2285 = vmatprep.subr.bf16.mxu0 %v2700_v8  ;;  %2671 = vmatprep.subr.bf16.mxu1 %v2700_v8  ;;  %v2711_v20 = vld [vmem:[%s2971_s9 + $0x2a0] ss:$28 sps:$4 sm:$0xff]   ;;  %v2725_v31 = vld [vmem:[%s2971_s9 + $0x2d8] ss:$28 sps:$4 sm:$0xff]   ;;  %v2737_v40 = vld [vmem:[%s2971_s9 + $0x310] ss:$28 sps:$4 sm:$0xff]  }
  0x15   : > { %1450 = vmatprep.mubr.bf16.mxu1 %v2713_v12  ;;  %v2742_v45 = vld [vmem:[%s2971_s9 + $0xac] ss:$28 sps:$4 sm:$0xff]   ;;  %v2750_v52 = vld [vmem:[%s3542_s1 + $0xb0] sm:$0xff]   ;;  %v2762_v53 = vld [vmem:[%s3542_s1 + $0x118] sm:$0xff]  }
  0x16   : > { %v2744_v46 = vld [vmem:[%s2971_s9 + $0x34c] ss:$28 sps:$4 sm:$0xff]   ;;  %v2754_v54 = vld [vmem:[%s2971_s9 + $0xe4] ss:$28 sps:$4 sm:$0xff]   ;;  %v2752_v55 = vld [vmem:[%s3542_s1 + $0xf8] sm:$0xff]  }
  0x17   : > { %2286 = vmatpush3.bf16.msra.mxu0 %v2701_v9  ;;  %2679 = vmatpush3.bf16.msra.mxu1 %v2701_v9  ;;  %v2746_v49 = vld [vmem:[%s2971_s9 + $0xa8] ss:$28 sps:$4 sm:$0xff]   ;;  %v2753_v57 = vld [vmem:[%s3542_s1 + $0xb8] sm:$0xff]   ;;  %v2769_v5 = vld [vmem:[%s2971_s9 + $0x154] ss:$28 sps:$4 sm:$0xff]  }
  0x18   : > { %2287 = vmatprep.subr.bf16.mxu0 %v2702_v10  ;;  %2672 = vmatprep.subr.bf16.mxu1 %v2702_v10  ;;  %v2747_v50 = vld [vmem:[%s2971_s9 + $0x348] ss:$28 sps:$4 sm:$0xff]   ;;  %v2759_v62 = vld [vmem:[%s2971_s9 + $0xe0] ss:$28 sps:$4 sm:$0xff]   ;;  %v2767_v3 = vld [vmem:[%s2971_s9 + $0x118] ss:$28 sps:$4 sm:$0xff]  }
  0x19   : > { %v2758_v56 = vld [vmem:[%s2971_s9 + $0xc] ss:$28 sps:$4 sm:$0xff]   ;;  %v2761_v58 = vld [vmem:[%s3542_s1 + $0x180] sm:$0xff]   ;;  %v2763_v63 = vld [vmem:[%s2971_s9 + $0x11c] ss:$28 sps:$4 sm:$0xff]  }
  0x1a   : > { %v2756_v59 = vld [vmem:[%s2971_s9 + $0x8] ss:$28 sps:$4 sm:$0xff]   ;;  %v2768_v4 = vld [vmem:[%s2971_s9 + $0x40] ss:$28 sps:$4 sm:$0xff]   ;;  %v2797_v7 = vld [vmem:[%s3542_s1 + $0x170] sm:$0xff]  }
  0x1b   : > { %2288 = vmatpush3.bf16.msra.mxu0 %v2703_v13  ;;  %2680 = vmatpush3.bf16.msra.mxu1 %v2703_v13  ;;  %v2775_v60 = vld [vmem:[%s3542_s1 + $0x160] sm:$0xff]   ;;  %v2783_v1 = vld [vmem:[%s3542_s1 + $0x168] sm:$0xff]   ;;  %v2771_v6 = vld [vmem:[%s2971_s9 + $0x7c] ss:$28 sps:$4 sm:$0xff]  }
  0x1c   : > { %2289 = vmatprep.subr.bf16.mxu0 %v2704_v14  ;;  %2673 = vmatprep.subr.bf16.mxu1 %v2704_v14  ;;  %v2776_v61 = vld [vmem:[%s3542_s1 + $0x120] sm:$0xff]   ;;  %v2784_v2 = vld [vmem:[%s3542_s1 + $0x128] sm:$0xff]   ;;  %v2798_v8 = vld [vmem:[%s3542_s1 + $0x130] sm:$0xff]  }
  0x1d   : > { %v2765_v0 = vld [vmem:[%s2971_s9 + $0x44] ss:$28 sps:$4 sm:$0xff]   ;;  %v2773_v9 = vld [vmem:[%s2971_s9 + $0x150] ss:$28 sps:$4 sm:$0xff]   ;;  %v2774_v10 = vld [vmem:[%s2971_s9 + $0x78] ss:$28 sps:$4 sm:$0xff]  }
  0x1e   : > { %v2777_v11 = vld [vmem:[%s2971_s9 + $0x18c] ss:$28 sps:$4 sm:$0xff]   ;;  %v2805_v12 = vld [vmem:[%s3542_s1 + $0x178] sm:$0xff]   ;;  %v2779_v14 = vld [vmem:[%s2971_s9 + $0xb4] ss:$28 sps:$4 sm:$0xff]  }
  0x1f   : > { %2290 = vmatpush3.bf16.msra.mxu0 %v2705_v15  ;;  %2681 = vmatpush3.bf16.msra.mxu1 %v2705_v15  ;;  %v2806_v13 = vld [vmem:[%s3542_s1 + $0x138] sm:$0xff]   ;;  %v2819_v15 = vld [vmem:[%s3542_s1 + $0x188] sm:$0xff]  }
  0x20   : > { %2291 = vmatprep.subr.bf16.mxu0 %v2706_v16  ;;  %2674 = vmatprep.subr.bf16.mxu1 %v2706_v16  ;;  %v2781_v16 = vld [vmem:[%s2971_s9 + $0x188] ss:$28 sps:$4 sm:$0xff]  }
  0x23   : > { %2292 = vmatpush3.bf16.msra.mxu0 %v2707_v17  ;;  %2682 = vmatpush3.bf16.msra.mxu1 %v2707_v17  ;;  %v2782_v17 = vld [vmem:[%s2971_s9 + $0xb0] ss:$28 sps:$4 sm:$0xff]  }
  0x24   : > { %2389 = vmatprep.subr.bf16.mxu1 %v2714_v18  ;;  %2501 = vmatprep.subr.bf16.mxu0 %v2715_v21  ;;  %v2785_v18 = vld [vmem:[%s2971_s9 + $0x1c4] ss:$28 sps:$4 sm:$0xff]  }
  0x25   : > { %v2790_v21 = vld [vmem:[%s2971_s9 + $0xe8] ss:$28 sps:$4 sm:$0xff]  }
  0x26   : > { %1355 = vmatmul.mubr.bf16.vlgmr.msra.gmra.mrb[0].mxu0 %v2708_v19  ;;  %1451 = vmatmul.mubr.bf16.vlgmr.msra.gmra.mrb[0].mxu1 %v2711_v20  ;;  %v2787_v19 = vld [vmem:[%s2971_s9 + $0xec] ss:$28 sps:$4 sm:$0xff]   ;;  %v2789_v20 = vld [vmem:[%s2971_s9 + $0x1c0] ss:$28 sps:$4 sm:$0xff]  }
  0x27   : > { %2390 = vmatpush3.bf16.msra.mxu1 %v2716_v22  ;;  %2502 = vmatpush3.bf16.msra.mxu0 %v2717_v23  ;;  %v2791_v22 = vld [vmem:[%s2971_s9 + $0x1fc] ss:$28 sps:$4 sm:$0xff]   ;;  %v2793_v23 = vld [vmem:[%s2971_s9 + $0x124] ss:$28 sps:$4 sm:$0xff]  }
  0x28   : > { %2391 = vmatprep.subr.bf16.mxu1 %v2718_v24  ;;  %1362 = vmatprep.mubr.bf16.mxu0 %v2720_v25  ;;  %v2795_v24 = vld [vmem:[%s2971_s9 + $0x1f8] ss:$28 sps:$4 sm:$0xff]   ;;  %v2796_v25 = vld [vmem:[%s2971_s9 + $0x120] ss:$28 sps:$4 sm:$0xff]  }
  0x29   : > { %1458 = vmatprep.mubr.bf16.mxu1 %v2722_v26  ;;  %2503 = vmatprep.subr.bf16.mxu0 %v2729_v27  ;;  %v2799_v26 = vld [vmem:[%s2971_s9 + $0x234] ss:$28 sps:$4 sm:$0xff]   ;;  %v2801_v27 = vld [vmem:[%s2971_s9 + $0x15c] ss:$28 sps:$4 sm:$0xff]  }
  0x2b   : > { %2392 = vmatpush3.bf16.msra.mxu1 %v2719_v28  ;;  %2504 = vmatpush3.bf16.msra.mxu0 %v2731_v29  ;;  %v2803_v28 = vld [vmem:[%s2971_s9 + $0x230] ss:$28 sps:$4 sm:$0xff]   ;;  %v2804_v29 = vld [vmem:[%s2971_s9 + $0x158] ss:$28 sps:$4 sm:$0xff]  }
  0x2c   : > { %2393 = vmatprep.subr.bf16.mxu1 %v2726_v32  ;;  %2505 = vmatprep.subr.bf16.mxu0 %v2749_v41  ;;  %v2811_v32 = vld [vmem:[%s2971_s9 + $0x268] ss:$28 sps:$4 sm:$0xff]  }
  0x2d   : > { %v2825_v41 = vld [vmem:[%s2971_s9 + $0x48] ss:$28 sps:$4 sm:$0xff]  }
  0x2e   : > { %1363 = vmatmul.mubr.bf16.gmra.mrb[4].mxu0 %v2724_v30  ;;  %1459 = vmatmul.mubr.bf16.gmra.mrb[4].mxu1 %v2725_v31  ;;  %v2807_v30 = vld [vmem:[%s2971_s9 + $0x26c] ss:$28 sps:$4 sm:$0xff]   ;;  %v2809_v31 = vld [vmem:[%s2971_s9 + $0x194] ss:$28 sps:$4 sm:$0xff]  }
  0x2f   : > { %2394 = vmatpush3.bf16.msra.mxu1 %v2727_v33  ;;  %1370 = vmatprep.mubr.bf16.mxu0 %v2732_v35  ;;  %v2812_v33 = vld [vmem:[%s2971_s9 + $0x190] ss:$28 sps:$4 sm:$0xff]  }
  0x30   : > { %2395 = vmatprep.subr.bf16.mxu1 %v2728_v34  ;;  %1466 = vmatprep.mubr.bf16.mxu1 %v2734_v36  ;;  %v2813_v34 = vld [vmem:[%s2971_s9 + $0x1cc] ss:$28 sps:$4 sm:$0xff]   ;;  %v2817_v35 = vld [vmem:[%s2971_s9 + $0x14] ss:$28 sps:$4 sm:$0xff]  }
  0x31   : > { %2506 = vmatpush3.bf16.msra.mxu0 %v2751_v44  ;;  %v2815_v36 = vld [vmem:[%s2971_s9 + $0x10] ss:$28 sps:$4 sm:$0xff]   ;;  %v2830_v44 = vld [vmem:[%s2971_s9 + $0x238] ss:$28 sps:$4 sm:$0xff]  }
  0x32   : > { %2507 = vmatprep.subr.bf16.mxu0 %v2760_v51  ;;  %v2840_v51 = vld [vmem:[%s2971_s9 + $0xf4] ss:$28 sps:$4 sm:$0xff]  }
  0x33   : > { %2396 = vmatpush3.bf16.msra.mxu1 %v2730_v37  ;;  %v2818_v37 = vld [vmem:[%s2971_s9 + $0x1c8] ss:$28 sps:$4 sm:$0xff]  }
  0x34   : > { %2397 = vmatprep.subr.bf16.mxu1 %v2738_v38  ;;  %v2820_v38 = vld [vmem:[%s2971_s9 + $0x204] ss:$28 sps:$4 sm:$0xff]  }
  0x35   : > { %2508 = vmatpush3.bf16.msra.mxu0 %v2762_v53  ;;  %v2843_v53 = vld [vmem:[%s2971_s9 + $0xf0] ss:$28 sps:$4 sm:$0xff]  }
  0x36   : > { %1371 = vmatmul.mubr.bf16.gmra.mrb[8].mxu0 %v2736_v39  ;;  %1467 = vmatmul.mubr.bf16.gmra.mrb[8].mxu1 %v2737_v40  ;;  %v2822_v39 = vld [vmem:[%s2971_s9 + $0x4c] ss:$28 sps:$4 sm:$0xff]   ;;  %v2824_v40 = vld [vmem:[%s2971_s9 + $0x200] ss:$28 sps:$4 sm:$0xff]  }
  0x37   : > { %2398 = vmatpush3.bf16.msra.mxu1 %v2739_v42  ;;  %1378 = vmatprep.mubr.bf16.mxu0 %v2742_v45  ;;  %v2826_v42 = vld [vmem:[%s2971_s9 + $0x23c] ss:$28 sps:$4 sm:$0xff]  }
  0x38   : > { %2399 = vmatprep.subr.bf16.mxu1 %v2740_v43  ;;  %1474 = vmatprep.mubr.bf16.mxu1 %v2744_v46  ;;  %v2828_v43 = vld [vmem:[%s2971_s9 + $0x84] ss:$28 sps:$4 sm:$0xff]   ;;  %v2832_v46 = vld [vmem:[%s2971_s9 + $0x274] ss:$28 sps:$4 sm:$0xff]  }
  0x39   : > { %2509 = vmatprep.subr.bf16.mxu0 %v2775_v60  ;;  %v2831_v45 = vld [vmem:[%s2971_s9 + $0x80] ss:$28 sps:$4 sm:$0xff]   ;;  %v2854_v60 = vld [vmem:[%s2971_s9 + $0x318] ss:$28 sps:$4 sm:$0xff]  }
  0x3a   : > { %2510 = vmatpush3.bf16.msra.mxu0 %v2776_v61  ;;  %v2855_v61 = vld [vmem:[%s2971_s9 + $0x160] ss:$28 sps:$4 sm:$0xff]  }
  0x3b   : > { %2400 = vmatpush3.bf16.msra.mxu1 %v2741_v47  ;;  %2511 = vmatprep.subr.bf16.mxu0 %v2783_v1  ;;  %v2834_v47 = vld [vmem:[%s2971_s9 + $0xbc] ss:$28 sps:$4 sm:$0xff]  }
  0x3c   : > { %2401 = vmatprep.subr.bf16.mxu1 %v2748_v48  ;;  %v2836_v48 = vld [vmem:[%s2971_s9 + $0x270] ss:$28 sps:$4 sm:$0xff]   ;;  %v2861_v1 = vld [vmem:[%s2971_s9 + $0x198] ss:$28 sps:$4 sm:$0xff]  }
  0x3e   : > { %1379 = vmatmul.mubr.bf16.gmra.mrb[12].mxu0 %v2746_v49  ;;  %1475 = vmatmul.mubr.bf16.gmra.mrb[12].mxu1 %v2747_v50  ;;  %v2837_v49 = vld [vmem:[%s2971_s9 + $0xb8] ss:$28 sps:$4 sm:$0xff]   ;;  %v2838_v50 = vld [vmem:[%s2971_s9 + $0x2ac] ss:$28 sps:$4 sm:$0xff]  }
  0x3f   : > { %2402 = vmatpush3.bf16.msra.mxu1 %v2750_v52  ;;  %1386 = vmatprep.mubr.bf16.mxu0 %v2754_v54  ;;  %v2842_v52 = vld [vmem:[%s2971_s9 + $0x2a8] ss:$28 sps:$4 sm:$0xff]  }
  0x40   : > { %2403 = vmatprep.subr.bf16.mxu1 %v2752_v55  ;;  %1515 = vmatprep.mubr.bf16.mxu1 %v2758_v56  ;;  %v2844_v54 = vld [vmem:[%s2971_s9 + $0x2e4] ss:$28 sps:$4 sm:$0xff]   ;;  %v2846_v55 = vld [vmem:[%s2971_s9 + $0x12c] ss:$28 sps:$4 sm:$0xff]  }
  0x41   : > { %2512 = vmatpush3.bf16.msra.mxu0 %v2784_v2  ;;  %v2848_v56 = vld [vmem:[%s2971_s9 + $0x2e0] ss:$28 sps:$4 sm:$0xff]   ;;  %v2862_v2 = vld [vmem:[%s2971_s9 + $0x1d4] ss:$28 sps:$4 sm:$0xff]  }
  0x42   : > { %2513 = vmatprep.subr.bf16.mxu0 %v2797_v7  ;;  %v2869_v7 = vld [vmem:[%s2971_s9 + $0x88] ss:$28 sps:$4 sm:$0xff]  }
  0x43   : > { %2404 = vmatpush3.bf16.msra.mxu1 %v2753_v57  ;;  %v2849_v57 = vld [vmem:[%s2971_s9 + $0x128] ss:$28 sps:$4 sm:$0xff]  }
  0x44   : > { %2631 = vmatprep.subr.bf16.mxu1 %v2761_v58 }
  0x45   : > { %2514 = vmatpush3.bf16.msra.mxu0 %v2798_v8  ;;  %v2870_v8 = vld [vmem:[%s2971_s9 + $0x208] ss:$28 sps:$4 sm:$0xff]  }
  0x46   : > { %1387 = vmatmul.mubr.bf16.gmra.mrb[16].mxu0 %v2759_v62  ;;  %1516 = vmatmul.mubr.bf16.vlgmr.msra.gmra.mrb[16].mxu1 %v2756_v59  ;;  %v2852_v59 = vld [vmem:[%s2971_s9 + $0x164] ss:$28 sps:$4 sm:$0xff]   ;;  %v2856_v62 = vld [vmem:[%s2971_s9 + $0x354] ss:$28 sps:$4 sm:$0xff]  }
  0x47   : > { %2632 = vmatpush3.bf16.msra.mxu1 %v2761_v58  ;;  %1394 = vmatprep.mubr.bf16.mxu0 %v2763_v63  ;;  %v2850_v58 = vld [vmem:[%s2971_s9 + $0x31c] ss:$28 sps:$4 sm:$0xff]  }
  0x48   : > { %1523 = vmatprep.mubr.bf16.mxu1 %v2765_v0  ;;  %2515 = vmatprep.subr.bf16.mxu0 %v2805_v12  ;;  %v2858_v63 = vld [vmem:[%s2971_s9 + $0x19c] ss:$28 sps:$4 sm:$0xff]   ;;  %v2860_v0 = vld [vmem:[%s2971_s9 + $0x350] ss:$28 sps:$4 sm:$0xff]  }
  0x49   : > { %2516 = vmatpush3.bf16.msra.mxu0 %v2806_v13  ;;  %2633 = vmatprep.subr.bf16.mxu1 %v2819_v15  ;;  %v2875_v12 = vld [vmem:[%s2971_s9 + $0x240] ss:$28 sps:$4 sm:$0xff]   ;;  %v2876_v13 = vld [vmem:[%s2971_s9 + $0x130] ss:$28 sps:$4 sm:$0xff]  }
  0x4b   : > { %2634 = vmatpush3.bf16.msra.mxu1 %v2819_v15  ;;  %v2879_v15 = vld [vmem:[%s2971_s9 + $0x168] ss:$28 sps:$4 sm:$0xff]  }
  0x4e   : > { %1395 = vmatmul.mubr.bf16.gmra.mrb[20].mxu0 %v2767_v3  ;;  %1524 = vmatmul.mubr.bf16.gmra.mrb[20].mxu1 %v2768_v4  ;;  %v2864_v3 = vld [vmem:[%s2971_s9 + $0x18] ss:$28 sps:$4 sm:$0xff]   ;;  %v2865_v4 = vld [vmem:[%s2971_s9 + $0x1d0] ss:$28 sps:$4 sm:$0xff]  }
  0x4f   : > { %1402 = vmatprep.mubr.bf16.mxu0 %v2769_v5  ;;  %1531 = vmatprep.mubr.bf16.mxu1 %v2771_v6  ;;  %v2866_v5 = vld [vmem:[%s2971_s9 + $0x50] ss:$28 sps:$4 sm:$0xff]  }
  0x50   : > { %v2867_v6 = vld [vmem:[%s2971_s9 + $0x20c] ss:$28 sps:$4 sm:$0xff]  }
  0x56   : > { %1403 = vmatmul.mubr.bf16.gmra.mrb[24].mxu0 %v2773_v9  ;;  %1532 = vmatmul.mubr.bf16.gmra.mrb[24].mxu1 %v2774_v10  ;;  %v2871_v9 = vld [vmem:[%s2971_s9 + $0xc0] ss:$28 sps:$4 sm:$0xff]  }
  0x57   : > { %1410 = vmatprep.mubr.bf16.mxu0 %v2777_v11  ;;  %1539 = vmatprep.mubr.bf16.mxu1 %v2779_v14  ;;  %v2872_v10 = vld [vmem:[%s2971_s9 + $0x244] ss:$28 sps:$4 sm:$0xff]   ;;  %v2874_v11 = vld [vmem:[%s2971_s9 + $0xf8] ss:$28 sps:$4 sm:$0xff]  }
  0x58   : > { %v2877_v14 = vld [vmem:[%s2971_s9 + $0x27c] ss:$28 sps:$4 sm:$0xff]  }
  0x5e   : > { %1411 = vmatmul.mubr.bf16.gmra.mrb[28].mxu0 %v2781_v16  ;;  %1540 = vmatmul.mubr.bf16.gmra.mrb[28].mxu1 %v2782_v17  ;;  %v2880_v16 = vld [vmem:[%s2971_s9 + $0x278] ss:$28 sps:$4 sm:$0xff]   ;;  %v2881_v17 = vld [vmem:[%s2971_s9 + $0x1a0] ss:$28 sps:$4 sm:$0xff]  }
  0x5f   : > { %1418 = vmatprep.mubr.bf16.mxu0 %v2785_v18  ;;  %1547 = vmatprep.mubr.bf16.mxu1 %v2787_v19  ;;  %v2882_v18 = vld [vmem:[%s2971_s9 + $0x2b4] ss:$28 sps:$4 sm:$0xff]  }
  0x60   : > { %v2884_v19 = vld [vmem:[%s2971_s9 + $0x1d8] ss:$28 sps:$4 sm:$0xff]  }
  0x66   : > { %1419 = vmatmul.mubr.bf16.gmra.mrb[32].mxu0 %v2789_v20  ;;  %1548 = vmatmul.mubr.bf16.gmra.mrb[32].mxu1 %v2790_v21  ;;  %v2885_v20 = vld [vmem:[%s2971_s9 + $0x2b0] ss:$28 sps:$4 sm:$0xff]  }
  0x67   : > { %1426 = vmatprep.mubr.bf16.mxu0 %v2791_v22  ;;  %1555 = vmatprep.mubr.bf16.mxu1 %v2793_v23  ;;  %v2886_v21 = vld [vmem:[%s2971_s9 + $0x210] ss:$28 sps:$4 sm:$0xff]   ;;  %v2889_v23 = vld [vmem:[%s2971_s9 + $0x248] ss:$28 sps:$4 sm:$0xff]  }
  0x68   : > { %v2887_v22 = vld [vmem:[%s2971_s9 + $0x2ec] ss:$28 sps:$4 sm:$0xff]  }
  0x6e   : > { %1427 = vmatmul.mubr.bf16.gmra.mrb[36].mxu0 %v2795_v24  ;;  %1556 = vmatmul.mubr.bf16.gmra.mrb[36].mxu1 %v2796_v25  ;;  %v2890_v24 = vld [vmem:[%s2971_s9 + $0x2e8] ss:$28 sps:$4 sm:$0xff]   ;;  %v2891_v25 = vld [vmem:[%s2971_s9 + $0x280] ss:$28 sps:$4 sm:$0xff]  }
  0x6f   : > { %1434 = vmatprep.mubr.bf16.mxu0 %v2799_v26  ;;  %1563 = vmatprep.mubr.bf16.mxu1 %v2801_v27  ;;  %v2892_v26 = vld [vmem:[%s2971_s9 + $0x324] ss:$28 sps:$4 sm:$0xff]   ;;  %v2894_v27 = vld [vmem:[%s2971_s9 + $0x2b8] ss:$28 sps:$4 sm:$0xff]  }
  0x76   : > { %1435 = vmatmul.mubr.bf16.gmra.mrb[40].mxu0 %v2803_v28  ;;  %1564 = vmatmul.mubr.bf16.gmra.mrb[40].mxu1 %v2804_v29  ;;  %v2895_v28 = vld [vmem:[%s2971_s9 + $0x320] ss:$28 sps:$4 sm:$0xff]   ;;  %v2896_v29 = vld [vmem:[%s2971_s9 + $0x2f0] ss:$28 sps:$4 sm:$0xff]  }
  0x77   : > { %1442 = vmatprep.mubr.bf16.mxu0 %v2807_v30  ;;  %1571 = vmatprep.mubr.bf16.mxu1 %v2809_v31  ;;  %v2897_v30 = vld [vmem:[%s2971_s9 + $0x35c] ss:$28 sps:$4 sm:$0xff]   ;;  %v2899_v31 = vld [vmem:[%s2971_s9 + $0x328] ss:$28 sps:$4 sm:$0xff]  }
  0x7e   : > { %1443 = vmatmul.mubr.bf16.gmra.mrb[44].mxu0 %v2811_v32  ;;  %1572 = vmatmul.mubr.bf16.gmra.mrb[44].mxu1 %v2812_v33 }
  0x7f   : > { %1579 = vmatprep.mubr.bf16.mxu1 %v2813_v34  ;;  %1676 = vmatprep.mubr.bf16.mxu0 %v2817_v35 }
  0x86   : > { %1580 = vmatmul.mubr.bf16.gmra.mrb[48].mxu1 %v2818_v37  ;;  %1677 = vmatmul.mubr.bf16.vlgmr.msra.gmra.mrb[48].mxu0 %v2815_v36  ;;  %v2900_v36 = vld [vmem:[%s2971_s9 + $0x358] ss:$28 sps:$4 sm:$0xff]   ;;  %v2901_v37 = vld [vmem:[%s2971_s9 + $0x360] ss:$28 sps:$4 sm:$0xff]  }
  0x87   : > { %1587 = vmatprep.mubr.bf16.mxu1 %v2820_v38  ;;  %1684 = vmatprep.mubr.bf16.mxu0 %v2822_v39 }
  0x8e   : > { %1588 = vmatmul.mubr.bf16.gmra.mrb[52].mxu1 %v2824_v40  ;;  %1685 = vmatmul.mubr.bf16.gmra.mrb[52].mxu0 %v2825_v41 }
  0x8f   : > { %1595 = vmatprep.mubr.bf16.mxu1 %v2826_v42  ;;  %1692 = vmatprep.mubr.bf16.mxu0 %v2828_v43 }
  0x96   : > { %1596 = vmatmul.mubr.bf16.gmra.mrb[56].mxu1 %v2830_v44  ;;  %1693 = vmatmul.mubr.bf16.gmra.mrb[56].mxu0 %v2831_v45 }
  0x97   : > { %1603 = vmatprep.mubr.bf16.mxu1 %v2832_v46  ;;  %1700 = vmatprep.mubr.bf16.mxu0 %v2834_v47 }
  0x9e   : > { %1604 = vmatmul.mubr.bf16.gmra.mrb[60].mxu1 %v2836_v48  ;;  %1701 = vmatmul.mubr.bf16.gmra.mrb[60].mxu0 %v2837_v49 }
  0x9f   : > { %1611 = vmatprep.mubr.bf16.mxu1 %v2838_v50  ;;  %1708 = vmatprep.mubr.bf16.mxu0 %v2840_v51 }
  0xa6   : > { %1612 = vmatmul.mubr.bf16.gmra.mrb[64].mxu1 %v2842_v52  ;;  %1709 = vmatmul.mubr.bf16.gmra.mrb[64].mxu0 %v2843_v53 }
  0xa7   : > { %1619 = vmatprep.mubr.bf16.mxu1 %v2844_v54  ;;  %1716 = vmatprep.mubr.bf16.mxu0 %v2846_v55 }
  0xae   : > { %1620 = vmatmul.mubr.bf16.gmra.mrb[68].mxu1 %v2848_v56  ;;  %1717 = vmatmul.mubr.bf16.gmra.mrb[68].mxu0 %v2849_v57 }
  0xaf   : > { %1627 = vmatprep.mubr.bf16.mxu1 %v2850_v58  ;;  %1724 = vmatprep.mubr.bf16.mxu0 %v2852_v59 }
  0xb6   : > { %1628 = vmatmul.mubr.bf16.gmra.mrb[72].mxu1 %v2854_v60  ;;  %1725 = vmatmul.mubr.bf16.gmra.mrb[72].mxu0 %v2855_v61 }
  0xb7   : > { %1635 = vmatprep.mubr.bf16.mxu1 %v2856_v62  ;;  %1732 = vmatprep.mubr.bf16.mxu0 %v2858_v63 }
  0xbe   : > { %1636 = vmatmul.mubr.bf16.gmra.mrb[76].mxu1 %v2860_v0  ;;  %1733 = vmatmul.mubr.bf16.gmra.mrb[76].mxu0 %v2861_v1 }
  0xbf   : > { %1740 = vmatprep.mubr.bf16.mxu0 %v2862_v2  ;;  %2635 = vmatprep.mubr.msk.bf16.mxu1 %vm1273_vm0, %v2864_v3 }
  0xc6   : > { %1741 = vmatmul.mubr.bf16.gmra.mrb[80].mxu0 %v2865_v4  ;;  %2636 = vmatmul.mubr.msk.bf16.vlgmr.msra.gmra.mrb[80].mxu1 %vm1273_vm0, %v2866_v5 }
  0xc7   : > { %1748 = vmatprep.mubr.bf16.mxu0 %v2867_v6  ;;  %2639 = vmatprep.mubr.msk.bf16.mxu1 %vm1273_vm0, %v2869_v7 }
  0xce   : > { %1749 = vmatmul.mubr.bf16.gmra.mrb[84].mxu0 %v2870_v8  ;;  %2640 = vmatmul.mubr.msk.bf16.gmra.mrb[84].mxu1 %vm1273_vm0, %v2871_v9 }
  0xcf   : > { %1756 = vmatprep.mubr.bf16.mxu0 %v2872_v10  ;;  %2643 = vmatprep.mubr.msk.bf16.mxu1 %vm1273_vm0, %v2874_v11 }
  0xd6   : > { %1757 = vmatmul.mubr.bf16.gmra.mrb[88].mxu0 %v2875_v12  ;;  %2644 = vmatmul.mubr.msk.bf16.gmra.mrb[88].mxu1 %vm1273_vm0, %v2876_v13 }
  0xd7   : > { %1764 = vmatprep.mubr.bf16.mxu0 %v2877_v14  ;;  %2647 = vmatprep.mubr.msk.bf16.mxu1 %vm1273_vm0, %v2879_v15 }
  0xde   : > { %1765 = vmatmul.mubr.bf16.gmra.mrb[92].mxu0 %v2880_v16  ;;  %2648 = vmatmul.mubr.msk.bf16.gmra.mrb[92].mxu1 %vm1273_vm0, %v2881_v17 }
  0xdf   : > { %1772 = vmatprep.mubr.bf16.mxu0 %v2882_v18  ;;  %2651 = vmatprep.mubr.msk.bf16.mxu1 %vm1273_vm0, %v2884_v19  ;;  %v3243_v18 = vld [vmem:[%s3543_s2] ss:$0 sm:$0xff] }
  0xe6   : > { %1773 = vmatmul.mubr.bf16.gmra.mrb[96].mxu0 %v2885_v20  ;;  %2652 = vmatmul.mubr.msk.bf16.gmra.mrb[96].mxu1 %vm1273_vm0, %v2886_v21 }
  0xe7   : > { %1780 = vmatprep.mubr.bf16.mxu0 %v2887_v22  ;;  %2655 = vmatprep.mubr.msk.bf16.mxu1 %vm1273_vm0, %v2889_v23 }
  0xee   : > { %1781 = vmatmul.mubr.bf16.gmra.mrb[100].mxu0 %v2890_v24  ;;  %2656 = vmatmul.mubr.msk.bf16.gmra.mrb[100].mxu1 %vm1273_vm0, %v2891_v25 }
  0xef   : > { %1788 = vmatprep.mubr.bf16.mxu0 %v2892_v26  ;;  %2659 = vmatprep.mubr.msk.bf16.mxu1 %vm1273_vm0, %v2894_v27 }
  0xf6   : > { %1789 = vmatmul.mubr.bf16.gmra.mrb[104].mxu0 %v2895_v28  ;;  %2660 = vmatmul.mubr.msk.bf16.gmra.mrb[104].mxu1 %vm1273_vm0, %v2896_v29 }
  0xf7   : > { %1796 = vmatprep.mubr.bf16.mxu0 %v2897_v30  ;;  %2663 = vmatprep.mubr.msk.bf16.mxu1 %vm1273_vm0, %v2899_v31 }
  0xf9   : > { %v2293_v32 = vpop.f32.mrb[0].mxu0  ;;  %v2365_v33 = vpop.f32.mrb[0].mxu1 }
  0xfa   : > { %v2294_v34 = vpop.f32.mrb[1].mxu0  ;;  %v2366_v35 = vpop.f32.mrb[1].mxu1 }
  0xfb   : > { %v2295_v38 = vadd.f32 %v2294_v34, %v2293_v32  ;;  %v2296_v39 = vpop.f32.mrb[2].mxu0  ;;  %v3223_v40 = vadd.f32 %v2366_v35, %v2365_v33  ;;  %v2368_v41 = vpop.f32.mrb[2].mxu1 }
  0xfc   : > { %v2297_v42 = vpop.f32.mrb[3].mxu0  ;;  %v2369_v43 = vpop.f32.mrb[3].mxu1 }
  0xfd   : > { %v2298_v44 = vadd.f32 %v2297_v42, %v2296_v39  ;;  %v3225_v45 = vadd.f32 %v2369_v43, %v2368_v41  ;;  %v1357_v23 = vadd.f32 %v2295_v38, %v3243_v18 }
  0xfe   : > { %1797 = vmatmul.mubr.bf16.gmra.mrb[108].mxu0 %v2900_v36  ;;  %2664 = vmatmul.mubr.msk.bf16.gmra.mrb[108].mxu1 %vm1273_vm0, %v2901_v37 }
  0xff   : > { %v1360_v30 = vadd.f32 %v2298_v44, %v3243_v18 }
 0x101   : > { %v2299_v46 = vpop.f32.mrb[4].mxu0  ;;  %v2371_v47 = vpop.f32.mrb[4].mxu1 }
 0x102   : > { %v2300_v48 = vpop.f32.mrb[5].mxu0  ;;  %v2372_v49 = vpop.f32.mrb[5].mxu1 }
 0x103   : > { %v2301_v50 = vadd.f32 %v2300_v48, %v2299_v46  ;;  %v2302_v51 = vpop.f32.mrb[6].mxu0  ;;  %v3228_v52 = vadd.f32 %v2372_v49, %v2371_v47  ;;  %v2374_v53 = vpop.f32.mrb[6].mxu1 }
 0x104   : > { %v2303_v54 = vpop.f32.mrb[7].mxu0  ;;  %v2375_v55 = vpop.f32.mrb[7].mxu1 }
 0x105   : > { %v2304_v56 = vadd.f32 %v2303_v54, %v2302_v51  ;;  %v3230_v57 = vadd.f32 %v2375_v55, %v2374_v53  ;;  %v1365_v38 = vadd.f32 %v2301_v50, %v3243_v18 }
 0x107   : > { %v1368_v44 = vadd.f32 %v2304_v56, %v3243_v18 }
 0x109   : > { %v2305_v58 = vpop.f32.mrb[8].mxu0  ;;  %v2377_v59 = vpop.f32.mrb[8].mxu1 }
 0x10a   : > { %v2306_v60 = vpop.f32.mrb[9].mxu0  ;;  %v2378_v61 = vpop.f32.mrb[9].mxu1 }
 0x10b   : > { %v2307_v62 = vadd.f32 %v2306_v60, %v2305_v58  ;;  %v2308_v63 = vpop.f32.mrb[10].mxu0  ;;  %v3232_v0 = vadd.f32 %v2378_v61, %v2377_v59  ;;  %v2380_v1 = vpop.f32.mrb[10].mxu1 }
 0x10c   : > { %v2309_v2 = vpop.f32.mrb[11].mxu0  ;;  %v2381_v3 = vpop.f32.mrb[11].mxu1 }
 0x10d   : > { %v2310_v4 = vadd.f32 %v2309_v2, %v2308_v63  ;;  %v3234_v5 = vadd.f32 %v2381_v3, %v2380_v1  ;;  %v1373_v50 = vadd.f32 %v2307_v62, %v3243_v18 }
 0x10f   : > { %v1376_v56 = vadd.f32 %v2310_v4, %v3243_v18 }
 0x111   : > { %v2311_v6 = vpop.f32.mrb[12].mxu0  ;;  %v2383_v7 = vpop.f32.mrb[12].mxu1 }
 0x112   : > { %v2312_v8 = vpop.f32.mrb[13].mxu0  ;;  %v2384_v9 = vpop.f32.mrb[13].mxu1 }
 0x113   : > { %v2313_v10 = vadd.f32 %v2312_v8, %v2311_v6  ;;  %v2314_v11 = vpop.f32.mrb[14].mxu0  ;;  %v3236_v12 = vadd.f32 %v2384_v9, %v2383_v7  ;;  %v2386_v13 = vpop.f32.mrb[14].mxu1 }
 0x114   : > { %v2315_v14 = vpop.f32.mrb[15].mxu0  ;;  %v2387_v15 = vpop.f32.mrb[15].mxu1 }
 0x115   : > { %v2316_v16 = vadd.f32 %v2315_v14, %v2314_v11  ;;  %v3238_v17 = vadd.f32 %v2387_v15, %v2386_v13  ;;  %v1381_v62 = vadd.f32 %v2313_v10, %v3243_v18 }
 0x117   : > { %v1384_v4 = vadd.f32 %v2316_v16, %v3243_v18 }
 0x119   : > { %v2317_v19 = vpop.f32.mrb[16].mxu0  ;;  %v2405_v20 = vpop.f32.mrb[16].mxu1 }
 0x11a   : > { %v2318_v21 = vpop.f32.mrb[17].mxu0  ;;  %v2406_v22 = vpop.f32.mrb[17].mxu1 }
 0x11b   : > { %v3246_v24 = vadd.f32 %v2318_v21, %v2317_v19  ;;  %v2407_v25 = vadd.f32 %v2406_v22, %v2405_v20  ;;  %v2320_v26 = vpop.f32.mrb[18].mxu0  ;;  %v2408_v27 = vpop.f32.mrb[18].mxu1 }
 0x11c   : > { %v2321_v28 = vpop.f32.mrb[19].mxu0  ;;  %v2409_v29 = vpop.f32.mrb[19].mxu1 }
 0x11d   : > { %v3249_v31 = vadd.f32 %v2407_v25, %v1357_v23  ;;  %v2322_v32 = vadd.f32 %v2321_v28, %v2320_v26  ;;  %v2410_v33 = vadd.f32 %v2409_v29, %v2408_v27  ;;  %v1389_v10 = vadd.f32 %v3246_v24, %v3243_v18 }
 0x11f   : > { %v3251_v34 = vadd.f32 %v2410_v33, %v1360_v30 }
 0x121   : > { %v2323_v35 = vpop.f32.mrb[20].mxu0  ;;  %v2411_v36 = vpop.f32.mrb[20].mxu1 }
 0x122   : > { %v2324_v37 = vpop.f32.mrb[21].mxu0  ;;  %v2412_v39 = vpop.f32.mrb[21].mxu1 }
 0x123   : > { %v3254_v41 = vadd.f32 %v2324_v37, %v2323_v35  ;;  %v2413_v42 = vadd.f32 %v2412_v39, %v2411_v36  ;;  %v2326_v43 = vpop.f32.mrb[22].mxu0  ;;  %v2414_v46 = vpop.f32.mrb[22].mxu1 }
 0x124   : > { %v2327_v47 = vpop.f32.mrb[23].mxu0  ;;  %v2415_v48 = vpop.f32.mrb[23].mxu1 }
 0x125   : > { %v3257_v49 = vadd.f32 %v2413_v42, %v1365_v38  ;;  %v2328_v51 = vadd.f32 %v2327_v47, %v2326_v43  ;;  %v2416_v53 = vadd.f32 %v2415_v48, %v2414_v46  ;;  %v1392_v47 = vadd.f32 %v2322_v32, %v3243_v18 }
 0x126   : > { %v1397_v24 = vadd.f32 %v3254_v41, %v3243_v18 }
 0x127   : > { %v3259_v54 = vadd.f32 %v2416_v53, %v1368_v44 }
 0x129   : > { %v2329_v55 = vpop.f32.mrb[24].mxu0  ;;  %v2417_v58 = vpop.f32.mrb[24].mxu1 }
 0x12a   : > { %v2330_v59 = vpop.f32.mrb[25].mxu0  ;;  %v2418_v60 = vpop.f32.mrb[25].mxu1 }
 0x12b   : > { %v3262_v61 = vadd.f32 %v2330_v59, %v2329_v55  ;;  %v2419_v63 = vadd.f32 %v2418_v60, %v2417_v58  ;;  %v2332_v1 = vpop.f32.mrb[26].mxu0  ;;  %v2420_v2 = vpop.f32.mrb[26].mxu1 }
 0x12c   : > { %v2333_v3 = vpop.f32.mrb[27].mxu0  ;;  %v2421_v6 = vpop.f32.mrb[27].mxu1 }
 0x12d   : > { %v3265_v7 = vadd.f32 %v2419_v63, %v1373_v50  ;;  %v2334_v8 = vadd.f32 %v2333_v3, %v2332_v1  ;;  %v2422_v9 = vadd.f32 %v2421_v6, %v2420_v2  ;;  %v1405_v41 = vadd.f32 %v3262_v61, %v3243_v18 }
 0x12f   : > { %v3267_v11 = vadd.f32 %v2422_v9, %v1376_v56  ;;  %v1400_v56 = vadd.f32 %v2328_v51, %v3243_v18 }
 0x131   : > { %v2335_v13 = vpop.f32.mrb[28].mxu0  ;;  %v2423_v14 = vpop.f32.mrb[28].mxu1 }
 0x132   : > { %v2336_v15 = vpop.f32.mrb[29].mxu0  ;;  %v2424_v19 = vpop.f32.mrb[29].mxu1 }
 0x133   : > { %v3270_v20 = vadd.f32 %v2336_v15, %v2335_v13  ;;  %v2425_v21 = vadd.f32 %v2424_v19, %v2423_v14  ;;  %v2338_v22 = vpop.f32.mrb[30].mxu0  ;;  %v2426_v23 = vpop.f32.mrb[30].mxu1 }
 0x134   : > { %v2339_v25 = vpop.f32.mrb[31].mxu0  ;;  %v2427_v26 = vpop.f32.mrb[31].mxu1 }
 0x135   : > { %v3273_v27 = vadd.f32 %v2425_v21, %v1381_v62  ;;  %v2340_v28 = vadd.f32 %v2339_v25, %v2338_v22  ;;  %v2428_v29 = vadd.f32 %v2427_v26, %v2426_v23 }
 0x137   : > { %v3275_v30 = vadd.f32 %v2428_v29, %v1384_v4 }
 0x139   : > { %v2341_v33 = vpop.f32.mrb[32].mxu0  ;;  %v2429_v35 = vpop.f32.mrb[32].mxu1 }
 0x13a   : > { %v2342_v36 = vpop.f32.mrb[33].mxu0  ;;  %v2430_v37 = vpop.f32.mrb[33].mxu1 }
 0x13b   : > { %v3279_v39 = vadd.f32 %v2342_v36, %v2341_v33  ;;  %v2431_v38 = vadd.f32 %v2430_v37, %v2429_v35  ;;  %v2344_v42 = vpop.f32.mrb[34].mxu0  ;;  %v2432_v43 = vpop.f32.mrb[34].mxu1  ;;  %v1408_v33 = vadd.f32 %v2334_v8, %v3243_v18 }
 0x13c   : > { %v2345_v46 = vpop.f32.mrb[35].mxu0  ;;  %v2433_v16 = vpop.f32.mrb[35].mxu1 }
 0x13d   : > { %v3282_v48 = vadd.f32 %v2431_v38, %v1389_v10  ;;  %v2346_v44 = vadd.f32 %v2345_v46, %v2344_v42  ;;  %v2434_v53 = vadd.f32 %v2433_v16, %v2432_v43  ;;  %v1413_v46 = vadd.f32 %v3270_v20, %v3243_v18 }
 0x13f   : > { %v3284_v55 = vadd.f32 %v2434_v53, %v1392_v47 }
 0x141   : > { %v2347_v58 = vpop.f32.mrb[36].mxu0  ;;  %v2435_v59 = vpop.f32.mrb[36].mxu1 }
 0x142   : > { %v2348_v60 = vpop.f32.mrb[37].mxu0  ;;  %v2436_v50 = vpop.f32.mrb[37].mxu1 }
 0x143   : > { %v3288_v63 = vadd.f32 %v2348_v60, %v2347_v58  ;;  %v2437_v1 = vadd.f32 %v2436_v50, %v2435_v59  ;;  %v2350_v2 = vpop.f32.mrb[38].mxu0  ;;  %v2438_v3 = vpop.f32.mrb[38].mxu1  ;;  %v1416_v60 = vadd.f32 %v2340_v28, %v3243_v18  ;;  %v1424_v28 = vadd.f32 %v2346_v44, %v3243_v18 }
 0x144   : > { %v2351_v6 = vpop.f32.mrb[39].mxu0  ;;  %v2439_v32 = vpop.f32.mrb[39].mxu1 }
 0x145   : > { %v3291_v9 = vadd.f32 %v2437_v1, %v1397_v24  ;;  %v2352_v13 = vadd.f32 %v2351_v6, %v2350_v2  ;;  %v2440_v14 = vadd.f32 %v2439_v32, %v2438_v3  ;;  %v1429_v44 = vadd.f32 %v3288_v63, %v3243_v18 }
 0x147   : > { %v3293_v15 = vadd.f32 %v2440_v14, %v1400_v56  ;;  %v1421_v56 = vadd.f32 %v3279_v39, %v3243_v18 }
 0x149   : > { %v2353_v19 = vpop.f32.mrb[40].mxu0  ;;  %v2441_v62 = vpop.f32.mrb[40].mxu1 }
 0x14a   : > { %v2354_v21 = vpop.f32.mrb[41].mxu0  ;;  %v2442_v22 = vpop.f32.mrb[41].mxu1 }
 0x14b   : > { %v3297_v23 = vadd.f32 %v2354_v21, %v2353_v19  ;;  %v2443_v25 = vadd.f32 %v2442_v22, %v2441_v62  ;;  %v2356_v26 = vpop.f32.mrb[42].mxu0  ;;  %v2444_v4 = vpop.f32.mrb[42].mxu1 }
 0x14c   : > { %v2357_v29 = vpop.f32.mrb[43].mxu0  ;;  %v2445_v51 = vpop.f32.mrb[43].mxu1 }
 0x14d   : > { %v3300_v35 = vadd.f32 %v2443_v25, %v1405_v41  ;;  %v3302_v36 = vadd.f32 %v2357_v29, %v2356_v26  ;;  %v2446_v37 = vadd.f32 %v2445_v51, %v2444_v4 }
 0x14f   : > { %v3304_v10 = vadd.f32 %v2446_v37, %v1408_v33 }
 0x151   : > { %v2359_v38 = vpop.f32.mrb[44].mxu0  ;;  %v2447_v42 = vpop.f32.mrb[44].mxu1 }
 0x152   : > { %v2360_v43 = vpop.f32.mrb[45].mxu0  ;;  %v2448_v61 = vpop.f32.mrb[45].mxu1 }
 0x153   : > { %v3308_v16 = vadd.f32 %v2360_v43, %v2359_v38  ;;  %v2449_v47 = vadd.f32 %v2448_v61, %v2447_v42  ;;  %v2362_v53 = vpop.f32.mrb[46].mxu0  ;;  %v2450_v58 = vpop.f32.mrb[46].mxu1 }
 0x154   : > { %v2363_v8 = vpop.f32.mrb[47].mxu0  ;;  %v2451_v59 = vpop.f32.mrb[47].mxu1 }
 0x155   : > { %v3311_v50 = vadd.f32 %v2449_v47, %v1413_v46  ;;  %v3313_v24 = vadd.f32 %v2363_v8, %v2362_v53  ;;  %v2452_v1 = vadd.f32 %v2451_v59, %v2450_v58  ;;  %v1432_v53 = vadd.f32 %v2352_v13, %v3243_v18 }
 0x156   : > { %v1437_v13 = vadd.f32 %v3297_v23, %v3243_v18 }
 0x157   : > { %v3315_v2 = vadd.f32 %v2452_v1, %v1416_v60 }
 0x159   : > { %v2453_v3 = vpop.f32.mrb[48].mxu1  ;;  %v2517_v6 = vpop.f32.mrb[48].mxu0 }
 0x15a   : > { %v2454_v32 = vpop.f32.mrb[49].mxu1  ;;  %v2518_v20 = vpop.f32.mrb[49].mxu0 }
 0x15b   : > { %v2455_v14 = vadd.f32 %v2454_v32, %v2453_v3  ;;  %v2519_v19 = vadd.f32 %v2518_v20, %v2517_v6  ;;  %v2456_v62 = vpop.f32.mrb[50].mxu1  ;;  %v2520_v21 = vpop.f32.mrb[50].mxu0 }
 0x15c   : > { %v2457_v22 = vpop.f32.mrb[51].mxu1  ;;  %v2521_v41 = vpop.f32.mrb[51].mxu0 }
 0x15d   : > { %v3320_v25 = vadd.f32 %v2455_v14, %v1421_v56  ;;  %v2458_v26 = vadd.f32 %v2457_v22, %v2456_v62  ;;  %v2522_v4 = vadd.f32 %v2521_v41, %v2520_v21  ;;  %v3323_v29 = vadd.f32 %v2519_v19, %v3249_v31 }
 0x15f   : > { %v3325_v51 = vadd.f32 %v2458_v26, %v1424_v28  ;;  %v3328_v33 = vadd.f32 %v2522_v4, %v3251_v34 }
 0x161   : > { %v2459_v39 = vpop.f32.mrb[52].mxu1  ;;  %v2523_v37 = vpop.f32.mrb[52].mxu0 }
 0x162   : > { %v2460_v38 = vpop.f32.mrb[53].mxu1  ;;  %v2524_v42 = vpop.f32.mrb[53].mxu0 }
 0x163   : > { %v2461_v43 = vadd.f32 %v2460_v38, %v2459_v39  ;;  %v2525_v61 = vadd.f32 %v2524_v42, %v2523_v37  ;;  %v2462_v46 = vpop.f32.mrb[54].mxu1  ;;  %v2526_v47 = vpop.f32.mrb[54].mxu0 }
 0x164   : > { %v2463_v31 = vpop.f32.mrb[55].mxu1  ;;  %v2527_v58 = vpop.f32.mrb[55].mxu0 }
 0x165   : > { %v3333_v8 = vadd.f32 %v2461_v43, %v1429_v44  ;;  %v2464_v59 = vadd.f32 %v2463_v31, %v2462_v46  ;;  %v2528_v34 = vadd.f32 %v2527_v58, %v2526_v47  ;;  %v3336_v60 = vadd.f32 %v2525_v61, %v3257_v49 }
 0x166   : > { %v1440_v49 = vadd.f32 %v3302_v36, %v3243_v18  ;;  %v1445_v36 = vadd.f32 %v3308_v16, %v3243_v18 }
 0x167   : > { %v3338_v1 = vadd.f32 %v2464_v59, %v1432_v53  ;;  %v3341_v3 = vadd.f32 %v2528_v34, %v3259_v54 }
 0x169   : > { %v2465_v63 = vpop.f32.mrb[56].mxu1  ;;  %v2529_v6 = vpop.f32.mrb[56].mxu0 }
 0x16a   : > { %v2466_v32 = vpop.f32.mrb[57].mxu1  ;;  %v2530_v20 = vpop.f32.mrb[57].mxu0 }
 0x16b   : > { %v2467_v56 = vadd.f32 %v2466_v32, %v2465_v63  ;;  %v2531_v14 = vadd.f32 %v2530_v20, %v2529_v6  ;;  %v2468_v19 = vpop.f32.mrb[58].mxu1  ;;  %v2532_v62 = vpop.f32.mrb[58].mxu0 }
 0x16c   : > { %v2469_v21 = vpop.f32.mrb[59].mxu1  ;;  %v2533_v28 = vpop.f32.mrb[59].mxu0 }
 0x16d   : > { %v3347_v22 = vadd.f32 %v2467_v56, %v1437_v13  ;;  %v2470_v54 = vadd.f32 %v2469_v21, %v2468_v19  ;;  %v2534_v41 = vadd.f32 %v2533_v28, %v2532_v62  ;;  %v3350_v26 = vadd.f32 %v2531_v14, %v3265_v7 }
 0x16e   : > { %v1448_v7 = vadd.f32 %v3313_v24, %v3243_v18  ;;  %v1453_v24 = vadd.f32 %v3223_v40, %v3243_v18 }
 0x16f   : > { %v3352_v4 = vadd.f32 %v2470_v54, %v1440_v49  ;;  %v3355_v23 = vadd.f32 %v2534_v41, %v3267_v11 }
 0x171   : > { %v2471_v39 = vpop.f32.mrb[60].mxu1  ;;  %v2535_v37 = vpop.f32.mrb[60].mxu0 }
 0x172   : > { %v2472_v38 = vpop.f32.mrb[61].mxu1  ;;  %v2536_v42 = vpop.f32.mrb[61].mxu0 }
 0x173   : > { %v2473_v44 = vadd.f32 %v2472_v38, %v2471_v39  ;;  %v2537_v43 = vadd.f32 %v2536_v42, %v2535_v37  ;;  %v2474_v61 = vpop.f32.mrb[62].mxu1  ;;  %v2538_v46 = vpop.f32.mrb[62].mxu0 }
 0x174   : > { %v2475_v47 = vpop.f32.mrb[63].mxu1  ;;  %v2539_v53 = vpop.f32.mrb[63].mxu0 }
 0x175   : > { %v3361_v31 = vadd.f32 %v2473_v44, %v1445_v36  ;;  %v2476_v11 = vadd.f32 %v2475_v47, %v2474_v61  ;;  %v2540_v58 = vadd.f32 %v2539_v53, %v2538_v46  ;;  %v3364_v59 = vadd.f32 %v2537_v43, %v3273_v27 }
 0x176   : > { %v1456_v27 = vadd.f32 %v3225_v45, %v3243_v18  ;;  %v1461_v45 = vadd.f32 %v3228_v52, %v3243_v18 }
 0x177   : > { %v3366_v34 = vadd.f32 %v2476_v11, %v1448_v7  ;;  %v3369_v16 = vadd.f32 %v2540_v58, %v3275_v30 }
 0x179   : > { %v2477_v63 = vpop.f32.mrb[64].mxu1  ;;  %v2541_v6 = vpop.f32.mrb[64].mxu0 }
 0x17a   : > { %v2478_v32 = vpop.f32.mrb[65].mxu1  ;;  %v2542_v20 = vpop.f32.mrb[65].mxu0 }
 0x17b   : > { %v2479_v13 = vadd.f32 %v2478_v32, %v2477_v63  ;;  %v2543_v56 = vadd.f32 %v2542_v20, %v2541_v6  ;;  %v2480_v14 = vpop.f32.mrb[66].mxu1  ;;  %v2544_v19 = vpop.f32.mrb[66].mxu0 }
 0x17c   : > { %v2481_v62 = vpop.f32.mrb[67].mxu1  ;;  %v2545_v49 = vpop.f32.mrb[67].mxu0 }
 0x17d   : > { %v3375_v21 = vadd.f32 %v2479_v13, %v1453_v24  ;;  %v2482_v30 = vadd.f32 %v2481_v62, %v2480_v14  ;;  %v2546_v28 = vadd.f32 %v2545_v49, %v2544_v19  ;;  %v3378_v54 = vadd.f32 %v2543_v56, %v3282_v48 }
 0x17e   : > { %v1464_v48 = vadd.f32 %v3230_v57, %v3243_v18  ;;  %v1469_v57 = vadd.f32 %v3232_v0, %v3243_v18 }
 0x17f   : > { %v3380_v41 = vadd.f32 %v2482_v30, %v1456_v27  ;;  %v3383_v40 = vadd.f32 %v2546_v28, %v3284_v55 }
 0x181   : > { %v2483_v39 = vpop.f32.mrb[68].mxu1  ;;  %v2547_v37 = vpop.f32.mrb[68].mxu0 }
 0x182   : > { %v2484_v38 = vpop.f32.mrb[69].mxu1  ;;  %v2548_v42 = vpop.f32.mrb[69].mxu0 }
 0x183   : > { %v2485_v36 = vadd.f32 %v2484_v38, %v2483_v39  ;;  %v2549_v44 = vadd.f32 %v2548_v42, %v2547_v37  ;;  %v2486_v43 = vpop.f32.mrb[70].mxu1  ;;  %v2550_v61 = vpop.f32.mrb[70].mxu0 }
 0x184   : > { %v2487_v46 = vpop.f32.mrb[71].mxu1  ;;  %v2551_v7 = vpop.f32.mrb[71].mxu0 }
 0x185   : > { %v3389_v47 = vadd.f32 %v2485_v36, %v1461_v45  ;;  %v2488_v55 = vadd.f32 %v2487_v46, %v2486_v43  ;;  %v2552_v53 = vadd.f32 %v2551_v7, %v2550_v61  ;;  %v3392_v11 = vadd.f32 %v2549_v44, %v3291_v9 }
 0x186   : > { %v1472_v9 = vadd.f32 %v3234_v5, %v3243_v18  ;;  %v1477_v5 = vadd.f32 %v3236_v12, %v3243_v18 }
 0x187   : > { %v3394_v58 = vadd.f32 %v2488_v55, %v1464_v48  ;;  %v3397_v52 = vadd.f32 %v2552_v53, %v3293_v15 }
 0x189   : > { %v2489_v63 = vpop.f32.mrb[72].mxu1  ;;  %v2553_v6 = vpop.f32.mrb[72].mxu0 }
 0x18a   : > { %v2490_v32 = vpop.f32.mrb[73].mxu1  ;;  %v2554_v20 = vpop.f32.mrb[73].mxu0 }
 0x18b   : > { %v2491_v24 = vadd.f32 %v2490_v32, %v2489_v63  ;;  %v2555_v13 = vadd.f32 %v2554_v20, %v2553_v6  ;;  %v2492_v56 = vpop.f32.mrb[74].mxu1  ;;  %v2556_v14 = vpop.f32.mrb[74].mxu0 }
 0x18c   : > { %v2493_v19 = vpop.f32.mrb[75].mxu1  ;;  %v2557_v27 = vpop.f32.mrb[75].mxu0 }
 0x18d   : > { %v3403_v62 = vadd.f32 %v2491_v24, %v1469_v57  ;;  %v2494_v15 = vadd.f32 %v2493_v19, %v2492_v56  ;;  %v2558_v49 = vadd.f32 %v2557_v27, %v2556_v14  ;;  %v3406_v30 = vadd.f32 %v2555_v13, %v3300_v35 }
 0x18e   : > { %v1480_v35 = vadd.f32 %v3238_v17, %v3243_v18 }
 0x18f   : > { %v3408_v28 = vadd.f32 %v2494_v15, %v1472_v9  ;;  %v3411_v0 = vadd.f32 %v2558_v49, %v3304_v10 }
 0x191   : > { %v2495_v39 = vpop.f32.mrb[76].mxu1  ;;  %v2559_v37 = vpop.f32.mrb[76].mxu0 }
 0x192   : > { %v2496_v38 = vpop.f32.mrb[77].mxu1  ;;  %v2560_v42 = vpop.f32.mrb[77].mxu0 }
 0x193   : > { %v2497_v45 = vadd.f32 %v2496_v38, %v2495_v39  ;;  %v2561_v36 = vadd.f32 %v2560_v42, %v2559_v37  ;;  %v2498_v44 = vpop.f32.mrb[78].mxu1  ;;  %v2562_v43 = vpop.f32.mrb[78].mxu0 }
 0x194   : > { %v2499_v61 = vpop.f32.mrb[79].mxu1  ;;  %v2563_v48 = vpop.f32.mrb[79].mxu0 }
 0x195   : > { %v3417_v46 = vadd.f32 %v2497_v45, %v1477_v5  ;;  %v2500_v10 = vadd.f32 %v2499_v61, %v2498_v44  ;;  %v2564_v7 = vadd.f32 %v2563_v48, %v2562_v43  ;;  %v3420_v55 = vadd.f32 %v2561_v36, %v3311_v50 }
 0x197   : > { %v3422_v53 = vadd.f32 %v2500_v10, %v1480_v35  ;;  %v3425_v12 = vadd.f32 %v2564_v7, %v3315_v2 }
 0x199   : > { %v2565_v63 = vpop.f32.mrb[80].mxu0  ;;  %v2637_v6 = vpop.f32.mrb[80].mxu1 }
 0x19a   : > { %v1848_v32 = vadd.f32 %v2637_v6, %v3336_v60  ;;  %v2566_v17 = vpop.f32.mrb[81].mxu0  ;;  %v1839_v18 = vpop.f32.mrb[81].mxu1 }
 0x19b   : > { %v2567_v50 = vadd.f32 %v2566_v17, %v2565_v63  ;;  %v1840_v20 = vadd.f32 %v1839_v18, %v3323_v29  ;;  %v2568_v2 = vpop.f32.mrb[82].mxu0  ;;  %v2638_v57 = vpop.f32.mrb[82].mxu1 }
 0x19c   : > { %v1968_v24 = vmax.f32 %v1848_v32, 0.0  ;;  %v1851_v60 = vadd.f32 %v2638_v57, %v3341_v3  ;;  %v2569_v13 = vpop.f32.mrb[83].mxu0  ;;  %v1842_v56 = vpop.f32.mrb[83].mxu1 }
 0x19d   : > { %v1966_v14 = vmax.f32 %v1840_v20, 0.0  ;;  %v2570_v9 = vadd.f32 %v2569_v13, %v2568_v2  ;;  %v1843_v19 = vadd.f32 %v1842_v56, %v3328_v33  ;;  %v3438_v27 = vadd.f32 %v2567_v50, %v3320_v25 }
 0x19e   : > { %2001 = vst.msk [vmem:[%s3432_s26 + $0x10] sm:$0xff] %vm1998_vm1, %v1968_v24  ;;  %v1969_v15 = vmax.f32 %v1851_v60, 0.0 }
 0x19f   : > { %1999 = vst.msk [vmem:[%s3432_s26] sm:$0xff] %vm1998_vm1, %v1966_v14  ;;  %v1967_v29 = vmax.f32 %v1843_v19, 0.0  ;;  %v3445_v49 = vadd.f32 %v2570_v9, %v3325_v51 }
 0x1a0   : > { %2002 = vst.msk [vmem:[%s3432_s26 + $0x18] sm:$0xff] %vm1998_vm1, %v1969_v15 }
 0x1a1   : > { %2000 = vst.msk [vmem:[%s3432_s26 + $0x8] sm:$0xff] %vm1998_vm1, %v1967_v29  ;;  %v2571_v3 = vpop.f32.mrb[84].mxu0  ;;  %v2641_v39 = vpop.f32.mrb[84].mxu1 }
 0x1a2   : > { %v1864_v33 = vadd.f32 %v2641_v39, %v3364_v59  ;;  %v2572_v25 = vpop.f32.mrb[85].mxu0  ;;  %v1855_v37 = vpop.f32.mrb[85].mxu1 }
 0x1a3   : > { %v2573_v38 = vadd.f32 %v2572_v25, %v2571_v3  ;;  %v1856_v42 = vadd.f32 %v1855_v37, %v3350_v26  ;;  %v2574_v5 = vpop.f32.mrb[86].mxu0  ;;  %v2642_v51 = vpop.f32.mrb[86].mxu1 }
 0x1a4   : > { %v1972_v45 = vmax.f32 %v1864_v33, 0.0  ;;  %v1867_v36 = vadd.f32 %v2642_v51, %v3369_v16  ;;  %v2575_v44 = vpop.f32.mrb[87].mxu0  ;;  %v1858_v43 = vpop.f32.mrb[87].mxu1 }
 0x1a5   : > { %v1970_v35 = vmax.f32 %v1856_v42, 0.0  ;;  %v2576_v61 = vadd.f32 %v2575_v44, %v2574_v5  ;;  %v1859_v48 = vadd.f32 %v1858_v43, %v3355_v23  ;;  %v1751_v59 = vadd.f32 %v2573_v38, %v3333_v8 }
 0x1a6   : > { %2005 = vst.msk [vmem:[%s3432_s26 + $0x30] sm:$0xff] %vm1998_vm1, %v1972_v45  ;;  %v1973_v10 = vmax.f32 %v1867_v36, 0.0 }
 0x1a7   : > { %2003 = vst.msk [vmem:[%s3432_s26 + $0x20] sm:$0xff] %vm1998_vm1, %v1970_v35  ;;  %v1971_v26 = vmax.f32 %v1859_v48, 0.0  ;;  %v1754_v7 = vadd.f32 %v2576_v61, %v3338_v1 }
 0x1a8   : > { %2006 = vst.msk [vmem:[%s3432_s26 + $0x38] sm:$0xff] %vm1998_vm1, %v1973_v10 }
 0x1a9   : > { %2004 = vst.msk [vmem:[%s3432_s26 + $0x28] sm:$0xff] %vm1998_vm1, %v1971_v26  ;;  %v2577_v16 = vpop.f32.mrb[88].mxu0  ;;  %v2645_v63 = vpop.f32.mrb[88].mxu1 }
 0x1aa   : > { %v1880_v6 = vadd.f32 %v2645_v63, %v3392_v11  ;;  %v2578_v23 = vpop.f32.mrb[89].mxu0  ;;  %v1871_v8 = vpop.f32.mrb[89].mxu1 }
 0x1ab   : > { %v2579_v32 = vadd.f32 %v2578_v23, %v2577_v16  ;;  %v1872_v17 = vadd.f32 %v1871_v8, %v3378_v54  ;;  %v2580_v18 = vpop.f32.mrb[90].mxu0  ;;  %v2646_v50 = vpop.f32.mrb[90].mxu1 }
 0x1ac   : > { %v1976_v1 = vmax.f32 %v1880_v6, 0.0  ;;  %v1883_v20 = vadd.f32 %v2646_v50, %v3397_v52  ;;  %v2581_v2 = vpop.f32.mrb[91].mxu0  ;;  %v1874_v57 = vpop.f32.mrb[91].mxu1 }
 0x1ad   : > { %v1974_v24 = vmax.f32 %v1872_v17, 0.0  ;;  %v2582_v60 = vadd.f32 %v2581_v2, %v2580_v18  ;;  %v1875_v13 = vadd.f32 %v1874_v57, %v3383_v40  ;;  %v1759_v11 = vadd.f32 %v2579_v32, %v3347_v22 }
 0x1ae   : > { %2009 = vst.msk [vmem:[%s3432_s26 + $0x50] sm:$0xff] %vm1998_vm1, %v1976_v1  ;;  %v1977_v56 = vmax.f32 %v1883_v20, 0.0 }
 0x1af   : > { %2007 = vst.msk [vmem:[%s3432_s26 + $0x40] sm:$0xff] %vm1998_vm1, %v1974_v24  ;;  %v1975_v54 = vmax.f32 %v1875_v13, 0.0  ;;  %v3475_v14 = vadd.f32 %v2582_v60, %v3352_v4 }
 0x1b0   : > { %2010 = vst.msk [vmem:[%s3432_s26 + $0x58] sm:$0xff] %vm1998_vm1, %v1977_v56 }
 0x1b1   : > { %2008 = vst.msk [vmem:[%s3432_s26 + $0x48] sm:$0xff] %vm1998_vm1, %v1975_v54  ;;  %v2583_v52 = vpop.f32.mrb[92].mxu0  ;;  %v2649_v9 = vpop.f32.mrb[92].mxu1 }
 0x1b2   : > { %v1896_v40 = vadd.f32 %v2649_v9, %v3420_v55  ;;  %v2584_v19 = vpop.f32.mrb[93].mxu0  ;;  %v1887_v22 = vpop.f32.mrb[93].mxu1 }
 0x1b3   : > { %v2585_v15 = vadd.f32 %v2584_v19, %v2583_v52  ;;  %v1888_v29 = vadd.f32 %v1887_v22, %v3406_v30  ;;  %v2586_v3 = vpop.f32.mrb[94].mxu0  ;;  %v2650_v4 = vpop.f32.mrb[94].mxu1 }
 0x1b4   : > { %v1980_v39 = vmax.f32 %v1896_v40, 0.0  ;;  %v1899_v33 = vadd.f32 %v2650_v4, %v3425_v12  ;;  %v2587_v25 = vpop.f32.mrb[95].mxu0  ;;  %v1890_v37 = vpop.f32.mrb[95].mxu1 }
 0x1b5   : > { %v1978_v38 = vmax.f32 %v1888_v29, 0.0  ;;  %v2588_v42 = vadd.f32 %v2587_v25, %v2586_v3  ;;  %v1891_v5 = vadd.f32 %v1890_v37, %v3411_v0  ;;  %v1767_v55 = vadd.f32 %v2585_v15, %v3361_v31 }
 0x1b6   : > { %2013 = vst.msk [vmem:[%s3432_s26 + $0x70] sm:$0xff] %vm1998_vm1, %v1980_v39  ;;  %v1981_v51 = vmax.f32 %v1899_v33, 0.0 }
 0x1b7   : > { %2011 = vst.msk [vmem:[%s3432_s26 + $0x60] sm:$0xff] %vm1998_vm1, %v1978_v38  ;;  %v1979_v30 = vmax.f32 %v1891_v5, 0.0  ;;  %v1770_v45 = vadd.f32 %v2588_v42, %v3366_v34 }
 0x1b8   : > { %2014 = vst.msk [vmem:[%s3432_s26 + $0x78] sm:$0xff] %vm1998_vm1, %v1981_v51 }
 0x1b9   : > { %2012 = vst.msk [vmem:[%s3432_s26 + $0x68] sm:$0xff] %vm1998_vm1, %v1979_v30  ;;  %v2589_v12 = vpop.f32.mrb[96].mxu0  ;;  %v2653_v36 = vpop.f32.mrb[96].mxu1 }
 0x1ba   : > { %v1912_v44 = vadd.f32 %v2653_v36, %v1751_v59  ;;  %v2590_v43 = vpop.f32.mrb[97].mxu0  ;;  %v1903_v0 = vpop.f32.mrb[97].mxu1 }
 0x1bb   : > { %v2591_v31 = vadd.f32 %v2590_v43, %v2589_v12  ;;  %v1904_v35 = vadd.f32 %v1903_v0, %v3438_v27  ;;  %v2592_v61 = vpop.f32.mrb[98].mxu0  ;;  %v2654_v48 = vpop.f32.mrb[98].mxu1 }
 0x1bc   : > { %v1984_v10 = vmax.f32 %v1912_v44, 0.0  ;;  %v1915_v34 = vadd.f32 %v2654_v48, %v1754_v7  ;;  %v2593_v26 = vpop.f32.mrb[99].mxu0  ;;  %v1906_v16 = vpop.f32.mrb[99].mxu1 }
 0x1bd   : > { %v1982_v63 = vmax.f32 %v1904_v35, 0.0  ;;  %v2594_v6 = vadd.f32 %v2593_v26, %v2592_v61  ;;  %v1907_v23 = vadd.f32 %v1906_v16, %v3445_v49  ;;  %v1775_v59 = vadd.f32 %v2591_v31, %v3375_v21 }
 0x1be   : > { %2017 = vst.msk [vmem:[%s3432_s26 + $0x90] sm:$0xff] %vm1998_vm1, %v1984_v10  ;;  %v1985_v8 = vmax.f32 %v1915_v34, 0.0 }
 0x1bf   : > { %2015 = vst.msk [vmem:[%s3432_s26 + $0x80] sm:$0xff] %vm1998_vm1, %v1982_v63  ;;  %v1983_v27 = vmax.f32 %v1907_v23, 0.0  ;;  %v1778_v32 = vadd.f32 %v2594_v6, %v3380_v41 }
 0x1c0   : > { %2018 = vst.msk [vmem:[%s3432_s26 + $0x98] sm:$0xff] %vm1998_vm1, %v1985_v8 }
 0x1c1   : > { %2016 = vst.msk [vmem:[%s3432_s26 + $0x88] sm:$0xff] %vm1998_vm1, %v1983_v27  ;;  %v2595_v7 = vpop.f32.mrb[100].mxu0  ;;  %v2657_v17 = vpop.f32.mrb[100].mxu1 }
 0x1c2   : > { %v1928_v18 = vadd.f32 %v2657_v17, %v1767_v55  ;;  %v2596_v50 = vpop.f32.mrb[101].mxu0  ;;  %v1919_v49 = vpop.f32.mrb[101].mxu1 }
 0x1c3   : > { %v2597_v21 = vadd.f32 %v2596_v50, %v2595_v7  ;;  %v1920_v1 = vadd.f32 %v1919_v49, %v1759_v11  ;;  %v2598_v20 = vpop.f32.mrb[102].mxu0  ;;  %v2658_v2 = vpop.f32.mrb[102].mxu1 }
 0x1c4   : > { %v1988_v57 = vmax.f32 %v1928_v18, 0.0  ;;  %v1931_v24 = vadd.f32 %v2658_v2, %v1770_v45  ;;  %v2599_v41 = vpop.f32.mrb[103].mxu0  ;;  %v1922_v60 = vpop.f32.mrb[103].mxu1 }
 0x1c5   : > { %v1986_v13 = vmax.f32 %v1920_v1, 0.0  ;;  %v2600_v56 = vadd.f32 %v2599_v41, %v2598_v20  ;;  %v1923_v54 = vadd.f32 %v1922_v60, %v3475_v14  ;;  %v1783_v52 = vadd.f32 %v2597_v21, %v3389_v47 }
 0x1c6   : > { %2021 = vst.msk [vmem:[%s3432_s26 + $0xb0] sm:$0xff] %vm1998_vm1, %v1988_v57  ;;  %v1989_v9 = vmax.f32 %v1931_v24, 0.0 }
 0x1c7   : > { %2019 = vst.msk [vmem:[%s3432_s26 + $0xa0] sm:$0xff] %vm1998_vm1, %v1986_v13  ;;  %v1987_v11 = vmax.f32 %v1923_v54, 0.0  ;;  %v1786_v40 = vadd.f32 %v2600_v56, %v3394_v58 }
 0x1c8   : > { %2022 = vst.msk [vmem:[%s3432_s26 + $0xb8] sm:$0xff] %vm1998_vm1, %v1989_v9 }
 0x1c9   : > { %2020 = vst.msk [vmem:[%s3432_s26 + $0xa8] sm:$0xff] %vm1998_vm1, %v1987_v11  ;;  %v2601_v19 = vpop.f32.mrb[104].mxu0  ;;  %v2661_v22 = vpop.f32.mrb[104].mxu1 }
 0x1ca   : > { %v1944_v15 = vadd.f32 %v2661_v22, %v1783_v52  ;;  %v2602_v29 = vpop.f32.mrb[105].mxu0  ;;  %v1935_v14 = vpop.f32.mrb[105].mxu1 }
 0x1cb   : > { %v2603_v47 = vadd.f32 %v2602_v29, %v2601_v19  ;;  %v1936_v3 = vadd.f32 %v1935_v14, %v1775_v59  ;;  %v2604_v4 = vpop.f32.mrb[106].mxu0  ;;  %v2662_v39 = vpop.f32.mrb[106].mxu1 }
 0x1cc   : > { %v1992_v33 = vmax.f32 %v1944_v15, 0.0  ;;  %v1947_v25 = vadd.f32 %v2662_v39, %v1786_v40  ;;  %v2605_v58 = vpop.f32.mrb[107].mxu0  ;;  %v1938_v37 = vpop.f32.mrb[107].mxu1 }
 0x1cd   : > { %v1990_v38 = vmax.f32 %v1936_v3, 0.0  ;;  %v2606_v42 = vadd.f32 %v2605_v58, %v2604_v4  ;;  %v1939_v5 = vadd.f32 %v1938_v37, %v1778_v32  ;;  %v1791_v55 = vadd.f32 %v2603_v47, %v3403_v62 }
 0x1ce   : > { %2025 = vst.msk [vmem:[%s3432_s26 + $0xd0] sm:$0xff] %vm1998_vm1, %v1992_v33  ;;  %v1993_v51 = vmax.f32 %v1947_v25, 0.0 }
 0x1cf   : > { %2023 = vst.msk [vmem:[%s3432_s26 + $0xc0] sm:$0xff] %vm1998_vm1, %v1990_v38  ;;  %v1991_v30 = vmax.f32 %v1939_v5, 0.0  ;;  %v1794_v45 = vadd.f32 %v2606_v42, %v3408_v28 }
 0x1d0   : > { %2026 = vst.msk [vmem:[%s3432_s26 + $0xd8] sm:$0xff] %vm1998_vm1, %v1993_v51 }
 0x1d1   : > { %2024 = vst.msk [vmem:[%s3432_s26 + $0xc8] sm:$0xff] %vm1998_vm1, %v1991_v30  ;;  %v2607_v12 = vpop.f32.mrb[108].mxu0  ;;  %v2665_v36 = vpop.f32.mrb[108].mxu1 }
 0x1d2   : > { %v2608_v44 = vpop.f32.mrb[109].mxu0  ;;  %v1951_v43 = vpop.f32.mrb[109].mxu1 }
 0x1d3   : > { %v2609_v0 = vadd.f32 %v2608_v44, %v2607_v12  ;;  %v1952_v62 = vadd.f32 %v1951_v43, %v1791_v55  ;;  %v2610_v31 = vpop.f32.mrb[110].mxu0  ;;  %v2666_v35 = vpop.f32.mrb[110].mxu1 }
 0x1d4   : > { %v2611_v61 = vpop.f32.mrb[111].mxu0  ;;  %v1954_v48 = vpop.f32.mrb[111].mxu1 }
 0x1d5   : > { %v1799_v28 = vadd.f32 %v2609_v0, %v3417_v46  ;;  %v1994_v10 = vmax.f32 %v1952_v62, 0.0  ;;  %v2612_v34 = vadd.f32 %v2611_v61, %v2610_v31  ;;  %v1955_v26 = vadd.f32 %v1954_v48, %v1794_v45 }
 0x1d7   : > { %v1960_v16 = vadd.f32 %v2665_v36, %v1799_v28  ;;  %2027 = vst.msk [vmem:[%s3432_s26 + $0xe0] sm:$0xff] %vm1998_vm1, %v1994_v10  ;;  %v1802_v63 = vadd.f32 %v2612_v34, %v3422_v53  ;;  %v1995_v6 = vmax.f32 %v1955_v26, 0.0 }
 0x1d9   : > { %v1996_v23 = vmax.f32 %v1960_v16, 0.0  ;;  %v1963_v59 = vadd.f32 %v2666_v35, %v1802_v63  ;;  %2028 = vst.msk [vmem:[%s3432_s26 + $0xe8] sm:$0xff] %vm1998_vm1, %v1995_v6 }
 0x1db   : > { %2029 = vst.msk [vmem:[%s3432_s26 + $0xf0] sm:$0xff] %vm1998_vm1, %v1996_v23  ;;  %v1997_v8 = vmax.f32 %v1963_v59, 0.0 }
 0x1dd   : > { %2030 = vst.msk [vmem:[%s3432_s26 + $0xf8] sm:$0xff] %vm1998_vm1, %v1997_v8 }
 0x1de PF: > { %s13_s12 = sadd.s32 1, %s2908_s12  }
 0x1df   : > { %p10_p4 = scmp.ge.s32.totalorder %s13_s12, 4  }
 0x1e1   :  { %12 = sbr.rel (!%p10_p4) target bundleno = 1 (0x1), region = 62 }

// kernel: forward.8
= control target key start
LH: loop header
LB: loop body
LE: loop exit
PB: predicated region body
PF: predicated region fallthrough
CT: control target
= control target key end

     0   :  { %vm161_vm0 = vcmask 522240   ;;  %s496_s0 = inlined_call_operand.vmem [shape: f32[2,14,14,64], index: 0, kind: input, shape index: {}]   ;;  %s497_s1 = inlined_call_operand.vmem [shape: f32[2,7,7,64], index: 1, kind: output, shape index: {}]  }
   0x1   :  { %v8_v0 = vld [vmem:[%s496_s0] ss:$2 sm:$0x7f]  ;;  %v220_v1 = vld [vmem:[%s496_s0 + $0x1] ss:$2 sm:$0x7f] }
   0x2   :  { %v234_v2 = vld [vmem:[%s496_s0 + $0x10] ss:$2 sm:$0x7f]  ;;  %v248_v3 = vld [vmem:[%s496_s0 + $0x11] ss:$2 sm:$0x7f]  ;;  %v119_v4 = vmax.f32 %v8_v0, %v220_v1 }
   0x3   :  { %v133_v5 = vmax.f32 %v234_v2, %v248_v3  ;;  %v207_v6 = vld [vmem:[%s496_s0 + $0x20] ss:$2 sm:$0x7f]  ;;  %v221_v7 = vld [vmem:[%s496_s0 + $0x21] ss:$2 sm:$0x7f] }
   0x4   :  { %v235_v8 = vld [vmem:[%s496_s0 + $0x30] ss:$2 sm:$0x7f]  ;;  %v249_v9 = vld [vmem:[%s496_s0 + $0x31] ss:$2 sm:$0x7f]  ;;  %v120_v10 = vmax.f32 %v207_v6, %v221_v7 }
   0x5   :  { %v147_v11 = vmax.f32 %v119_v4, %v133_v5  ;;  %v134_v12 = vmax.f32 %v235_v8, %v249_v9  ;;  %v208_v13 = vld [vmem:[%s496_s0 + $0x40] ss:$2 sm:$0x7f]  ;;  %v222_v14 = vld [vmem:[%s496_s0 + $0x41] ss:$2 sm:$0x7f] }
   0x6   :  { %v236_v15 = vld [vmem:[%s496_s0 + $0x50] ss:$2 sm:$0x7f]  ;;  %v250_v16 = vld [vmem:[%s496_s0 + $0x51] ss:$2 sm:$0x7f]  ;;  %v121_v17 = vmax.f32 %v208_v13, %v222_v14 }
   0x7   :  { %162 = vst.msk [vmem:[%s497_s1] sm:$0x7f] %vm161_vm0, %v147_v11  ;;  %v148_v18 = vmax.f32 %v120_v10, %v134_v12  ;;  %v135_v19 = vmax.f32 %v236_v15, %v250_v16  ;;  %v209_v20 = vld [vmem:[%s496_s0 + $0x60] ss:$2 sm:$0x7f] }
   0x8   :  { %v223_v21 = vld [vmem:[%s496_s0 + $0x61] ss:$2 sm:$0x7f]  ;;  %v237_v22 = vld [vmem:[%s496_s0 + $0x70] ss:$2 sm:$0x7f] }
   0x9   :  { %v251_v23 = vld [vmem:[%s496_s0 + $0x71] ss:$2 sm:$0x7f]  ;;  %v122_v24 = vmax.f32 %v209_v20, %v223_v21  ;;  %163 = vst.msk [vmem:[%s497_s1 + $0x8] sm:$0x7f] %vm161_vm0, %v148_v18  ;;  %v149_v25 = vmax.f32 %v121_v17, %v135_v19 }
   0xa   :  { %v136_v26 = vmax.f32 %v237_v22, %v251_v23  ;;  %v210_v27 = vld [vmem:[%s496_s0 + $0x80] ss:$2 sm:$0x7f]  ;;  %v224_v28 = vld [vmem:[%s496_s0 + $0x81] ss:$2 sm:$0x7f] }
   0xb   :  { %v238_v29 = vld [vmem:[%s496_s0 + $0x90] ss:$2 sm:$0x7f]  ;;  %v252_v30 = vld [vmem:[%s496_s0 + $0x91] ss:$2 sm:$0x7f]  ;;  %v123_v31 = vmax.f32 %v210_v27, %v224_v28 }
   0xc   :  { %164 = vst.msk [vmem:[%s497_s1 + $0x10] sm:$0x7f] %vm161_vm0, %v149_v25  ;;  %v150_v32 = vmax.f32 %v122_v24, %v136_v26  ;;  %v137_v33 = vmax.f32 %v238_v29, %v252_v30  ;;  %v211_v34 = vld [vmem:[%s496_s0 + $0xa0] ss:$2 sm:$0x7f] }
   0xd   :  { %v225_v35 = vld [vmem:[%s496_s0 + $0xa1] ss:$2 sm:$0x7f]  ;;  %v239_v36 = vld [vmem:[%s496_s0 + $0xb0] ss:$2 sm:$0x7f] }
   0xe   :  { %v253_v37 = vld [vmem:[%s496_s0 + $0xb1] ss:$2 sm:$0x7f]  ;;  %v124_v38 = vmax.f32 %v211_v34, %v225_v35  ;;  %165 = vst.msk [vmem:[%s497_s1 + $0x18] sm:$0x7f] %vm161_vm0, %v150_v32  ;;  %v151_v39 = vmax.f32 %v123_v31, %v137_v33 }
   0xf   :  { %v138_v40 = vmax.f32 %v239_v36, %v253_v37  ;;  %v212_v41 = vld [vmem:[%s496_s0 + $0xc0] ss:$2 sm:$0x7f]  ;;  %v226_v42 = vld [vmem:[%s496_s0 + $0xc1] ss:$2 sm:$0x7f] }
  0x10   :  { %v240_v43 = vld [vmem:[%s496_s0 + $0xd0] ss:$2 sm:$0x7f]  ;;  %v254_v44 = vld [vmem:[%s496_s0 + $0xd1] ss:$2 sm:$0x7f]  ;;  %v125_v45 = vmax.f32 %v212_v41, %v226_v42 }
  0x11   :  { %166 = vst.msk [vmem:[%s497_s1 + $0x20] sm:$0x7f] %vm161_vm0, %v151_v39  ;;  %v152_v46 = vmax.f32 %v124_v38, %v138_v40  ;;  %v139_v47 = vmax.f32 %v240_v43, %v254_v44  ;;  %v213_v48 = vld [vmem:[%s496_s0 + $0xe0] ss:$2 sm:$0x7f] }
  0x12   :  { %v227_v49 = vld [vmem:[%s496_s0 + $0xe1] ss:$2 sm:$0x7f]  ;;  %v241_v50 = vld [vmem:[%s496_s0 + $0xf0] ss:$2 sm:$0x7f] }
  0x13   :  { %v255_v51 = vld [vmem:[%s496_s0 + $0xf1] ss:$2 sm:$0x7f]  ;;  %v126_v52 = vmax.f32 %v213_v48, %v227_v49  ;;  %167 = vst.msk [vmem:[%s497_s1 + $0x28] sm:$0x7f] %vm161_vm0, %v152_v46  ;;  %v153_v53 = vmax.f32 %v125_v45, %v139_v47 }
  0x14   :  { %v140_v54 = vmax.f32 %v241_v50, %v255_v51  ;;  %v214_v55 = vld [vmem:[%s496_s0 + $0x100] ss:$2 sm:$0x7f]  ;;  %v228_v56 = vld [vmem:[%s496_s0 + $0x101] ss:$2 sm:$0x7f] }
  0x15   :  { %v242_v57 = vld [vmem:[%s496_s0 + $0x110] ss:$2 sm:$0x7f]  ;;  %v256_v58 = vld [vmem:[%s496_s0 + $0x111] ss:$2 sm:$0x7f]  ;;  %v127_v59 = vmax.f32 %v214_v55, %v228_v56 }
  0x16   :  { %168 = vst.msk [vmem:[%s497_s1 + $0x30] sm:$0x7f] %vm161_vm0, %v153_v53  ;;  %v154_v60 = vmax.f32 %v126_v52, %v140_v54  ;;  %v141_v61 = vmax.f32 %v242_v57, %v256_v58  ;;  %v215_v62 = vld [vmem:[%s496_s0 + $0x120] ss:$2 sm:$0x7f] }
  0x17   :  { %v229_v63 = vld [vmem:[%s496_s0 + $0x121] ss:$2 sm:$0x7f]  ;;  %v243_v0 = vld [vmem:[%s496_s0 + $0x130] ss:$2 sm:$0x7f] }
  0x18   :  { %v257_v1 = vld [vmem:[%s496_s0 + $0x131] ss:$2 sm:$0x7f]  ;;  %v128_v2 = vmax.f32 %v215_v62, %v229_v63  ;;  %169 = vst.msk [vmem:[%s497_s1 + $0x38] sm:$0x7f] %vm161_vm0, %v154_v60  ;;  %v155_v3 = vmax.f32 %v127_v59, %v141_v61 }
  0x19   :  { %v142_v4 = vmax.f32 %v243_v0, %v257_v1  ;;  %v216_v5 = vld [vmem:[%s496_s0 + $0x140] ss:$2 sm:$0x7f]  ;;  %v230_v6 = vld [vmem:[%s496_s0 + $0x141] ss:$2 sm:$0x7f] }
  0x1a   :  { %v244_v7 = vld [vmem:[%s496_s0 + $0x150] ss:$2 sm:$0x7f]  ;;  %v258_v8 = vld [vmem:[%s496_s0 + $0x151] ss:$2 sm:$0x7f]  ;;  %v129_v9 = vmax.f32 %v216_v5, %v230_v6 }
  0x1b   :  { %170 = vst.msk [vmem:[%s497_s1 + $0x40] sm:$0x7f] %vm161_vm0, %v155_v3  ;;  %v156_v10 = vmax.f32 %v128_v2, %v142_v4  ;;  %v143_v11 = vmax.f32 %v244_v7, %v258_v8  ;;  %v217_v12 = vld [vmem:[%s496_s0 + $0x160] ss:$2 sm:$0x7f] }
  0x1c   :  { %v231_v13 = vld [vmem:[%s496_s0 + $0x161] ss:$2 sm:$0x7f]  ;;  %v245_v14 = vld [vmem:[%s496_s0 + $0x170] ss:$2 sm:$0x7f] }
  0x1d   :  { %v259_v15 = vld [vmem:[%s496_s0 + $0x171] ss:$2 sm:$0x7f]  ;;  %v130_v16 = vmax.f32 %v217_v12, %v231_v13  ;;  %171 = vst.msk [vmem:[%s497_s1 + $0x48] sm:$0x7f] %vm161_vm0, %v156_v10  ;;  %v157_v17 = vmax.f32 %v129_v9, %v143_v11 }
  0x1e   :  { %v144_v18 = vmax.f32 %v245_v14, %v259_v15  ;;  %v218_v19 = vld [vmem:[%s496_s0 + $0x180] ss:$2 sm:$0x7f]  ;;  %v232_v20 = vld [vmem:[%s496_s0 + $0x181] ss:$2 sm:$0x7f] }
  0x1f   :  { %v246_v21 = vld [vmem:[%s496_s0 + $0x190] ss:$2 sm:$0x7f]  ;;  %v260_v22 = vld [vmem:[%s496_s0 + $0x191] ss:$2 sm:$0x7f]  ;;  %v131_v23 = vmax.f32 %v218_v19, %v232_v20 }
  0x20   :  { %172 = vst.msk [vmem:[%s497_s1 + $0x50] sm:$0x7f] %vm161_vm0, %v157_v17  ;;  %v158_v24 = vmax.f32 %v130_v16, %v144_v18  ;;  %v145_v25 = vmax.f32 %v246_v21, %v260_v22  ;;  %v219_v26 = vld [vmem:[%s496_s0 + $0x1a0] ss:$2 sm:$0x7f] }
  0x21   :  { %v233_v27 = vld [vmem:[%s496_s0 + $0x1a1] ss:$2 sm:$0x7f]  ;;  %v247_v28 = vld [vmem:[%s496_s0 + $0x1b0] ss:$2 sm:$0x7f] }
  0x22   :  { %v261_v29 = vld [vmem:[%s496_s0 + $0x1b1] ss:$2 sm:$0x7f]  ;;  %v132_v30 = vmax.f32 %v219_v26, %v233_v27  ;;  %173 = vst.msk [vmem:[%s497_s1 + $0x58] sm:$0x7f] %vm161_vm0, %v158_v24  ;;  %v159_v31 = vmax.f32 %v131_v23, %v145_v25 }
  0x23   :  { %v146_v32 = vmax.f32 %v247_v28, %v261_v29 }
  0x24   :  { %174 = vst.msk [vmem:[%s497_s1 + $0x60] sm:$0x7f] %vm161_vm0, %v159_v31 }
  0x25   :  { %v160_v33 = vmax.f32 %v132_v30, %v146_v32 }
  0x27   :  { %175 = vst.msk [vmem:[%s497_s1 + $0x68] sm:$0x7f] %vm161_vm0, %v160_v33 }

// kernel: forward.9
= control target key start
LH: loop header
LB: loop body
LE: loop exit
PB: predicated region body
PF: predicated region fallthrough
CT: control target
= control target key end

     0   :  { %10 = vsyncpa [#allocation5], 0  ;;  %s6444_s18 = smov 0   ;;  %s6446_s19 = smov 0   ;;  %s7857_s0 = inlined_call_operand.vmem [shape: bf16[2,3136], index: 0, kind: input, shape index: {}]   ;;  %s7858_s1 = inlined_call_operand.vmem [shape: bf16[3136,1024], index: 1, kind: input, shape index: {}]   ;;  %s7859_s2 = inlined_call_operand.vmem [shape: f32[1,1024], index: 2, kind: input, shape index: {}]   ;;  %s7860_s3 = inlined_call_operand.vmem [shape: bf16[1024,128], index: 3, kind: input, shape index: {}]   ;;  %s7861_s4 = inlined_call_operand.vmem [shape: f32[1,128], index: 4, kind: input, shape index: {}]   ;;  %s7862_s5 = inlined_call_operand.hbm [shape: f32[2,128], index: 5, kind: output, shape index: {}]  }
   0x1   :  { %s6448_s20 = smov 0  }
   0x2 LB: > { %s6460_s21 = sadd.s32 4294967295, %s6408_s20   ;;  %s6463_s22 = sadd.s32 1, %s6408_s20   ;;  %s6408_s20 = sphi %s6448_s20, %s7865_s20   ;;  %s6404_s19 = sphi %s6446_s19, %s7864_s19   ;;  %s6400_s18 = sphi %s6444_s18, %s7863_s18  }
   0x3   : > { %s41_s23 = ssub.s32 %s6408_s20, %s6463_s22  ;;  %s44_s24 = sadd.s32 1, %s6404_s19 }
   0x4   : > { %p42_p0 = scmp.eq.s32.totalorder %s41_s23, 0  ;;  %p51_p1 = scmp.ne.s32.totalorder %s6404_s19, %s6400_s18 }
   0x5   : > { %p52_p2 = scmp.eq.s32.totalorder %s6408_s20, 0  ;;  %p5216_p4 = scmp.ge.s32.totalorder %s6408_s20, 4 }
   0x6   : > { %s6472_s25 = scalar_select %p42_p0, %s6404_s19, %s44_s24  }
   0x7   : > { %p53_p3 = por %p52_p2, %p51_p1  ;;  %177 = sbr.rel (%p5216_p4) target bundleno = 410 (0x19a), region = 24 }
   0xe   : > { %180 = sbr.rel (!%p53_p3) target bundleno = 410 (0x19a), region = 28  ;;  %s182_s26 = sand.u32 (%p53_p3), 1, %s6404_s19  }
   0xf   : > { %s5640_s27 = sshll.u32 (%p53_p3), %s6408_s20, 3  ;;  %s5711_s28 = smul.u32 (%p53_p3), 3136, %s182_s26 }
  0x10   : > { %s6480_s6 = scalar_lea.vmem (%p53_p3), %s7858_s1, %s5640_s27 }
  0x11   : > { %v997_v0 = vld [vmem:[%s6480_s6] sm:$0xff] (%p53_p3)  ;;  %s6488_s7 = scalar_lea.vmem (%p53_p3), [#allocation3], %s5711_s28 }
  0x12   : > { %v999_v1 = vld [vmem:[%s6480_s6 + $0x20] sm:$0xff] (%p53_p3)  ;;  %998 = vst [vmem:[%s6488_s7] sm:$0xff] (%p53_p3), %v997_v0 }
  0x13   : > { %v1001_v2 = vld [vmem:[%s6480_s6 + $0x40] sm:$0xff] (%p53_p3)  ;;  %1000 = vst [vmem:[%s6488_s7 + $0x8] sm:$0xff] (%p53_p3), %v999_v1 }
  0x14   : > { %v1003_v3 = vld [vmem:[%s6480_s6 + $0x60] sm:$0xff] (%p53_p3)  ;;  %1002 = vst [vmem:[%s6488_s7 + $0x10] sm:$0xff] (%p53_p3), %v1001_v2 }
  0x15   : > { %v1005_v4 = vld [vmem:[%s6480_s6 + $0x80] sm:$0xff]  ;;  %1004 = vst [vmem:[%s6488_s7 + $0x18] sm:$0xff] %v1003_v3 }
  0x16   : > { %v1007_v5 = vld [vmem:[%s6480_s6 + $0xa0] sm:$0xff]  ;;  %1006 = vst [vmem:[%s6488_s7 + $0x20] sm:$0xff] %v1005_v4 }
  0x17   : > { %1008 = vst [vmem:[%s6488_s7 + $0x28] sm:$0xff] %v1007_v5  ;;  %v1009_v6 = vld [vmem:[%s6480_s6 + $0xc0] sm:$0xff] }
  0x18   : > { %v1011_v7 = vld [vmem:[%s6480_s6 + $0xe0] sm:$0xff]  ;;  %1010 = vst [vmem:[%s6488_s7 + $0x30] sm:$0xff] %v1009_v6 }
  0x19   : > { %v1013_v8 = vld [vmem:[%s6480_s6 + $0x100] sm:$0xff]  ;;  %1012 = vst [vmem:[%s6488_s7 + $0x38] sm:$0xff] %v1011_v7 }
  0x1a   : > { %1014 = vst [vmem:[%s6488_s7 + $0x40] sm:$0xff] %v1013_v8  ;;  %v1015_v9 = vld [vmem:[%s6480_s6 + $0x120] sm:$0xff] }
  0x1b   : > { %v1017_v10 = vld [vmem:[%s6480_s6 + $0x140] sm:$0xff]  ;;  %1016 = vst [vmem:[%s6488_s7 + $0x48] sm:$0xff] %v1015_v9 }
  0x1c   : > { %v1019_v11 = vld [vmem:[%s6480_s6 + $0x160] sm:$0xff]  ;;  %1018 = vst [vmem:[%s6488_s7 + $0x50] sm:$0xff] %v1017_v10 }
  0x1d   : > { %1020 = vst [vmem:[%s6488_s7 + $0x58] sm:$0xff] %v1019_v11  ;;  %v1021_v12 = vld [vmem:[%s6480_s6 + $0x180] sm:$0xff] }
  0x1e   : > { %v1023_v13 = vld [vmem:[%s6480_s6 + $0x1a0] sm:$0xff]  ;;  %1022 = vst [vmem:[%s6488_s7 + $0x60] sm:$0xff] %v1021_v12 }
  0x1f   : > { %v1025_v14 = vld [vmem:[%s6480_s6 + $0x1c0] sm:$0xff]  ;;  %1024 = vst [vmem:[%s6488_s7 + $0x68] sm:$0xff] %v1023_v13 }
  0x20   : > { %1026 = vst [vmem:[%s6488_s7 + $0x70] sm:$0xff] %v1025_v14  ;;  %v1027_v15 = vld [vmem:[%s6480_s6 + $0x1e0] sm:$0xff] }
  0x21   : > { %v1029_v16 = vld [vmem:[%s6480_s6 + $0x200] sm:$0xff]  ;;  %1028 = vst [vmem:[%s6488_s7 + $0x78] sm:$0xff] %v1027_v15 }
  0x22   : > { %v1031_v17 = vld [vmem:[%s6480_s6 + $0x220] sm:$0xff]  ;;  %1030 = vst [vmem:[%s6488_s7 + $0x80] sm:$0xff] %v1029_v16 }
  0x23   : > { %1032 = vst [vmem:[%s6488_s7 + $0x88] sm:$0xff] %v1031_v17  ;;  %v1033_v18 = vld [vmem:[%s6480_s6 + $0x240] sm:$0xff] }
  0x24   : > { %v1035_v19 = vld [vmem:[%s6480_s6 + $0x260] sm:$0xff]  ;;  %1034 = vst [vmem:[%s6488_s7 + $0x90] sm:$0xff] %v1033_v18 }
  0x25   : > { %v1037_v20 = vld [vmem:[%s6480_s6 + $0x280] sm:$0xff]  ;;  %1036 = vst [vmem:[%s6488_s7 + $0x98] sm:$0xff] %v1035_v19 }
  0x26   : > { %1038 = vst [vmem:[%s6488_s7 + $0xa0] sm:$0xff] %v1037_v20  ;;  %v1039_v21 = vld [vmem:[%s6480_s6 + $0x2a0] sm:$0xff] }
  0x27   : > { %v1041_v22 = vld [vmem:[%s6480_s6 + $0x2c0] sm:$0xff]  ;;  %1040 = vst [vmem:[%s6488_s7 + $0xa8] sm:$0xff] %v1039_v21 }
  0x28   : > { %v1043_v23 = vld [vmem:[%s6480_s6 + $0x2e0] sm:$0xff]  ;;  %1042 = vst [vmem:[%s6488_s7 + $0xb0] sm:$0xff] %v1041_v22 }
  0x29   : > { %1044 = vst [vmem:[%s6488_s7 + $0xb8] sm:$0xff] %v1043_v23  ;;  %v1045_v24 = vld [vmem:[%s6480_s6 + $0x300] sm:$0xff] }
  0x2a   : > { %v1047_v25 = vld [vmem:[%s6480_s6 + $0x320] sm:$0xff]  ;;  %1046 = vst [vmem:[%s6488_s7 + $0xc0] sm:$0xff] %v1045_v24 }
  0x2b   : > { %v1049_v26 = vld [vmem:[%s6480_s6 + $0x340] sm:$0xff]  ;;  %1048 = vst [vmem:[%s6488_s7 + $0xc8] sm:$0xff] %v1047_v25 }
  0x2c   : > { %1050 = vst [vmem:[%s6488_s7 + $0xd0] sm:$0xff] %v1049_v26  ;;  %v1051_v27 = vld [vmem:[%s6480_s6 + $0x360] sm:$0xff] }
  0x2d   : > { %v1053_v28 = vld [vmem:[%s6480_s6 + $0x380] sm:$0xff]  ;;  %1052 = vst [vmem:[%s6488_s7 + $0xd8] sm:$0xff] %v1051_v27 }
  0x2e   : > { %v1055_v29 = vld [vmem:[%s6480_s6 + $0x3a0] sm:$0xff]  ;;  %1054 = vst [vmem:[%s6488_s7 + $0xe0] sm:$0xff] %v1053_v28 }
  0x2f   : > { %1056 = vst [vmem:[%s6488_s7 + $0xe8] sm:$0xff] %v1055_v29  ;;  %v1057_v30 = vld [vmem:[%s6480_s6 + $0x3c0] sm:$0xff] }
  0x30   : > { %v1059_v31 = vld [vmem:[%s6480_s6 + $0x3e0] sm:$0xff]  ;;  %1058 = vst [vmem:[%s6488_s7 + $0xf0] sm:$0xff] %v1057_v30 }
  0x31   : > { %v1061_v32 = vld [vmem:[%s6480_s6 + $0x400] sm:$0xff]  ;;  %1060 = vst [vmem:[%s6488_s7 + $0xf8] sm:$0xff] %v1059_v31 }
  0x32   : > { %1062 = vst [vmem:[%s6488_s7 + $0x100] sm:$0xff] %v1061_v32  ;;  %v1063_v33 = vld [vmem:[%s6480_s6 + $0x420] sm:$0xff] }
  0x33   : > { %v1065_v34 = vld [vmem:[%s6480_s6 + $0x440] sm:$0xff]  ;;  %1064 = vst [vmem:[%s6488_s7 + $0x108] sm:$0xff] %v1063_v33 }
  0x34   : > { %v1067_v35 = vld [vmem:[%s6480_s6 + $0x460] sm:$0xff]  ;;  %1066 = vst [vmem:[%s6488_s7 + $0x110] sm:$0xff] %v1065_v34 }
  0x35   : > { %1068 = vst [vmem:[%s6488_s7 + $0x118] sm:$0xff] %v1067_v35  ;;  %v1069_v36 = vld [vmem:[%s6480_s6 + $0x480] sm:$0xff] }
  0x36   : > { %v1071_v37 = vld [vmem:[%s6480_s6 + $0x4a0] sm:$0xff]  ;;  %1070 = vst [vmem:[%s6488_s7 + $0x120] sm:$0xff] %v1069_v36 }
  0x37   : > { %v1073_v38 = vld [vmem:[%s6480_s6 + $0x4c0] sm:$0xff]  ;;  %1072 = vst [vmem:[%s6488_s7 + $0x128] sm:$0xff] %v1071_v37 }
  0x38   : > { %1074 = vst [vmem:[%s6488_s7 + $0x130] sm:$0xff] %v1073_v38  ;;  %v1075_v39 = vld [vmem:[%s6480_s6 + $0x4e0] sm:$0xff] }
  0x39   : > { %v1077_v40 = vld [vmem:[%s6480_s6 + $0x500] sm:$0xff]  ;;  %1076 = vst [vmem:[%s6488_s7 + $0x138] sm:$0xff] %v1075_v39 }
  0x3a   : > { %v1079_v41 = vld [vmem:[%s6480_s6 + $0x520] sm:$0xff]  ;;  %1078 = vst [vmem:[%s6488_s7 + $0x140] sm:$0xff] %v1077_v40 }
  0x3b   : > { %1080 = vst [vmem:[%s6488_s7 + $0x148] sm:$0xff] %v1079_v41  ;;  %v1081_v42 = vld [vmem:[%s6480_s6 + $0x540] sm:$0xff] }
  0x3c   : > { %v1083_v43 = vld [vmem:[%s6480_s6 + $0x560] sm:$0xff]  ;;  %1082 = vst [vmem:[%s6488_s7 + $0x150] sm:$0xff] %v1081_v42 }
  0x3d   : > { %v1085_v44 = vld [vmem:[%s6480_s6 + $0x580] sm:$0xff]  ;;  %1084 = vst [vmem:[%s6488_s7 + $0x158] sm:$0xff] %v1083_v43 }
  0x3e   : > { %1086 = vst [vmem:[%s6488_s7 + $0x160] sm:$0xff] %v1085_v44  ;;  %v1087_v45 = vld [vmem:[%s6480_s6 + $0x5a0] sm:$0xff] }
  0x3f   : > { %v1089_v46 = vld [vmem:[%s6480_s6 + $0x5c0] sm:$0xff]  ;;  %1088 = vst [vmem:[%s6488_s7 + $0x168] sm:$0xff] %v1087_v45 }
  0x40   : > { %v1091_v47 = vld [vmem:[%s6480_s6 + $0x5e0] sm:$0xff]  ;;  %1090 = vst [vmem:[%s6488_s7 + $0x170] sm:$0xff] %v1089_v46 }
  0x41   : > { %1092 = vst [vmem:[%s6488_s7 + $0x178] sm:$0xff] %v1091_v47  ;;  %v1093_v48 = vld [vmem:[%s6480_s6 + $0x600] sm:$0xff] }
  0x42   : > { %v1095_v49 = vld [vmem:[%s6480_s6 + $0x620] sm:$0xff]  ;;  %1094 = vst [vmem:[%s6488_s7 + $0x180] sm:$0xff] %v1093_v48 }
  0x43   : > { %v1097_v50 = vld [vmem:[%s6480_s6 + $0x640] sm:$0xff]  ;;  %1096 = vst [vmem:[%s6488_s7 + $0x188] sm:$0xff] %v1095_v49 }
  0x44   : > { %1098 = vst [vmem:[%s6488_s7 + $0x190] sm:$0xff] %v1097_v50  ;;  %v1099_v51 = vld [vmem:[%s6480_s6 + $0x660] sm:$0xff] }
  0x45   : > { %v1101_v52 = vld [vmem:[%s6480_s6 + $0x680] sm:$0xff]  ;;  %1100 = vst [vmem:[%s6488_s7 + $0x198] sm:$0xff] %v1099_v51 }
  0x46   : > { %v1103_v53 = vld [vmem:[%s6480_s6 + $0x6a0] sm:$0xff]  ;;  %1102 = vst [vmem:[%s6488_s7 + $0x1a0] sm:$0xff] %v1101_v52 }
  0x47   : > { %1104 = vst [vmem:[%s6488_s7 + $0x1a8] sm:$0xff] %v1103_v53  ;;  %v1105_v54 = vld [vmem:[%s6480_s6 + $0x6c0] sm:$0xff] }
  0x48   : > { %v1107_v55 = vld [vmem:[%s6480_s6 + $0x6e0] sm:$0xff]  ;;  %1106 = vst [vmem:[%s6488_s7 + $0x1b0] sm:$0xff] %v1105_v54 }
  0x49   : > { %v1109_v56 = vld [vmem:[%s6480_s6 + $0x700] sm:$0xff]  ;;  %1108 = vst [vmem:[%s6488_s7 + $0x1b8] sm:$0xff] %v1107_v55 }
  0x4a   : > { %1110 = vst [vmem:[%s6488_s7 + $0x1c0] sm:$0xff] %v1109_v56  ;;  %v1111_v57 = vld [vmem:[%s6480_s6 + $0x720] sm:$0xff] }
  0x4b   : > { %v1113_v58 = vld [vmem:[%s6480_s6 + $0x740] sm:$0xff]  ;;  %1112 = vst [vmem:[%s6488_s7 + $0x1c8] sm:$0xff] %v1111_v57 }
  0x4c   : > { %v1115_v59 = vld [vmem:[%s6480_s6 + $0x760] sm:$0xff]  ;;  %1114 = vst [vmem:[%s6488_s7 + $0x1d0] sm:$0xff] %v1113_v58 }
  0x4d   : > { %1116 = vst [vmem:[%s6488_s7 + $0x1d8] sm:$0xff] %v1115_v59  ;;  %v1117_v60 = vld [vmem:[%s6480_s6 + $0x780] sm:$0xff] }
  0x4e   : > { %v1119_v61 = vld [vmem:[%s6480_s6 + $0x7a0] sm:$0xff]  ;;  %1118 = vst [vmem:[%s6488_s7 + $0x1e0] sm:$0xff] %v1117_v60 }
  0x4f   : > { %v1121_v62 = vld [vmem:[%s6480_s6 + $0x7c0] sm:$0xff]  ;;  %1120 = vst [vmem:[%s6488_s7 + $0x1e8] sm:$0xff] %v1119_v61 }
  0x50   : > { %1122 = vst [vmem:[%s6488_s7 + $0x1f0] sm:$0xff] %v1121_v62  ;;  %v1123_v63 = vld [vmem:[%s6480_s6 + $0x7e0] sm:$0xff] }
  0x51   : > { %v1125_v0 = vld [vmem:[%s6480_s6 + $0x800] sm:$0xff]  ;;  %1124 = vst [vmem:[%s6488_s7 + $0x1f8] sm:$0xff] %v1123_v63 }
  0x52   : > { %v1127_v1 = vld [vmem:[%s6480_s6 + $0x820] sm:$0xff]  ;;  %1126 = vst [vmem:[%s6488_s7 + $0x200] sm:$0xff] %v1125_v0 }
  0x53   : > { %1128 = vst [vmem:[%s6488_s7 + $0x208] sm:$0xff] %v1127_v1  ;;  %v1129_v2 = vld [vmem:[%s6480_s6 + $0x840] sm:$0xff] }
  0x54   : > { %v1131_v3 = vld [vmem:[%s6480_s6 + $0x860] sm:$0xff]  ;;  %1130 = vst [vmem:[%s6488_s7 + $0x210] sm:$0xff] %v1129_v2 }
  0x55   : > { %v1133_v4 = vld [vmem:[%s6480_s6 + $0x880] sm:$0xff]  ;;  %1132 = vst [vmem:[%s6488_s7 + $0x218] sm:$0xff] %v1131_v3 }
  0x56   : > { %1134 = vst [vmem:[%s6488_s7 + $0x220] sm:$0xff] %v1133_v4  ;;  %v1135_v5 = vld [vmem:[%s6480_s6 + $0x8a0] sm:$0xff] }
  0x57   : > { %v1137_v6 = vld [vmem:[%s6480_s6 + $0x8c0] sm:$0xff]  ;;  %1136 = vst [vmem:[%s6488_s7 + $0x228] sm:$0xff] %v1135_v5 }
  0x58   : > { %v1139_v7 = vld [vmem:[%s6480_s6 + $0x8e0] sm:$0xff]  ;;  %1138 = vst [vmem:[%s6488_s7 + $0x230] sm:$0xff] %v1137_v6 }
  0x59   : > { %1140 = vst [vmem:[%s6488_s7 + $0x238] sm:$0xff] %v1139_v7  ;;  %v1141_v8 = vld [vmem:[%s6480_s6 + $0x900] sm:$0xff] }
  0x5a   : > { %v1143_v9 = vld [vmem:[%s6480_s6 + $0x920] sm:$0xff]  ;;  %1142 = vst [vmem:[%s6488_s7 + $0x240] sm:$0xff] %v1141_v8 }
  0x5b   : > { %v1145_v10 = vld [vmem:[%s6480_s6 + $0x940] sm:$0xff]  ;;  %1144 = vst [vmem:[%s6488_s7 + $0x248] sm:$0xff] %v1143_v9 }
  0x5c   : > { %1146 = vst [vmem:[%s6488_s7 + $0x250] sm:$0xff] %v1145_v10  ;;  %v1147_v11 = vld [vmem:[%s6480_s6 + $0x960] sm:$0xff] }
  0x5d   : > { %v1149_v12 = vld [vmem:[%s6480_s6 + $0x980] sm:$0xff]  ;;  %1148 = vst [vmem:[%s6488_s7 + $0x258] sm:$0xff] %v1147_v11 }
  0x5e   : > { %v1151_v13 = vld [vmem:[%s6480_s6 + $0x9a0] sm:$0xff]  ;;  %1150 = vst [vmem:[%s6488_s7 + $0x260] sm:$0xff] %v1149_v12 }
  0x5f   : > { %1152 = vst [vmem:[%s6488_s7 + $0x268] sm:$0xff] %v1151_v13  ;;  %v1153_v14 = vld [vmem:[%s6480_s6 + $0x9c0] sm:$0xff] }
  0x60   : > { %v1155_v15 = vld [vmem:[%s6480_s6 + $0x9e0] sm:$0xff]  ;;  %1154 = vst [vmem:[%s6488_s7 + $0x270] sm:$0xff] %v1153_v14 }
  0x61   : > { %v1157_v16 = vld [vmem:[%s6480_s6 + $0xa00] sm:$0xff]  ;;  %1156 = vst [vmem:[%s6488_s7 + $0x278] sm:$0xff] %v1155_v15 }
  0x62   : > { %1158 = vst [vmem:[%s6488_s7 + $0x280] sm:$0xff] %v1157_v16  ;;  %v1159_v17 = vld [vmem:[%s6480_s6 + $0xa20] sm:$0xff] }
  0x63   : > { %v1161_v18 = vld [vmem:[%s6480_s6 + $0xa40] sm:$0xff]  ;;  %1160 = vst [vmem:[%s6488_s7 + $0x288] sm:$0xff] %v1159_v17 }
  0x64   : > { %v1163_v19 = vld [vmem:[%s6480_s6 + $0xa60] sm:$0xff]  ;;  %1162 = vst [vmem:[%s6488_s7 + $0x290] sm:$0xff] %v1161_v18 }
  0x65   : > { %1164 = vst [vmem:[%s6488_s7 + $0x298] sm:$0xff] %v1163_v19  ;;  %v1165_v20 = vld [vmem:[%s6480_s6 + $0xa80] sm:$0xff] }
  0x66   : > { %v1167_v21 = vld [vmem:[%s6480_s6 + $0xaa0] sm:$0xff]  ;;  %1166 = vst [vmem:[%s6488_s7 + $0x2a0] sm:$0xff] %v1165_v20 }
  0x67   : > { %v1169_v22 = vld [vmem:[%s6480_s6 + $0xac0] sm:$0xff]  ;;  %1168 = vst [vmem:[%s6488_s7 + $0x2a8] sm:$0xff] %v1167_v21 }
  0x68   : > { %1170 = vst [vmem:[%s6488_s7 + $0x2b0] sm:$0xff] %v1169_v22  ;;  %v1171_v23 = vld [vmem:[%s6480_s6 + $0xae0] sm:$0xff] }
  0x69   : > { %v1173_v24 = vld [vmem:[%s6480_s6 + $0xb00] sm:$0xff]  ;;  %1172 = vst [vmem:[%s6488_s7 + $0x2b8] sm:$0xff] %v1171_v23 }
  0x6a   : > { %v1175_v25 = vld [vmem:[%s6480_s6 + $0xb20] sm:$0xff]  ;;  %1174 = vst [vmem:[%s6488_s7 + $0x2c0] sm:$0xff] %v1173_v24 }
  0x6b   : > { %1176 = vst [vmem:[%s6488_s7 + $0x2c8] sm:$0xff] %v1175_v25  ;;  %v1177_v26 = vld [vmem:[%s6480_s6 + $0xb40] sm:$0xff] }
  0x6c   : > { %v1179_v27 = vld [vmem:[%s6480_s6 + $0xb60] sm:$0xff]  ;;  %1178 = vst [vmem:[%s6488_s7 + $0x2d0] sm:$0xff] %v1177_v26 }
  0x6d   : > { %v1181_v28 = vld [vmem:[%s6480_s6 + $0xb80] sm:$0xff]  ;;  %1180 = vst [vmem:[%s6488_s7 + $0x2d8] sm:$0xff] %v1179_v27 }
  0x6e   : > { %1182 = vst [vmem:[%s6488_s7 + $0x2e0] sm:$0xff] %v1181_v28  ;;  %v1183_v29 = vld [vmem:[%s6480_s6 + $0xba0] sm:$0xff] }
  0x6f   : > { %v1185_v30 = vld [vmem:[%s6480_s6 + $0xbc0] sm:$0xff]  ;;  %1184 = vst [vmem:[%s6488_s7 + $0x2e8] sm:$0xff] %v1183_v29 }
  0x70   : > { %v1187_v31 = vld [vmem:[%s6480_s6 + $0xbe0] sm:$0xff]  ;;  %1186 = vst [vmem:[%s6488_s7 + $0x2f0] sm:$0xff] %v1185_v30 }
  0x71   : > { %1188 = vst [vmem:[%s6488_s7 + $0x2f8] sm:$0xff] %v1187_v31  ;;  %v1189_v32 = vld [vmem:[%s6480_s6 + $0xc00] sm:$0xff] }
  0x72   : > { %v1191_v33 = vld [vmem:[%s6480_s6 + $0xc20] sm:$0xff]  ;;  %1190 = vst [vmem:[%s6488_s7 + $0x300] sm:$0xff] %v1189_v32 }
  0x73   : > { %v1193_v34 = vld [vmem:[%s6480_s6 + $0xc40] sm:$0xff]  ;;  %1192 = vst [vmem:[%s6488_s7 + $0x308] sm:$0xff] %v1191_v33 }
  0x74   : > { %1194 = vst [vmem:[%s6488_s7 + $0x310] sm:$0xff] %v1193_v34  ;;  %v1195_v35 = vld [vmem:[%s6480_s6 + $0xc60] sm:$0xff] }
  0x75   : > { %v1197_v36 = vld [vmem:[%s6480_s6 + $0xc80] sm:$0xff]  ;;  %1196 = vst [vmem:[%s6488_s7 + $0x318] sm:$0xff] %v1195_v35 }
  0x76   : > { %v1199_v37 = vld [vmem:[%s6480_s6 + $0xca0] sm:$0xff]  ;;  %1198 = vst [vmem:[%s6488_s7 + $0x320] sm:$0xff] %v1197_v36 }
  0x77   : > { %1200 = vst [vmem:[%s6488_s7 + $0x328] sm:$0xff] %v1199_v37  ;;  %v1201_v38 = vld [vmem:[%s6480_s6 + $0xcc0] sm:$0xff] }
  0x78   : > { %v1203_v39 = vld [vmem:[%s6480_s6 + $0xce0] sm:$0xff]  ;;  %1202 = vst [vmem:[%s6488_s7 + $0x330] sm:$0xff] %v1201_v38 }
  0x79   : > { %v1205_v40 = vld [vmem:[%s6480_s6 + $0xd00] sm:$0xff]  ;;  %1204 = vst [vmem:[%s6488_s7 + $0x338] sm:$0xff] %v1203_v39 }
  0x7a   : > { %1206 = vst [vmem:[%s6488_s7 + $0x340] sm:$0xff] %v1205_v40  ;;  %v1207_v41 = vld [vmem:[%s6480_s6 + $0xd20] sm:$0xff] }
  0x7b   : > { %v1209_v42 = vld [vmem:[%s6480_s6 + $0xd40] sm:$0xff]  ;;  %1208 = vst [vmem:[%s6488_s7 + $0x348] sm:$0xff] %v1207_v41 }
  0x7c   : > { %v1211_v43 = vld [vmem:[%s6480_s6 + $0xd60] sm:$0xff]  ;;  %1210 = vst [vmem:[%s6488_s7 + $0x350] sm:$0xff] %v1209_v42 }
  0x7d   : > { %1212 = vst [vmem:[%s6488_s7 + $0x358] sm:$0xff] %v1211_v43  ;;  %v1213_v44 = vld [vmem:[%s6480_s6 + $0xd80] sm:$0xff] }
  0x7e   : > { %v1215_v45 = vld [vmem:[%s6480_s6 + $0xda0] sm:$0xff]  ;;  %1214 = vst [vmem:[%s6488_s7 + $0x360] sm:$0xff] %v1213_v44 }
  0x7f   : > { %v1217_v46 = vld [vmem:[%s6480_s6 + $0xdc0] sm:$0xff]  ;;  %1216 = vst [vmem:[%s6488_s7 + $0x368] sm:$0xff] %v1215_v45 }
  0x80   : > { %1218 = vst [vmem:[%s6488_s7 + $0x370] sm:$0xff] %v1217_v46  ;;  %v1219_v47 = vld [vmem:[%s6480_s6 + $0xde0] sm:$0xff] }
  0x81   : > { %v1221_v48 = vld [vmem:[%s6480_s6 + $0xe00] sm:$0xff]  ;;  %1220 = vst [vmem:[%s6488_s7 + $0x378] sm:$0xff] %v1219_v47 }
  0x82   : > { %v1223_v49 = vld [vmem:[%s6480_s6 + $0xe20] sm:$0xff]  ;;  %1222 = vst [vmem:[%s6488_s7 + $0x380] sm:$0xff] %v1221_v48 }
  0x83   : > { %1224 = vst [vmem:[%s6488_s7 + $0x388] sm:$0xff] %v1223_v49  ;;  %v1225_v50 = vld [vmem:[%s6480_s6 + $0xe40] sm:$0xff] }
  0x84   : > { %v1227_v51 = vld [vmem:[%s6480_s6 + $0xe60] sm:$0xff]  ;;  %1226 = vst [vmem:[%s6488_s7 + $0x390] sm:$0xff] %v1225_v50 }
  0x85   : > { %v1229_v52 = vld [vmem:[%s6480_s6 + $0xe80] sm:$0xff]  ;;  %1228 = vst [vmem:[%s6488_s7 + $0x398] sm:$0xff] %v1227_v51 }
  0x86   : > { %1230 = vst [vmem:[%s6488_s7 + $0x3a0] sm:$0xff] %v1229_v52  ;;  %v1231_v53 = vld [vmem:[%s6480_s6 + $0xea0] sm:$0xff] }
  0x87   : > { %v1233_v54 = vld [vmem:[%s6480_s6 + $0xec0] sm:$0xff]  ;;  %1232 = vst [vmem:[%s6488_s7 + $0x3a8] sm:$0xff] %v1231_v53 }
  0x88   : > { %v1235_v55 = vld [vmem:[%s6480_s6 + $0xee0] sm:$0xff]  ;;  %1234 = vst [vmem:[%s6488_s7 + $0x3b0] sm:$0xff] %v1233_v54 }
  0x89   : > { %1236 = vst [vmem:[%s6488_s7 + $0x3b8] sm:$0xff] %v1235_v55  ;;  %v1237_v56 = vld [vmem:[%s6480_s6 + $0xf00] sm:$0xff] }
  0x8a   : > { %v1239_v57 = vld [vmem:[%s6480_s6 + $0xf20] sm:$0xff]  ;;  %1238 = vst [vmem:[%s6488_s7 + $0x3c0] sm:$0xff] %v1237_v56 }
  0x8b   : > { %v1241_v58 = vld [vmem:[%s6480_s6 + $0xf40] sm:$0xff]  ;;  %1240 = vst [vmem:[%s6488_s7 + $0x3c8] sm:$0xff] %v1239_v57 }
  0x8c   : > { %1242 = vst [vmem:[%s6488_s7 + $0x3d0] sm:$0xff] %v1241_v58  ;;  %v1243_v59 = vld [vmem:[%s6480_s6 + $0xf60] sm:$0xff] }
  0x8d   : > { %v1245_v60 = vld [vmem:[%s6480_s6 + $0xf80] sm:$0xff]  ;;  %1244 = vst [vmem:[%s6488_s7 + $0x3d8] sm:$0xff] %v1243_v59 }
  0x8e   : > { %v1247_v61 = vld [vmem:[%s6480_s6 + $0xfa0] sm:$0xff]  ;;  %1246 = vst [vmem:[%s6488_s7 + $0x3e0] sm:$0xff] %v1245_v60 }
  0x8f   : > { %1248 = vst [vmem:[%s6488_s7 + $0x3e8] sm:$0xff] %v1247_v61  ;;  %v1249_v62 = vld [vmem:[%s6480_s6 + $0xfc0] sm:$0xff] }
  0x90   : > { %v1251_v63 = vld [vmem:[%s6480_s6 + $0xfe0] sm:$0xff]  ;;  %1250 = vst [vmem:[%s6488_s7 + $0x3f0] sm:$0xff] %v1249_v62 }
  0x91   : > { %v1253_v0 = vld [vmem:[%s6480_s6 + $0x1000] sm:$0xff]  ;;  %1252 = vst [vmem:[%s6488_s7 + $0x3f8] sm:$0xff] %v1251_v63 }
  0x92   : > { %1254 = vst [vmem:[%s6488_s7 + $0x400] sm:$0xff] %v1253_v0  ;;  %v1255_v1 = vld [vmem:[%s6480_s6 + $0x1020] sm:$0xff] }
  0x93   : > { %v1257_v2 = vld [vmem:[%s6480_s6 + $0x1040] sm:$0xff]  ;;  %1256 = vst [vmem:[%s6488_s7 + $0x408] sm:$0xff] %v1255_v1 }
  0x94   : > { %v1259_v3 = vld [vmem:[%s6480_s6 + $0x1060] sm:$0xff]  ;;  %1258 = vst [vmem:[%s6488_s7 + $0x410] sm:$0xff] %v1257_v2 }
  0x95   : > { %1260 = vst [vmem:[%s6488_s7 + $0x418] sm:$0xff] %v1259_v3  ;;  %v1261_v4 = vld [vmem:[%s6480_s6 + $0x1080] sm:$0xff] }
  0x96   : > { %v1263_v5 = vld [vmem:[%s6480_s6 + $0x10a0] sm:$0xff]  ;;  %1262 = vst [vmem:[%s6488_s7 + $0x420] sm:$0xff] %v1261_v4 }
  0x97   : > { %v1265_v6 = vld [vmem:[%s6480_s6 + $0x10c0] sm:$0xff]  ;;  %1264 = vst [vmem:[%s6488_s7 + $0x428] sm:$0xff] %v1263_v5 }
  0x98   : > { %1266 = vst [vmem:[%s6488_s7 + $0x430] sm:$0xff] %v1265_v6  ;;  %v1267_v7 = vld [vmem:[%s6480_s6 + $0x10e0] sm:$0xff] }
  0x99   : > { %v1269_v8 = vld [vmem:[%s6480_s6 + $0x1100] sm:$0xff]  ;;  %1268 = vst [vmem:[%s6488_s7 + $0x438] sm:$0xff] %v1267_v7 }
  0x9a   : > { %v1271_v9 = vld [vmem:[%s6480_s6 + $0x1120] sm:$0xff]  ;;  %1270 = vst [vmem:[%s6488_s7 + $0x440] sm:$0xff] %v1269_v8 }
  0x9b   : > { %1272 = vst [vmem:[%s6488_s7 + $0x448] sm:$0xff] %v1271_v9  ;;  %v1273_v10 = vld [vmem:[%s6480_s6 + $0x1140] sm:$0xff] }
  0x9c   : > { %v1275_v11 = vld [vmem:[%s6480_s6 + $0x1160] sm:$0xff]  ;;  %1274 = vst [vmem:[%s6488_s7 + $0x450] sm:$0xff] %v1273_v10 }
  0x9d   : > { %v1277_v12 = vld [vmem:[%s6480_s6 + $0x1180] sm:$0xff]  ;;  %1276 = vst [vmem:[%s6488_s7 + $0x458] sm:$0xff] %v1275_v11 }
  0x9e   : > { %1278 = vst [vmem:[%s6488_s7 + $0x460] sm:$0xff] %v1277_v12  ;;  %v1279_v13 = vld [vmem:[%s6480_s6 + $0x11a0] sm:$0xff] }
  0x9f   : > { %v1281_v14 = vld [vmem:[%s6480_s6 + $0x11c0] sm:$0xff]  ;;  %1280 = vst [vmem:[%s6488_s7 + $0x468] sm:$0xff] %v1279_v13 }
  0xa0   : > { %v1283_v15 = vld [vmem:[%s6480_s6 + $0x11e0] sm:$0xff]  ;;  %1282 = vst [vmem:[%s6488_s7 + $0x470] sm:$0xff] %v1281_v14 }
  0xa1   : > { %1284 = vst [vmem:[%s6488_s7 + $0x478] sm:$0xff] %v1283_v15  ;;  %v1285_v16 = vld [vmem:[%s6480_s6 + $0x1200] sm:$0xff] }
  0xa2   : > { %v1287_v17 = vld [vmem:[%s6480_s6 + $0x1220] sm:$0xff]  ;;  %1286 = vst [vmem:[%s6488_s7 + $0x480] sm:$0xff] %v1285_v16 }
  0xa3   : > { %v1289_v18 = vld [vmem:[%s6480_s6 + $0x1240] sm:$0xff]  ;;  %1288 = vst [vmem:[%s6488_s7 + $0x488] sm:$0xff] %v1287_v17 }
  0xa4   : > { %1290 = vst [vmem:[%s6488_s7 + $0x490] sm:$0xff] %v1289_v18  ;;  %v1291_v19 = vld [vmem:[%s6480_s6 + $0x1260] sm:$0xff] }
  0xa5   : > { %v1293_v20 = vld [vmem:[%s6480_s6 + $0x1280] sm:$0xff]  ;;  %1292 = vst [vmem:[%s6488_s7 + $0x498] sm:$0xff] %v1291_v19 }
  0xa6   : > { %v1295_v21 = vld [vmem:[%s6480_s6 + $0x12a0] sm:$0xff]  ;;  %1294 = vst [vmem:[%s6488_s7 + $0x4a0] sm:$0xff] %v1293_v20 }
  0xa7   : > { %1296 = vst [vmem:[%s6488_s7 + $0x4a8] sm:$0xff] %v1295_v21  ;;  %v1297_v22 = vld [vmem:[%s6480_s6 + $0x12c0] sm:$0xff] }
  0xa8   : > { %v1299_v23 = vld [vmem:[%s6480_s6 + $0x12e0] sm:$0xff]  ;;  %1298 = vst [vmem:[%s6488_s7 + $0x4b0] sm:$0xff] %v1297_v22 }
  0xa9   : > { %v1301_v24 = vld [vmem:[%s6480_s6 + $0x1300] sm:$0xff]  ;;  %1300 = vst [vmem:[%s6488_s7 + $0x4b8] sm:$0xff] %v1299_v23 }
  0xaa   : > { %1302 = vst [vmem:[%s6488_s7 + $0x4c0] sm:$0xff] %v1301_v24  ;;  %v1303_v25 = vld [vmem:[%s6480_s6 + $0x1320] sm:$0xff] }
  0xab   : > { %v1305_v26 = vld [vmem:[%s6480_s6 + $0x1340] sm:$0xff]  ;;  %1304 = vst [vmem:[%s6488_s7 + $0x4c8] sm:$0xff] %v1303_v25 }
  0xac   : > { %v1307_v27 = vld [vmem:[%s6480_s6 + $0x1360] sm:$0xff]  ;;  %1306 = vst [vmem:[%s6488_s7 + $0x4d0] sm:$0xff] %v1305_v26 }
  0xad   : > { %1308 = vst [vmem:[%s6488_s7 + $0x4d8] sm:$0xff] %v1307_v27  ;;  %v1309_v28 = vld [vmem:[%s6480_s6 + $0x1380] sm:$0xff] }
  0xae   : > { %v1311_v29 = vld [vmem:[%s6480_s6 + $0x13a0] sm:$0xff]  ;;  %1310 = vst [vmem:[%s6488_s7 + $0x4e0] sm:$0xff] %v1309_v28 }
  0xaf   : > { %v1313_v30 = vld [vmem:[%s6480_s6 + $0x13c0] sm:$0xff]  ;;  %1312 = vst [vmem:[%s6488_s7 + $0x4e8] sm:$0xff] %v1311_v29 }
  0xb0   : > { %1314 = vst [vmem:[%s6488_s7 + $0x4f0] sm:$0xff] %v1313_v30  ;;  %v1315_v31 = vld [vmem:[%s6480_s6 + $0x13e0] sm:$0xff] }
  0xb1   : > { %v1317_v32 = vld [vmem:[%s6480_s6 + $0x1400] sm:$0xff]  ;;  %1316 = vst [vmem:[%s6488_s7 + $0x4f8] sm:$0xff] %v1315_v31 }
  0xb2   : > { %v1319_v33 = vld [vmem:[%s6480_s6 + $0x1420] sm:$0xff]  ;;  %1318 = vst [vmem:[%s6488_s7 + $0x500] sm:$0xff] %v1317_v32 }
  0xb3   : > { %1320 = vst [vmem:[%s6488_s7 + $0x508] sm:$0xff] %v1319_v33  ;;  %v1321_v34 = vld [vmem:[%s6480_s6 + $0x1440] sm:$0xff] }
  0xb4   : > { %v1323_v35 = vld [vmem:[%s6480_s6 + $0x1460] sm:$0xff]  ;;  %1322 = vst [vmem:[%s6488_s7 + $0x510] sm:$0xff] %v1321_v34 }
  0xb5   : > { %v1325_v36 = vld [vmem:[%s6480_s6 + $0x1480] sm:$0xff]  ;;  %1324 = vst [vmem:[%s6488_s7 + $0x518] sm:$0xff] %v1323_v35 }
  0xb6   : > { %1326 = vst [vmem:[%s6488_s7 + $0x520] sm:$0xff] %v1325_v36  ;;  %v1327_v37 = vld [vmem:[%s6480_s6 + $0x14a0] sm:$0xff] }
  0xb7   : > { %v1329_v38 = vld [vmem:[%s6480_s6 + $0x14c0] sm:$0xff]  ;;  %1328 = vst [vmem:[%s6488_s7 + $0x528] sm:$0xff] %v1327_v37 }
  0xb8   : > { %v1331_v39 = vld [vmem:[%s6480_s6 + $0x14e0] sm:$0xff]  ;;  %1330 = vst [vmem:[%s6488_s7 + $0x530] sm:$0xff] %v1329_v38 }
  0xb9   : > { %1332 = vst [vmem:[%s6488_s7 + $0x538] sm:$0xff] %v1331_v39  ;;  %v1333_v40 = vld [vmem:[%s6480_s6 + $0x1500] sm:$0xff] }
  0xba   : > { %v1335_v41 = vld [vmem:[%s6480_s6 + $0x1520] sm:$0xff]  ;;  %1334 = vst [vmem:[%s6488_s7 + $0x540] sm:$0xff] %v1333_v40 }
  0xbb   : > { %v1337_v42 = vld [vmem:[%s6480_s6 + $0x1540] sm:$0xff]  ;;  %1336 = vst [vmem:[%s6488_s7 + $0x548] sm:$0xff] %v1335_v41 }
  0xbc   : > { %1338 = vst [vmem:[%s6488_s7 + $0x550] sm:$0xff] %v1337_v42  ;;  %v1339_v43 = vld [vmem:[%s6480_s6 + $0x1560] sm:$0xff] }
  0xbd   : > { %v1341_v44 = vld [vmem:[%s6480_s6 + $0x1580] sm:$0xff]  ;;  %1340 = vst [vmem:[%s6488_s7 + $0x558] sm:$0xff] %v1339_v43 }
  0xbe   : > { %v1343_v45 = vld [vmem:[%s6480_s6 + $0x15a0] sm:$0xff]  ;;  %1342 = vst [vmem:[%s6488_s7 + $0x560] sm:$0xff] %v1341_v44 }
  0xbf   : > { %1344 = vst [vmem:[%s6488_s7 + $0x568] sm:$0xff] %v1343_v45  ;;  %v1345_v46 = vld [vmem:[%s6480_s6 + $0x15c0] sm:$0xff] }
  0xc0   : > { %v1347_v47 = vld [vmem:[%s6480_s6 + $0x15e0] sm:$0xff]  ;;  %1346 = vst [vmem:[%s6488_s7 + $0x570] sm:$0xff] %v1345_v46 }
  0xc1   : > { %v1349_v48 = vld [vmem:[%s6480_s6 + $0x1600] sm:$0xff]  ;;  %1348 = vst [vmem:[%s6488_s7 + $0x578] sm:$0xff] %v1347_v47 }
  0xc2   : > { %1350 = vst [vmem:[%s6488_s7 + $0x580] sm:$0xff] %v1349_v48  ;;  %v1351_v49 = vld [vmem:[%s6480_s6 + $0x1620] sm:$0xff] }
  0xc3   : > { %v1353_v50 = vld [vmem:[%s6480_s6 + $0x1640] sm:$0xff]  ;;  %1352 = vst [vmem:[%s6488_s7 + $0x588] sm:$0xff] %v1351_v49 }
  0xc4   : > { %v1355_v51 = vld [vmem:[%s6480_s6 + $0x1660] sm:$0xff]  ;;  %1354 = vst [vmem:[%s6488_s7 + $0x590] sm:$0xff] %v1353_v50 }
  0xc5   : > { %1356 = vst [vmem:[%s6488_s7 + $0x598] sm:$0xff] %v1355_v51  ;;  %v1357_v52 = vld [vmem:[%s6480_s6 + $0x1680] sm:$0xff] }
  0xc6   : > { %v1359_v53 = vld [vmem:[%s6480_s6 + $0x16a0] sm:$0xff]  ;;  %1358 = vst [vmem:[%s6488_s7 + $0x5a0] sm:$0xff] %v1357_v52 }
  0xc7   : > { %v1361_v54 = vld [vmem:[%s6480_s6 + $0x16c0] sm:$0xff]  ;;  %1360 = vst [vmem:[%s6488_s7 + $0x5a8] sm:$0xff] %v1359_v53 }
  0xc8   : > { %1362 = vst [vmem:[%s6488_s7 + $0x5b0] sm:$0xff] %v1361_v54  ;;  %v1363_v55 = vld [vmem:[%s6480_s6 + $0x16e0] sm:$0xff] }
  0xc9   : > { %v1365_v56 = vld [vmem:[%s6480_s6 + $0x1700] sm:$0xff]  ;;  %1364 = vst [vmem:[%s6488_s7 + $0x5b8] sm:$0xff] %v1363_v55 }
  0xca   : > { %v1367_v57 = vld [vmem:[%s6480_s6 + $0x1720] sm:$0xff]  ;;  %1366 = vst [vmem:[%s6488_s7 + $0x5c0] sm:$0xff] %v1365_v56 }
  0xcb   : > { %1368 = vst [vmem:[%s6488_s7 + $0x5c8] sm:$0xff] %v1367_v57  ;;  %v1369_v58 = vld [vmem:[%s6480_s6 + $0x1740] sm:$0xff] }
  0xcc   : > { %v1371_v59 = vld [vmem:[%s6480_s6 + $0x1760] sm:$0xff]  ;;  %1370 = vst [vmem:[%s6488_s7 + $0x5d0] sm:$0xff] %v1369_v58 }
  0xcd   : > { %v1373_v60 = vld [vmem:[%s6480_s6 + $0x1780] sm:$0xff]  ;;  %1372 = vst [vmem:[%s6488_s7 + $0x5d8] sm:$0xff] %v1371_v59 }
  0xce   : > { %1374 = vst [vmem:[%s6488_s7 + $0x5e0] sm:$0xff] %v1373_v60  ;;  %v1375_v61 = vld [vmem:[%s6480_s6 + $0x17a0] sm:$0xff] }
  0xcf   : > { %v1377_v62 = vld [vmem:[%s6480_s6 + $0x17c0] sm:$0xff]  ;;  %1376 = vst [vmem:[%s6488_s7 + $0x5e8] sm:$0xff] %v1375_v61 }
  0xd0   : > { %v1379_v63 = vld [vmem:[%s6480_s6 + $0x17e0] sm:$0xff]  ;;  %1378 = vst [vmem:[%s6488_s7 + $0x5f0] sm:$0xff] %v1377_v62 }
  0xd1   : > { %1380 = vst [vmem:[%s6488_s7 + $0x5f8] sm:$0xff] %v1379_v63  ;;  %v1381_v0 = vld [vmem:[%s6480_s6 + $0x1800] sm:$0xff] }
  0xd2   : > { %v1383_v1 = vld [vmem:[%s6480_s6 + $0x1820] sm:$0xff]  ;;  %1382 = vst [vmem:[%s6488_s7 + $0x600] sm:$0xff] %v1381_v0 }
  0xd3   : > { %v1385_v2 = vld [vmem:[%s6480_s6 + $0x1840] sm:$0xff]  ;;  %1384 = vst [vmem:[%s6488_s7 + $0x608] sm:$0xff] %v1383_v1 }
  0xd4   : > { %1386 = vst [vmem:[%s6488_s7 + $0x610] sm:$0xff] %v1385_v2  ;;  %v1387_v3 = vld [vmem:[%s6480_s6 + $0x1860] sm:$0xff] }
  0xd5   : > { %v1389_v4 = vld [vmem:[%s6480_s6 + $0x1880] sm:$0xff]  ;;  %1388 = vst [vmem:[%s6488_s7 + $0x618] sm:$0xff] %v1387_v3 }
  0xd6   : > { %v1391_v5 = vld [vmem:[%s6480_s6 + $0x18a0] sm:$0xff]  ;;  %1390 = vst [vmem:[%s6488_s7 + $0x620] sm:$0xff] %v1389_v4 }
  0xd7   : > { %1392 = vst [vmem:[%s6488_s7 + $0x628] sm:$0xff] %v1391_v5  ;;  %v1393_v6 = vld [vmem:[%s6480_s6 + $0x18c0] sm:$0xff] }
  0xd8   : > { %v1395_v7 = vld [vmem:[%s6480_s6 + $0x18e0] sm:$0xff]  ;;  %1394 = vst [vmem:[%s6488_s7 + $0x630] sm:$0xff] %v1393_v6 }
  0xd9   : > { %v1397_v8 = vld [vmem:[%s6480_s6 + $0x1900] sm:$0xff]  ;;  %1396 = vst [vmem:[%s6488_s7 + $0x638] sm:$0xff] %v1395_v7 }
  0xda   : > { %1398 = vst [vmem:[%s6488_s7 + $0x640] sm:$0xff] %v1397_v8  ;;  %v1399_v9 = vld [vmem:[%s6480_s6 + $0x1920] sm:$0xff] }
  0xdb   : > { %v1401_v10 = vld [vmem:[%s6480_s6 + $0x1940] sm:$0xff]  ;;  %1400 = vst [vmem:[%s6488_s7 + $0x648] sm:$0xff] %v1399_v9 }
  0xdc   : > { %v1403_v11 = vld [vmem:[%s6480_s6 + $0x1960] sm:$0xff]  ;;  %1402 = vst [vmem:[%s6488_s7 + $0x650] sm:$0xff] %v1401_v10 }
  0xdd   : > { %1404 = vst [vmem:[%s6488_s7 + $0x658] sm:$0xff] %v1403_v11  ;;  %v1405_v12 = vld [vmem:[%s6480_s6 + $0x1980] sm:$0xff] }
  0xde   : > { %v1407_v13 = vld [vmem:[%s6480_s6 + $0x19a0] sm:$0xff]  ;;  %1406 = vst [vmem:[%s6488_s7 + $0x660] sm:$0xff] %v1405_v12 }
  0xdf   : > { %v1409_v14 = vld [vmem:[%s6480_s6 + $0x19c0] sm:$0xff]  ;;  %1408 = vst [vmem:[%s6488_s7 + $0x668] sm:$0xff] %v1407_v13 }
  0xe0   : > { %1410 = vst [vmem:[%s6488_s7 + $0x670] sm:$0xff] %v1409_v14  ;;  %v1411_v15 = vld [vmem:[%s6480_s6 + $0x19e0] sm:$0xff] }
  0xe1   : > { %v1413_v16 = vld [vmem:[%s6480_s6 + $0x1a00] sm:$0xff]  ;;  %1412 = vst [vmem:[%s6488_s7 + $0x678] sm:$0xff] %v1411_v15 }
  0xe2   : > { %v1415_v17 = vld [vmem:[%s6480_s6 + $0x1a20] sm:$0xff]  ;;  %1414 = vst [vmem:[%s6488_s7 + $0x680] sm:$0xff] %v1413_v16 }
  0xe3   : > { %1416 = vst [vmem:[%s6488_s7 + $0x688] sm:$0xff] %v1415_v17  ;;  %v1417_v18 = vld [vmem:[%s6480_s6 + $0x1a40] sm:$0xff] }
  0xe4   : > { %v1419_v19 = vld [vmem:[%s6480_s6 + $0x1a60] sm:$0xff]  ;;  %1418 = vst [vmem:[%s6488_s7 + $0x690] sm:$0xff] %v1417_v18 }
  0xe5   : > { %v1421_v20 = vld [vmem:[%s6480_s6 + $0x1a80] sm:$0xff]  ;;  %1420 = vst [vmem:[%s6488_s7 + $0x698] sm:$0xff] %v1419_v19 }
  0xe6   : > { %1422 = vst [vmem:[%s6488_s7 + $0x6a0] sm:$0xff] %v1421_v20  ;;  %v1423_v21 = vld [vmem:[%s6480_s6 + $0x1aa0] sm:$0xff] }
  0xe7   : > { %v1425_v22 = vld [vmem:[%s6480_s6 + $0x1ac0] sm:$0xff]  ;;  %1424 = vst [vmem:[%s6488_s7 + $0x6a8] sm:$0xff] %v1423_v21 }
  0xe8   : > { %v1427_v23 = vld [vmem:[%s6480_s6 + $0x1ae0] sm:$0xff]  ;;  %1426 = vst [vmem:[%s6488_s7 + $0x6b0] sm:$0xff] %v1425_v22 }
  0xe9   : > { %1428 = vst [vmem:[%s6488_s7 + $0x6b8] sm:$0xff] %v1427_v23  ;;  %v1429_v24 = vld [vmem:[%s6480_s6 + $0x1b00] sm:$0xff] }
  0xea   : > { %v1431_v25 = vld [vmem:[%s6480_s6 + $0x1b20] sm:$0xff]  ;;  %1430 = vst [vmem:[%s6488_s7 + $0x6c0] sm:$0xff] %v1429_v24 }
  0xeb   : > { %v1433_v26 = vld [vmem:[%s6480_s6 + $0x1b40] sm:$0xff]  ;;  %1432 = vst [vmem:[%s6488_s7 + $0x6c8] sm:$0xff] %v1431_v25 }
  0xec   : > { %1434 = vst [vmem:[%s6488_s7 + $0x6d0] sm:$0xff] %v1433_v26  ;;  %v1435_v27 = vld [vmem:[%s6480_s6 + $0x1b60] sm:$0xff] }
  0xed   : > { %v1437_v28 = vld [vmem:[%s6480_s6 + $0x1b80] sm:$0xff]  ;;  %1436 = vst [vmem:[%s6488_s7 + $0x6d8] sm:$0xff] %v1435_v27 }
  0xee   : > { %v1439_v29 = vld [vmem:[%s6480_s6 + $0x1ba0] sm:$0xff]  ;;  %1438 = vst [vmem:[%s6488_s7 + $0x6e0] sm:$0xff] %v1437_v28 }
  0xef   : > { %1440 = vst [vmem:[%s6488_s7 + $0x6e8] sm:$0xff] %v1439_v29  ;;  %v1441_v30 = vld [vmem:[%s6480_s6 + $0x1bc0] sm:$0xff] }
  0xf0   : > { %v1443_v31 = vld [vmem:[%s6480_s6 + $0x1be0] sm:$0xff]  ;;  %1442 = vst [vmem:[%s6488_s7 + $0x6f0] sm:$0xff] %v1441_v30 }
  0xf1   : > { %v1445_v32 = vld [vmem:[%s6480_s6 + $0x1c00] sm:$0xff]  ;;  %1444 = vst [vmem:[%s6488_s7 + $0x6f8] sm:$0xff] %v1443_v31 }
  0xf2   : > { %1446 = vst [vmem:[%s6488_s7 + $0x700] sm:$0xff] %v1445_v32  ;;  %v1447_v33 = vld [vmem:[%s6480_s6 + $0x1c20] sm:$0xff] }
  0xf3   : > { %v1449_v34 = vld [vmem:[%s6480_s6 + $0x1c40] sm:$0xff]  ;;  %1448 = vst [vmem:[%s6488_s7 + $0x708] sm:$0xff] %v1447_v33 }
  0xf4   : > { %v1451_v35 = vld [vmem:[%s6480_s6 + $0x1c60] sm:$0xff]  ;;  %1450 = vst [vmem:[%s6488_s7 + $0x710] sm:$0xff] %v1449_v34 }
  0xf5   : > { %1452 = vst [vmem:[%s6488_s7 + $0x718] sm:$0xff] %v1451_v35  ;;  %v1453_v36 = vld [vmem:[%s6480_s6 + $0x1c80] sm:$0xff] }
  0xf6   : > { %v1455_v37 = vld [vmem:[%s6480_s6 + $0x1ca0] sm:$0xff]  ;;  %1454 = vst [vmem:[%s6488_s7 + $0x720] sm:$0xff] %v1453_v36 }
  0xf7   : > { %v1457_v38 = vld [vmem:[%s6480_s6 + $0x1cc0] sm:$0xff]  ;;  %1456 = vst [vmem:[%s6488_s7 + $0x728] sm:$0xff] %v1455_v37 }
  0xf8   : > { %1458 = vst [vmem:[%s6488_s7 + $0x730] sm:$0xff] %v1457_v38  ;;  %v1459_v39 = vld [vmem:[%s6480_s6 + $0x1ce0] sm:$0xff] }
  0xf9   : > { %v1461_v40 = vld [vmem:[%s6480_s6 + $0x1d00] sm:$0xff]  ;;  %1460 = vst [vmem:[%s6488_s7 + $0x738] sm:$0xff] %v1459_v39 }
  0xfa   : > { %v1463_v41 = vld [vmem:[%s6480_s6 + $0x1d20] sm:$0xff]  ;;  %1462 = vst [vmem:[%s6488_s7 + $0x740] sm:$0xff] %v1461_v40 }
  0xfb   : > { %1464 = vst [vmem:[%s6488_s7 + $0x748] sm:$0xff] %v1463_v41  ;;  %v1465_v42 = vld [vmem:[%s6480_s6 + $0x1d40] sm:$0xff] }
  0xfc   : > { %v1467_v43 = vld [vmem:[%s6480_s6 + $0x1d60] sm:$0xff]  ;;  %1466 = vst [vmem:[%s6488_s7 + $0x750] sm:$0xff] %v1465_v42 }
  0xfd   : > { %v1469_v44 = vld [vmem:[%s6480_s6 + $0x1d80] sm:$0xff]  ;;  %1468 = vst [vmem:[%s6488_s7 + $0x758] sm:$0xff] %v1467_v43 }
  0xfe   : > { %1470 = vst [vmem:[%s6488_s7 + $0x760] sm:$0xff] %v1469_v44  ;;  %v1471_v45 = vld [vmem:[%s6480_s6 + $0x1da0] sm:$0xff] }
  0xff   : > { %v1473_v46 = vld [vmem:[%s6480_s6 + $0x1dc0] sm:$0xff]  ;;  %1472 = vst [vmem:[%s6488_s7 + $0x768] sm:$0xff] %v1471_v45 }
 0x100   : > { %v1475_v47 = vld [vmem:[%s6480_s6 + $0x1de0] sm:$0xff]  ;;  %1474 = vst [vmem:[%s6488_s7 + $0x770] sm:$0xff] %v1473_v46 }
 0x101   : > { %1476 = vst [vmem:[%s6488_s7 + $0x778] sm:$0xff] %v1475_v47  ;;  %v1477_v48 = vld [vmem:[%s6480_s6 + $0x1e00] sm:$0xff] }
 0x102   : > { %v1479_v49 = vld [vmem:[%s6480_s6 + $0x1e20] sm:$0xff]  ;;  %1478 = vst [vmem:[%s6488_s7 + $0x780] sm:$0xff] %v1477_v48 }
 0x103   : > { %v1481_v50 = vld [vmem:[%s6480_s6 + $0x1e40] sm:$0xff]  ;;  %1480 = vst [vmem:[%s6488_s7 + $0x788] sm:$0xff] %v1479_v49 }
 0x104   : > { %1482 = vst [vmem:[%s6488_s7 + $0x790] sm:$0xff] %v1481_v50  ;;  %v1483_v51 = vld [vmem:[%s6480_s6 + $0x1e60] sm:$0xff] }
 0x105   : > { %v1485_v52 = vld [vmem:[%s6480_s6 + $0x1e80] sm:$0xff]  ;;  %1484 = vst [vmem:[%s6488_s7 + $0x798] sm:$0xff] %v1483_v51 }
 0x106   : > { %v1487_v53 = vld [vmem:[%s6480_s6 + $0x1ea0] sm:$0xff]  ;;  %1486 = vst [vmem:[%s6488_s7 + $0x7a0] sm:$0xff] %v1485_v52 }
 0x107   : > { %1488 = vst [vmem:[%s6488_s7 + $0x7a8] sm:$0xff] %v1487_v53  ;;  %v1489_v54 = vld [vmem:[%s6480_s6 + $0x1ec0] sm:$0xff] }
 0x108   : > { %v1491_v55 = vld [vmem:[%s6480_s6 + $0x1ee0] sm:$0xff]  ;;  %1490 = vst [vmem:[%s6488_s7 + $0x7b0] sm:$0xff] %v1489_v54 }
 0x109   : > { %v1493_v56 = vld [vmem:[%s6480_s6 + $0x1f00] sm:$0xff]  ;;  %1492 = vst [vmem:[%s6488_s7 + $0x7b8] sm:$0xff] %v1491_v55 }
 0x10a   : > { %1494 = vst [vmem:[%s6488_s7 + $0x7c0] sm:$0xff] %v1493_v56  ;;  %v1495_v57 = vld [vmem:[%s6480_s6 + $0x1f20] sm:$0xff] }
 0x10b   : > { %v1497_v58 = vld [vmem:[%s6480_s6 + $0x1f40] sm:$0xff]  ;;  %1496 = vst [vmem:[%s6488_s7 + $0x7c8] sm:$0xff] %v1495_v57 }
 0x10c   : > { %v1499_v59 = vld [vmem:[%s6480_s6 + $0x1f60] sm:$0xff]  ;;  %1498 = vst [vmem:[%s6488_s7 + $0x7d0] sm:$0xff] %v1497_v58 }
 0x10d   : > { %1500 = vst [vmem:[%s6488_s7 + $0x7d8] sm:$0xff] %v1499_v59  ;;  %v1501_v60 = vld [vmem:[%s6480_s6 + $0x1f80] sm:$0xff] }
 0x10e   : > { %v1503_v61 = vld [vmem:[%s6480_s6 + $0x1fa0] sm:$0xff]  ;;  %1502 = vst [vmem:[%s6488_s7 + $0x7e0] sm:$0xff] %v1501_v60 }
 0x10f   : > { %v1505_v62 = vld [vmem:[%s6480_s6 + $0x1fc0] sm:$0xff]  ;;  %1504 = vst [vmem:[%s6488_s7 + $0x7e8] sm:$0xff] %v1503_v61 }
 0x110   : > { %1506 = vst [vmem:[%s6488_s7 + $0x7f0] sm:$0xff] %v1505_v62  ;;  %v1507_v63 = vld [vmem:[%s6480_s6 + $0x1fe0] sm:$0xff] }
 0x111   : > { %v1509_v0 = vld [vmem:[%s6480_s6 + $0x2000] sm:$0xff]  ;;  %1508 = vst [vmem:[%s6488_s7 + $0x7f8] sm:$0xff] %v1507_v63 }
 0x112   : > { %v1511_v1 = vld [vmem:[%s6480_s6 + $0x2020] sm:$0xff]  ;;  %1510 = vst [vmem:[%s6488_s7 + $0x800] sm:$0xff] %v1509_v0 }
 0x113   : > { %1512 = vst [vmem:[%s6488_s7 + $0x808] sm:$0xff] %v1511_v1  ;;  %v1513_v2 = vld [vmem:[%s6480_s6 + $0x2040] sm:$0xff] }
 0x114   : > { %v1515_v3 = vld [vmem:[%s6480_s6 + $0x2060] sm:$0xff]  ;;  %1514 = vst [vmem:[%s6488_s7 + $0x810] sm:$0xff] %v1513_v2 }
 0x115   : > { %v1517_v4 = vld [vmem:[%s6480_s6 + $0x2080] sm:$0xff]  ;;  %1516 = vst [vmem:[%s6488_s7 + $0x818] sm:$0xff] %v1515_v3 }
 0x116   : > { %1518 = vst [vmem:[%s6488_s7 + $0x820] sm:$0xff] %v1517_v4  ;;  %v1519_v5 = vld [vmem:[%s6480_s6 + $0x20a0] sm:$0xff] }
 0x117   : > { %v1521_v6 = vld [vmem:[%s6480_s6 + $0x20c0] sm:$0xff]  ;;  %1520 = vst [vmem:[%s6488_s7 + $0x828] sm:$0xff] %v1519_v5 }
 0x118   : > { %v1523_v7 = vld [vmem:[%s6480_s6 + $0x20e0] sm:$0xff]  ;;  %1522 = vst [vmem:[%s6488_s7 + $0x830] sm:$0xff] %v1521_v6 }
 0x119   : > { %1524 = vst [vmem:[%s6488_s7 + $0x838] sm:$0xff] %v1523_v7  ;;  %v1525_v8 = vld [vmem:[%s6480_s6 + $0x2100] sm:$0xff] }
 0x11a   : > { %v1527_v9 = vld [vmem:[%s6480_s6 + $0x2120] sm:$0xff]  ;;  %1526 = vst [vmem:[%s6488_s7 + $0x840] sm:$0xff] %v1525_v8 }
 0x11b   : > { %v1529_v10 = vld [vmem:[%s6480_s6 + $0x2140] sm:$0xff]  ;;  %1528 = vst [vmem:[%s6488_s7 + $0x848] sm:$0xff] %v1527_v9 }
 0x11c   : > { %1530 = vst [vmem:[%s6488_s7 + $0x850] sm:$0xff] %v1529_v10  ;;  %v1531_v11 = vld [vmem:[%s6480_s6 + $0x2160] sm:$0xff] }
 0x11d   : > { %v1533_v12 = vld [vmem:[%s6480_s6 + $0x2180] sm:$0xff]  ;;  %1532 = vst [vmem:[%s6488_s7 + $0x858] sm:$0xff] %v1531_v11 }
 0x11e   : > { %v1535_v13 = vld [vmem:[%s6480_s6 + $0x21a0] sm:$0xff]  ;;  %1534 = vst [vmem:[%s6488_s7 + $0x860] sm:$0xff] %v1533_v12 }
 0x11f   : > { %1536 = vst [vmem:[%s6488_s7 + $0x868] sm:$0xff] %v1535_v13  ;;  %v1537_v14 = vld [vmem:[%s6480_s6 + $0x21c0] sm:$0xff] }
 0x120   : > { %v1539_v15 = vld [vmem:[%s6480_s6 + $0x21e0] sm:$0xff]  ;;  %1538 = vst [vmem:[%s6488_s7 + $0x870] sm:$0xff] %v1537_v14 }
 0x121   : > { %v1541_v16 = vld [vmem:[%s6480_s6 + $0x2200] sm:$0xff]  ;;  %1540 = vst [vmem:[%s6488_s7 + $0x878] sm:$0xff] %v1539_v15 }
 0x122   : > { %1542 = vst [vmem:[%s6488_s7 + $0x880] sm:$0xff] %v1541_v16  ;;  %v1543_v17 = vld [vmem:[%s6480_s6 + $0x2220] sm:$0xff] }
 0x123   : > { %v1545_v18 = vld [vmem:[%s6480_s6 + $0x2240] sm:$0xff]  ;;  %1544 = vst [vmem:[%s6488_s7 + $0x888] sm:$0xff] %v1543_v17 }
 0x124   : > { %v1547_v19 = vld [vmem:[%s6480_s6 + $0x2260] sm:$0xff]  ;;  %1546 = vst [vmem:[%s6488_s7 + $0x890] sm:$0xff] %v1545_v18 }
 0x125   : > { %1548 = vst [vmem:[%s6488_s7 + $0x898] sm:$0xff] %v1547_v19  ;;  %v1549_v20 = vld [vmem:[%s6480_s6 + $0x2280] sm:$0xff] }
 0x126   : > { %v1551_v21 = vld [vmem:[%s6480_s6 + $0x22a0] sm:$0xff]  ;;  %1550 = vst [vmem:[%s6488_s7 + $0x8a0] sm:$0xff] %v1549_v20 }
 0x127   : > { %v1553_v22 = vld [vmem:[%s6480_s6 + $0x22c0] sm:$0xff]  ;;  %1552 = vst [vmem:[%s6488_s7 + $0x8a8] sm:$0xff] %v1551_v21 }
 0x128   : > { %1554 = vst [vmem:[%s6488_s7 + $0x8b0] sm:$0xff] %v1553_v22  ;;  %v1555_v23 = vld [vmem:[%s6480_s6 + $0x22e0] sm:$0xff] }
 0x129   : > { %v1557_v24 = vld [vmem:[%s6480_s6 + $0x2300] sm:$0xff]  ;;  %1556 = vst [vmem:[%s6488_s7 + $0x8b8] sm:$0xff] %v1555_v23 }
 0x12a   : > { %v1559_v25 = vld [vmem:[%s6480_s6 + $0x2320] sm:$0xff]  ;;  %1558 = vst [vmem:[%s6488_s7 + $0x8c0] sm:$0xff] %v1557_v24 }
 0x12b   : > { %1560 = vst [vmem:[%s6488_s7 + $0x8c8] sm:$0xff] %v1559_v25  ;;  %v1561_v26 = vld [vmem:[%s6480_s6 + $0x2340] sm:$0xff] }
 0x12c   : > { %v1563_v27 = vld [vmem:[%s6480_s6 + $0x2360] sm:$0xff]  ;;  %1562 = vst [vmem:[%s6488_s7 + $0x8d0] sm:$0xff] %v1561_v26 }
 0x12d   : > { %v1565_v28 = vld [vmem:[%s6480_s6 + $0x2380] sm:$0xff]  ;;  %1564 = vst [vmem:[%s6488_s7 + $0x8d8] sm:$0xff] %v1563_v27 }
 0x12e   : > { %1566 = vst [vmem:[%s6488_s7 + $0x8e0] sm:$0xff] %v1565_v28  ;;  %v1567_v29 = vld [vmem:[%s6480_s6 + $0x23a0] sm:$0xff] }
 0x12f   : > { %v1569_v30 = vld [vmem:[%s6480_s6 + $0x23c0] sm:$0xff]  ;;  %1568 = vst [vmem:[%s6488_s7 + $0x8e8] sm:$0xff] %v1567_v29 }
 0x130   : > { %v1571_v31 = vld [vmem:[%s6480_s6 + $0x23e0] sm:$0xff]  ;;  %1570 = vst [vmem:[%s6488_s7 + $0x8f0] sm:$0xff] %v1569_v30 }
 0x131   : > { %1572 = vst [vmem:[%s6488_s7 + $0x8f8] sm:$0xff] %v1571_v31  ;;  %v1573_v32 = vld [vmem:[%s6480_s6 + $0x2400] sm:$0xff] }
 0x132   : > { %v1575_v33 = vld [vmem:[%s6480_s6 + $0x2420] sm:$0xff]  ;;  %1574 = vst [vmem:[%s6488_s7 + $0x900] sm:$0xff] %v1573_v32 }
 0x133   : > { %v1577_v34 = vld [vmem:[%s6480_s6 + $0x2440] sm:$0xff]  ;;  %1576 = vst [vmem:[%s6488_s7 + $0x908] sm:$0xff] %v1575_v33 }
 0x134   : > { %1578 = vst [vmem:[%s6488_s7 + $0x910] sm:$0xff] %v1577_v34  ;;  %v1579_v35 = vld [vmem:[%s6480_s6 + $0x2460] sm:$0xff] }
 0x135   : > { %v1581_v36 = vld [vmem:[%s6480_s6 + $0x2480] sm:$0xff]  ;;  %1580 = vst [vmem:[%s6488_s7 + $0x918] sm:$0xff] %v1579_v35 }
 0x136   : > { %v1583_v37 = vld [vmem:[%s6480_s6 + $0x24a0] sm:$0xff]  ;;  %1582 = vst [vmem:[%s6488_s7 + $0x920] sm:$0xff] %v1581_v36 }
 0x137   : > { %1584 = vst [vmem:[%s6488_s7 + $0x928] sm:$0xff] %v1583_v37  ;;  %v1585_v38 = vld [vmem:[%s6480_s6 + $0x24c0] sm:$0xff] }
 0x138   : > { %v1587_v39 = vld [vmem:[%s6480_s6 + $0x24e0] sm:$0xff]  ;;  %1586 = vst [vmem:[%s6488_s7 + $0x930] sm:$0xff] %v1585_v38 }
 0x139   : > { %v1589_v40 = vld [vmem:[%s6480_s6 + $0x2500] sm:$0xff]  ;;  %1588 = vst [vmem:[%s6488_s7 + $0x938] sm:$0xff] %v1587_v39 }
 0x13a   : > { %1590 = vst [vmem:[%s6488_s7 + $0x940] sm:$0xff] %v1589_v40  ;;  %v1591_v41 = vld [vmem:[%s6480_s6 + $0x2520] sm:$0xff] }
 0x13b   : > { %v1593_v42 = vld [vmem:[%s6480_s6 + $0x2540] sm:$0xff]  ;;  %1592 = vst [vmem:[%s6488_s7 + $0x948] sm:$0xff] %v1591_v41 }
 0x13c   : > { %v1595_v43 = vld [vmem:[%s6480_s6 + $0x2560] sm:$0xff]  ;;  %1594 = vst [vmem:[%s6488_s7 + $0x950] sm:$0xff] %v1593_v42 }
 0x13d   : > { %1596 = vst [vmem:[%s6488_s7 + $0x958] sm:$0xff] %v1595_v43  ;;  %v1597_v44 = vld [vmem:[%s6480_s6 + $0x2580] sm:$0xff] }
 0x13e   : > { %v1599_v45 = vld [vmem:[%s6480_s6 + $0x25a0] sm:$0xff]  ;;  %1598 = vst [vmem:[%s6488_s7 + $0x960] sm:$0xff] %v1597_v44 }
 0x13f   : > { %v1601_v46 = vld [vmem:[%s6480_s6 + $0x25c0] sm:$0xff]  ;;  %1600 = vst [vmem:[%s6488_s7 + $0x968] sm:$0xff] %v1599_v45 }
 0x140   : > { %1602 = vst [vmem:[%s6488_s7 + $0x970] sm:$0xff] %v1601_v46  ;;  %v1603_v47 = vld [vmem:[%s6480_s6 + $0x25e0] sm:$0xff] }
 0x141   : > { %v1605_v48 = vld [vmem:[%s6480_s6 + $0x2600] sm:$0xff]  ;;  %1604 = vst [vmem:[%s6488_s7 + $0x978] sm:$0xff] %v1603_v47 }
 0x142   : > { %v1607_v49 = vld [vmem:[%s6480_s6 + $0x2620] sm:$0xff]  ;;  %1606 = vst [vmem:[%s6488_s7 + $0x980] sm:$0xff] %v1605_v48 }
 0x143   : > { %1608 = vst [vmem:[%s6488_s7 + $0x988] sm:$0xff] %v1607_v49  ;;  %v1609_v50 = vld [vmem:[%s6480_s6 + $0x2640] sm:$0xff] }
 0x144   : > { %v1611_v51 = vld [vmem:[%s6480_s6 + $0x2660] sm:$0xff]  ;;  %1610 = vst [vmem:[%s6488_s7 + $0x990] sm:$0xff] %v1609_v50 }
 0x145   : > { %v1613_v52 = vld [vmem:[%s6480_s6 + $0x2680] sm:$0xff]  ;;  %1612 = vst [vmem:[%s6488_s7 + $0x998] sm:$0xff] %v1611_v51 }
 0x146   : > { %1614 = vst [vmem:[%s6488_s7 + $0x9a0] sm:$0xff] %v1613_v52  ;;  %v1615_v53 = vld [vmem:[%s6480_s6 + $0x26a0] sm:$0xff] }
 0x147   : > { %v1617_v54 = vld [vmem:[%s6480_s6 + $0x26c0] sm:$0xff]  ;;  %1616 = vst [vmem:[%s6488_s7 + $0x9a8] sm:$0xff] %v1615_v53 }
 0x148   : > { %v1619_v55 = vld [vmem:[%s6480_s6 + $0x26e0] sm:$0xff]  ;;  %1618 = vst [vmem:[%s6488_s7 + $0x9b0] sm:$0xff] %v1617_v54 }
 0x149   : > { %1620 = vst [vmem:[%s6488_s7 + $0x9b8] sm:$0xff] %v1619_v55  ;;  %v1621_v56 = vld [vmem:[%s6480_s6 + $0x2700] sm:$0xff] }
 0x14a   : > { %v1623_v57 = vld [vmem:[%s6480_s6 + $0x2720] sm:$0xff]  ;;  %1622 = vst [vmem:[%s6488_s7 + $0x9c0] sm:$0xff] %v1621_v56 }
 0x14b   : > { %v1625_v58 = vld [vmem:[%s6480_s6 + $0x2740] sm:$0xff]  ;;  %1624 = vst [vmem:[%s6488_s7 + $0x9c8] sm:$0xff] %v1623_v57 }
 0x14c   : > { %1626 = vst [vmem:[%s6488_s7 + $0x9d0] sm:$0xff] %v1625_v58  ;;  %v1627_v59 = vld [vmem:[%s6480_s6 + $0x2760] sm:$0xff] }
 0x14d   : > { %v1629_v60 = vld [vmem:[%s6480_s6 + $0x2780] sm:$0xff]  ;;  %1628 = vst [vmem:[%s6488_s7 + $0x9d8] sm:$0xff] %v1627_v59 }
 0x14e   : > { %v1631_v61 = vld [vmem:[%s6480_s6 + $0x27a0] sm:$0xff]  ;;  %1630 = vst [vmem:[%s6488_s7 + $0x9e0] sm:$0xff] %v1629_v60 }
 0x14f   : > { %1632 = vst [vmem:[%s6488_s7 + $0x9e8] sm:$0xff] %v1631_v61  ;;  %v1633_v62 = vld [vmem:[%s6480_s6 + $0x27c0] sm:$0xff] }
 0x150   : > { %v1635_v63 = vld [vmem:[%s6480_s6 + $0x27e0] sm:$0xff]  ;;  %1634 = vst [vmem:[%s6488_s7 + $0x9f0] sm:$0xff] %v1633_v62 }
 0x151   : > { %v1637_v0 = vld [vmem:[%s6480_s6 + $0x2800] sm:$0xff]  ;;  %1636 = vst [vmem:[%s6488_s7 + $0x9f8] sm:$0xff] %v1635_v63 }
 0x152   : > { %1638 = vst [vmem:[%s6488_s7 + $0xa00] sm:$0xff] %v1637_v0  ;;  %v1639_v1 = vld [vmem:[%s6480_s6 + $0x2820] sm:$0xff] }
 0x153   : > { %v1641_v2 = vld [vmem:[%s6480_s6 + $0x2840] sm:$0xff]  ;;  %1640 = vst [vmem:[%s6488_s7 + $0xa08] sm:$0xff] %v1639_v1 }
 0x154   : > { %v1643_v3 = vld [vmem:[%s6480_s6 + $0x2860] sm:$0xff]  ;;  %1642 = vst [vmem:[%s6488_s7 + $0xa10] sm:$0xff] %v1641_v2 }
 0x155   : > { %1644 = vst [vmem:[%s6488_s7 + $0xa18] sm:$0xff] %v1643_v3  ;;  %v1645_v4 = vld [vmem:[%s6480_s6 + $0x2880] sm:$0xff] }
 0x156   : > { %v1647_v5 = vld [vmem:[%s6480_s6 + $0x28a0] sm:$0xff]  ;;  %1646 = vst [vmem:[%s6488_s7 + $0xa20] sm:$0xff] %v1645_v4 }
 0x157   : > { %v1649_v6 = vld [vmem:[%s6480_s6 + $0x28c0] sm:$0xff]  ;;  %1648 = vst [vmem:[%s6488_s7 + $0xa28] sm:$0xff] %v1647_v5 }
 0x158   : > { %1650 = vst [vmem:[%s6488_s7 + $0xa30] sm:$0xff] %v1649_v6  ;;  %v1651_v7 = vld [vmem:[%s6480_s6 + $0x28e0] sm:$0xff] }
 0x159   : > { %v1653_v8 = vld [vmem:[%s6480_s6 + $0x2900] sm:$0xff]  ;;  %1652 = vst [vmem:[%s6488_s7 + $0xa38] sm:$0xff] %v1651_v7 }
 0x15a   : > { %v1655_v9 = vld [vmem:[%s6480_s6 + $0x2920] sm:$0xff]  ;;  %1654 = vst [vmem:[%s6488_s7 + $0xa40] sm:$0xff] %v1653_v8 }
 0x15b   : > { %1656 = vst [vmem:[%s6488_s7 + $0xa48] sm:$0xff] %v1655_v9  ;;  %v1657_v10 = vld [vmem:[%s6480_s6 + $0x2940] sm:$0xff] }
 0x15c   : > { %v1659_v11 = vld [vmem:[%s6480_s6 + $0x2960] sm:$0xff]  ;;  %1658 = vst [vmem:[%s6488_s7 + $0xa50] sm:$0xff] %v1657_v10 }
 0x15d   : > { %v1661_v12 = vld [vmem:[%s6480_s6 + $0x2980] sm:$0xff]  ;;  %1660 = vst [vmem:[%s6488_s7 + $0xa58] sm:$0xff] %v1659_v11 }
 0x15e   : > { %1662 = vst [vmem:[%s6488_s7 + $0xa60] sm:$0xff] %v1661_v12  ;;  %v1663_v13 = vld [vmem:[%s6480_s6 + $0x29a0] sm:$0xff] }
 0x15f   : > { %v1665_v14 = vld [vmem:[%s6480_s6 + $0x29c0] sm:$0xff]  ;;  %1664 = vst [vmem:[%s6488_s7 + $0xa68] sm:$0xff] %v1663_v13 }
 0x160   : > { %v1667_v15 = vld [vmem:[%s6480_s6 + $0x29e0] sm:$0xff]  ;;  %1666 = vst [vmem:[%s6488_s7 + $0xa70] sm:$0xff] %v1665_v14 }
 0x161   : > { %1668 = vst [vmem:[%s6488_s7 + $0xa78] sm:$0xff] %v1667_v15  ;;  %v1669_v16 = vld [vmem:[%s6480_s6 + $0x2a00] sm:$0xff] }
 0x162   : > { %v1671_v17 = vld [vmem:[%s6480_s6 + $0x2a20] sm:$0xff]  ;;  %1670 = vst [vmem:[%s6488_s7 + $0xa80] sm:$0xff] %v1669_v16 }
 0x163   : > { %v1673_v18 = vld [vmem:[%s6480_s6 + $0x2a40] sm:$0xff]  ;;  %1672 = vst [vmem:[%s6488_s7 + $0xa88] sm:$0xff] %v1671_v17 }
 0x164   : > { %1674 = vst [vmem:[%s6488_s7 + $0xa90] sm:$0xff] %v1673_v18  ;;  %v1675_v19 = vld [vmem:[%s6480_s6 + $0x2a60] sm:$0xff] }
 0x165   : > { %v1677_v20 = vld [vmem:[%s6480_s6 + $0x2a80] sm:$0xff]  ;;  %1676 = vst [vmem:[%s6488_s7 + $0xa98] sm:$0xff] %v1675_v19 }
 0x166   : > { %v1679_v21 = vld [vmem:[%s6480_s6 + $0x2aa0] sm:$0xff]  ;;  %1678 = vst [vmem:[%s6488_s7 + $0xaa0] sm:$0xff] %v1677_v20 }
 0x167   : > { %1680 = vst [vmem:[%s6488_s7 + $0xaa8] sm:$0xff] %v1679_v21  ;;  %v1681_v22 = vld [vmem:[%s6480_s6 + $0x2ac0] sm:$0xff] }
 0x168   : > { %v1683_v23 = vld [vmem:[%s6480_s6 + $0x2ae0] sm:$0xff]  ;;  %1682 = vst [vmem:[%s6488_s7 + $0xab0] sm:$0xff] %v1681_v22 }
 0x169   : > { %v1685_v24 = vld [vmem:[%s6480_s6 + $0x2b00] sm:$0xff]  ;;  %1684 = vst [vmem:[%s6488_s7 + $0xab8] sm:$0xff] %v1683_v23 }
 0x16a   : > { %1686 = vst [vmem:[%s6488_s7 + $0xac0] sm:$0xff] %v1685_v24  ;;  %v1687_v25 = vld [vmem:[%s6480_s6 + $0x2b20] sm:$0xff] }
 0x16b   : > { %v1689_v26 = vld [vmem:[%s6480_s6 + $0x2b40] sm:$0xff]  ;;  %1688 = vst [vmem:[%s6488_s7 + $0xac8] sm:$0xff] %v1687_v25 }
 0x16c   : > { %v1691_v27 = vld [vmem:[%s6480_s6 + $0x2b60] sm:$0xff]  ;;  %1690 = vst [vmem:[%s6488_s7 + $0xad0] sm:$0xff] %v1689_v26 }
 0x16d   : > { %1692 = vst [vmem:[%s6488_s7 + $0xad8] sm:$0xff] %v1691_v27  ;;  %v1693_v28 = vld [vmem:[%s6480_s6 + $0x2b80] sm:$0xff] }
 0x16e   : > { %v1695_v29 = vld [vmem:[%s6480_s6 + $0x2ba0] sm:$0xff]  ;;  %1694 = vst [vmem:[%s6488_s7 + $0xae0] sm:$0xff] %v1693_v28 }
 0x16f   : > { %v1697_v30 = vld [vmem:[%s6480_s6 + $0x2bc0] sm:$0xff]  ;;  %1696 = vst [vmem:[%s6488_s7 + $0xae8] sm:$0xff] %v1695_v29 }
 0x170   : > { %1698 = vst [vmem:[%s6488_s7 + $0xaf0] sm:$0xff] %v1697_v30  ;;  %v1699_v31 = vld [vmem:[%s6480_s6 + $0x2be0] sm:$0xff] }
 0x171   : > { %v1701_v32 = vld [vmem:[%s6480_s6 + $0x2c00] sm:$0xff]  ;;  %1700 = vst [vmem:[%s6488_s7 + $0xaf8] sm:$0xff] %v1699_v31 }
 0x172   : > { %v1703_v33 = vld [vmem:[%s6480_s6 + $0x2c20] sm:$0xff]  ;;  %1702 = vst [vmem:[%s6488_s7 + $0xb00] sm:$0xff] %v1701_v32 }
 0x173   : > { %1704 = vst [vmem:[%s6488_s7 + $0xb08] sm:$0xff] %v1703_v33  ;;  %v1705_v34 = vld [vmem:[%s6480_s6 + $0x2c40] sm:$0xff] }
 0x174   : > { %v1707_v35 = vld [vmem:[%s6480_s6 + $0x2c60] sm:$0xff]  ;;  %1706 = vst [vmem:[%s6488_s7 + $0xb10] sm:$0xff] %v1705_v34 }
 0x175   : > { %v1709_v36 = vld [vmem:[%s6480_s6 + $0x2c80] sm:$0xff]  ;;  %1708 = vst [vmem:[%s6488_s7 + $0xb18] sm:$0xff] %v1707_v35 }
 0x176   : > { %1710 = vst [vmem:[%s6488_s7 + $0xb20] sm:$0xff] %v1709_v36  ;;  %v1711_v37 = vld [vmem:[%s6480_s6 + $0x2ca0] sm:$0xff] }
 0x177   : > { %v1713_v38 = vld [vmem:[%s6480_s6 + $0x2cc0] sm:$0xff]  ;;  %1712 = vst [vmem:[%s6488_s7 + $0xb28] sm:$0xff] %v1711_v37 }
 0x178   : > { %v1715_v39 = vld [vmem:[%s6480_s6 + $0x2ce0] sm:$0xff]  ;;  %1714 = vst [vmem:[%s6488_s7 + $0xb30] sm:$0xff] %v1713_v38 }
 0x179   : > { %1716 = vst [vmem:[%s6488_s7 + $0xb38] sm:$0xff] %v1715_v39  ;;  %v1717_v40 = vld [vmem:[%s6480_s6 + $0x2d00] sm:$0xff] }
 0x17a   : > { %v1719_v41 = vld [vmem:[%s6480_s6 + $0x2d20] sm:$0xff]  ;;  %1718 = vst [vmem:[%s6488_s7 + $0xb40] sm:$0xff] %v1717_v40 }
 0x17b   : > { %v1721_v42 = vld [vmem:[%s6480_s6 + $0x2d40] sm:$0xff]  ;;  %1720 = vst [vmem:[%s6488_s7 + $0xb48] sm:$0xff] %v1719_v41 }
 0x17c   : > { %1722 = vst [vmem:[%s6488_s7 + $0xb50] sm:$0xff] %v1721_v42  ;;  %v1723_v43 = vld [vmem:[%s6480_s6 + $0x2d60] sm:$0xff] }
 0x17d   : > { %v1725_v44 = vld [vmem:[%s6480_s6 + $0x2d80] sm:$0xff]  ;;  %1724 = vst [vmem:[%s6488_s7 + $0xb58] sm:$0xff] %v1723_v43 }
 0x17e   : > { %v1727_v45 = vld [vmem:[%s6480_s6 + $0x2da0] sm:$0xff]  ;;  %1726 = vst [vmem:[%s6488_s7 + $0xb60] sm:$0xff] %v1725_v44 }
 0x17f   : > { %1728 = vst [vmem:[%s6488_s7 + $0xb68] sm:$0xff] %v1727_v45  ;;  %v1729_v46 = vld [vmem:[%s6480_s6 + $0x2dc0] sm:$0xff] }
 0x180   : > { %v1731_v47 = vld [vmem:[%s6480_s6 + $0x2de0] sm:$0xff]  ;;  %1730 = vst [vmem:[%s6488_s7 + $0xb70] sm:$0xff] %v1729_v46 }
 0x181   : > { %v1733_v48 = vld [vmem:[%s6480_s6 + $0x2e00] sm:$0xff]  ;;  %1732 = vst [vmem:[%s6488_s7 + $0xb78] sm:$0xff] %v1731_v47 }
 0x182   : > { %1734 = vst [vmem:[%s6488_s7 + $0xb80] sm:$0xff] %v1733_v48  ;;  %v1735_v49 = vld [vmem:[%s6480_s6 + $0x2e20] sm:$0xff] }
 0x183   : > { %v1737_v50 = vld [vmem:[%s6480_s6 + $0x2e40] sm:$0xff]  ;;  %1736 = vst [vmem:[%s6488_s7 + $0xb88] sm:$0xff] %v1735_v49 }
 0x184   : > { %v1739_v51 = vld [vmem:[%s6480_s6 + $0x2e60] sm:$0xff]  ;;  %1738 = vst [vmem:[%s6488_s7 + $0xb90] sm:$0xff] %v1737_v50 }
 0x185   : > { %1740 = vst [vmem:[%s6488_s7 + $0xb98] sm:$0xff] %v1739_v51  ;;  %v1741_v52 = vld [vmem:[%s6480_s6 + $0x2e80] sm:$0xff] }
 0x186   : > { %v1743_v53 = vld [vmem:[%s6480_s6 + $0x2ea0] sm:$0xff]  ;;  %1742 = vst [vmem:[%s6488_s7 + $0xba0] sm:$0xff] %v1741_v52 }
 0x187   : > { %v1745_v54 = vld [vmem:[%s6480_s6 + $0x2ec0] sm:$0xff]  ;;  %1744 = vst [vmem:[%s6488_s7 + $0xba8] sm:$0xff] %v1743_v53 }
 0x188   : > { %1746 = vst [vmem:[%s6488_s7 + $0xbb0] sm:$0xff] %v1745_v54  ;;  %v1747_v55 = vld [vmem:[%s6480_s6 + $0x2ee0] sm:$0xff] }
 0x189   : > { %v1749_v56 = vld [vmem:[%s6480_s6 + $0x2f00] sm:$0xff]  ;;  %1748 = vst [vmem:[%s6488_s7 + $0xbb8] sm:$0xff] %v1747_v55 }
 0x18a   : > { %v1751_v57 = vld [vmem:[%s6480_s6 + $0x2f20] sm:$0xff]  ;;  %1750 = vst [vmem:[%s6488_s7 + $0xbc0] sm:$0xff] %v1749_v56 }
 0x18b   : > { %1752 = vst [vmem:[%s6488_s7 + $0xbc8] sm:$0xff] %v1751_v57  ;;  %v1753_v58 = vld [vmem:[%s6480_s6 + $0x2f40] sm:$0xff] }
 0x18c   : > { %v1755_v59 = vld [vmem:[%s6480_s6 + $0x2f60] sm:$0xff]  ;;  %1754 = vst [vmem:[%s6488_s7 + $0xbd0] sm:$0xff] %v1753_v58 }
 0x18d   : > { %v1757_v60 = vld [vmem:[%s6480_s6 + $0x2f80] sm:$0xff]  ;;  %1756 = vst [vmem:[%s6488_s7 + $0xbd8] sm:$0xff] %v1755_v59 }
 0x18e   : > { %1758 = vst [vmem:[%s6488_s7 + $0xbe0] sm:$0xff] %v1757_v60  ;;  %v1759_v61 = vld [vmem:[%s6480_s6 + $0x2fa0] sm:$0xff] }
 0x18f   : > { %v1761_v62 = vld [vmem:[%s6480_s6 + $0x2fc0] sm:$0xff]  ;;  %1760 = vst [vmem:[%s6488_s7 + $0xbe8] sm:$0xff] %v1759_v61 }
 0x190   : > { %v1763_v63 = vld [vmem:[%s6480_s6 + $0x2fe0] sm:$0xff]  ;;  %1762 = vst [vmem:[%s6488_s7 + $0xbf0] sm:$0xff] %v1761_v62 }
 0x191   : > { %1764 = vst [vmem:[%s6488_s7 + $0xbf8] sm:$0xff] %v1763_v63  ;;  %v1765_v0 = vld [vmem:[%s6480_s6 + $0x3000] sm:$0xff] }
 0x192   : > { %v1767_v1 = vld [vmem:[%s6480_s6 + $0x3020] sm:$0xff]  ;;  %1766 = vst [vmem:[%s6488_s7 + $0xc00] sm:$0xff] %v1765_v0 }
 0x193   : > { %v1769_v2 = vld [vmem:[%s6480_s6 + $0x3040] sm:$0xff]  ;;  %1768 = vst [vmem:[%s6488_s7 + $0xc08] sm:$0xff] %v1767_v1 }
 0x194   : > { %1770 = vst [vmem:[%s6488_s7 + $0xc10] sm:$0xff] %v1769_v2  ;;  %v1771_v3 = vld [vmem:[%s6480_s6 + $0x3060] sm:$0xff] }
 0x195   : > { %v1773_v4 = vld [vmem:[%s6480_s6 + $0x3080] sm:$0xff]  ;;  %1772 = vst [vmem:[%s6488_s7 + $0xc18] sm:$0xff] %v1771_v3 }
 0x196   : > { %v1775_v5 = vld [vmem:[%s6480_s6 + $0x30a0] sm:$0xff]  ;;  %1774 = vst [vmem:[%s6488_s7 + $0xc20] sm:$0xff] %v1773_v4 }
 0x197   : > { %1776 = vst [vmem:[%s6488_s7 + $0xc28] sm:$0xff] %v1775_v5  ;;  %v1777_v6 = vld [vmem:[%s6480_s6 + $0x30c0] sm:$0xff] }
 0x198   : > { %v1779_v7 = vld [vmem:[%s6480_s6 + $0x30e0] sm:$0xff]  ;;  %1778 = vst [vmem:[%s6488_s7 + $0xc30] sm:$0xff] %v1777_v6 }
 0x199   : > { %1780 = vst [vmem:[%s6488_s7 + $0xc38] sm:$0xff] %v1779_v7 }
 0x19a PF: > { %p5219_p5 = scmp.ge.s32.totalorder %s6408_s20, 1  ;;  %p1802_p6 = scmp.lt.s32.totalorder %s6408_s20, 5 }
 0x19c   : > { %p1803_p7 = pnand %p5219_p5, %p1802_p6 }
 0x19d   : > { %s1809_s8 = sand.u32 (!%p1803_p7), 1, %s6400_s18   ;;  %s5220_s9 = sshll.u32 (!%p1803_p7), %s6460_s21, 1 }
 0x19e   : > { %1806 = sbr.rel (%p1803_p7) target bundleno = 1305 (0x519), region = 74  ;;  %p1842_p8 = scmp.lt.s32.totalorder (!%p1803_p7), %s5220_s9, 7 }
 0x19f   : > { %s5712_s10 = smul.u32 (!%p1803_p7), 3136, %s1809_s8  ;;  %s5221_s11 = sshll.u32 (!%p1803_p7), %s6460_s21, 5 }
 0x1a0   : > { %p1847_p9 = scmp.lt.s32.totalorder (!%p1803_p7), %s5221_s11, 127  ;;  %p5223_p10 = scmp.ne.s32.totalorder (!%p1803_p7), %s6460_s21, 0 }
 0x1a1   : > { %s7284_s18 = scalar_lea.vmem (!%p1803_p7), [#allocation3], %s5712_s10 }
 0x1a5   : > { %s7867_s9 = smov (!%p1842_p8, %s5220_s9), 7  ;;  %s7869_s11 = smov (!%p1847_p9, %s5221_s11), 127 }
 0x1a6   : > { %s1844_s14 = scalar_lea.vmem %s7859_s2, %s7867_s9  ;;  %s5222_s15 = sshll.u32 %s7869_s11, 2  ;;  %v6410_v8 = vmov (!%p5223_p10), 0.0  }
 0x1a7   : > { %s7282_s20 = scalar_lea.vmem %s7860_s3, %s5222_s15  ;;  %1856 = sbr.rel (%p5223_p10) target bundleno = 430 (0x1ae), region = 82  ;;  %1857 = vst [vmem:[#allocation2] sm:$0x3] (!%p5223_p10), %v6410_v8 }
 0x1ae PF: > { %v5747_v9 = vld [vmem:[%s7284_s18 + $0x4] ss:$8 sps:$4 sm:$0xff]   ;;  %v5751_v11 = vld [vmem:[%s7284_s18] ss:$8 sps:$4 sm:$0xff]   ;;  %v5753_v13 = vld [vmem:[%s7284_s18 + $0x14] ss:$8 sps:$4 sm:$0xff]   ;;  %v2256_v45 = vlaneseq }
 0x1af   : > { %v5749_v10 = vld [vmem:[%s7284_s18 + $0x604] ss:$8 sps:$4 sm:$0xff]   ;;  %4419 = vmatprep.subr.bf16.mxu1 %v5747_v9  ;;  %v5752_v12 = vld [vmem:[%s7284_s18 + $0x600] ss:$8 sps:$4 sm:$0xff]   ;;  %v5755_v14 = vld [vmem:[%s7284_s18 + $0x614] ss:$8 sps:$4 sm:$0xff]  }
 0x1b0   : > { %4665 = vmatprep.subr.bf16.mxu0 %v5749_v10  ;;  %4420 = vmatpush1.bf16.msra.mxu1 %v5751_v11  ;;  %v5757_v15 = vld [vmem:[%s7284_s18 + $0x10] ss:$8 sps:$4 sm:$0xff]   ;;  %v5759_v17 = vld [vmem:[%s7284_s18 + $0x24] ss:$8 sps:$4 sm:$0xff]   ;;  %v5763_v19 = vld [vmem:[%s7284_s18 + $0x20] ss:$8 sps:$4 sm:$0xff]  }
 0x1b1   : > { %4666 = vmatpush1.bf16.msra.mxu0 %v5752_v12  ;;  %4421 = vmatprep.subr.bf16.mxu1 %v5753_v13  ;;  %v5758_v16 = vld [vmem:[%s7284_s18 + $0x610] ss:$8 sps:$4 sm:$0xff]   ;;  %v5761_v18 = vld [vmem:[%s7284_s18 + $0x624] ss:$8 sps:$4 sm:$0xff]   ;;  %v5764_v20 = vld [vmem:[%s7284_s18 + $0x620] ss:$8 sps:$4 sm:$0xff]  }
 0x1b2   : > { %4667 = vmatprep.subr.bf16.mxu0 %v5755_v14  ;;  %v5765_v21 = vld [vmem:[%s7284_s18 + $0x34] ss:$8 sps:$4 sm:$0xff]   ;;  %v5769_v23 = vld [vmem:[%s7284_s18 + $0x30] ss:$8 sps:$4 sm:$0xff]   ;;  %v5771_v25 = vld [vmem:[%s7284_s18 + $0x44] ss:$8 sps:$4 sm:$0xff]  }
 0x1b3   : > { %v5767_v22 = vld [vmem:[%s7284_s18 + $0x634] ss:$8 sps:$4 sm:$0xff]   ;;  %v5770_v24 = vld [vmem:[%s7284_s18 + $0x630] ss:$8 sps:$4 sm:$0xff]   ;;  %v5773_v26 = vld [vmem:[%s7284_s18 + $0x644] ss:$8 sps:$4 sm:$0xff]  }
 0x1b4   : > { %4422 = vmatpush1.bf16.msra.mxu1 %v5757_v15  ;;  %v5775_v27 = vld [vmem:[%s7284_s18 + $0x40] ss:$8 sps:$4 sm:$0xff]   ;;  %v5777_v29 = vld [vmem:[%s7284_s18 + $0x54] ss:$8 sps:$4 sm:$0xff]   ;;  %v5781_v31 = vld [vmem:[%s7284_s18 + $0x50] ss:$8 sps:$4 sm:$0xff]  }
 0x1b5   : > { %4668 = vmatpush1.bf16.msra.mxu0 %v5758_v16  ;;  %4423 = vmatprep.subr.bf16.mxu1 %v5759_v17  ;;  %v5776_v28 = vld [vmem:[%s7284_s18 + $0x640] ss:$8 sps:$4 sm:$0xff]   ;;  %v5779_v30 = vld [vmem:[%s7284_s18 + $0x654] ss:$8 sps:$4 sm:$0xff]   ;;  %v5782_v32 = vld [vmem:[%s7284_s18 + $0x650] ss:$8 sps:$4 sm:$0xff]  }
 0x1b6   : > { %4669 = vmatprep.subr.bf16.mxu0 %v5761_v18  ;;  %v5783_v33 = vld [vmem:[%s7284_s18 + $0x64] ss:$8 sps:$4 sm:$0xff]   ;;  %v5787_v35 = vld [vmem:[%s7284_s18 + $0x60] ss:$8 sps:$4 sm:$0xff]   ;;  %v5789_v37 = vld [vmem:[%s7284_s18 + $0x74] ss:$8 sps:$4 sm:$0xff]  }
 0x1b7   : > { %v5785_v34 = vld [vmem:[%s7284_s18 + $0x664] ss:$8 sps:$4 sm:$0xff]   ;;  %v5788_v36 = vld [vmem:[%s7284_s18 + $0x660] ss:$8 sps:$4 sm:$0xff]   ;;  %v5791_v38 = vld [vmem:[%s7284_s18 + $0x674] ss:$8 sps:$4 sm:$0xff]  }
 0x1b8   : > { %4424 = vmatpush1.bf16.msra.mxu1 %v5763_v19  ;;  %v5793_v39 = vld [vmem:[%s7284_s18 + $0x70] ss:$8 sps:$4 sm:$0xff]   ;;  %v5795_v41 = vld [vmem:[%s7284_s18 + $0x84] ss:$8 sps:$4 sm:$0xff]   ;;  %v5799_v43 = vld [vmem:[%s7284_s18 + $0x80] ss:$8 sps:$4 sm:$0xff]  }
 0x1b9   : > { %4670 = vmatpush1.bf16.msra.mxu0 %v5764_v20  ;;  %4425 = vmatprep.subr.bf16.mxu1 %v5765_v21  ;;  %v5794_v40 = vld [vmem:[%s7284_s18 + $0x670] ss:$8 sps:$4 sm:$0xff]   ;;  %v5797_v42 = vld [vmem:[%s7284_s18 + $0x684] ss:$8 sps:$4 sm:$0xff]   ;;  %v5800_v44 = vld [vmem:[%s7284_s18 + $0x680] ss:$8 sps:$4 sm:$0xff]  }
 0x1ba   : > { %4671 = vmatprep.subr.bf16.mxu0 %v5767_v22  ;;  %v6411_v46 = vmov 1966171168   ;;  %v5801_v48 = vld [vmem:[%s7284_s18 + $0x94] ss:$8 sps:$4 sm:$0xff]   ;;  %v5805_v50 = vld [vmem:[%s7284_s18 + $0x90] ss:$8 sps:$4 sm:$0xff]  }
 0x1bb   : > { %v2272_v47 = vunpack.c.l.s4 %v6411_v46  ;;  %v5803_v49 = vld [vmem:[%s7284_s18 + $0x694] ss:$8 sps:$4 sm:$0xff]   ;;  %v7326_v51 = vshrl.u32 %v2256_v45, 7  ;;  %v5806_v53 = vld [vmem:[%s7284_s18 + $0x690] ss:$8 sps:$4 sm:$0xff]   ;;  %v1859_v1 = vld [vmem:[%s7857_s0 + $0x8] sm:$0xff] }
 0x1bc   : > { %4426 = vmatpush1.bf16.msra.mxu1 %v5769_v23  ;;  %v5807_v54 = vld [vmem:[%s7284_s18 + $0xa4] ss:$8 sps:$4 sm:$0xff]   ;;  %v5811_v56 = vld [vmem:[%s7284_s18 + $0xa0] ss:$8 sps:$4 sm:$0xff]   ;;  %v5813_v59 = vld [vmem:[%s7284_s18 + $0xb4] ss:$8 sps:$4 sm:$0xff]   ;;  %v2319_v5 = vcombine.high %v1859_v1, %v1859_v1 }
 0x1bd   : > { %4672 = vmatpush1.bf16.msra.mxu0 %v5770_v24  ;;  %4427 = vmatprep.subr.bf16.mxu1 %v5771_v25  ;;  %v2273_v52 = vunpack.c.0.s8 %v2272_v47  ;;  %v5809_v55 = vld [vmem:[%s7284_s18 + $0x6a4] ss:$8 sps:$4 sm:$0xff]   ;;  %v5812_v57 = vld [vmem:[%s7284_s18 + $0x6a0] ss:$8 sps:$4 sm:$0xff]   ;;  %v5815_v60 = vld [vmem:[%s7284_s18 + $0x6b4] ss:$8 sps:$4 sm:$0xff]  }
 0x1be   : > { %4673 = vmatprep.subr.bf16.mxu0 %v5773_v26  ;;  %v7341_v61 = vld [vmem:[%s7857_s0] sm:$0xff]  ;;  %v5817_v62 = vld [vmem:[%s7284_s18 + $0xb0] ss:$8 sps:$4 sm:$0xff]   ;;  %vm4415_vm0 = vcmask 523264   ;;  %p5634_p11 = scmp.ne.s32.totalorder %s6460_s21, 3 }
 0x1bf   : > { %v7334_v58 = vsub.s32 %v2273_v52, %v7326_v51  ;;  %v5818_v0 = vld [vmem:[%s7284_s18 + $0x6b0] ss:$8 sps:$4 sm:$0xff]   ;;  %v5819_v2 = vld [vmem:[%s7284_s18 + $0xc4] ss:$8 sps:$4 sm:$0xff]   ;;  %v5823_v8 = vld [vmem:[%s7284_s18 + $0xc0] ss:$8 sps:$4 sm:$0xff]  }
 0x1c0   : > { %4428 = vmatpush1.bf16.msra.mxu1 %v5775_v27  ;;  %v5821_v3 = vld [vmem:[%s7284_s18 + $0x6c4] ss:$8 sps:$4 sm:$0xff]   ;;  %v5824_v9 = vld [vmem:[%s7284_s18 + $0x6c0] ss:$8 sps:$4 sm:$0xff]   ;;  %v5825_v10 = vld [vmem:[%s7284_s18 + $0xd4] ss:$8 sps:$4 sm:$0xff]  }
 0x1c1   : > { %4674 = vmatpush1.bf16.msra.mxu0 %v5776_v28  ;;  %4429 = vmatprep.subr.bf16.mxu1 %v5777_v29  ;;  %v2277_v63 = vrot.slane %v7341_v61, %v7334_v58  ;;  %v2333_v7 = vrot.slane %v2319_v5, %v7334_v58  ;;  %v5827_v11 = vld [vmem:[%s7284_s18 + $0x6d4] ss:$8 sps:$4 sm:$0xff]   ;;  %v5829_v14 = vld [vmem:[%s7284_s18 + $0xd0] ss:$8 sps:$4 sm:$0xff]   ;;  %v5831_v16 = vld [vmem:[%s7284_s18 + $0xe4] ss:$8 sps:$4 sm:$0xff]  }
 0x1c2   : > { %4675 = vmatprep.subr.bf16.mxu0 %v5779_v30  ;;  %v5830_v15 = vld [vmem:[%s7284_s18 + $0x6d0] ss:$8 sps:$4 sm:$0xff]   ;;  %v5833_v17 = vld [vmem:[%s7284_s18 + $0x6e4] ss:$8 sps:$4 sm:$0xff]   ;;  %v5835_v18 = vld [vmem:[%s7284_s18 + $0xe0] ss:$8 sps:$4 sm:$0xff]  }
 0x1c3   : > { %v2285_v4 = vcombine.high %v2277_v63, %v2277_v63  ;;  %v2335_v12 = vcombine.high %v2333_v7, %v2333_v7  ;;  %v5836_v19 = vld [vmem:[%s7284_s18 + $0x6e0] ss:$8 sps:$4 sm:$0xff]   ;;  %v5837_v20 = vld [vmem:[%s7284_s18 + $0xf4] ss:$8 sps:$4 sm:$0xff]   ;;  %v5841_v22 = vld [vmem:[%s7284_s18 + $0xf0] ss:$8 sps:$4 sm:$0xff]   ;;  %v7372_v26 = vrot.slane %v2277_v63, %v7334_v58  ;;  %v7375_v27 = vrot.slane %v2333_v7, %v7334_v58 }
 0x1c4   : > { %4430 = vmatpush1.bf16.msra.mxu1 %v5781_v31  ;;  %v5839_v21 = vld [vmem:[%s7284_s18 + $0x6f4] ss:$8 sps:$4 sm:$0xff]   ;;  %v5842_v23 = vld [vmem:[%s7284_s18 + $0x6f0] ss:$8 sps:$4 sm:$0xff]   ;;  %v5846_v24 = vld [vmem:[%s7284_s18 + $0x104] ss:$8 sps:$4 sm:$0xff]  }
 0x1c5   : > { %4676 = vmatpush1.bf16.msra.mxu0 %v5782_v32  ;;  %4431 = vmatprep.subr.bf16.mxu1 %v5783_v33  ;;  %v2307_v6 = vrot.slane %v2285_v4, %v7334_v58  ;;  %v2363_v13 = vrot.slane %v2335_v12, %v7334_v58  ;;  %v5850_v25 = vld [vmem:[%s7284_s18 + $0x704] ss:$8 sps:$4 sm:$0xff]   ;;  %v5844_v28 = vld [vmem:[%s7284_s18 + $0x100] ss:$8 sps:$4 sm:$0xff]   ;;  %v5853_v30 = vld [vmem:[%s7284_s18 + $0x114] ss:$8 sps:$4 sm:$0xff]  }
 0x1c6   : > { %4677 = vmatprep.subr.bf16.mxu0 %v5785_v34  ;;  %v5848_v29 = vld [vmem:[%s7284_s18 + $0x700] ss:$8 sps:$4 sm:$0xff]   ;;  %v5856_v31 = vld [vmem:[%s7284_s18 + $0x714] ss:$8 sps:$4 sm:$0xff]   ;;  %v5851_v34 = vld [vmem:[%s7284_s18 + $0x110] ss:$8 sps:$4 sm:$0xff]  }
 0x1c7   : > { %4451 = vmatprep.mubr.bf16.mxu1 %v2307_v6  ;;  %4697 = vmatprep.mubr.bf16.mxu0 %v2363_v13  ;;  %v2317_v32 = vcombine.high %v2307_v6, %v2307_v6  ;;  %v2367_v33 = vcombine.high %v2363_v13, %v2363_v13  ;;  %v5874_v45 = vld [vmem:[%s7284_s18 + $0x744] ss:$8 sps:$4 sm:$0xff]   ;;  %v5869_v46 = vld [vmem:[%s7284_s18 + $0x140] ss:$8 sps:$4 sm:$0xff]   ;;  %v5878_v52 = vld [vmem:[%s7284_s18 + $0x750] ss:$8 sps:$4 sm:$0xff]  }
 0x1c8   : > { %4432 = vmatpush1.bf16.msra.mxu1 %v5787_v35  ;;  %v5854_v35 = vld [vmem:[%s7284_s18 + $0x710] ss:$8 sps:$4 sm:$0xff]   ;;  %v5872_v47 = vld [vmem:[%s7284_s18 + $0x740] ss:$8 sps:$4 sm:$0xff]   ;;  %v5895_v63 = vld [vmem:[%s7284_s18 + $0x184] ss:$8 sps:$4 sm:$0xff]  }
 0x1c9   : > { %4678 = vmatpush1.bf16.msra.mxu0 %v5788_v36  ;;  %4433 = vmatprep.subr.bf16.mxu1 %v5789_v37  ;;  %v5859_v36 = vld [vmem:[%s7284_s18 + $0x124] ss:$8 sps:$4 sm:$0xff]   ;;  %v5893_v1 = vld [vmem:[%s7284_s18 + $0x180] ss:$8 sps:$4 sm:$0xff]   ;;  %v5904_v4 = vld [vmem:[%s7284_s18 + $0x794] ss:$8 sps:$4 sm:$0xff]  }
 0x1ca   : > { %4679 = vmatprep.subr.bf16.mxu0 %v5791_v38  ;;  %v5862_v37 = vld [vmem:[%s7284_s18 + $0x724] ss:$8 sps:$4 sm:$0xff]   ;;  %v5857_v38 = vld [vmem:[%s7284_s18 + $0x120] ss:$8 sps:$4 sm:$0xff]   ;;  %v5899_v5 = vld [vmem:[%s7284_s18 + $0x190] ss:$8 sps:$4 sm:$0xff]  }
 0x1cb   : > { %v5902_v6 = vld [vmem:[%s7284_s18 + $0x790] ss:$8 sps:$4 sm:$0xff]   ;;  %v5907_v7 = vld [vmem:[%s7284_s18 + $0x1a4] ss:$8 sps:$4 sm:$0xff]   ;;  %v5916_v12 = vld [vmem:[%s7284_s18 + $0x7b4] ss:$8 sps:$4 sm:$0xff]  }
 0x1cc   : > { %4434 = vmatpush1.bf16.msra.mxu1 %v5793_v39  ;;  %v5860_v39 = vld [vmem:[%s7284_s18 + $0x720] ss:$8 sps:$4 sm:$0xff]   ;;  %v5911_v13 = vld [vmem:[%s7284_s18 + $0x1b0] ss:$8 sps:$4 sm:$0xff]  }
 0x1cd   : > { %4680 = vmatpush1.bf16.msra.mxu0 %v5794_v40  ;;  %4435 = vmatprep.subr.bf16.mxu1 %v5795_v41  ;;  %v5865_v40 = vld [vmem:[%s7284_s18 + $0x134] ss:$8 sps:$4 sm:$0xff]  }
 0x1ce   : > { %4681 = vmatprep.subr.bf16.mxu0 %v5797_v42  ;;  %v5868_v41 = vld [vmem:[%s7284_s18 + $0x734] ss:$8 sps:$4 sm:$0xff]   ;;  %v5863_v42 = vld [vmem:[%s7284_s18 + $0x130] ss:$8 sps:$4 sm:$0xff]  }
 0x1d0   : > { %4436 = vmatpush1.bf16.msra.mxu1 %v5799_v43  ;;  %v5866_v43 = vld [vmem:[%s7284_s18 + $0x730] ss:$8 sps:$4 sm:$0xff]  }
 0x1d1   : > { %4682 = vmatpush1.bf16.msra.mxu0 %v5800_v44  ;;  %4437 = vmatprep.subr.bf16.mxu1 %v5801_v48  ;;  %v5871_v44 = vld [vmem:[%s7284_s18 + $0x144] ss:$8 sps:$4 sm:$0xff]   ;;  %v5877_v48 = vld [vmem:[%s7284_s18 + $0x154] ss:$8 sps:$4 sm:$0xff]  }
 0x1d2   : > { %4683 = vmatprep.subr.bf16.mxu0 %v5803_v49  ;;  %v5880_v49 = vld [vmem:[%s7284_s18 + $0x754] ss:$8 sps:$4 sm:$0xff]  }
 0x1d4   : > { %4438 = vmatpush1.bf16.msra.mxu1 %v5805_v50  ;;  %v5875_v50 = vld [vmem:[%s7284_s18 + $0x150] ss:$8 sps:$4 sm:$0xff]  }
 0x1d5   : > { %4684 = vmatpush1.bf16.msra.mxu0 %v5806_v53  ;;  %4439 = vmatprep.subr.bf16.mxu1 %v5807_v54  ;;  %v5883_v53 = vld [vmem:[%s7284_s18 + $0x164] ss:$8 sps:$4 sm:$0xff]  }
 0x1d6   : > { %4685 = vmatprep.subr.bf16.mxu0 %v5809_v55  ;;  %v5886_v54 = vld [vmem:[%s7284_s18 + $0x764] ss:$8 sps:$4 sm:$0xff]   ;;  %v5881_v55 = vld [vmem:[%s7284_s18 + $0x160] ss:$8 sps:$4 sm:$0xff]  }
 0x1d8   : > { %4440 = vmatpush1.bf16.msra.mxu1 %v5811_v56  ;;  %v5884_v56 = vld [vmem:[%s7284_s18 + $0x760] ss:$8 sps:$4 sm:$0xff]  }
 0x1d9   : > { %4686 = vmatpush1.bf16.msra.mxu0 %v5812_v57  ;;  %4441 = vmatprep.subr.bf16.mxu1 %v5813_v59  ;;  %v5889_v57 = vld [vmem:[%s7284_s18 + $0x174] ss:$8 sps:$4 sm:$0xff]  }
 0x1da   : > { %4687 = vmatprep.subr.bf16.mxu0 %v5815_v60  ;;  %v5892_v59 = vld [vmem:[%s7284_s18 + $0x774] ss:$8 sps:$4 sm:$0xff]   ;;  %v5887_v60 = vld [vmem:[%s7284_s18 + $0x170] ss:$8 sps:$4 sm:$0xff]  }
 0x1dc   : > { %4442 = vmatpush1.bf16.msra.mxu1 %v5817_v62  ;;  %v5890_v62 = vld [vmem:[%s7284_s18 + $0x770] ss:$8 sps:$4 sm:$0xff]  }
 0x1dd   : > { %4688 = vmatpush1.bf16.msra.mxu0 %v5818_v0  ;;  %4443 = vmatprep.subr.bf16.mxu1 %v5819_v2  ;;  %v5898_v0 = vld [vmem:[%s7284_s18 + $0x784] ss:$8 sps:$4 sm:$0xff]   ;;  %v5896_v2 = vld [vmem:[%s7284_s18 + $0x780] ss:$8 sps:$4 sm:$0xff]  }
 0x1de   : > { %4689 = vmatprep.subr.bf16.mxu0 %v5821_v3  ;;  %v5901_v3 = vld [vmem:[%s7284_s18 + $0x194] ss:$8 sps:$4 sm:$0xff]  }
 0x1e0   : > { %4444 = vmatpush1.bf16.msra.mxu1 %v5823_v8  ;;  %v5910_v8 = vld [vmem:[%s7284_s18 + $0x7a4] ss:$8 sps:$4 sm:$0xff]  }
 0x1e1   : > { %4690 = vmatpush1.bf16.msra.mxu0 %v5824_v9  ;;  %4445 = vmatprep.subr.bf16.mxu1 %v5825_v10  ;;  %v5905_v9 = vld [vmem:[%s7284_s18 + $0x1a0] ss:$8 sps:$4 sm:$0xff]  }
 0x1e2   : > { %4691 = vmatprep.subr.bf16.mxu0 %v5827_v11  ;;  %v5908_v10 = vld [vmem:[%s7284_s18 + $0x7a0] ss:$8 sps:$4 sm:$0xff]   ;;  %v5913_v11 = vld [vmem:[%s7284_s18 + $0x1b4] ss:$8 sps:$4 sm:$0xff]  }
 0x1e4   : > { %4446 = vmatpush1.bf16.msra.mxu1 %v5829_v14  ;;  %v5914_v14 = vld [vmem:[%s7284_s18 + $0x7b0] ss:$8 sps:$4 sm:$0xff]  }
 0x1e5   : > { %4692 = vmatpush1.bf16.msra.mxu0 %v5830_v15  ;;  %4447 = vmatprep.subr.bf16.mxu1 %v5831_v16  ;;  %v5919_v15 = vld [vmem:[%s7284_s18 + $0x1c4] ss:$8 sps:$4 sm:$0xff]  }
 0x1e6   : > { %4693 = vmatprep.subr.bf16.mxu0 %v5833_v17  ;;  %v5922_v16 = vld [vmem:[%s7284_s18 + $0x7c4] ss:$8 sps:$4 sm:$0xff]   ;;  %v5917_v17 = vld [vmem:[%s7284_s18 + $0x1c0] ss:$8 sps:$4 sm:$0xff]  }
 0x1e8   : > { %4448 = vmatpush1.bf16.msra.mxu1 %v5835_v18  ;;  %v5920_v18 = vld [vmem:[%s7284_s18 + $0x7c0] ss:$8 sps:$4 sm:$0xff]  }
 0x1e9   : > { %4694 = vmatpush1.bf16.msra.mxu0 %v5836_v19  ;;  %4449 = vmatprep.subr.bf16.mxu1 %v5837_v20  ;;  %v5925_v19 = vld [vmem:[%s7284_s18 + $0x1d4] ss:$8 sps:$4 sm:$0xff]  }
 0x1ea   : > { %4695 = vmatprep.subr.bf16.mxu0 %v5839_v21  ;;  %v5928_v20 = vld [vmem:[%s7284_s18 + $0x7d4] ss:$8 sps:$4 sm:$0xff]   ;;  %v5923_v21 = vld [vmem:[%s7284_s18 + $0x1d0] ss:$8 sps:$4 sm:$0xff]  }
 0x1ec   : > { %4450 = vmatpush1.bf16.msra.mxu1 %v5841_v22  ;;  %v5926_v22 = vld [vmem:[%s7284_s18 + $0x7d0] ss:$8 sps:$4 sm:$0xff]  }
 0x1ed   : > { %4696 = vmatpush1.bf16.msra.mxu0 %v5842_v23  ;;  %4460 = vmatprep.subr.bf16.mxu1 %v5846_v24  ;;  %v5931_v23 = vld [vmem:[%s7284_s18 + $0x1e4] ss:$8 sps:$4 sm:$0xff]  }
 0x1ee   : > { %4706 = vmatprep.subr.bf16.mxu0 %v5850_v25  ;;  %v5934_v24 = vld [vmem:[%s7284_s18 + $0x7e4] ss:$8 sps:$4 sm:$0xff]   ;;  %v2270_v25 = vcombine.high %v7341_v61, %v7341_v61  ;;  %v5938_v61 = vld [vmem:[%s7284_s18 + $0x7f0] ss:$8 sps:$4 sm:$0xff]  }
 0x1ef   : > { %4452 = vmatmul.mubr.bf16.vlgmr.msra.gmra.mrb[0].mxu1 %v7372_v26 }
 0x1f0   : > { %4698 = vmatmul.mubr.bf16.vlgmr.msra.gmra.mrb[0].mxu0 %v7375_v27  ;;  %4461 = vmatpush1.bf16.msra.mxu1 %v5844_v28  ;;  %v5929_v28 = vld [vmem:[%s7284_s18 + $0x1e0] ss:$8 sps:$4 sm:$0xff]  }
 0x1f1   : > { %4707 = vmatpush1.bf16.msra.mxu0 %v5848_v29  ;;  %4462 = vmatprep.subr.bf16.mxu1 %v5853_v30  ;;  %v5932_v29 = vld [vmem:[%s7284_s18 + $0x7e0] ss:$8 sps:$4 sm:$0xff]   ;;  %v5937_v30 = vld [vmem:[%s7284_s18 + $0x1f4] ss:$8 sps:$4 sm:$0xff]  }
 0x1f2   : > { %4708 = vmatprep.subr.bf16.mxu0 %v5856_v31  ;;  %4492 = vmatprep.mubr.bf16.mxu1 %v2317_v32  ;;  %v5940_v31 = vld [vmem:[%s7284_s18 + $0x7f4] ss:$8 sps:$4 sm:$0xff]   ;;  %v7442_v32 = vrot.slane %v2270_v25, %v7334_v58  ;;  %v6007_v25 = vld [vmem:[%s7284_s18 + $0x2b0] ss:$8 sps:$4 sm:$0xff]  }
 0x1f3   : > { %4738 = vmatprep.mubr.bf16.mxu0 %v2367_v33  ;;  %v5935_v33 = vld [vmem:[%s7284_s18 + $0x1f0] ss:$8 sps:$4 sm:$0xff]  }
 0x1f4   : > { %4463 = vmatpush1.bf16.msra.mxu1 %v5851_v34  ;;  %v5943_v34 = vld [vmem:[%s7284_s18 + $0x204] ss:$8 sps:$4 sm:$0xff]  }
 0x1f5   : > { %4709 = vmatpush1.bf16.msra.mxu0 %v5854_v35  ;;  %4464 = vmatprep.subr.bf16.mxu1 %v5859_v36  ;;  %v5946_v35 = vld [vmem:[%s7284_s18 + $0x804] ss:$8 sps:$4 sm:$0xff]   ;;  %v2286_v36 = vcombine.high %v7442_v32, %v7442_v32 }
 0x1f6   : > { %4710 = vmatprep.subr.bf16.mxu0 %v5862_v37  ;;  %v2315_v37 = vcombine.high %v7372_v26, %v7372_v26  ;;  %v7464_v26 = vld [vmem:[%s7857_s0 + $0x10] sm:$0xff] }
 0x1f8   : > { %4465 = vmatpush1.bf16.msra.mxu1 %v5857_v38  ;;  %v2365_v38 = vcombine.high %v7375_v27, %v7375_v27  ;;  %v5947_v27 = vld [vmem:[%s7284_s18 + $0x210] ss:$8 sps:$4 sm:$0xff]  }
 0x1f9   : > { %4711 = vmatpush1.bf16.msra.mxu0 %v5860_v39  ;;  %4466 = vmatprep.subr.bf16.mxu1 %v5865_v40  ;;  %v5941_v39 = vld [vmem:[%s7284_s18 + $0x200] ss:$8 sps:$4 sm:$0xff]  }
 0x1fa   : > { %4712 = vmatprep.subr.bf16.mxu0 %v5868_v41  ;;  %v5944_v40 = vld [vmem:[%s7284_s18 + $0x800] ss:$8 sps:$4 sm:$0xff]   ;;  %v5949_v41 = vld [vmem:[%s7284_s18 + $0x214] ss:$8 sps:$4 sm:$0xff]  }
 0x1fc   : > { %4467 = vmatpush1.bf16.msra.mxu1 %v5863_v42  ;;  %v5952_v42 = vld [vmem:[%s7284_s18 + $0x814] ss:$8 sps:$4 sm:$0xff]  }
 0x1fd   : > { %4713 = vmatpush1.bf16.msra.mxu0 %v5866_v43  ;;  %4468 = vmatprep.subr.bf16.mxu1 %v5871_v44  ;;  %v7459_v43 = vrot.slane %v2286_v36, %v7334_v58  ;;  %v7469_v44 = vrot.slane %v7464_v26, %v7334_v58  ;;  %v6022_v36 = vld [vmem:[%s7284_s18 + $0x8d0] ss:$8 sps:$4 sm:$0xff]  }
 0x1fe   : > { %4714 = vmatprep.subr.bf16.mxu0 %v5874_v45  ;;  %v5950_v45 = vld [vmem:[%s7284_s18 + $0x810] ss:$8 sps:$4 sm:$0xff]  }
 0x200   : > { %4469 = vmatpush1.bf16.msra.mxu1 %v5869_v46  ;;  %v5955_v46 = vld [vmem:[%s7284_s18 + $0x224] ss:$8 sps:$4 sm:$0xff]  }
 0x201   : > { %4715 = vmatpush1.bf16.msra.mxu0 %v5872_v47  ;;  %4470 = vmatprep.subr.bf16.mxu1 %v5877_v48  ;;  %v5958_v47 = vld [vmem:[%s7284_s18 + $0x824] ss:$8 sps:$4 sm:$0xff]   ;;  %v2383_v48 = vcombine.high %v7469_v44, %v7469_v44 }
 0x202   : > { %4716 = vmatprep.subr.bf16.mxu0 %v5880_v49  ;;  %v5953_v49 = vld [vmem:[%s7284_s18 + $0x220] ss:$8 sps:$4 sm:$0xff]  }
 0x204   : > { %4471 = vmatpush1.bf16.msra.mxu1 %v5875_v50  ;;  %v7479_v50 = vrot.slane %v2383_v48, %v7334_v58  ;;  %v6037_v48 = vld [vmem:[%s7284_s18 + $0x300] ss:$8 sps:$4 sm:$0xff]  }
 0x205   : > { %4717 = vmatpush1.bf16.msra.mxu0 %v5878_v52  ;;  %4472 = vmatprep.subr.bf16.mxu1 %v5883_v53  ;;  %v5956_v52 = vld [vmem:[%s7284_s18 + $0x820] ss:$8 sps:$4 sm:$0xff]   ;;  %v5961_v53 = vld [vmem:[%s7284_s18 + $0x234] ss:$8 sps:$4 sm:$0xff]  }
 0x206   : > { %4718 = vmatprep.subr.bf16.mxu0 %v5886_v54  ;;  %v5964_v54 = vld [vmem:[%s7284_s18 + $0x834] ss:$8 sps:$4 sm:$0xff]  }
 0x208   : > { %4473 = vmatpush1.bf16.msra.mxu1 %v5881_v55  ;;  %v5959_v55 = vld [vmem:[%s7284_s18 + $0x230] ss:$8 sps:$4 sm:$0xff]  }
 0x209   : > { %4719 = vmatpush1.bf16.msra.mxu0 %v5884_v56  ;;  %4474 = vmatprep.subr.bf16.mxu1 %v5889_v57  ;;  %v5962_v56 = vld [vmem:[%s7284_s18 + $0x830] ss:$8 sps:$4 sm:$0xff]   ;;  %v5967_v57 = vld [vmem:[%s7284_s18 + $0x244] ss:$8 sps:$4 sm:$0xff]  }
 0x20a   : > { %4720 = vmatprep.subr.bf16.mxu0 %v5892_v59  ;;  %v5970_v59 = vld [vmem:[%s7284_s18 + $0x844] ss:$8 sps:$4 sm:$0xff]  }
 0x20c   : > { %4475 = vmatpush1.bf16.msra.mxu1 %v5887_v60  ;;  %v5965_v60 = vld [vmem:[%s7284_s18 + $0x240] ss:$8 sps:$4 sm:$0xff]  }
 0x20d   : > { %4721 = vmatpush1.bf16.msra.mxu0 %v5890_v62  ;;  %4476 = vmatprep.subr.bf16.mxu1 %v5895_v63  ;;  %v5968_v62 = vld [vmem:[%s7284_s18 + $0x840] ss:$8 sps:$4 sm:$0xff]   ;;  %v5973_v63 = vld [vmem:[%s7284_s18 + $0x254] ss:$8 sps:$4 sm:$0xff]  }
 0x20e   : > { %4722 = vmatprep.subr.bf16.mxu0 %v5898_v0  ;;  %v5976_v0 = vld [vmem:[%s7284_s18 + $0x854] ss:$8 sps:$4 sm:$0xff]  }
 0x210   : > { %4477 = vmatpush1.bf16.msra.mxu1 %v5893_v1  ;;  %v5971_v1 = vld [vmem:[%s7284_s18 + $0x250] ss:$8 sps:$4 sm:$0xff]  }
 0x211   : > { %4723 = vmatpush1.bf16.msra.mxu0 %v5896_v2  ;;  %4478 = vmatprep.subr.bf16.mxu1 %v5901_v3  ;;  %v5974_v2 = vld [vmem:[%s7284_s18 + $0x850] ss:$8 sps:$4 sm:$0xff]   ;;  %v5979_v3 = vld [vmem:[%s7284_s18 + $0x264] ss:$8 sps:$4 sm:$0xff]  }
 0x212   : > { %4724 = vmatprep.subr.bf16.mxu0 %v5904_v4  ;;  %v5982_v4 = vld [vmem:[%s7284_s18 + $0x864] ss:$8 sps:$4 sm:$0xff]  }
 0x214   : > { %4479 = vmatpush1.bf16.msra.mxu1 %v5899_v5  ;;  %v5977_v5 = vld [vmem:[%s7284_s18 + $0x260] ss:$8 sps:$4 sm:$0xff]  }
 0x215   : > { %4725 = vmatpush1.bf16.msra.mxu0 %v5902_v6  ;;  %4480 = vmatprep.subr.bf16.mxu1 %v5907_v7  ;;  %v5980_v6 = vld [vmem:[%s7284_s18 + $0x860] ss:$8 sps:$4 sm:$0xff]   ;;  %v5985_v7 = vld [vmem:[%s7284_s18 + $0x274] ss:$8 sps:$4 sm:$0xff]  }
 0x216   : > { %4726 = vmatprep.subr.bf16.mxu0 %v5910_v8  ;;  %v5988_v8 = vld [vmem:[%s7284_s18 + $0x874] ss:$8 sps:$4 sm:$0xff]  }
 0x218   : > { %4481 = vmatpush1.bf16.msra.mxu1 %v5905_v9  ;;  %v5983_v9 = vld [vmem:[%s7284_s18 + $0x270] ss:$8 sps:$4 sm:$0xff]  }
 0x219   : > { %4727 = vmatpush1.bf16.msra.mxu0 %v5908_v10  ;;  %4482 = vmatprep.subr.bf16.mxu1 %v5913_v11  ;;  %v5986_v10 = vld [vmem:[%s7284_s18 + $0x870] ss:$8 sps:$4 sm:$0xff]   ;;  %v5991_v11 = vld [vmem:[%s7284_s18 + $0x284] ss:$8 sps:$4 sm:$0xff]  }
 0x21a   : > { %4728 = vmatprep.subr.bf16.mxu0 %v5916_v12  ;;  %v5994_v12 = vld [vmem:[%s7284_s18 + $0x884] ss:$8 sps:$4 sm:$0xff]  }
 0x21c   : > { %4483 = vmatpush1.bf16.msra.mxu1 %v5911_v13  ;;  %v5989_v13 = vld [vmem:[%s7284_s18 + $0x280] ss:$8 sps:$4 sm:$0xff]  }
 0x21d   : > { %4729 = vmatpush1.bf16.msra.mxu0 %v5914_v14  ;;  %4484 = vmatprep.subr.bf16.mxu1 %v5919_v15  ;;  %v5992_v14 = vld [vmem:[%s7284_s18 + $0x880] ss:$8 sps:$4 sm:$0xff]   ;;  %v5997_v15 = vld [vmem:[%s7284_s18 + $0x294] ss:$8 sps:$4 sm:$0xff]  }
 0x21e   : > { %4730 = vmatprep.subr.bf16.mxu0 %v5922_v16  ;;  %v6000_v16 = vld [vmem:[%s7284_s18 + $0x894] ss:$8 sps:$4 sm:$0xff]  }
 0x220   : > { %4485 = vmatpush1.bf16.msra.mxu1 %v5917_v17  ;;  %v5995_v17 = vld [vmem:[%s7284_s18 + $0x290] ss:$8 sps:$4 sm:$0xff]  }
 0x221   : > { %4731 = vmatpush1.bf16.msra.mxu0 %v5920_v18  ;;  %4486 = vmatprep.subr.bf16.mxu1 %v5925_v19  ;;  %v5998_v18 = vld [vmem:[%s7284_s18 + $0x890] ss:$8 sps:$4 sm:$0xff]   ;;  %v6003_v19 = vld [vmem:[%s7284_s18 + $0x2a4] ss:$8 sps:$4 sm:$0xff]  }
 0x222   : > { %4732 = vmatprep.subr.bf16.mxu0 %v5928_v20  ;;  %v6006_v20 = vld [vmem:[%s7284_s18 + $0x8a4] ss:$8 sps:$4 sm:$0xff]  }
 0x224   : > { %4487 = vmatpush1.bf16.msra.mxu1 %v5923_v21  ;;  %v6001_v21 = vld [vmem:[%s7284_s18 + $0x2a0] ss:$8 sps:$4 sm:$0xff]  }
 0x225   : > { %4733 = vmatpush1.bf16.msra.mxu0 %v5926_v22  ;;  %4488 = vmatprep.subr.bf16.mxu1 %v5931_v23  ;;  %v6004_v22 = vld [vmem:[%s7284_s18 + $0x8a0] ss:$8 sps:$4 sm:$0xff]   ;;  %v6009_v23 = vld [vmem:[%s7284_s18 + $0x2b4] ss:$8 sps:$4 sm:$0xff]  }
 0x226   : > { %4734 = vmatprep.subr.bf16.mxu0 %v5934_v24  ;;  %v6012_v24 = vld [vmem:[%s7284_s18 + $0x8b4] ss:$8 sps:$4 sm:$0xff]  }
 0x228   : > { %4489 = vmatpush1.bf16.msra.mxu1 %v5929_v28  ;;  %v6010_v28 = vld [vmem:[%s7284_s18 + $0x8b0] ss:$8 sps:$4 sm:$0xff]  }
 0x229   : > { %4735 = vmatpush1.bf16.msra.mxu0 %v5932_v29  ;;  %4490 = vmatprep.subr.bf16.mxu1 %v5937_v30  ;;  %v6015_v29 = vld [vmem:[%s7284_s18 + $0x2c4] ss:$8 sps:$4 sm:$0xff]  }
 0x22a   : > { %4736 = vmatprep.subr.bf16.mxu0 %v5940_v31  ;;  %v6018_v30 = vld [vmem:[%s7284_s18 + $0x8c4] ss:$8 sps:$4 sm:$0xff]   ;;  %v6013_v31 = vld [vmem:[%s7284_s18 + $0x2c0] ss:$8 sps:$4 sm:$0xff]  }
 0x22c   : > { %4491 = vmatpush1.bf16.msra.mxu1 %v5935_v33  ;;  %v6016_v33 = vld [vmem:[%s7284_s18 + $0x8c0] ss:$8 sps:$4 sm:$0xff]  }
 0x22d   : > { %4737 = vmatpush1.bf16.msra.mxu0 %v5938_v61  ;;  %4501 = vmatprep.subr.bf16.mxu1 %v5943_v34  ;;  %v6021_v61 = vld [vmem:[%s7284_s18 + $0x2d4] ss:$8 sps:$4 sm:$0xff]  }
 0x22e   : > { %4747 = vmatprep.subr.bf16.mxu0 %v5946_v35  ;;  %v6024_v34 = vld [vmem:[%s7284_s18 + $0x8d4] ss:$8 sps:$4 sm:$0xff]   ;;  %v6019_v35 = vld [vmem:[%s7284_s18 + $0x2d0] ss:$8 sps:$4 sm:$0xff]  }
 0x22f   : > { %4493 = vmatmul.mubr.bf16.vlgmr.msra.gmra.mrb[0].mxu1 %v2315_v37  ;;  %v6027_v37 = vld [vmem:[%s7284_s18 + $0x2e4] ss:$8 sps:$4 sm:$0xff]  }
 0x230   : > { %4739 = vmatmul.mubr.bf16.vlgmr.msra.gmra.mrb[0].mxu0 %v2365_v38  ;;  %4502 = vmatpush1.bf16.msra.mxu1 %v5941_v39  ;;  %v6030_v38 = vld [vmem:[%s7284_s18 + $0x8e4] ss:$8 sps:$4 sm:$0xff]   ;;  %v6025_v39 = vld [vmem:[%s7284_s18 + $0x2e0] ss:$8 sps:$4 sm:$0xff]  }
 0x231   : > { %4748 = vmatpush1.bf16.msra.mxu0 %v5944_v40  ;;  %4503 = vmatprep.subr.bf16.mxu1 %v5949_v41  ;;  %v6028_v40 = vld [vmem:[%s7284_s18 + $0x8e0] ss:$8 sps:$4 sm:$0xff]   ;;  %v6033_v41 = vld [vmem:[%s7284_s18 + $0x2f4] ss:$8 sps:$4 sm:$0xff]  }
 0x232   : > { %4749 = vmatprep.subr.bf16.mxu0 %v5952_v42  ;;  %4533 = vmatprep.mubr.bf16.mxu1 %v7459_v43  ;;  %v6036_v42 = vld [vmem:[%s7284_s18 + $0x8f4] ss:$8 sps:$4 sm:$0xff]  }
 0x233   : > { %4779 = vmatprep.mubr.bf16.mxu0 %v7479_v50 }
 0x234   : > { %4504 = vmatpush1.bf16.msra.mxu1 %v5947_v27  ;;  %v6031_v27 = vld [vmem:[%s7284_s18 + $0x2f0] ss:$8 sps:$4 sm:$0xff]  }
 0x235   : > { %4750 = vmatpush1.bf16.msra.mxu0 %v5950_v45  ;;  %4505 = vmatprep.subr.bf16.mxu1 %v5955_v46  ;;  %v6034_v45 = vld [vmem:[%s7284_s18 + $0x8f0] ss:$8 sps:$4 sm:$0xff]   ;;  %v6039_v46 = vld [vmem:[%s7284_s18 + $0x304] ss:$8 sps:$4 sm:$0xff]  }
 0x236   : > { %4751 = vmatprep.subr.bf16.mxu0 %v5958_v47  ;;  %v6042_v47 = vld [vmem:[%s7284_s18 + $0x904] ss:$8 sps:$4 sm:$0xff]  }
 0x238   : > { %4506 = vmatpush1.bf16.msra.mxu1 %v5953_v49  ;;  %v7540_v49 = vrot.slane %v7442_v32, %v7334_v58  ;;  %v2415_v32 = vcombine.high %v7479_v50, %v7479_v50  ;;  %v6049_v50 = vld [vmem:[%s7284_s18 + $0x320] ss:$8 sps:$4 sm:$0xff]  }
 0x239   : > { %4752 = vmatpush1.bf16.msra.mxu0 %v5956_v52  ;;  %4507 = vmatprep.subr.bf16.mxu1 %v5961_v53  ;;  %v7544_v52 = vrot.slane %v7469_v44, %v7334_v58  ;;  %v6040_v53 = vld [vmem:[%s7284_s18 + $0x900] ss:$8 sps:$4 sm:$0xff]   ;;  %v6043_v44 = vld [vmem:[%s7284_s18 + $0x310] ss:$8 sps:$4 sm:$0xff]  }
 0x23a   : > { %4753 = vmatprep.subr.bf16.mxu0 %v5964_v54  ;;  %v6045_v54 = vld [vmem:[%s7284_s18 + $0x314] ss:$8 sps:$4 sm:$0xff]  }
 0x23c   : > { %4508 = vmatpush1.bf16.msra.mxu1 %v5959_v55  ;;  %v6048_v55 = vld [vmem:[%s7284_s18 + $0x914] ss:$8 sps:$4 sm:$0xff]  }
 0x23d   : > { %4754 = vmatpush1.bf16.msra.mxu0 %v5962_v56  ;;  %4509 = vmatprep.subr.bf16.mxu1 %v5967_v57  ;;  %v2318_v56 = vcombine.high %v7459_v43, %v7459_v43  ;;  %v6046_v57 = vld [vmem:[%s7284_s18 + $0x910] ss:$8 sps:$4 sm:$0xff]   ;;  %v6054_v43 = vld [vmem:[%s7284_s18 + $0x924] ss:$8 sps:$4 sm:$0xff]  }
 0x23e   : > { %4755 = vmatprep.subr.bf16.mxu0 %v5970_v59  ;;  %v6051_v59 = vld [vmem:[%s7284_s18 + $0x324] ss:$8 sps:$4 sm:$0xff]  }
 0x240   : > { %4510 = vmatpush1.bf16.msra.mxu1 %v5965_v60  ;;  %v6052_v60 = vld [vmem:[%s7284_s18 + $0x920] ss:$8 sps:$4 sm:$0xff]  }
 0x241   : > { %4756 = vmatpush1.bf16.msra.mxu0 %v5968_v62  ;;  %4511 = vmatprep.subr.bf16.mxu1 %v5973_v63  ;;  %v6057_v62 = vld [vmem:[%s7284_s18 + $0x334] ss:$8 sps:$4 sm:$0xff]  }
 0x242   : > { %4757 = vmatprep.subr.bf16.mxu0 %v5976_v0  ;;  %v6060_v63 = vld [vmem:[%s7284_s18 + $0x934] ss:$8 sps:$4 sm:$0xff]   ;;  %v6055_v0 = vld [vmem:[%s7284_s18 + $0x330] ss:$8 sps:$4 sm:$0xff]  }
 0x244   : > { %4512 = vmatpush1.bf16.msra.mxu1 %v5971_v1  ;;  %v6058_v1 = vld [vmem:[%s7284_s18 + $0x930] ss:$8 sps:$4 sm:$0xff]  }
 0x245   : > { %4758 = vmatpush1.bf16.msra.mxu0 %v5974_v2  ;;  %4513 = vmatprep.subr.bf16.mxu1 %v5979_v3  ;;  %v6063_v2 = vld [vmem:[%s7284_s18 + $0x344] ss:$8 sps:$4 sm:$0xff]  }
 0x246   : > { %4759 = vmatprep.subr.bf16.mxu0 %v5982_v4  ;;  %v6066_v3 = vld [vmem:[%s7284_s18 + $0x944] ss:$8 sps:$4 sm:$0xff]   ;;  %v6061_v4 = vld [vmem:[%s7284_s18 + $0x340] ss:$8 sps:$4 sm:$0xff]  }
 0x248   : > { %4514 = vmatpush1.bf16.msra.mxu1 %v5977_v5  ;;  %v6064_v5 = vld [vmem:[%s7284_s18 + $0x940] ss:$8 sps:$4 sm:$0xff]  }
 0x249   : > { %4760 = vmatpush1.bf16.msra.mxu0 %v5980_v6  ;;  %4515 = vmatprep.subr.bf16.mxu1 %v5985_v7  ;;  %v6069_v6 = vld [vmem:[%s7284_s18 + $0x354] ss:$8 sps:$4 sm:$0xff]  }
 0x24a   : > { %4761 = vmatprep.subr.bf16.mxu0 %v5988_v8  ;;  %v6072_v7 = vld [vmem:[%s7284_s18 + $0x954] ss:$8 sps:$4 sm:$0xff]   ;;  %v6067_v8 = vld [vmem:[%s7284_s18 + $0x350] ss:$8 sps:$4 sm:$0xff]  }
 0x24c   : > { %4516 = vmatpush1.bf16.msra.mxu1 %v5983_v9  ;;  %v6070_v9 = vld [vmem:[%s7284_s18 + $0x950] ss:$8 sps:$4 sm:$0xff]  }
 0x24d   : > { %4762 = vmatpush1.bf16.msra.mxu0 %v5986_v10  ;;  %4517 = vmatprep.subr.bf16.mxu1 %v5991_v11  ;;  %v6075_v10 = vld [vmem:[%s7284_s18 + $0x364] ss:$8 sps:$4 sm:$0xff]  }
 0x24e   : > { %4763 = vmatprep.subr.bf16.mxu0 %v5994_v12  ;;  %v6078_v11 = vld [vmem:[%s7284_s18 + $0x964] ss:$8 sps:$4 sm:$0xff]   ;;  %v6073_v12 = vld [vmem:[%s7284_s18 + $0x360] ss:$8 sps:$4 sm:$0xff]  }
 0x250   : > { %4518 = vmatpush1.bf16.msra.mxu1 %v5989_v13  ;;  %v6076_v13 = vld [vmem:[%s7284_s18 + $0x960] ss:$8 sps:$4 sm:$0xff]  }
 0x251   : > { %4764 = vmatpush1.bf16.msra.mxu0 %v5992_v14  ;;  %4519 = vmatprep.subr.bf16.mxu1 %v5997_v15  ;;  %v6081_v14 = vld [vmem:[%s7284_s18 + $0x374] ss:$8 sps:$4 sm:$0xff]  }
 0x252   : > { %4765 = vmatprep.subr.bf16.mxu0 %v6000_v16  ;;  %v6084_v15 = vld [vmem:[%s7284_s18 + $0x974] ss:$8 sps:$4 sm:$0xff]   ;;  %v6079_v16 = vld [vmem:[%s7284_s18 + $0x370] ss:$8 sps:$4 sm:$0xff]  }
 0x254   : > { %4520 = vmatpush1.bf16.msra.mxu1 %v5995_v17  ;;  %v6082_v17 = vld [vmem:[%s7284_s18 + $0x970] ss:$8 sps:$4 sm:$0xff]  }
 0x255   : > { %4766 = vmatpush1.bf16.msra.mxu0 %v5998_v18  ;;  %4521 = vmatprep.subr.bf16.mxu1 %v6003_v19  ;;  %v6087_v18 = vld [vmem:[%s7284_s18 + $0x384] ss:$8 sps:$4 sm:$0xff]  }
 0x256   : > { %4767 = vmatprep.subr.bf16.mxu0 %v6006_v20  ;;  %v6090_v19 = vld [vmem:[%s7284_s18 + $0x984] ss:$8 sps:$4 sm:$0xff]   ;;  %v6085_v20 = vld [vmem:[%s7284_s18 + $0x380] ss:$8 sps:$4 sm:$0xff]  }
 0x258   : > { %4522 = vmatpush1.bf16.msra.mxu1 %v6001_v21  ;;  %v6088_v21 = vld [vmem:[%s7284_s18 + $0x980] ss:$8 sps:$4 sm:$0xff]  }
 0x259   : > { %4768 = vmatpush1.bf16.msra.mxu0 %v6004_v22  ;;  %4523 = vmatprep.subr.bf16.mxu1 %v6009_v23  ;;  %v6093_v22 = vld [vmem:[%s7284_s18 + $0x394] ss:$8 sps:$4 sm:$0xff]  }
 0x25a   : > { %4769 = vmatprep.subr.bf16.mxu0 %v6012_v24  ;;  %v6096_v23 = vld [vmem:[%s7284_s18 + $0x994] ss:$8 sps:$4 sm:$0xff]   ;;  %v6091_v24 = vld [vmem:[%s7284_s18 + $0x390] ss:$8 sps:$4 sm:$0xff]  }
 0x25c   : > { %4524 = vmatpush1.bf16.msra.mxu1 %v6007_v25  ;;  %v6094_v25 = vld [vmem:[%s7284_s18 + $0x990] ss:$8 sps:$4 sm:$0xff]  }
 0x25d   : > { %4770 = vmatpush1.bf16.msra.mxu0 %v6010_v28  ;;  %4525 = vmatprep.subr.bf16.mxu1 %v6015_v29  ;;  %v6099_v28 = vld [vmem:[%s7284_s18 + $0x3a4] ss:$8 sps:$4 sm:$0xff]  }
 0x25e   : > { %4771 = vmatprep.subr.bf16.mxu0 %v6018_v30  ;;  %v6102_v29 = vld [vmem:[%s7284_s18 + $0x9a4] ss:$8 sps:$4 sm:$0xff]   ;;  %v6097_v30 = vld [vmem:[%s7284_s18 + $0x3a0] ss:$8 sps:$4 sm:$0xff]  }
 0x260   : > { %4526 = vmatpush1.bf16.msra.mxu1 %v6013_v31  ;;  %v6100_v31 = vld [vmem:[%s7284_s18 + $0x9a0] ss:$8 sps:$4 sm:$0xff]  }
 0x261   : > { %4772 = vmatpush1.bf16.msra.mxu0 %v6016_v33  ;;  %4527 = vmatprep.subr.bf16.mxu1 %v6021_v61  ;;  %v6105_v33 = vld [vmem:[%s7284_s18 + $0x3b4] ss:$8 sps:$4 sm:$0xff]  }
 0x262   : > { %4773 = vmatprep.subr.bf16.mxu0 %v6024_v34  ;;  %v6108_v61 = vld [vmem:[%s7284_s18 + $0x9b4] ss:$8 sps:$4 sm:$0xff]   ;;  %v6103_v34 = vld [vmem:[%s7284_s18 + $0x3b0] ss:$8 sps:$4 sm:$0xff]  }
 0x264   : > { %4528 = vmatpush1.bf16.msra.mxu1 %v6019_v35  ;;  %v6106_v35 = vld [vmem:[%s7284_s18 + $0x9b0] ss:$8 sps:$4 sm:$0xff]  }
 0x265   : > { %4774 = vmatpush1.bf16.msra.mxu0 %v6022_v36  ;;  %4529 = vmatprep.subr.bf16.mxu1 %v6027_v37  ;;  %v6111_v36 = vld [vmem:[%s7284_s18 + $0x3c4] ss:$8 sps:$4 sm:$0xff]  }
 0x266   : > { %4775 = vmatprep.subr.bf16.mxu0 %v6030_v38  ;;  %v6114_v37 = vld [vmem:[%s7284_s18 + $0x9c4] ss:$8 sps:$4 sm:$0xff]   ;;  %v6109_v38 = vld [vmem:[%s7284_s18 + $0x3c0] ss:$8 sps:$4 sm:$0xff]  }
 0x268   : > { %4530 = vmatpush1.bf16.msra.mxu1 %v6025_v39  ;;  %v6112_v39 = vld [vmem:[%s7284_s18 + $0x9c0] ss:$8 sps:$4 sm:$0xff]  }
 0x269   : > { %4776 = vmatpush1.bf16.msra.mxu0 %v6028_v40  ;;  %4531 = vmatprep.subr.bf16.mxu1 %v6033_v41  ;;  %v6117_v40 = vld [vmem:[%s7284_s18 + $0x3d4] ss:$8 sps:$4 sm:$0xff]  }
 0x26a   : > { %4777 = vmatprep.subr.bf16.mxu0 %v6036_v42  ;;  %v6120_v41 = vld [vmem:[%s7284_s18 + $0x9d4] ss:$8 sps:$4 sm:$0xff]   ;;  %v6115_v42 = vld [vmem:[%s7284_s18 + $0x3d0] ss:$8 sps:$4 sm:$0xff]  }
 0x26c   : > { %4532 = vmatpush1.bf16.msra.mxu1 %v6031_v27  ;;  %v6118_v27 = vld [vmem:[%s7284_s18 + $0x9d0] ss:$8 sps:$4 sm:$0xff]  }
 0x26d   : > { %4778 = vmatpush1.bf16.msra.mxu0 %v6034_v45  ;;  %4542 = vmatprep.subr.bf16.mxu1 %v6039_v46  ;;  %v6123_v45 = vld [vmem:[%s7284_s18 + $0x3e4] ss:$8 sps:$4 sm:$0xff]  }
 0x26e   : > { %4788 = vmatprep.subr.bf16.mxu0 %v6042_v47  ;;  %v6126_v46 = vld [vmem:[%s7284_s18 + $0x9e4] ss:$8 sps:$4 sm:$0xff]   ;;  %v2368_v47 = vcombine.high %v7464_v26, %v7464_v26  ;;  %v6127_v26 = vld [vmem:[%s7284_s18 + $0x3f0] ss:$8 sps:$4 sm:$0xff]  }
 0x26f   : > { %4534 = vmatmul.mubr.bf16.vlgmr.msra.gmra.mrb[0].mxu1 %v7540_v49 }
 0x270   : > { %4780 = vmatmul.mubr.bf16.vlgmr.msra.gmra.mrb[0].mxu0 %v7544_v52  ;;  %4543 = vmatpush1.bf16.msra.mxu1 %v6037_v48  ;;  %v6121_v48 = vld [vmem:[%s7284_s18 + $0x3e0] ss:$8 sps:$4 sm:$0xff]  }
 0x271   : > { %4789 = vmatpush1.bf16.msra.mxu0 %v6040_v53  ;;  %4544 = vmatprep.subr.bf16.mxu1 %v6045_v54  ;;  %v6124_v53 = vld [vmem:[%s7284_s18 + $0x9e0] ss:$8 sps:$4 sm:$0xff]   ;;  %v6129_v54 = vld [vmem:[%s7284_s18 + $0x3f4] ss:$8 sps:$4 sm:$0xff]  }
 0x272   : > { %4790 = vmatprep.subr.bf16.mxu0 %v6048_v55  ;;  %4574 = vmatprep.mubr.bf16.mxu1 %v2318_v56  ;;  %v6132_v55 = vld [vmem:[%s7284_s18 + $0x9f4] ss:$8 sps:$4 sm:$0xff]   ;;  %v7616_v56 = vld.sshfl [vmem:[%s7857_s0 + $0x8] sm:$0xff pattern:$0x75316420] }
 0x273   : > { %4820 = vmatprep.mubr.bf16.mxu0 %v2415_v32  ;;  %v7619_v32 = vrot.slane %v2368_v47, %v7334_v58  ;;  %v6202_v47 = vld [vmem:[%s7284_s18 + $0xab0] ss:$8 sps:$4 sm:$0xff]  }
 0x274   : > { %4545 = vmatpush1.bf16.msra.mxu1 %v6043_v44  ;;  %v6130_v44 = vld [vmem:[%s7284_s18 + $0x9f0] ss:$8 sps:$4 sm:$0xff]  }
 0x275   : > { %4791 = vmatpush1.bf16.msra.mxu0 %v6046_v57  ;;  %4546 = vmatprep.subr.bf16.mxu1 %v6051_v59  ;;  %v6135_v57 = vld [vmem:[%s7284_s18 + $0x404] ss:$8 sps:$4 sm:$0xff]  }
 0x276   : > { %4792 = vmatprep.subr.bf16.mxu0 %v6054_v43  ;;  %v6138_v59 = vld [vmem:[%s7284_s18 + $0xa04] ss:$8 sps:$4 sm:$0xff]   ;;  %v2334_v43 = vcombine.high %v7616_v56, %v7616_v56 }
 0x278   : > { %4547 = vmatpush1.bf16.msra.mxu1 %v6049_v50  ;;  %v2384_v50 = vcombine.high %v7619_v32, %v7619_v32 }
 0x279   : > { %4793 = vmatpush1.bf16.msra.mxu0 %v6052_v60  ;;  %4548 = vmatprep.subr.bf16.mxu1 %v6057_v62  ;;  %v6133_v60 = vld [vmem:[%s7284_s18 + $0x400] ss:$8 sps:$4 sm:$0xff]   ;;  %v2316_v62 = vcombine.high %v7540_v49, %v7540_v49 }
 0x27a   : > { %4794 = vmatprep.subr.bf16.mxu0 %v6060_v63  ;;  %v2413_v63 = vcombine.high %v7544_v52, %v7544_v52  ;;  %v7643_v49 = vrot.slane %v2384_v50, %v7334_v58  ;;  %v6147_v52 = vld [vmem:[%s7284_s18 + $0x424] ss:$8 sps:$4 sm:$0xff]  }
 0x27b   : > { %v6222_v50 = vld [vmem:[%s7284_s18 + $0xae4] ss:$8 sps:$4 sm:$0xff]  }
 0x27c   : > { %4549 = vmatpush1.bf16.msra.mxu1 %v6055_v0  ;;  %v6136_v0 = vld [vmem:[%s7284_s18 + $0xa00] ss:$8 sps:$4 sm:$0xff]  }
 0x27d   : > { %4795 = vmatpush1.bf16.msra.mxu0 %v6058_v1  ;;  %4550 = vmatprep.subr.bf16.mxu1 %v6063_v2  ;;  %v6141_v1 = vld [vmem:[%s7284_s18 + $0x414] ss:$8 sps:$4 sm:$0xff]  }
 0x27e   : > { %4796 = vmatprep.subr.bf16.mxu0 %v6066_v3  ;;  %v6144_v2 = vld [vmem:[%s7284_s18 + $0xa14] ss:$8 sps:$4 sm:$0xff]   ;;  %v6139_v3 = vld [vmem:[%s7284_s18 + $0x410] ss:$8 sps:$4 sm:$0xff]  }
 0x280   : > { %4551 = vmatpush1.bf16.msra.mxu1 %v6061_v4  ;;  %v6142_v4 = vld [vmem:[%s7284_s18 + $0xa10] ss:$8 sps:$4 sm:$0xff]  }
 0x281   : > { %4797 = vmatpush1.bf16.msra.mxu0 %v6064_v5  ;;  %4552 = vmatprep.subr.bf16.mxu1 %v6069_v6  ;;  %v7640_v5 = vrot.slane %v2334_v43, %v7334_v58  ;;  %v6150_v6 = vld [vmem:[%s7284_s18 + $0xa24] ss:$8 sps:$4 sm:$0xff]  }
 0x282   : > { %4798 = vmatprep.subr.bf16.mxu0 %v6072_v7  ;;  %v6145_v7 = vld [vmem:[%s7284_s18 + $0x420] ss:$8 sps:$4 sm:$0xff]   ;;  %v6219_v43 = vld [vmem:[%s7284_s18 + $0x4e4] ss:$8 sps:$4 sm:$0xff]  }
 0x284   : > { %4553 = vmatpush1.bf16.msra.mxu1 %v6067_v8  ;;  %v6148_v8 = vld [vmem:[%s7284_s18 + $0xa20] ss:$8 sps:$4 sm:$0xff]  }
 0x285   : > { %4799 = vmatpush1.bf16.msra.mxu0 %v6070_v9  ;;  %4554 = vmatprep.subr.bf16.mxu1 %v6075_v10  ;;  %v6153_v9 = vld [vmem:[%s7284_s18 + $0x434] ss:$8 sps:$4 sm:$0xff]  }
 0x286   : > { %4800 = vmatprep.subr.bf16.mxu0 %v6078_v11  ;;  %v6156_v10 = vld [vmem:[%s7284_s18 + $0xa34] ss:$8 sps:$4 sm:$0xff]   ;;  %v6151_v11 = vld [vmem:[%s7284_s18 + $0x430] ss:$8 sps:$4 sm:$0xff]  }
 0x288   : > { %4555 = vmatpush1.bf16.msra.mxu1 %v6073_v12  ;;  %v6154_v12 = vld [vmem:[%s7284_s18 + $0xa30] ss:$8 sps:$4 sm:$0xff]  }
 0x289   : > { %4801 = vmatpush1.bf16.msra.mxu0 %v6076_v13  ;;  %4556 = vmatprep.subr.bf16.mxu1 %v6081_v14  ;;  %v6159_v13 = vld [vmem:[%s7284_s18 + $0x444] ss:$8 sps:$4 sm:$0xff]  }
 0x28a   : > { %4802 = vmatprep.subr.bf16.mxu0 %v6084_v15  ;;  %v6162_v14 = vld [vmem:[%s7284_s18 + $0xa44] ss:$8 sps:$4 sm:$0xff]   ;;  %v6157_v15 = vld [vmem:[%s7284_s18 + $0x440] ss:$8 sps:$4 sm:$0xff]  }
 0x28c   : > { %4557 = vmatpush1.bf16.msra.mxu1 %v6079_v16  ;;  %v6160_v16 = vld [vmem:[%s7284_s18 + $0xa40] ss:$8 sps:$4 sm:$0xff]  }
 0x28d   : > { %4803 = vmatpush1.bf16.msra.mxu0 %v6082_v17  ;;  %4558 = vmatprep.subr.bf16.mxu1 %v6087_v18  ;;  %v6165_v17 = vld [vmem:[%s7284_s18 + $0x454] ss:$8 sps:$4 sm:$0xff]  }
 0x28e   : > { %4804 = vmatprep.subr.bf16.mxu0 %v6090_v19  ;;  %v6168_v18 = vld [vmem:[%s7284_s18 + $0xa54] ss:$8 sps:$4 sm:$0xff]   ;;  %v6163_v19 = vld [vmem:[%s7284_s18 + $0x450] ss:$8 sps:$4 sm:$0xff]  }
 0x290   : > { %4559 = vmatpush1.bf16.msra.mxu1 %v6085_v20  ;;  %v6166_v20 = vld [vmem:[%s7284_s18 + $0xa50] ss:$8 sps:$4 sm:$0xff]  }
 0x291   : > { %4805 = vmatpush1.bf16.msra.mxu0 %v6088_v21  ;;  %4560 = vmatprep.subr.bf16.mxu1 %v6093_v22  ;;  %v6171_v21 = vld [vmem:[%s7284_s18 + $0x464] ss:$8 sps:$4 sm:$0xff]  }
 0x292   : > { %4806 = vmatprep.subr.bf16.mxu0 %v6096_v23  ;;  %v6174_v22 = vld [vmem:[%s7284_s18 + $0xa64] ss:$8 sps:$4 sm:$0xff]   ;;  %v6169_v23 = vld [vmem:[%s7284_s18 + $0x460] ss:$8 sps:$4 sm:$0xff]  }
 0x294   : > { %4561 = vmatpush1.bf16.msra.mxu1 %v6091_v24  ;;  %v6172_v24 = vld [vmem:[%s7284_s18 + $0xa60] ss:$8 sps:$4 sm:$0xff]  }
 0x295   : > { %4807 = vmatpush1.bf16.msra.mxu0 %v6094_v25  ;;  %4562 = vmatprep.subr.bf16.mxu1 %v6099_v28  ;;  %v6177_v25 = vld [vmem:[%s7284_s18 + $0x474] ss:$8 sps:$4 sm:$0xff]  }
 0x296   : > { %4808 = vmatprep.subr.bf16.mxu0 %v6102_v29  ;;  %v6180_v28 = vld [vmem:[%s7284_s18 + $0xa74] ss:$8 sps:$4 sm:$0xff]   ;;  %v6175_v29 = vld [vmem:[%s7284_s18 + $0x470] ss:$8 sps:$4 sm:$0xff]  }
 0x298   : > { %4563 = vmatpush1.bf16.msra.mxu1 %v6097_v30  ;;  %v6178_v30 = vld [vmem:[%s7284_s18 + $0xa70] ss:$8 sps:$4 sm:$0xff]  }
 0x299   : > { %4809 = vmatpush1.bf16.msra.mxu0 %v6100_v31  ;;  %4564 = vmatprep.subr.bf16.mxu1 %v6105_v33  ;;  %v6183_v31 = vld [vmem:[%s7284_s18 + $0x484] ss:$8 sps:$4 sm:$0xff]  }
 0x29a   : > { %4810 = vmatprep.subr.bf16.mxu0 %v6108_v61  ;;  %v6186_v33 = vld [vmem:[%s7284_s18 + $0xa84] ss:$8 sps:$4 sm:$0xff]   ;;  %v6181_v61 = vld [vmem:[%s7284_s18 + $0x480] ss:$8 sps:$4 sm:$0xff]  }
 0x29c   : > { %4565 = vmatpush1.bf16.msra.mxu1 %v6103_v34  ;;  %v6184_v34 = vld [vmem:[%s7284_s18 + $0xa80] ss:$8 sps:$4 sm:$0xff]  }
 0x29d   : > { %4811 = vmatpush1.bf16.msra.mxu0 %v6106_v35  ;;  %4566 = vmatprep.subr.bf16.mxu1 %v6111_v36  ;;  %v6189_v35 = vld [vmem:[%s7284_s18 + $0x494] ss:$8 sps:$4 sm:$0xff]  }
 0x29e   : > { %4812 = vmatprep.subr.bf16.mxu0 %v6114_v37  ;;  %v6192_v36 = vld [vmem:[%s7284_s18 + $0xa94] ss:$8 sps:$4 sm:$0xff]   ;;  %v6187_v37 = vld [vmem:[%s7284_s18 + $0x490] ss:$8 sps:$4 sm:$0xff]  }
 0x2a0   : > { %4567 = vmatpush1.bf16.msra.mxu1 %v6109_v38  ;;  %v6190_v38 = vld [vmem:[%s7284_s18 + $0xa90] ss:$8 sps:$4 sm:$0xff]  }
 0x2a1   : > { %4813 = vmatpush1.bf16.msra.mxu0 %v6112_v39  ;;  %4568 = vmatprep.subr.bf16.mxu1 %v6117_v40  ;;  %v6195_v39 = vld [vmem:[%s7284_s18 + $0x4a4] ss:$8 sps:$4 sm:$0xff]  }
 0x2a2   : > { %4814 = vmatprep.subr.bf16.mxu0 %v6120_v41  ;;  %v6198_v40 = vld [vmem:[%s7284_s18 + $0xaa4] ss:$8 sps:$4 sm:$0xff]   ;;  %v6193_v41 = vld [vmem:[%s7284_s18 + $0x4a0] ss:$8 sps:$4 sm:$0xff]  }
 0x2a4   : > { %4569 = vmatpush1.bf16.msra.mxu1 %v6115_v42  ;;  %v6196_v42 = vld [vmem:[%s7284_s18 + $0xaa0] ss:$8 sps:$4 sm:$0xff]  }
 0x2a5   : > { %4815 = vmatpush1.bf16.msra.mxu0 %v6118_v27  ;;  %4570 = vmatprep.subr.bf16.mxu1 %v6123_v45  ;;  %v6201_v27 = vld [vmem:[%s7284_s18 + $0x4b4] ss:$8 sps:$4 sm:$0xff]  }
 0x2a6   : > { %4816 = vmatprep.subr.bf16.mxu0 %v6126_v46  ;;  %v6204_v45 = vld [vmem:[%s7284_s18 + $0xab4] ss:$8 sps:$4 sm:$0xff]   ;;  %v6199_v46 = vld [vmem:[%s7284_s18 + $0x4b0] ss:$8 sps:$4 sm:$0xff]  }
 0x2a8   : > { %4571 = vmatpush1.bf16.msra.mxu1 %v6121_v48  ;;  %v6207_v48 = vld [vmem:[%s7284_s18 + $0x4c4] ss:$8 sps:$4 sm:$0xff]  }
 0x2a9   : > { %4817 = vmatpush1.bf16.msra.mxu0 %v6124_v53  ;;  %4572 = vmatprep.subr.bf16.mxu1 %v6129_v54  ;;  %v6210_v53 = vld [vmem:[%s7284_s18 + $0xac4] ss:$8 sps:$4 sm:$0xff]   ;;  %v6205_v54 = vld [vmem:[%s7284_s18 + $0x4c0] ss:$8 sps:$4 sm:$0xff]  }
 0x2aa   : > { %4818 = vmatprep.subr.bf16.mxu0 %v6132_v55  ;;  %v6208_v55 = vld [vmem:[%s7284_s18 + $0xac0] ss:$8 sps:$4 sm:$0xff]  }
 0x2ac   : > { %4573 = vmatpush1.bf16.msra.mxu1 %v6127_v26  ;;  %v6213_v26 = vld [vmem:[%s7284_s18 + $0x4d4] ss:$8 sps:$4 sm:$0xff]  }
 0x2ad   : > { %4819 = vmatpush1.bf16.msra.mxu0 %v6130_v44  ;;  %4583 = vmatprep.subr.bf16.mxu1 %v6135_v57  ;;  %v6216_v44 = vld [vmem:[%s7284_s18 + $0xad4] ss:$8 sps:$4 sm:$0xff]   ;;  %v6211_v57 = vld [vmem:[%s7284_s18 + $0x4d0] ss:$8 sps:$4 sm:$0xff]  }
 0x2ae   : > { %4829 = vmatprep.subr.bf16.mxu0 %v6138_v59  ;;  %v6214_v59 = vld [vmem:[%s7284_s18 + $0xad0] ss:$8 sps:$4 sm:$0xff]  }
 0x2af   : > { %4575 = vmatmul.mubr.bf16.vlgmr.msra.gmra.mrb[0].mxu1 %v2316_v62  ;;  %v6220_v62 = vld [vmem:[%s7284_s18 + $0xae0] ss:$8 sps:$4 sm:$0xff]  }
 0x2b0   : > { %4821 = vmatmul.mubr.bf16.vlgmr.msra.gmra.mrb[0].mxu0 %v2413_v63  ;;  %4584 = vmatpush1.bf16.msra.mxu1 %v6133_v60  ;;  %v6217_v60 = vld [vmem:[%s7284_s18 + $0x4e0] ss:$8 sps:$4 sm:$0xff]   ;;  %v6225_v63 = vld [vmem:[%s7284_s18 + $0x4f4] ss:$8 sps:$4 sm:$0xff]  }
 0x2b1   : > { %4830 = vmatpush1.bf16.msra.mxu0 %v6136_v0  ;;  %4585 = vmatprep.subr.bf16.mxu1 %v6141_v1  ;;  %v6228_v0 = vld [vmem:[%s7284_s18 + $0xaf4] ss:$8 sps:$4 sm:$0xff]   ;;  %v6223_v1 = vld [vmem:[%s7284_s18 + $0x4f0] ss:$8 sps:$4 sm:$0xff]  }
 0x2b2   : > { %4831 = vmatprep.subr.bf16.mxu0 %v6144_v2  ;;  %4615 = vmatprep.mubr.bf16.mxu1 %v7640_v5  ;;  %v6226_v2 = vld [vmem:[%s7284_s18 + $0xaf0] ss:$8 sps:$4 sm:$0xff]  }
 0x2b3   : > { %4861 = vmatprep.mubr.bf16.mxu0 %v7643_v49 }
 0x2b4   : > { %4586 = vmatpush1.bf16.msra.mxu1 %v6139_v3  ;;  %v6231_v3 = vld [vmem:[%s7284_s18 + $0x504] ss:$8 sps:$4 sm:$0xff]  }
 0x2b5   : > { %4832 = vmatpush1.bf16.msra.mxu0 %v6142_v4  ;;  %4587 = vmatprep.subr.bf16.mxu1 %v6147_v52  ;;  %v6235_v4 = vld [vmem:[%s7284_s18 + $0xb04] ss:$8 sps:$4 sm:$0xff]   ;;  %v7707_v52 = vrot.slane %v7616_v56, %v7334_v58  ;;  %v2366_v56 = vcombine.high %v7640_v5, %v7640_v5 }
 0x2b6   : > { %4833 = vmatprep.subr.bf16.mxu0 %v6150_v6  ;;  %v7711_v6 = vrot.slane %v7619_v32, %v7334_v58  ;;  %v6236_v32 = vld [vmem:[%s7284_s18 + $0x510] ss:$8 sps:$4 sm:$0xff]   ;;  %v6244_v5 = vld [vmem:[%s7284_s18 + $0x524] ss:$8 sps:$4 sm:$0xff]  }
 0x2b8   : > { %4588 = vmatpush1.bf16.msra.mxu1 %v6145_v7  ;;  %v6229_v7 = vld [vmem:[%s7284_s18 + $0x500] ss:$8 sps:$4 sm:$0xff]  }
 0x2b9   : > { %4834 = vmatpush1.bf16.msra.mxu0 %v6148_v8  ;;  %4589 = vmatprep.subr.bf16.mxu1 %v6153_v9  ;;  %v6233_v8 = vld [vmem:[%s7284_s18 + $0xb00] ss:$8 sps:$4 sm:$0xff]   ;;  %v6238_v9 = vld [vmem:[%s7284_s18 + $0x514] ss:$8 sps:$4 sm:$0xff]  }
 0x2ba   : > { %4835 = vmatprep.subr.bf16.mxu0 %v6156_v10  ;;  %v6241_v10 = vld [vmem:[%s7284_s18 + $0xb14] ss:$8 sps:$4 sm:$0xff]  }
 0x2bc   : > { %4590 = vmatpush1.bf16.msra.mxu1 %v6151_v11  ;;  %v2416_v11 = vcombine.high %v7643_v49, %v7643_v49  ;;  %v6242_v49 = vld [vmem:[%s7284_s18 + $0x520] ss:$8 sps:$4 sm:$0xff]  }
 0x2bd   : > { %4836 = vmatpush1.bf16.msra.mxu0 %v6154_v12  ;;  %4591 = vmatprep.subr.bf16.mxu1 %v6159_v13  ;;  %v6239_v12 = vld [vmem:[%s7284_s18 + $0xb10] ss:$8 sps:$4 sm:$0xff]   ;;  %v6247_v13 = vld [vmem:[%s7284_s18 + $0xb24] ss:$8 sps:$4 sm:$0xff]  }
 0x2be   : > { %4837 = vmatprep.subr.bf16.mxu0 %v6162_v14  ;;  %v6245_v14 = vld [vmem:[%s7284_s18 + $0xb20] ss:$8 sps:$4 sm:$0xff]  }
 0x2c0   : > { %4592 = vmatpush1.bf16.msra.mxu1 %v6157_v15  ;;  %v6250_v15 = vld [vmem:[%s7284_s18 + $0x534] ss:$8 sps:$4 sm:$0xff]  }
 0x2c1   : > { %4838 = vmatpush1.bf16.msra.mxu0 %v6160_v16  ;;  %4593 = vmatprep.subr.bf16.mxu1 %v6165_v17  ;;  %v6253_v16 = vld [vmem:[%s7284_s18 + $0xb34] ss:$8 sps:$4 sm:$0xff]   ;;  %v6248_v17 = vld [vmem:[%s7284_s18 + $0x530] ss:$8 sps:$4 sm:$0xff]  }
 0x2c2   : > { %4839 = vmatprep.subr.bf16.mxu0 %v6168_v18  ;;  %v6251_v18 = vld [vmem:[%s7284_s18 + $0xb30] ss:$8 sps:$4 sm:$0xff]  }
 0x2c4   : > { %4594 = vmatpush1.bf16.msra.mxu1 %v6163_v19  ;;  %v6256_v19 = vld [vmem:[%s7284_s18 + $0x544] ss:$8 sps:$4 sm:$0xff]  }
 0x2c5   : > { %4840 = vmatpush1.bf16.msra.mxu0 %v6166_v20  ;;  %4595 = vmatprep.subr.bf16.mxu1 %v6171_v21  ;;  %v6259_v20 = vld [vmem:[%s7284_s18 + $0xb44] ss:$8 sps:$4 sm:$0xff]   ;;  %v6254_v21 = vld [vmem:[%s7284_s18 + $0x540] ss:$8 sps:$4 sm:$0xff]  }
 0x2c6   : > { %4841 = vmatprep.subr.bf16.mxu0 %v6174_v22  ;;  %v6257_v22 = vld [vmem:[%s7284_s18 + $0xb40] ss:$8 sps:$4 sm:$0xff]  }
 0x2c8   : > { %4596 = vmatpush1.bf16.msra.mxu1 %v6169_v23  ;;  %v6262_v23 = vld [vmem:[%s7284_s18 + $0x554] ss:$8 sps:$4 sm:$0xff]  }
 0x2c9   : > { %4842 = vmatpush1.bf16.msra.mxu0 %v6172_v24  ;;  %4597 = vmatprep.subr.bf16.mxu1 %v6177_v25  ;;  %v6265_v24 = vld [vmem:[%s7284_s18 + $0xb54] ss:$8 sps:$4 sm:$0xff]   ;;  %v6260_v25 = vld [vmem:[%s7284_s18 + $0x550] ss:$8 sps:$4 sm:$0xff]  }
 0x2ca   : > { %4843 = vmatprep.subr.bf16.mxu0 %v6180_v28  ;;  %v6263_v28 = vld [vmem:[%s7284_s18 + $0xb50] ss:$8 sps:$4 sm:$0xff]  }
 0x2cc   : > { %4598 = vmatpush1.bf16.msra.mxu1 %v6175_v29  ;;  %v6268_v29 = vld [vmem:[%s7284_s18 + $0x564] ss:$8 sps:$4 sm:$0xff]  }
 0x2cd   : > { %4844 = vmatpush1.bf16.msra.mxu0 %v6178_v30  ;;  %4599 = vmatprep.subr.bf16.mxu1 %v6183_v31  ;;  %v6271_v30 = vld [vmem:[%s7284_s18 + $0xb64] ss:$8 sps:$4 sm:$0xff]   ;;  %v6266_v31 = vld [vmem:[%s7284_s18 + $0x560] ss:$8 sps:$4 sm:$0xff]  }
 0x2ce   : > { %4845 = vmatprep.subr.bf16.mxu0 %v6186_v33  ;;  %v6269_v33 = vld [vmem:[%s7284_s18 + $0xb60] ss:$8 sps:$4 sm:$0xff]  }
 0x2d0   : > { %4600 = vmatpush1.bf16.msra.mxu1 %v6181_v61  ;;  %v6274_v61 = vld [vmem:[%s7284_s18 + $0x574] ss:$8 sps:$4 sm:$0xff]  }
 0x2d1   : > { %4846 = vmatpush1.bf16.msra.mxu0 %v6184_v34  ;;  %4601 = vmatprep.subr.bf16.mxu1 %v6189_v35  ;;  %v6277_v34 = vld [vmem:[%s7284_s18 + $0xb74] ss:$8 sps:$4 sm:$0xff]   ;;  %v6272_v35 = vld [vmem:[%s7284_s18 + $0x570] ss:$8 sps:$4 sm:$0xff]  }
 0x2d2   : > { %4847 = vmatprep.subr.bf16.mxu0 %v6192_v36  ;;  %v6275_v36 = vld [vmem:[%s7284_s18 + $0xb70] ss:$8 sps:$4 sm:$0xff]  }
 0x2d4   : > { %4602 = vmatpush1.bf16.msra.mxu1 %v6187_v37  ;;  %v6280_v37 = vld [vmem:[%s7284_s18 + $0x584] ss:$8 sps:$4 sm:$0xff]  }
 0x2d5   : > { %4848 = vmatpush1.bf16.msra.mxu0 %v6190_v38  ;;  %4603 = vmatprep.subr.bf16.mxu1 %v6195_v39  ;;  %v6283_v38 = vld [vmem:[%s7284_s18 + $0xb84] ss:$8 sps:$4 sm:$0xff]   ;;  %v6278_v39 = vld [vmem:[%s7284_s18 + $0x580] ss:$8 sps:$4 sm:$0xff]  }
 0x2d6   : > { %4849 = vmatprep.subr.bf16.mxu0 %v6198_v40  ;;  %v6281_v40 = vld [vmem:[%s7284_s18 + $0xb80] ss:$8 sps:$4 sm:$0xff]  }
 0x2d8   : > { %4604 = vmatpush1.bf16.msra.mxu1 %v6193_v41  ;;  %v6286_v41 = vld [vmem:[%s7284_s18 + $0x594] ss:$8 sps:$4 sm:$0xff]  }
 0x2d9   : > { %4850 = vmatpush1.bf16.msra.mxu0 %v6196_v42  ;;  %4605 = vmatprep.subr.bf16.mxu1 %v6201_v27  ;;  %v6289_v42 = vld [vmem:[%s7284_s18 + $0xb94] ss:$8 sps:$4 sm:$0xff]   ;;  %v6284_v27 = vld [vmem:[%s7284_s18 + $0x590] ss:$8 sps:$4 sm:$0xff]  }
 0x2da   : > { %4851 = vmatprep.subr.bf16.mxu0 %v6204_v45  ;;  %v6287_v45 = vld [vmem:[%s7284_s18 + $0xb90] ss:$8 sps:$4 sm:$0xff]  }
 0x2dc   : > { %4606 = vmatpush1.bf16.msra.mxu1 %v6199_v46  ;;  %v6292_v46 = vld [vmem:[%s7284_s18 + $0x5a4] ss:$8 sps:$4 sm:$0xff]  }
 0x2dd   : > { %4852 = vmatpush1.bf16.msra.mxu0 %v6202_v47  ;;  %4607 = vmatprep.subr.bf16.mxu1 %v6207_v48  ;;  %v6295_v47 = vld [vmem:[%s7284_s18 + $0xba4] ss:$8 sps:$4 sm:$0xff]   ;;  %v6290_v48 = vld [vmem:[%s7284_s18 + $0x5a0] ss:$8 sps:$4 sm:$0xff]  }
 0x2de   : > { %4853 = vmatprep.subr.bf16.mxu0 %v6210_v53  ;;  %v6293_v53 = vld [vmem:[%s7284_s18 + $0xba0] ss:$8 sps:$4 sm:$0xff]  }
 0x2e0   : > { %4608 = vmatpush1.bf16.msra.mxu1 %v6205_v54  ;;  %v6298_v54 = vld [vmem:[%s7284_s18 + $0x5b4] ss:$8 sps:$4 sm:$0xff]  }
 0x2e1   : > { %4854 = vmatpush1.bf16.msra.mxu0 %v6208_v55  ;;  %4609 = vmatprep.subr.bf16.mxu1 %v6213_v26  ;;  %v6301_v55 = vld [vmem:[%s7284_s18 + $0xbb4] ss:$8 sps:$4 sm:$0xff]   ;;  %v6296_v26 = vld [vmem:[%s7284_s18 + $0x5b0] ss:$8 sps:$4 sm:$0xff]  }
 0x2e2   : > { %4855 = vmatprep.subr.bf16.mxu0 %v6216_v44  ;;  %v6299_v44 = vld [vmem:[%s7284_s18 + $0xbb0] ss:$8 sps:$4 sm:$0xff]  }
 0x2e4   : > { %4610 = vmatpush1.bf16.msra.mxu1 %v6211_v57  ;;  %v6304_v57 = vld [vmem:[%s7284_s18 + $0x5c4] ss:$8 sps:$4 sm:$0xff]  }
 0x2e5   : > { %4856 = vmatpush1.bf16.msra.mxu0 %v6214_v59  ;;  %4611 = vmatprep.subr.bf16.mxu1 %v6219_v43  ;;  %v6307_v59 = vld [vmem:[%s7284_s18 + $0xbc4] ss:$8 sps:$4 sm:$0xff]   ;;  %v6302_v43 = vld [vmem:[%s7284_s18 + $0x5c0] ss:$8 sps:$4 sm:$0xff]  }
 0x2e6   : > { %4857 = vmatprep.subr.bf16.mxu0 %v6222_v50  ;;  %v6305_v50 = vld [vmem:[%s7284_s18 + $0xbc0] ss:$8 sps:$4 sm:$0xff]  }
 0x2e8   : > { %4612 = vmatpush1.bf16.msra.mxu1 %v6217_v60  ;;  %v6310_v60 = vld [vmem:[%s7284_s18 + $0x5d4] ss:$8 sps:$4 sm:$0xff]  }
 0x2e9   : > { %4858 = vmatpush1.bf16.msra.mxu0 %v6220_v62  ;;  %4613 = vmatprep.subr.bf16.mxu1 %v6225_v63  ;;  %v6313_v62 = vld [vmem:[%s7284_s18 + $0xbd4] ss:$8 sps:$4 sm:$0xff]   ;;  %v6308_v63 = vld [vmem:[%s7284_s18 + $0x5d0] ss:$8 sps:$4 sm:$0xff]  }
 0x2ea   : > { %4859 = vmatprep.subr.bf16.mxu0 %v6228_v0  ;;  %v6311_v0 = vld [vmem:[%s7284_s18 + $0xbd0] ss:$8 sps:$4 sm:$0xff]  }
 0x2ec   : > { %4614 = vmatpush1.bf16.msra.mxu1 %v6223_v1  ;;  %v6316_v1 = vld [vmem:[%s7284_s18 + $0x5e4] ss:$8 sps:$4 sm:$0xff]  }
 0x2ed   : > { %4860 = vmatpush1.bf16.msra.mxu0 %v6226_v2  ;;  %4624 = vmatprep.subr.bf16.mxu1 %v6231_v3  ;;  %v6319_v2 = vld [vmem:[%s7284_s18 + $0xbe4] ss:$8 sps:$4 sm:$0xff]   ;;  %v6314_v3 = vld [vmem:[%s7284_s18 + $0x5e0] ss:$8 sps:$4 sm:$0xff]  }
 0x2ee   : > { %4870 = vmatprep.subr.bf16.mxu0 %v6235_v4  ;;  %v6317_v4 = vld [vmem:[%s7284_s18 + $0xbe0] ss:$8 sps:$4 sm:$0xff]  }
 0x2ef   : > { %4616 = vmatmul.mubr.bf16.vlgmr.msra.gmra.mrb[0].mxu1 %v7707_v52 }
 0x2f0   : > { %4862 = vmatmul.mubr.bf16.vlgmr.msra.gmra.mrb[0].mxu0 %v7711_v6  ;;  %4625 = vmatpush1.bf16.msra.mxu1 %v6229_v7  ;;  %v6322_v7 = vld [vmem:[%s7284_s18 + $0x5f4] ss:$8 sps:$4 sm:$0xff]  }
 0x2f1   : > { %4871 = vmatpush1.bf16.msra.mxu0 %v6233_v8  ;;  %4626 = vmatprep.subr.bf16.mxu1 %v6238_v9  ;;  %v6325_v8 = vld [vmem:[%s7284_s18 + $0xbf4] ss:$8 sps:$4 sm:$0xff]   ;;  %v6320_v9 = vld [vmem:[%s7284_s18 + $0x5f0] ss:$8 sps:$4 sm:$0xff]  }
 0x2f2   : > { %4872 = vmatprep.subr.bf16.mxu0 %v6241_v10  ;;  %4656 = vmatprep.mubr.bf16.mxu1 %v2366_v56  ;;  %v6323_v10 = vld [vmem:[%s7284_s18 + $0xbf0] ss:$8 sps:$4 sm:$0xff]   ;;  %v6328_v56 = vld [vmem:[%s7284_s18 + $0xc04] ss:$8 sps:$4 sm:$0xff]  }
 0x2f3   : > { %4902 = vmatprep.mubr.bf16.mxu0 %v2416_v11  ;;  %v6338_v11 = vld [vmem:[%s7282_s20 + $0x40] sm:$0xff]  }
 0x2f4   : > { %4627 = vmatpush1.bf16.msra.mxu1 %v6236_v32  ;;  %v2364_v32 = vcombine.high %v7707_v52, %v7707_v52  ;;  %v6329_v52 = vld [vmem:[%s7284_s18 + $0xc10] ss:$8 sps:$4 sm:$0xff]  }
 0x2f5   : > { %4873 = vmatpush1.bf16.msra.mxu0 %v6239_v12  ;;  %4628 = vmatprep.subr.bf16.mxu1 %v6244_v5  ;;  %v2414_v12 = vcombine.high %v7711_v6, %v7711_v6  ;;  %v6326_v5 = vld [vmem:[%s7284_s18 + $0xc00] ss:$8 sps:$4 sm:$0xff]   ;;  %v6334_v6 = vld [vmem:[%s7284_s18 + $0xc24] ss:$8 sps:$4 sm:$0xff]  }
 0x2f6   : > { %4874 = vmatprep.subr.bf16.mxu0 %v6247_v13  ;;  %v6331_v13 = vld [vmem:[%s7284_s18 + $0xc14] ss:$8 sps:$4 sm:$0xff]  }
 0x2f8   : > { %4629 = vmatpush1.bf16.msra.mxu1 %v6242_v49  ;;  %v6339_v49 = vld [vmem:[%s7282_s20] sm:$0xff]  }
 0x2f9   : > { %4875 = vmatpush1.bf16.msra.mxu0 %v6245_v14  ;;  %4630 = vmatprep.subr.bf16.mxu1 %v6250_v15  ;;  %v6340_v14 = vld [vmem:[%s7282_s20 + $0x48] sm:$0xff]   ;;  %v6412_v15 = vmov 0  }
 0x2fa   : > { %4876 = vmatprep.subr.bf16.mxu0 %v6253_v16  ;;  %v6341_v16 = vld [vmem:[%s7282_s20 + $0x8] sm:$0xff]  }
 0x2fc   : > { %4631 = vmatpush1.bf16.msra.mxu1 %v6248_v17  ;;  %v6332_v17 = vld [vmem:[%s7284_s18 + $0xc20] ss:$8 sps:$4 sm:$0xff]  }
 0x2fd   : > { %4877 = vmatpush1.bf16.msra.mxu0 %v6251_v18  ;;  %4632 = vmatprep.subr.bf16.mxu1 %v6256_v19  ;;  %v6337_v18 = vld [vmem:[%s7284_s18 + $0xc34] ss:$8 sps:$4 sm:$0xff]   ;;  %v6335_v19 = vld [vmem:[%s7284_s18 + $0xc30] ss:$8 sps:$4 sm:$0xff]  }
 0x2fe   : > { %4878 = vmatprep.subr.bf16.mxu0 %v6259_v20  ;;  %v5224_v20 = vld.sshfl [vmem:[%s7857_s0 + $0x18] sm:$0x1 pattern:$0x75316420] }
 0x300   : > { %4633 = vmatpush1.bf16.msra.mxu1 %v6254_v21  ;;  %v2430_v21 = vrot.slane %v5224_v20, %v7334_v58  ;;  %v6348_v58 = vld [vmem:[%s7282_s20 + $0x68] sm:$0xff]  }
 0x301   : > { %4879 = vmatpush1.bf16.msra.mxu0 %v6257_v22  ;;  %4634 = vmatprep.subr.bf16.mxu1 %v6262_v23  ;;  %v6342_v22 = vld [vmem:[%s7282_s20 + $0x50] sm:$0xff]  }
 0x302   : > { %4880 = vmatprep.subr.bf16.mxu0 %v6265_v24  ;;  %v6343_v23 = vld [vmem:[%s7282_s20 + $0x10] sm:$0xff]   ;;  %v6344_v24 = vld [vmem:[%s7282_s20 + $0x58] sm:$0xff]  }
 0x304   : > { %4635 = vmatpush1.bf16.msra.mxu1 %v6260_v25  ;;  %v6345_v25 = vld [vmem:[%s7282_s20 + $0x18] sm:$0xff]  }
 0x305   : > { %4881 = vmatpush1.bf16.msra.mxu0 %v6263_v28  ;;  %4636 = vmatprep.subr.bf16.mxu1 %v6268_v29  ;;  %v6346_v28 = vld [vmem:[%s7282_s20 + $0x60] sm:$0xff]  }
 0x306   : > { %4882 = vmatprep.subr.bf16.mxu0 %v6271_v30  ;;  %v6347_v29 = vld [vmem:[%s7282_s20 + $0x20] sm:$0xff]   ;;  %v6349_v30 = vld [vmem:[%s7282_s20 + $0x28] sm:$0xff]  }
 0x308   : > { %4637 = vmatpush1.bf16.msra.mxu1 %v6266_v31  ;;  %v6350_v31 = vld [vmem:[%s7282_s20 + $0x70] sm:$0xff]  }
 0x309   : > { %4883 = vmatpush1.bf16.msra.mxu0 %v6269_v33  ;;  %4638 = vmatprep.subr.bf16.mxu1 %v6274_v61  ;;  %v6351_v33 = vld [vmem:[%s7282_s20 + $0x30] sm:$0xff]   ;;  %v6352_v61 = vld [vmem:[%s7282_s20 + $0x78] sm:$0xff]  }
 0x30a   : > { %4884 = vmatprep.subr.bf16.mxu0 %v6277_v34  ;;  %v6353_v34 = vld [vmem:[%s7282_s20 + $0x38] sm:$0xff]  }
 0x30c   : > { %4639 = vmatpush1.bf16.msra.mxu1 %v6272_v35 }
 0x30d   : > { %4885 = vmatpush1.bf16.msra.mxu0 %v6275_v36  ;;  %4640 = vmatprep.subr.bf16.mxu1 %v6280_v37 }
 0x30e   : > { %4886 = vmatprep.subr.bf16.mxu0 %v6283_v38 }
 0x310   : > { %4641 = vmatpush1.bf16.msra.mxu1 %v6278_v39  ;;  %v2258_v39 = vsub.s32 0, %v7326_v51 }
 0x311   : > { %4887 = vmatpush1.bf16.msra.mxu0 %v6281_v40  ;;  %4642 = vmatprep.subr.bf16.mxu1 %v6286_v41  ;;  %v2254_v40 = vld [vmem:[%s1844_s14] sm:$0x3]  ;;  %v2262_v41 = vsub.s32 1, %v7326_v51 }
 0x312   : > { %4888 = vmatprep.subr.bf16.mxu0 %v6289_v42  ;;  %v2259_v42 = vrot.slane %v2254_v40, %v2258_v39 }
 0x314   : > { %4643 = vmatpush1.bf16.msra.mxu1 %v6284_v27  ;;  %v2263_v27 = vrot.slane %v2254_v40, %v2262_v41 }
 0x315   : > { %4889 = vmatpush1.bf16.msra.mxu0 %v6287_v45  ;;  %4644 = vmatprep.subr.bf16.mxu1 %v6292_v46 }
 0x316   : > { %4890 = vmatprep.subr.bf16.mxu0 %v6295_v47 }
 0x318   : > { %4645 = vmatpush1.bf16.msra.mxu1 %v6290_v48 }
 0x319   : > { %4891 = vmatpush1.bf16.msra.mxu0 %v6293_v53  ;;  %4646 = vmatprep.subr.bf16.mxu1 %v6298_v54 }
 0x31a   : > { %4892 = vmatprep.subr.bf16.mxu0 %v6301_v55 }
 0x31c   : > { %4647 = vmatpush1.bf16.msra.mxu1 %v6296_v26 }
 0x31d   : > { %4893 = vmatpush1.bf16.msra.mxu0 %v6299_v44  ;;  %4648 = vmatprep.subr.bf16.mxu1 %v6304_v57 }
 0x31e   : > { %4894 = vmatprep.subr.bf16.mxu0 %v6307_v59 }
 0x320   : > { %4649 = vmatpush1.bf16.msra.mxu1 %v6302_v43 }
 0x321   : > { %4895 = vmatpush1.bf16.msra.mxu0 %v6305_v50  ;;  %4650 = vmatprep.subr.bf16.mxu1 %v6310_v60  ;;  %v4954_v60 = vld [vmem:[#allocation2] sm:$0x3] }
 0x322   : > { %4896 = vmatprep.subr.bf16.mxu0 %v6313_v62 }
 0x324   : > { %4651 = vmatpush1.bf16.msra.mxu1 %v6308_v63 }
 0x325   : > { %4897 = vmatpush1.bf16.msra.mxu0 %v6311_v0  ;;  %4652 = vmatprep.subr.bf16.mxu1 %v6316_v1 }
 0x326   : > { %4898 = vmatprep.subr.bf16.mxu0 %v6319_v2 }
 0x328   : > { %4653 = vmatpush1.bf16.msra.mxu1 %v6314_v3  ;;  %v5635_v3 = vld [vmem:[%s7861_s4] ss:$0 sm:$0xff] (!%p5634_p11) }
 0x329   : > { %4899 = vmatpush1.bf16.msra.mxu0 %v6317_v4  ;;  %4654 = vmatprep.subr.bf16.mxu1 %v6322_v7 }
 0x32a   : > { %4900 = vmatprep.subr.bf16.mxu0 %v6325_v8 }
 0x32c   : > { %4655 = vmatpush1.bf16.msra.mxu1 %v6320_v9 }
 0x32d   : > { %4901 = vmatpush1.bf16.msra.mxu0 %v6323_v10  ;;  %5641 = vmatprep.subr.bf16.mxu1 %v6338_v11 }
 0x32e   : > { %4911 = vmatprep.subr.bf16.mxu0 %v6328_v56 }
 0x32f   : > { %4657 = vmatmul.mubr.bf16.vlgmr.msra.gmra.mrb[0].mxu1 %v2364_v32 }
 0x330   : > { %4903 = vmatmul.mubr.bf16.vlgmr.msra.gmra.mrb[0].mxu0 %v2414_v12  ;;  %5642 = vmatpush3.bf16.msra.mxu1 %v6339_v49 }
 0x331   : > { %4912 = vmatpush1.bf16.msra.mxu0 %v6326_v5  ;;  %4943 = vmatprep.mubr.bf16.mxu0 %v6412_v15 }
 0x332   : > { %4913 = vmatprep.subr.bf16.mxu0 %v6331_v13  ;;  %5643 = vmatprep.subr.bf16.mxu1 %v6340_v14 }
 0x334   : > { %5644 = vmatpush3.bf16.msra.mxu1 %v6341_v16 }
 0x335   : > { %4914 = vmatpush1.bf16.msra.mxu0 %v6329_v52  ;;  %5645 = vmatprep.subr.bf16.mxu1 %v6342_v22 }
 0x336   : > { %4915 = vmatprep.subr.bf16.mxu0 %v6334_v6 }
 0x338   : > { %5646 = vmatpush3.bf16.msra.mxu1 %v6343_v23 }
 0x339   : > { %4916 = vmatpush1.bf16.msra.mxu0 %v6332_v17  ;;  %5647 = vmatprep.subr.bf16.mxu1 %v6344_v24 }
 0x33a   : > { %4917 = vmatprep.subr.bf16.mxu0 %v6337_v18 }
 0x33c   : > { %5648 = vmatpush3.bf16.msra.mxu1 %v6345_v25 }
 0x33d   : > { %4918 = vmatpush1.bf16.msra.mxu0 %v6335_v19  ;;  %5649 = vmatprep.subr.bf16.mxu1 %v6346_v28 }
 0x340   : > { %5617 = vmatmul.mubr.msk.bf16.vlgmr.msra.gmra.mrb[0].mxu0 %vm4415_vm0, %v2430_v21  ;;  %5650 = vmatpush3.bf16.msra.mxu1 %v6347_v29 }
 0x341   : > { %5651 = vmatprep.subr.bf16.mxu1 %v6348_v58 }
 0x344   : > { %5652 = vmatpush3.bf16.msra.mxu1 %v6349_v30 }
 0x345   : > { %5653 = vmatprep.subr.bf16.mxu1 %v6350_v31 }
 0x348   : > { %5654 = vmatpush3.bf16.msra.mxu1 %v6351_v33 }
 0x349   : > { %5655 = vmatprep.subr.bf16.mxu1 %v6352_v61 }
 0x34c   : > { %5656 = vmatpush3.bf16.msra.mxu1 %v6353_v34 }
 0x402   : > { %v4658_v35 = vpop.f32.mrb[0].mxu1 }
 0x403   : > { %v4660_v36 = vpop.f32.mrb[1].mxu1  ;;  %v5663_v45 = vadd.f32 %v4658_v35, %v2259_v42 }
 0x404   : > { %v4662_v37 = vpop.f32.mrb[2].mxu1  ;;  %v5665_v46 = vadd.f32 %v4660_v36, %v2263_v27 }
 0x405   : > { %v4663_v38 = vpop.f32.mrb[3].mxu1 }
 0x413   : > { %v4945_v47 = vpop.f32.mrb[0].mxu0 }
 0x414   : > { %v5664_v48 = vadd.f32 %v5663_v45, %v4945_v47  ;;  %v4947_v53 = vpop.f32.mrb[1].mxu0 }
 0x415   : > { %v5666_v54 = vadd.f32 %v5665_v46, %v4947_v53  ;;  %v4949_v55 = vpop.f32.mrb[2].mxu0 }
 0x416   : > { %v4952_v26 = vmax.f32 %v5664_v48, 0.0  ;;  %v4950_v44 = vpop.f32.mrb[3].mxu0 }
 0x417   : > { %v4953_v57 = vmax.f32 %v5666_v54, 0.0 }
 0x418   : > { %v4955_v43 = vpack.c.bf16 %v4952_v26, %v4952_v26 }
 0x419   : > { %v4956_v59 = vpack.c.bf16 %v4953_v57, %v4953_v57 }
 0x41b   : > { %5117 = vmatprep.mubr.bf16.mxu1 %v4956_v59 }
 0x41c   : > { %5118 = vmatmul.mubr.bf16.vlgmr.msra.gmra.mrb[4].mxu1 %v4955_v43 }
 0x4ef   : > { %v5657_v50 = vpop.f32.mrb[4].mxu1  ;;  %5130 = sbr.rel (%p5634_p11) target bundleno = 1280 (0x500), region = 86 }
 0x4f0   : > { %v5658_v62 = vpop.f32.mrb[5].mxu1 }
 0x4f1   : > { %v5659_v51 = vadd.f32 %v5658_v62, %v5657_v50  ;;  %v5660_v63 = vpop.f32.mrb[6].mxu1 }
 0x4f2   : > { %v5661_v0 = vpop.f32.mrb[7].mxu1 }
 0x4f3   : > { %v5125_v1 = vadd.f32 %v5659_v51, %v4954_v60 }
 0x4f5   : > { %5126 = vst [vmem:[#allocation2] sm:$0x3] %v5125_v1 }
 0x4fc   : > { %v5131_v2 = vld [vmem:[#allocation2] sm:$0x3] }
 0x4fd   : > { %v5139_v4 = vadd.f32 %v5635_v3, %v5131_v2 }
 0x4ff   : > { %5140 = vst [vmem:[#allocation4] sm:$0x3] %v5139_v4 }
 0x500 PF: > { %p5717_p12 = scmp.eq.s32.totalorder %s6460_s21, 3  ;;  %s6413_s13 = smov [#allocation4]  }
 0x501   : > { %s5148_s14 = sshll.u32 %s6413_s13, 4  ;;  %s5149_s14 = int_to_ptr.vmem [resolvable:$true] %s5148_s14 }
 0x502   : > { %s6356_s15 = scalar_lea.vmem %s5149_s14, 32  ;;  %p6363_p2 = scmp.lt.s32.totalorder %s5149_s14, %s5149_s14 }
 0x503   : > { %p6357_p13 = scmp.ne.s32.totalorder %s5149_s14, %s6356_s15  ;;  %p6364_p3 = scmp.lt.s32.totalorder %s6356_s15, %s6356_s15 }
 0x505   : > { %p6358_p0 = pnand %p6357_p13, %p5717_p12  ;;  %p6365_p4 = por %p6364_p3, %p6363_p2 }
 0x507   : > { %p6359_p1 = pneg %p6358_p0 }
 0x509   : > { %p6366_p5 = pnand %p6365_p4, %p6359_p1 }
 0x50b   : > { %6369 = shalt.err (!%p6366_p5)
}
 0x50c   : > { %s6370_s20 = scalar_lea.hbm %s7862_s5, 32 }
 0x50d   : > { %p6371_p6 = scmp.ne.s32.totalorder %s7862_s5, %s6370_s20  ;;  %p6376_p9 = scmp.lt.u32.totalorder %s6370_s20, %s7862_s5 }
 0x50f   : > { %p6372_p7 = pnand %p6371_p6, %p5717_p12 }
 0x511   : > { %p6373_p8 = pneg %p6372_p7 }
 0x513   : > { %p6378_p10 = pnand %p6376_p9, %p6373_p8 }
 0x515   : > { %6381 = shalt.err (!%p6378_p10)
}
 0x516   : > { %5714 = dma.vmem_to_hbm [thread:$0]  (%p5717_p12), %s5149_s14, 32, %s7862_s5, [#allocation5]  }
 0x517   : > { %6395 = dma.done.wait (%p5717_p12), [#allocation5], 32  }
 0x518   : > { %6397 = vsyncadd (%p5717_p12), [#allocation5], 4294967264 }
 0x519 PF: > { %p13_p11 = scmp.ge.s32.totalorder %s6463_s22, 6   ;;  %s7863_s18 = smov %s6404_s19 }
 0x51a   : > { %s7864_s19 = smov %s6472_s25  ;;  %s7865_s20 = smov %s6463_s22 }
 0x51b   :  { %15 = sbr.rel (!%p13_p11) target bundleno = 2 (0x2), region = 124 }
 0x522   :  { %5161 = vsyncpa [#allocation5], 1 }
 0x523   :  { %5163 = vsyncpa [#allocation5 + $0x1], 1 }

</bundles_post_ra>
